<compile_context>
chip_gen: v7x
topology: tpu7x:2x2x1
jax: 0.10.0
libtpu: 0.0.40
codegen_flags: <defaults>
</compile_context>

<pallas_src>
import functools

import numpy as np
import jax
import jax.numpy as jnp
from jax.experimental import pallas as pl
from jax.experimental.pallas import tpu as pltpu

LANES = 128
F32 = jnp.float32
BF16 = jnp.bfloat16


def _r8(n):
    return (n + 7) // 8 * 8


def _geometry(N):
    """Static row-space geometry for batch size N (rows = (n, h, w) flattened)."""
    g = {}
    g["R0"] = N * 14 * 14                                    # input rows
    g["R1"] = N * 11 * 11                                    # conv1 out rows
    g["OFF1"] = [di * 14 + dj for di in range(4) for dj in range(4)]
    g["WIN1"] = (N - 1) * 196 + 10 * 14 + 10 + 1             # shifted-window length
    g["R2"] = N * 7 * 7                                      # conv2 out rows
    g["OFF2"] = [di * 11 + dj for di in range(5) for dj in range(5)]
    g["WIN2"] = (N - 1) * 121 + 6 * 11 + 6 + 1
    g["RP"] = N * 3 * 3                                      # pooled rows
    g["OFFP"] = [a * 7 + b for a in range(2) for b in range(2)]
    g["WINP"] = (N - 1) * 49 + 2 * 2 * 7 + 2 * 2 + 1
    g["R3"] = N * 2 * 2                                      # conv3 out rows
    g["OFF3"] = [di * 3 + dj for di in range(2) for dj in range(2)]
    g["WIN3"] = (N - 1) * 9 + 1 * 3 + 1 + 1
    g["RF"] = _r8(N)                                         # fc rows (padded batch)
    return g


# ---------------------------------------------------------------------------
# The single fused Pallas kernel
# ---------------------------------------------------------------------------
def _convnet3_kernel(x_ref, w1_ref, w2_ref, w3_ref, wf1_ref, wf2_ref,
                     b1_ref, b2_ref, b3_ref, bf1_ref, bf2_ref,
                     s1_ref, s2_ref, sp_ref, s3_ref, q_ref,
                     out_ref, y1_scr, y2_scr, yp_scr, *, geom):
    def conv_stage(src_ref, w_ref, offs, win, s_ref, b_ref):
        # shift-and-accumulate over the KH*KW taps (bf16 MXU, f32 accumulate)
        acc = None
        for t, off in enumerate(offs):
            window = src_ref[pl.ds(off, win), :].astype(BF16)
            term = jnp.dot(window, w_ref[t], preferred_element_type=F32)
            acc = term if acc is None else acc + term
        # gather the valid output rows with a 0/1 selection matmul, bias + ReLU
        sel = jnp.dot(s_ref[...], acc.astype(BF16), preferred_element_type=F32)
        return jnp.maximum(sel + b_ref[...], 0.0)

    # conv1 + ReLU : (N,14,14,2) -> (N,11,11,64)
    y1_scr[...] = conv_stage(x_ref, w1_ref, geom["OFF1"], geom["WIN1"], s1_ref, b1_ref)
    # conv2 + ReLU : -> (N,7,7,32)
    y2_scr[...] = conv_stage(y1_scr, w2_ref, geom["OFF2"], geom["WIN2"], s2_ref, b2_ref)
    # 2x2 max-pool (stride 2, floor) : -> (N,3,3,32); 4 shifted row-gathers + max
    pooled = None
    for off in geom["OFFP"]:
        window = y2_scr[pl.ds(off, geom["WINP"]), :].astype(BF16)
        tap = jnp.dot(sp_ref[...], window, preferred_element_type=F32)
        pooled = tap if pooled is None else jnp.maximum(pooled, tap)
    yp_scr[...] = pooled
    # conv3 + ReLU : -> (N,2,2,32), held as a small value
    y3 = conv_stage(yp_scr, w3_ref, geom["OFF3"], geom["WIN3"], s3_ref, b3_ref)
    y3 = y3.astype(BF16)
    # fc1 + sigmoid : torch's NCHW flatten folded into 4 per-spatial-slot weights
    acc1 = None
    for s in range(4):
        rows = jnp.dot(q_ref[s], y3, preferred_element_type=F32)   # picks y3[n*4+s, :]
        term = jnp.dot(rows.astype(BF16), wf1_ref[s], preferred_element_type=F32)
        acc1 = term if acc1 is None else acc1 + term
    h = jax.nn.sigmoid(acc1 + bf1_ref[...]).astype(BF16)
    # fc2 (lane-dense padded output; sliced to (N, 2) outside)
    out_ref[...] = jnp.dot(h, wf2_ref[...], preferred_element_type=F32) + bf2_ref[...]


def _full_block(shape):
    nd = len(shape)
    return pl.BlockSpec(shape, lambda *_: (0,) * nd)


@jax.jit
def convnet3_forward(x_nchw, consts):
    N, C, H, W = x_nchw.shape
    assert (C, H, W) == (2, 14, 14)
    g = _geometry(N)

    # Tiny layout plumbing (plain XLA): NCHW -> (N*H*W, 128) lane-padded rows.
    x_rows = jnp.transpose(x_nchw, (0, 2, 3, 1)).reshape(N * H * W, C)
    x_rows = jnp.pad(x_rows, ((0, 0), (0, LANES - C))).astype(F32)

    operands = (x_rows, consts["w1"], consts["w2"], consts["w3"],
                consts["wf1"], consts["wf2"],
                consts["b1"], consts["b2"], consts["b3"],
                consts["bf1"], consts["bf2"],
                consts["s1"], consts["s2"], consts["sp"], consts["s3"],
                consts["q"])

    out = pl.pallas_call(
        functools.partial(_convnet3_kernel, geom=g),
        out_shape=jax.ShapeDtypeStruct((g["RF"], LANES), F32),
        grid=(1,),
        in_specs=[_full_block(a.shape) for a in operands],
        out_specs=_full_block((g["RF"], LANES)),
        scratch_shapes=[
            pltpu.VMEM((_r8(g["R1"]), LANES), F32),   # conv1 activations
            pltpu.VMEM((_r8(g["R2"]), LANES), F32),   # conv2 activations
            pltpu.VMEM((_r8(g["RP"]), LANES), F32),   # pooled activations
        ],
        compiler_params=pltpu.CompilerParams(dimension_semantics=("arbitrary",)),
    )(*operands)
    return out[:N, :2]


# ---------------------------------------------------------------------------
# One-time preparation of padded / reordered weights and selection matrices
# ---------------------------------------------------------------------------
def prepare_constants(params, N):
    g = _geometry(N)

    def conv_taps(w):
        Cout, Cin, KH, KW = w.shape
        taps = []
        for di in range(KH):
            for dj in range(KW):
                t = w[:, :, di, dj].T                                   # (Cin, Cout)
                taps.append(jnp.pad(t, ((0, LANES - Cin), (0, LANES - Cout))))
        return jnp.stack(taps).astype(BF16)                             # (KH*KW,128,128)

    def pad_bias(b):
        return jnp.pad(b, (0, LANES - b.shape[0])).reshape(1, LANES).astype(F32)

    def selection(rows, cols, pairs):
        m = np.zeros((rows, cols), np.float32)
        for r, c in pairs:
            m[r, c] = 1.0
        return jnp.asarray(m, dtype=BF16)

    s1 = selection(_r8(g["R1"]), g["WIN1"],
                   [(n * 121 + oh * 11 + ow, n * 196 + oh * 14 + ow)
                    for n in range(N) for oh in range(11) for ow in range(11)])
    s2 = selection(_r8(g["R2"]), g["WIN2"],
                   [(n * 49 + oh * 7 + ow, n * 121 + oh * 11 + ow)
                    for n in range(N) for oh in range(7) for ow in range(7)])
    sp = selection(_r8(g["RP"]), g["WINP"],
                   [(n * 9 + ph * 3 + pw, n * 49 + 2 * ph * 7 + 2 * pw)
                    for n in range(N) for ph in range(3) for pw in range(3)])
    s3 = selection(_r8(g["R3"]), g["WIN3"],
                   [(n * 4 + oh * 2 + ow, n * 9 + oh * 3 + ow)
                    for n in range(N) for oh in range(2) for ow in range(2)])

    q = np.zeros((4, g["RF"], _r8(g["R3"])), np.float32)
    for s in range(4):
        for n in range(N):
            q[s, n, n * 4 + s] = 1.0
    q = jnp.asarray(q, dtype=BF16)

    # fc1: torch flattens NCHW, feature index = c*4 + s (s = h*2 + w).
    fc1_w = params["fc1_w"]                                             # (100, 128)
    wf1 = jnp.stack([
        jnp.pad(fc1_w[:, s::4].T, ((0, LANES - 32), (0, LANES - 100)))
        for s in range(4)]).astype(BF16)                                # (4,128,128)
    wf2 = jnp.pad(params["fc2_w"].T,
                  ((0, LANES - 100), (0, LANES - 2))).astype(BF16)      # (128,128)

    return {
        "w1": conv_taps(params["w1"]),
        "w2": conv_taps(params["w2"]),
        "w3": conv_taps(params["w3"]),
        "wf1": wf1, "wf2": wf2,
        "b1": pad_bias(params["b1"]), "b2": pad_bias(params["b2"]),
        "b3": pad_bias(params["b3"]),
        "bf1": pad_bias(params["fc1_b"]), "bf2": pad_bias(params["fc2_b"]),
        "s1": s1, "s2": s2, "sp": sp, "s3": s3, "q": q,
    }


# ---------------------------------------------------------------------------
# Deterministic parameter init (PyTorch-style uniform(-1/sqrt(fan_in), +...))
# ---------------------------------------------------------------------------
def init_params(key):
    def u(k, shape, fan_in):
        bound = 1.0 / float(fan_in) ** 0.5
        return jax.random.uniform(k, shape, jnp.float32, -bound, bound)

    ks = jax.random.split(key, 10)
    return {
        "w1": u(ks[0], (64, 2, 4, 4), 2 * 4 * 4),
        "b1": u(ks[1], (64,), 2 * 4 * 4),
        "w2": u(ks[2], (32, 64, 5, 5), 64 * 5 * 5),
        "b2": u(ks[3], (32,), 64 * 5 * 5),
        "w3": u(ks[4], (32, 32, 2, 2), 32 * 2 * 2),
        "b3": u(ks[5], (32,), 32 * 2 * 2),
        "fc1_w": u(ks[6], (100, 128), 128),     # torch Linear: (out, in)
        "fc1_b": u(ks[7], (100,), 128),
        "fc2_w": u(ks[8], (2, 100), 100),
        "fc2_b": u(ks[9], (2,), 100),
    }


# Plain-JAX reference (mirrors the PyTorch module) used as an in-script check.
def reference_forward(x_nchw, params):
    def conv(x, w, b):
        y = jax.lax.conv_general_dilated(
            x, w, window_strides=(1, 1), padding="VALID",
            dimension_numbers=("NCHW", "OIHW", "NCHW"))
        return y + b.reshape(1, -1, 1, 1)

    x = jax.nn.relu(conv(x_nchw, params["w1"], params["b1"]))
    x = jax.nn.relu(conv(x, params["w2"], params["b2"]))
    x = jax.lax.reduce_window(x, -jnp.inf, jax.lax.max,
                              (1, 1, 2, 2), (1, 1, 2, 2), "VALID")
    x = jax.nn.relu(conv(x, params["w3"], params["b3"]))
    x = x.reshape(x.shape[0], -1)
    x = jax.nn.sigmoid(x @ params["fc1_w"].T + params["fc1_b"])
    return x @ params["fc2_w"].T + params["fc2_b"]


if __name__ == "__main__":
    key = jax.random.PRNGKey(0)
    k_x, k_p = jax.random.split(key)
    # ConvNet3 expects 2-channel 14x14 inputs (MNIST digit pairs); batch=2.
    x = jax.random.normal(k_x, (2, 2, 14, 14), dtype=jnp.float32)
    params = init_params(k_p)

    consts = prepare_constants(params, N=x.shape[0])
    out = convnet3_forward(x, consts)
    out = jax.block_until_ready(out)
    assert out.shape == (2, 2), out.shape

    ref = reference_forward(x, params)
    err = float(jnp.max(jnp.abs(out - ref)))
    assert err < 5e-2, f"mismatch vs reference: max abs err = {err}"
    print("KERNEL_OK")
</pallas_src>

<mosaic_0001>
module attributes {stable_mosaic.version = 11 : i64} {
  func.func @_convnet3_kernel(%arg0: i32, %arg1: memref<392x128xf32, #tpu.memory_space<vmem>>, %arg2: memref<16x128x128xbf16, #tpu.memory_space<vmem>>, %arg3: memref<25x128x128xbf16, #tpu.memory_space<vmem>>, %arg4: memref<4x128x128xbf16, #tpu.memory_space<vmem>>, %arg5: memref<4x128x128xbf16, #tpu.memory_space<vmem>>, %arg6: memref<128x128xbf16, #tpu.memory_space<vmem>>, %arg7: memref<1x128xf32, #tpu.memory_space<vmem>>, %arg8: memref<1x128xf32, #tpu.memory_space<vmem>>, %arg9: memref<1x128xf32, #tpu.memory_space<vmem>>, %arg10: memref<1x128xf32, #tpu.memory_space<vmem>>, %arg11: memref<1x128xf32, #tpu.memory_space<vmem>>, %arg12: memref<248x347xbf16, #tpu.memory_space<vmem>>, %arg13: memref<104x194xbf16, #tpu.memory_space<vmem>>, %arg14: memref<24x82xbf16, #tpu.memory_space<vmem>>, %arg15: memref<8x14xbf16, #tpu.memory_space<vmem>>, %arg16: memref<4x8x8xbf16, #tpu.memory_space<vmem>>, %arg17: memref<8x128xf32, #tpu.memory_space<vmem>>, %arg18: memref<248x128xf32, #tpu.memory_space<vmem>>, %arg19: memref<104x128xf32, #tpu.memory_space<vmem>>, %arg20: memref<24x128xf32, #tpu.memory_space<vmem>>) attributes {dimension_semantics = [#tpu.dimension_semantics<arbitrary>], iteration_bounds = array<i64: 1>, scalar_prefetch = 0 : i64, scratch_operands = 3 : i64, tpu.core_type = #tpu.core_type<tc>, window_params = [{pipeline_mode = #tpu.pipeline_mode<synchronous>, transform_indices = @transform_0, window_bounds = array<i64: 392, 128>}, {pipeline_mode = #tpu.pipeline_mode<synchronous>, transform_indices = @transform_1, window_bounds = array<i64: 16, 128, 128>}, {pipeline_mode = #tpu.pipeline_mode<synchronous>, transform_indices = @transform_2, window_bounds = array<i64: 25, 128, 128>}, {pipeline_mode = #tpu.pipeline_mode<synchronous>, transform_indices = @transform_3, window_bounds = array<i64: 4, 128, 128>}, {pipeline_mode = #tpu.pipeline_mode<synchronous>, transform_indices = @transform_4, window_bounds = array<i64: 4, 128, 128>}, {pipeline_mode = #tpu.pipeline_mode<synchronous>, transform_indices = @transform_5, window_bounds = array<i64: 128, 128>}, {pipeline_mode = #tpu.pipeline_mode<synchronous>, transform_indices = @transform_6, window_bounds = array<i64: 1, 128>}, {pipeline_mode = #tpu.pipeline_mode<synchronous>, transform_indices = @transform_7, window_bounds = array<i64: 1, 128>}, {pipeline_mode = #tpu.pipeline_mode<synchronous>, transform_indices = @transform_8, window_bounds = array<i64: 1, 128>}, {pipeline_mode = #tpu.pipeline_mode<synchronous>, transform_indices = @transform_9, window_bounds = array<i64: 1, 128>}, {pipeline_mode = #tpu.pipeline_mode<synchronous>, transform_indices = @transform_10, window_bounds = array<i64: 1, 128>}, {pipeline_mode = #tpu.pipeline_mode<synchronous>, transform_indices = @transform_11, window_bounds = array<i64: 248, 347>}, {pipeline_mode = #tpu.pipeline_mode<synchronous>, transform_indices = @transform_12, window_bounds = array<i64: 104, 194>}, {pipeline_mode = #tpu.pipeline_mode<synchronous>, transform_indices = @transform_13, window_bounds = array<i64: 24, 82>}, {pipeline_mode = #tpu.pipeline_mode<synchronous>, transform_indices = @transform_14, window_bounds = array<i64: 8, 14>}, {pipeline_mode = #tpu.pipeline_mode<synchronous>, transform_indices = @transform_15, window_bounds = array<i64: 4, 8, 8>}, {pipeline_mode = #tpu.pipeline_mode<synchronous>, transform_indices = @transform_16, window_bounds = array<i64: 8, 128>}]} {
    %c0 = arith.constant 0 : index
    %c0_0 = arith.constant 0 : index
    %0 = vector.load %arg1[%c0, %c0_0] : memref<392x128xf32, #tpu.memory_space<vmem>>, vector<347x128xf32>
    %1 = arith.truncf %0 : vector<347x128xf32> to vector<347x128xbf16>
    %c0_1 = arith.constant 0 : index
    %c0_2 = arith.constant 0 : index
    %c0_3 = arith.constant 0 : index
    %2 = vector.load %arg2[%c0_1, %c0_2, %c0_3] : memref<16x128x128xbf16, #tpu.memory_space<vmem>>, vector<1x128x128xbf16>
    %3 = vector.shape_cast %2 : vector<1x128x128xbf16> to vector<128x128xbf16>
    %cst = arith.constant dense<0.000000e+00> : vector<347x128xf32>
    %4 = tpu.matmul %1, %3, %cst {dimension_numbers = #tpu.dot_dimension_numbers<[1], [0], [0], [1], [0, 0, 1, 1], [], []>} : vector<347x128xbf16>, vector<128x128xbf16>, vector<347x128xf32> -> vector<347x128xf32>
    %c1 = arith.constant 1 : index
    %c0_4 = arith.constant 0 : index
    %5 = vector.load %arg1[%c1, %c0_4] : memref<392x128xf32, #tpu.memory_space<vmem>>, vector<347x128xf32>
    %6 = arith.truncf %5 : vector<347x128xf32> to vector<347x128xbf16>
    %c1_5 = arith.constant 1 : index
    %c0_6 = arith.constant 0 : index
    %c0_7 = arith.constant 0 : index
    %7 = vector.load %arg2[%c1_5, %c0_6, %c0_7] : memref<16x128x128xbf16, #tpu.memory_space<vmem>>, vector<1x128x128xbf16>
    %8 = vector.shape_cast %7 : vector<1x128x128xbf16> to vector<128x128xbf16>
    %cst_8 = arith.constant dense<0.000000e+00> : vector<347x128xf32>
    %9 = tpu.matmul %6, %8, %cst_8 {dimension_numbers = #tpu.dot_dimension_numbers<[1], [0], [0], [1], [0, 0, 1, 1], [], []>} : vector<347x128xbf16>, vector<128x128xbf16>, vector<347x128xf32> -> vector<347x128xf32>
    %10 = arith.addf %4, %9 : vector<347x128xf32>
    %c2 = arith.constant 2 : index
    %c0_9 = arith.constant 0 : index
    %11 = vector.load %arg1[%c2, %c0_9] : memref<392x128xf32, #tpu.memory_space<vmem>>, vector<347x128xf32>
    %12 = arith.truncf %11 : vector<347x128xf32> to vector<347x128xbf16>
    %c2_10 = arith.constant 2 : index
    %c0_11 = arith.constant 0 : index
    %c0_12 = arith.constant 0 : index
    %13 = vector.load %arg2[%c2_10, %c0_11, %c0_12] : memref<16x128x128xbf16, #tpu.memory_space<vmem>>, vector<1x128x128xbf16>
    %14 = vector.shape_cast %13 : vector<1x128x128xbf16> to vector<128x128xbf16>
    %cst_13 = arith.constant dense<0.000000e+00> : vector<347x128xf32>
    %15 = tpu.matmul %12, %14, %cst_13 {dimension_numbers = #tpu.dot_dimension_numbers<[1], [0], [0], [1], [0, 0, 1, 1], [], []>} : vector<347x128xbf16>, vector<128x128xbf16>, vector<347x128xf32> -> vector<347x128xf32>
    %16 = arith.addf %10, %15 : vector<347x128xf32>
    %c3 = arith.constant 3 : index
    %c0_14 = arith.constant 0 : index
    %17 = vector.load %arg1[%c3, %c0_14] : memref<392x128xf32, #tpu.memory_space<vmem>>, vector<347x128xf32>
    %18 = arith.truncf %17 : vector<347x128xf32> to vector<347x128xbf16>
    %c3_15 = arith.constant 3 : index
    %c0_16 = arith.constant 0 : index
    %c0_17 = arith.constant 0 : index
    %19 = vector.load %arg2[%c3_15, %c0_16, %c0_17] : memref<16x128x128xbf16, #tpu.memory_space<vmem>>, vector<1x128x128xbf16>
    %20 = vector.shape_cast %19 : vector<1x128x128xbf16> to vector<128x128xbf16>
    %cst_18 = arith.constant dense<0.000000e+00> : vector<347x128xf32>
    %21 = tpu.matmul %18, %20, %cst_18 {dimension_numbers = #tpu.dot_dimension_numbers<[1], [0], [0], [1], [0, 0, 1, 1], [], []>} : vector<347x128xbf16>, vector<128x128xbf16>, vector<347x128xf32> -> vector<347x128xf32>
    %22 = arith.addf %16, %21 : vector<347x128xf32>
    %c14 = arith.constant 14 : index
    %c0_19 = arith.constant 0 : index
    %23 = vector.load %arg1[%c14, %c0_19] : memref<392x128xf32, #tpu.memory_space<vmem>>, vector<347x128xf32>
    %24 = arith.truncf %23 : vector<347x128xf32> to vector<347x128xbf16>
    %c4 = arith.constant 4 : index
    %c0_20 = arith.constant 0 : index
    %c0_21 = arith.constant 0 : index
    %25 = vector.load %arg2[%c4, %c0_20, %c0_21] : memref<16x128x128xbf16, #tpu.memory_space<vmem>>, vector<1x128x128xbf16>
    %26 = vector.shape_cast %25 : vector<1x128x128xbf16> to vector<128x128xbf16>
    %cst_22 = arith.constant dense<0.000000e+00> : vector<347x128xf32>
    %27 = tpu.matmul %24, %26, %cst_22 {dimension_numbers = #tpu.dot_dimension_numbers<[1], [0], [0], [1], [0, 0, 1, 1], [], []>} : vector<347x128xbf16>, vector<128x128xbf16>, vector<347x128xf32> -> vector<347x128xf32>
    %28 = arith.addf %22, %27 : vector<347x128xf32>
    %c15 = arith.constant 15 : index
    %c0_23 = arith.constant 0 : index
    %29 = vector.load %arg1[%c15, %c0_23] : memref<392x128xf32, #tpu.memory_space<vmem>>, vector<347x128xf32>
    %30 = arith.truncf %29 : vector<347x128xf32> to vector<347x128xbf16>
    %c5 = arith.constant 5 : index
    %c0_24 = arith.constant 0 : index
    %c0_25 = arith.constant 0 : index
    %31 = vector.load %arg2[%c5, %c0_24, %c0_25] : memref<16x128x128xbf16, #tpu.memory_space<vmem>>, vector<1x128x128xbf16>
    %32 = vector.shape_cast %31 : vector<1x128x128xbf16> to vector<128x128xbf16>
    %cst_26 = arith.constant dense<0.000000e+00> : vector<347x128xf32>
    %33 = tpu.matmul %30, %32, %cst_26 {dimension_numbers = #tpu.dot_dimension_numbers<[1], [0], [0], [1], [0, 0, 1, 1], [], []>} : vector<347x128xbf16>, vector<128x128xbf16>, vector<347x128xf32> -> vector<347x128xf32>
    %34 = arith.addf %28, %33 : vector<347x128xf32>
    %c16 = arith.constant 16 : index
    %c0_27 = arith.constant 0 : index
    %35 = vector.load %arg1[%c16, %c0_27] : memref<392x128xf32, #tpu.memory_space<vmem>>, vector<347x128xf32>
    %36 = arith.truncf %35 : vector<347x128xf32> to vector<347x128xbf16>
    %c6 = arith.constant 6 : index
    %c0_28 = arith.constant 0 : index
    %c0_29 = arith.constant 0 : index
    %37 = vector.load %arg2[%c6, %c0_28, %c0_29] : memref<16x128x128xbf16, #tpu.memory_space<vmem>>, vector<1x128x128xbf16>
    %38 = vector.shape_cast %37 : vector<1x128x128xbf16> to vector<128x128xbf16>
    %cst_30 = arith.constant dense<0.000000e+00> : vector<347x128xf32>
    %39 = tpu.matmul %36, %38, %cst_30 {dimension_numbers = #tpu.dot_dimension_numbers<[1], [0], [0], [1], [0, 0, 1, 1], [], []>} : vector<347x128xbf16>, vector<128x128xbf16>, vector<347x128xf32> -> vector<347x128xf32>
    %40 = arith.addf %34, %39 : vector<347x128xf32>
    %c17 = arith.constant 17 : index
    %c0_31 = arith.constant 0 : index
    %41 = vector.load %arg1[%c17, %c0_31] : memref<392x128xf32, #tpu.memory_space<vmem>>, vector<347x128xf32>
    %42 = arith.truncf %41 : vector<347x128xf32> to vector<347x128xbf16>
    %c7 = arith.constant 7 : index
    %c0_32 = arith.constant 0 : index
    %c0_33 = arith.constant 0 : index
    %43 = vector.load %arg2[%c7, %c0_32, %c0_33] : memref<16x128x128xbf16, #tpu.memory_space<vmem>>, vector<1x128x128xbf16>
    %44 = vector.shape_cast %43 : vector<1x128x128xbf16> to vector<128x128xbf16>
    %cst_34 = arith.constant dense<0.000000e+00> : vector<347x128xf32>
    %45 = tpu.matmul %42, %44, %cst_34 {dimension_numbers = #tpu.dot_dimension_numbers<[1], [0], [0], [1], [0, 0, 1, 1], [], []>} : vector<347x128xbf16>, vector<128x128xbf16>, vector<347x128xf32> -> vector<347x128xf32>
    %46 = arith.addf %40, %45 : vector<347x128xf32>
    %c28 = arith.constant 28 : index
    %c0_35 = arith.constant 0 : index
    %47 = vector.load %arg1[%c28, %c0_35] : memref<392x128xf32, #tpu.memory_space<vmem>>, vector<347x128xf32>
    %48 = arith.truncf %47 : vector<347x128xf32> to vector<347x128xbf16>
    %c8 = arith.constant 8 : index
    %c0_36 = arith.constant 0 : index
    %c0_37 = arith.constant 0 : index
    %49 = vector.load %arg2[%c8, %c0_36, %c0_37] : memref<16x128x128xbf16, #tpu.memory_space<vmem>>, vector<1x128x128xbf16>
    %50 = vector.shape_cast %49 : vector<1x128x128xbf16> to vector<128x128xbf16>
    %cst_38 = arith.constant dense<0.000000e+00> : vector<347x128xf32>
    %51 = tpu.matmul %48, %50, %cst_38 {dimension_numbers = #tpu.dot_dimension_numbers<[1], [0], [0], [1], [0, 0, 1, 1], [], []>} : vector<347x128xbf16>, vector<128x128xbf16>, vector<347x128xf32> -> vector<347x128xf32>
    %52 = arith.addf %46, %51 : vector<347x128xf32>
    %c29 = arith.constant 29 : index
    %c0_39 = arith.constant 0 : index
    %53 = vector.load %arg1[%c29, %c0_39] : memref<392x128xf32, #tpu.memory_space<vmem>>, vector<347x128xf32>
    %54 = arith.truncf %53 : vector<347x128xf32> to vector<347x128xbf16>
    %c9 = arith.constant 9 : index
    %c0_40 = arith.constant 0 : index
    %c0_41 = arith.constant 0 : index
    %55 = vector.load %arg2[%c9, %c0_40, %c0_41] : memref<16x128x128xbf16, #tpu.memory_space<vmem>>, vector<1x128x128xbf16>
    %56 = vector.shape_cast %55 : vector<1x128x128xbf16> to vector<128x128xbf16>
    %cst_42 = arith.constant dense<0.000000e+00> : vector<347x128xf32>
    %57 = tpu.matmul %54, %56, %cst_42 {dimension_numbers = #tpu.dot_dimension_numbers<[1], [0], [0], [1], [0, 0, 1, 1], [], []>} : vector<347x128xbf16>, vector<128x128xbf16>, vector<347x128xf32> -> vector<347x128xf32>
    %58 = arith.addf %52, %57 : vector<347x128xf32>
    %c30 = arith.constant 30 : index
    %c0_43 = arith.constant 0 : index
    %59 = vector.load %arg1[%c30, %c0_43] : memref<392x128xf32, #tpu.memory_space<vmem>>, vector<347x128xf32>
    %60 = arith.truncf %59 : vector<347x128xf32> to vector<347x128xbf16>
    %c10 = arith.constant 10 : index
    %c0_44 = arith.constant 0 : index
    %c0_45 = arith.constant 0 : index
    %61 = vector.load %arg2[%c10, %c0_44, %c0_45] : memref<16x128x128xbf16, #tpu.memory_space<vmem>>, vector<1x128x128xbf16>
    %62 = vector.shape_cast %61 : vector<1x128x128xbf16> to vector<128x128xbf16>
    %cst_46 = arith.constant dense<0.000000e+00> : vector<347x128xf32>
    %63 = tpu.matmul %60, %62, %cst_46 {dimension_numbers = #tpu.dot_dimension_numbers<[1], [0], [0], [1], [0, 0, 1, 1], [], []>} : vector<347x128xbf16>, vector<128x128xbf16>, vector<347x128xf32> -> vector<347x128xf32>
    %64 = arith.addf %58, %63 : vector<347x128xf32>
    %c31 = arith.constant 31 : index
    %c0_47 = arith.constant 0 : index
    %65 = vector.load %arg1[%c31, %c0_47] : memref<392x128xf32, #tpu.memory_space<vmem>>, vector<347x128xf32>
    %66 = arith.truncf %65 : vector<347x128xf32> to vector<347x128xbf16>
    %c11 = arith.constant 11 : index
    %c0_48 = arith.constant 0 : index
    %c0_49 = arith.constant 0 : index
    %67 = vector.load %arg2[%c11, %c0_48, %c0_49] : memref<16x128x128xbf16, #tpu.memory_space<vmem>>, vector<1x128x128xbf16>
    %68 = vector.shape_cast %67 : vector<1x128x128xbf16> to vector<128x128xbf16>
    %cst_50 = arith.constant dense<0.000000e+00> : vector<347x128xf32>
    %69 = tpu.matmul %66, %68, %cst_50 {dimension_numbers = #tpu.dot_dimension_numbers<[1], [0], [0], [1], [0, 0, 1, 1], [], []>} : vector<347x128xbf16>, vector<128x128xbf16>, vector<347x128xf32> -> vector<347x128xf32>
    %70 = arith.addf %64, %69 : vector<347x128xf32>
    %c42 = arith.constant 42 : index
    %c0_51 = arith.constant 0 : index
    %71 = vector.load %arg1[%c42, %c0_51] : memref<392x128xf32, #tpu.memory_space<vmem>>, vector<347x128xf32>
    %72 = arith.truncf %71 : vector<347x128xf32> to vector<347x128xbf16>
    %c12 = arith.constant 12 : index
    %c0_52 = arith.constant 0 : index
    %c0_53 = arith.constant 0 : index
    %73 = vector.load %arg2[%c12, %c0_52, %c0_53] : memref<16x128x128xbf16, #tpu.memory_space<vmem>>, vector<1x128x128xbf16>
    %74 = vector.shape_cast %73 : vector<1x128x128xbf16> to vector<128x128xbf16>
    %cst_54 = arith.constant dense<0.000000e+00> : vector<347x128xf32>
    %75 = tpu.matmul %72, %74, %cst_54 {dimension_numbers = #tpu.dot_dimension_numbers<[1], [0], [0], [1], [0, 0, 1, 1], [], []>} : vector<347x128xbf16>, vector<128x128xbf16>, vector<347x128xf32> -> vector<347x128xf32>
    %76 = arith.addf %70, %75 : vector<347x128xf32>
    %c43 = arith.constant 43 : index
    %c0_55 = arith.constant 0 : index
    %77 = vector.load %arg1[%c43, %c0_55] : memref<392x128xf32, #tpu.memory_space<vmem>>, vector<347x128xf32>
    %78 = arith.truncf %77 : vector<347x128xf32> to vector<347x128xbf16>
    %c13 = arith.constant 13 : index
    %c0_56 = arith.constant 0 : index
    %c0_57 = arith.constant 0 : index
    %79 = vector.load %arg2[%c13, %c0_56, %c0_57] : memref<16x128x128xbf16, #tpu.memory_space<vmem>>, vector<1x128x128xbf16>
    %80 = vector.shape_cast %79 : vector<1x128x128xbf16> to vector<128x128xbf16>
    %cst_58 = arith.constant dense<0.000000e+00> : vector<347x128xf32>
    %81 = tpu.matmul %78, %80, %cst_58 {dimension_numbers = #tpu.dot_dimension_numbers<[1], [0], [0], [1], [0, 0, 1, 1], [], []>} : vector<347x128xbf16>, vector<128x128xbf16>, vector<347x128xf32> -> vector<347x128xf32>
    %82 = arith.addf %76, %81 : vector<347x128xf32>
    %c44 = arith.constant 44 : index
    %c0_59 = arith.constant 0 : index
    %83 = vector.load %arg1[%c44, %c0_59] : memref<392x128xf32, #tpu.memory_space<vmem>>, vector<347x128xf32>
    %84 = arith.truncf %83 : vector<347x128xf32> to vector<347x128xbf16>
    %c14_60 = arith.constant 14 : index
    %c0_61 = arith.constant 0 : index
    %c0_62 = arith.constant 0 : index
    %85 = vector.load %arg2[%c14_60, %c0_61, %c0_62] : memref<16x128x128xbf16, #tpu.memory_space<vmem>>, vector<1x128x128xbf16>
    %86 = vector.shape_cast %85 : vector<1x128x128xbf16> to vector<128x128xbf16>
    %cst_63 = arith.constant dense<0.000000e+00> : vector<347x128xf32>
    %87 = tpu.matmul %84, %86, %cst_63 {dimension_numbers = #tpu.dot_dimension_numbers<[1], [0], [0], [1], [0, 0, 1, 1], [], []>} : vector<347x128xbf16>, vector<128x128xbf16>, vector<347x128xf32> -> vector<347x128xf32>
    %88 = arith.addf %82, %87 : vector<347x128xf32>
    %c45 = arith.constant 45 : index
    %c0_64 = arith.constant 0 : index
    %89 = vector.load %arg1[%c45, %c0_64] : memref<392x128xf32, #tpu.memory_space<vmem>>, vector<347x128xf32>
    %90 = arith.truncf %89 : vector<347x128xf32> to vector<347x128xbf16>
    %c15_65 = arith.constant 15 : index
    %c0_66 = arith.constant 0 : index
    %c0_67 = arith.constant 0 : index
    %91 = vector.load %arg2[%c15_65, %c0_66, %c0_67] : memref<16x128x128xbf16, #tpu.memory_space<vmem>>, vector<1x128x128xbf16>
    %92 = vector.shape_cast %91 : vector<1x128x128xbf16> to vector<128x128xbf16>
    %cst_68 = arith.constant dense<0.000000e+00> : vector<347x128xf32>
    %93 = tpu.matmul %90, %92, %cst_68 {dimension_numbers = #tpu.dot_dimension_numbers<[1], [0], [0], [1], [0, 0, 1, 1], [], []>} : vector<347x128xbf16>, vector<128x128xbf16>, vector<347x128xf32> -> vector<347x128xf32>
    %94 = arith.addf %88, %93 : vector<347x128xf32>
    %c0_69 = arith.constant 0 : index
    %c0_70 = arith.constant 0 : index
    %95 = vector.load %arg12[%c0_69, %c0_70] : memref<248x347xbf16, #tpu.memory_space<vmem>>, vector<248x347xbf16>
    %96 = arith.truncf %94 : vector<347x128xf32> to vector<347x128xbf16>
    %cst_71 = arith.constant dense<0.000000e+00> : vector<248x128xf32>
    %97 = tpu.matmul %95, %96, %cst_71 {dimension_numbers = #tpu.dot_dimension_numbers<[1], [0], [0], [1], [0, 0, 1, 1], [], []>} : vector<248x347xbf16>, vector<347x128xbf16>, vector<248x128xf32> -> vector<248x128xf32>
    %c0_72 = arith.constant 0 : index
    %c0_73 = arith.constant 0 : index
    %98 = vector.load %arg7[%c0_72, %c0_73] : memref<1x128xf32, #tpu.memory_space<vmem>>, vector<1x128xf32>
    %99 = vector.broadcast %98 : vector<1x128xf32> to vector<248x128xf32>
    %100 = arith.addf %97, %99 : vector<248x128xf32>
    %cst_74 = arith.constant 0.000000e+00 : f32
    %101 = vector.broadcast %cst_74 : f32 to vector<248x128xf32>
    %102 = arith.maximumf %100, %101 : vector<248x128xf32>
    %c0_75 = arith.constant 0 : index
    %c0_76 = arith.constant 0 : index
    %103 = vector.load %arg18[%c0_75, %c0_76] : memref<248x128xf32, #tpu.memory_space<vmem>>, vector<248x128xf32>
    tpu.vector_store %arg18[%c0_75, %c0_76], %102 {strides = array<i32>} : memref<248x128xf32, #tpu.memory_space<vmem>>, vector<248x128xf32>,
    %c0_77 = arith.constant 0 : index
    %c0_78 = arith.constant 0 : index
    %104 = vector.load %arg18[%c0_77, %c0_78] : memref<248x128xf32, #tpu.memory_space<vmem>>, vector<194x128xf32>
    %105 = arith.truncf %104 : vector<194x128xf32> to vector<194x128xbf16>
    %c0_79 = arith.constant 0 : index
    %c0_80 = arith.constant 0 : index
    %c0_81 = arith.constant 0 : index
    %106 = vector.load %arg3[%c0_79, %c0_80, %c0_81] : memref<25x128x128xbf16, #tpu.memory_space<vmem>>, vector<1x128x128xbf16>
    %107 = vector.shape_cast %106 : vector<1x128x128xbf16> to vector<128x128xbf16>
    %cst_82 = arith.constant dense<0.000000e+00> : vector<194x128xf32>
    %108 = tpu.matmul %105, %107, %cst_82 {dimension_numbers = #tpu.dot_dimension_numbers<[1], [0], [0], [1], [0, 0, 1, 1], [], []>} : vector<194x128xbf16>, vector<128x128xbf16>, vector<194x128xf32> -> vector<194x128xf32>
    %c1_83 = arith.constant 1 : index
    %c0_84 = arith.constant 0 : index
    %109 = vector.load %arg18[%c1_83, %c0_84] : memref<248x128xf32, #tpu.memory_space<vmem>>, vector<194x128xf32>
    %110 = arith.truncf %109 : vector<194x128xf32> to vector<194x128xbf16>
    %c1_85 = arith.constant 1 : index
    %c0_86 = arith.constant 0 : index
    %c0_87 = arith.constant 0 : index
    %111 = vector.load %arg3[%c1_85, %c0_86, %c0_87] : memref<25x128x128xbf16, #tpu.memory_space<vmem>>, vector<1x128x128xbf16>
    %112 = vector.shape_cast %111 : vector<1x128x128xbf16> to vector<128x128xbf16>
    %cst_88 = arith.constant dense<0.000000e+00> : vector<194x128xf32>
    %113 = tpu.matmul %110, %112, %cst_88 {dimension_numbers = #tpu.dot_dimension_numbers<[1], [0], [0], [1], [0, 0, 1, 1], [], []>} : vector<194x128xbf16>, vector<128x128xbf16>, vector<194x128xf32> -> vector<194x128xf32>
    %114 = arith.addf %108, %113 : vector<194x128xf32>
    %c2_89 = arith.constant 2 : index
    %c0_90 = arith.constant 0 : index
    %115 = vector.load %arg18[%c2_89, %c0_90] : memref<248x128xf32, #tpu.memory_space<vmem>>, vector<194x128xf32>
    %116 = arith.truncf %115 : vector<194x128xf32> to vector<194x128xbf16>
    %c2_91 = arith.constant 2 : index
    %c0_92 = arith.constant 0 : index
    %c0_93 = arith.constant 0 : index
    %117 = vector.load %arg3[%c2_91, %c0_92, %c0_93] : memref<25x128x128xbf16, #tpu.memory_space<vmem>>, vector<1x128x128xbf16>
    %118 = vector.shape_cast %117 : vector<1x128x128xbf16> to vector<128x128xbf16>
    %cst_94 = arith.constant dense<0.000000e+00> : vector<194x128xf32>
    %119 = tpu.matmul %116, %118, %cst_94 {dimension_numbers = #tpu.dot_dimension_numbers<[1], [0], [0], [1], [0, 0, 1, 1], [], []>} : vector<194x128xbf16>, vector<128x128xbf16>, vector<194x128xf32> -> vector<194x128xf32>
    %120 = arith.addf %114, %119 : vector<194x128xf32>
    %c3_95 = arith.constant 3 : index
    %c0_96 = arith.constant 0 : index
    %121 = vector.load %arg18[%c3_95, %c0_96] : memref<248x128xf32, #tpu.memory_space<vmem>>, vector<194x128xf32>
    %122 = arith.truncf %121 : vector<194x128xf32> to vector<194x128xbf16>
    %c3_97 = arith.constant 3 : index
    %c0_98 = arith.constant 0 : index
    %c0_99 = arith.constant 0 : index
    %123 = vector.load %arg3[%c3_97, %c0_98, %c0_99] : memref<25x128x128xbf16, #tpu.memory_space<vmem>>, vector<1x128x128xbf16>
    %124 = vector.shape_cast %123 : vector<1x128x128xbf16> to vector<128x128xbf16>
    %cst_100 = arith.constant dense<0.000000e+00> : vector<194x128xf32>
    %125 = tpu.matmul %122, %124, %cst_100 {dimension_numbers = #tpu.dot_dimension_numbers<[1], [0], [0], [1], [0, 0, 1, 1], [], []>} : vector<194x128xbf16>, vector<128x128xbf16>, vector<194x128xf32> -> vector<194x128xf32>
    %126 = arith.addf %120, %125 : vector<194x128xf32>
    %c4_101 = arith.constant 4 : index
    %c0_102 = arith.constant 0 : index
    %127 = vector.load %arg18[%c4_101, %c0_102] : memref<248x128xf32, #tpu.memory_space<vmem>>, vector<194x128xf32>
    %128 = arith.truncf %127 : vector<194x128xf32> to vector<194x128xbf16>
    %c4_103 = arith.constant 4 : index
    %c0_104 = arith.constant 0 : index
    %c0_105 = arith.constant 0 : index
    %129 = vector.load %arg3[%c4_103, %c0_104, %c0_105] : memref<25x128x128xbf16, #tpu.memory_space<vmem>>, vector<1x128x128xbf16>
    %130 = vector.shape_cast %129 : vector<1x128x128xbf16> to vector<128x128xbf16>
    %cst_106 = arith.constant dense<0.000000e+00> : vector<194x128xf32>
    %131 = tpu.matmul %128, %130, %cst_106 {dimension_numbers = #tpu.dot_dimension_numbers<[1], [0], [0], [1], [0, 0, 1, 1], [], []>} : vector<194x128xbf16>, vector<128x128xbf16>, vector<194x128xf32> -> vector<194x128xf32>
    %132 = arith.addf %126, %131 : vector<194x128xf32>
    %c11_107 = arith.constant 11 : index
    %c0_108 = arith.constant 0 : index
    %133 = vector.load %arg18[%c11_107, %c0_108] : memref<248x128xf32, #tpu.memory_space<vmem>>, vector<194x128xf32>
    %134 = arith.truncf %133 : vector<194x128xf32> to vector<194x128xbf16>
    %c5_109 = arith.constant 5 : index
    %c0_110 = arith.constant 0 : index
    %c0_111 = arith.constant 0 : index
    %135 = vector.load %arg3[%c5_109, %c0_110, %c0_111] : memref<25x128x128xbf16, #tpu.memory_space<vmem>>, vector<1x128x128xbf16>
    %136 = vector.shape_cast %135 : vector<1x128x128xbf16> to vector<128x128xbf16>
    %cst_112 = arith.constant dense<0.000000e+00> : vector<194x128xf32>
    %137 = tpu.matmul %134, %136, %cst_112 {dimension_numbers = #tpu.dot_dimension_numbers<[1], [0], [0], [1], [0, 0, 1, 1], [], []>} : vector<194x128xbf16>, vector<128x128xbf16>, vector<194x128xf32> -> vector<194x128xf32>
    %138 = arith.addf %132, %137 : vector<194x128xf32>
    %c12_113 = arith.constant 12 : index
    %c0_114 = arith.constant 0 : index
    %139 = vector.load %arg18[%c12_113, %c0_114] : memref<248x128xf32, #tpu.memory_space<vmem>>, vector<194x128xf32>
    %140 = arith.truncf %139 : vector<194x128xf32> to vector<194x128xbf16>
    %c6_115 = arith.constant 6 : index
    %c0_116 = arith.constant 0 : index
    %c0_117 = arith.constant 0 : index
    %141 = vector.load %arg3[%c6_115, %c0_116, %c0_117] : memref<25x128x128xbf16, #tpu.memory_space<vmem>>, vector<1x128x128xbf16>
    %142 = vector.shape_cast %141 : vector<1x128x128xbf16> to vector<128x128xbf16>
    %cst_118 = arith.constant dense<0.000000e+00> : vector<194x128xf32>
    %143 = tpu.matmul %140, %142, %cst_118 {dimension_numbers = #tpu.dot_dimension_numbers<[1], [0], [0], [1], [0, 0, 1, 1], [], []>} : vector<194x128xbf16>, vector<128x128xbf16>, vector<194x128xf32> -> vector<194x128xf32>
    %144 = arith.addf %138, %143 : vector<194x128xf32>
    %c13_119 = arith.constant 13 : index
    %c0_120 = arith.constant 0 : index
    %145 = vector.load %arg18[%c13_119, %c0_120] : memref<248x128xf32, #tpu.memory_space<vmem>>, vector<194x128xf32>
    %146 = arith.truncf %145 : vector<194x128xf32> to vector<194x128xbf16>
    %c7_121 = arith.constant 7 : index
    %c0_122 = arith.constant 0 : index
    %c0_123 = arith.constant 0 : index
    %147 = vector.load %arg3[%c7_121, %c0_122, %c0_123] : memref<25x128x128xbf16, #tpu.memory_space<vmem>>, vector<1x128x128xbf16>
    %148 = vector.shape_cast %147 : vector<1x128x128xbf16> to vector<128x128xbf16>
    %cst_124 = arith.constant dense<0.000000e+00> : vector<194x128xf32>
    %149 = tpu.matmul %146, %148, %cst_124 {dimension_numbers = #tpu.dot_dimension_numbers<[1], [0], [0], [1], [0, 0, 1, 1], [], []>} : vector<194x128xbf16>, vector<128x128xbf16>, vector<194x128xf32> -> vector<194x128xf32>
    %150 = arith.addf %144, %149 : vector<194x128xf32>
    %c14_125 = arith.constant 14 : index
    %c0_126 = arith.constant 0 : index
    %151 = vector.load %arg18[%c14_125, %c0_126] : memref<248x128xf32, #tpu.memory_space<vmem>>, vector<194x128xf32>
    %152 = arith.truncf %151 : vector<194x128xf32> to vector<194x128xbf16>
    %c8_127 = arith.constant 8 : index
    %c0_128 = arith.constant 0 : index
    %c0_129 = arith.constant 0 : index
    %153 = vector.load %arg3[%c8_127, %c0_128, %c0_129] : memref<25x128x128xbf16, #tpu.memory_space<vmem>>, vector<1x128x128xbf16>
    %154 = vector.shape_cast %153 : vector<1x128x128xbf16> to vector<128x128xbf16>
    %cst_130 = arith.constant dense<0.000000e+00> : vector<194x128xf32>
    %155 = tpu.matmul %152, %154, %cst_130 {dimension_numbers = #tpu.dot_dimension_numbers<[1], [0], [0], [1], [0, 0, 1, 1], [], []>} : vector<194x128xbf16>, vector<128x128xbf16>, vector<194x128xf32> -> vector<194x128xf32>
    %156 = arith.addf %150, %155 : vector<194x128xf32>
    %c15_131 = arith.constant 15 : index
    %c0_132 = arith.constant 0 : index
    %157 = vector.load %arg18[%c15_131, %c0_132] : memref<248x128xf32, #tpu.memory_space<vmem>>, vector<194x128xf32>
    %158 = arith.truncf %157 : vector<194x128xf32> to vector<194x128xbf16>
    %c9_133 = arith.constant 9 : index
    %c0_134 = arith.constant 0 : index
    %c0_135 = arith.constant 0 : index
    %159 = vector.load %arg3[%c9_133, %c0_134, %c0_135] : memref<25x128x128xbf16, #tpu.memory_space<vmem>>, vector<1x128x128xbf16>
    %160 = vector.shape_cast %159 : vector<1x128x128xbf16> to vector<128x128xbf16>
    %cst_136 = arith.constant dense<0.000000e+00> : vector<194x128xf32>
    %161 = tpu.matmul %158, %160, %cst_136 {dimension_numbers = #tpu.dot_dimension_numbers<[1], [0], [0], [1], [0, 0, 1, 1], [], []>} : vector<194x128xbf16>, vector<128x128xbf16>, vector<194x128xf32> -> vector<194x128xf32>
    %162 = arith.addf %156, %161 : vector<194x128xf32>
    %c22 = arith.constant 22 : index
    %c0_137 = arith.constant 0 : index
    %163 = vector.load %arg18[%c22, %c0_137] : memref<248x128xf32, #tpu.memory_space<vmem>>, vector<194x128xf32>
    %164 = arith.truncf %163 : vector<194x128xf32> to vector<194x128xbf16>
    %c10_138 = arith.constant 10 : index
    %c0_139 = arith.constant 0 : index
    %c0_140 = arith.constant 0 : index
    %165 = vector.load %arg3[%c10_138, %c0_139, %c0_140] : memref<25x128x128xbf16, #tpu.memory_space<vmem>>, vector<1x128x128xbf16>
    %166 = vector.shape_cast %165 : vector<1x128x128xbf16> to vector<128x128xbf16>
    %cst_141 = arith.constant dense<0.000000e+00> : vector<194x128xf32>
    %167 = tpu.matmul %164, %166, %cst_141 {dimension_numbers = #tpu.dot_dimension_numbers<[1], [0], [0], [1], [0, 0, 1, 1], [], []>} : vector<194x128xbf16>, vector<128x128xbf16>, vector<194x128xf32> -> vector<194x128xf32>
    %168 = arith.addf %162, %167 : vector<194x128xf32>
    %c23 = arith.constant 23 : index
    %c0_142 = arith.constant 0 : index
    %169 = vector.load %arg18[%c23, %c0_142] : memref<248x128xf32, #tpu.memory_space<vmem>>, vector<194x128xf32>
    %170 = arith.truncf %169 : vector<194x128xf32> to vector<194x128xbf16>
    %c11_143 = arith.constant 11 : index
    %c0_144 = arith.constant 0 : index
    %c0_145 = arith.constant 0 : index
    %171 = vector.load %arg3[%c11_143, %c0_144, %c0_145] : memref<25x128x128xbf16, #tpu.memory_space<vmem>>, vector<1x128x128xbf16>
    %172 = vector.shape_cast %171 : vector<1x128x128xbf16> to vector<128x128xbf16>
    %cst_146 = arith.constant dense<0.000000e+00> : vector<194x128xf32>
    %173 = tpu.matmul %170, %172, %cst_146 {dimension_numbers = #tpu.dot_dimension_numbers<[1], [0], [0], [1], [0, 0, 1, 1], [], []>} : vector<194x128xbf16>, vector<128x128xbf16>, vector<194x128xf32> -> vector<194x128xf32>
    %174 = arith.addf %168, %173 : vector<194x128xf32>
    %c24 = arith.constant 24 : index
    %c0_147 = arith.constant 0 : index
    %175 = vector.load %arg18[%c24, %c0_147] : memref<248x128xf32, #tpu.memory_space<vmem>>, vector<194x128xf32>
    %176 = arith.truncf %175 : vector<194x128xf32> to vector<194x128xbf16>
    %c12_148 = arith.constant 12 : index
    %c0_149 = arith.constant 0 : index
    %c0_150 = arith.constant 0 : index
    %177 = vector.load %arg3[%c12_148, %c0_149, %c0_150] : memref<25x128x128xbf16, #tpu.memory_space<vmem>>, vector<1x128x128xbf16>
    %178 = vector.shape_cast %177 : vector<1x128x128xbf16> to vector<128x128xbf16>
    %cst_151 = arith.constant dense<0.000000e+00> : vector<194x128xf32>
    %179 = tpu.matmul %176, %178, %cst_151 {dimension_numbers = #tpu.dot_dimension_numbers<[1], [0], [0], [1], [0, 0, 1, 1], [], []>} : vector<194x128xbf16>, vector<128x128xbf16>, vector<194x128xf32> -> vector<194x128xf32>
    %180 = arith.addf %174, %179 : vector<194x128xf32>
    %c25 = arith.constant 25 : index
    %c0_152 = arith.constant 0 : index
    %181 = vector.load %arg18[%c25, %c0_152] : memref<248x128xf32, #tpu.memory_space<vmem>>, vector<194x128xf32>
    %182 = arith.truncf %181 : vector<194x128xf32> to vector<194x128xbf16>
    %c13_153 = arith.constant 13 : index
    %c0_154 = arith.constant 0 : index
    %c0_155 = arith.constant 0 : index
    %183 = vector.load %arg3[%c13_153, %c0_154, %c0_155] : memref<25x128x128xbf16, #tpu.memory_space<vmem>>, vector<1x128x128xbf16>
    %184 = vector.shape_cast %183 : vector<1x128x128xbf16> to vector<128x128xbf16>
    %cst_156 = arith.constant dense<0.000000e+00> : vector<194x128xf32>
    %185 = tpu.matmul %182, %184, %cst_156 {dimension_numbers = #tpu.dot_dimension_numbers<[1], [0], [0], [1], [0, 0, 1, 1], [], []>} : vector<194x128xbf16>, vector<128x128xbf16>, vector<194x128xf32> -> vector<194x128xf32>
    %186 = arith.addf %180, %185 : vector<194x128xf32>
    %c26 = arith.constant 26 : index
    %c0_157 = arith.constant 0 : index
    %187 = vector.load %arg18[%c26, %c0_157] : memref<248x128xf32, #tpu.memory_space<vmem>>, vector<194x128xf32>
    %188 = arith.truncf %187 : vector<194x128xf32> to vector<194x128xbf16>
    %c14_158 = arith.constant 14 : index
    %c0_159 = arith.constant 0 : index
    %c0_160 = arith.constant 0 : index
    %189 = vector.load %arg3[%c14_158, %c0_159, %c0_160] : memref<25x128x128xbf16, #tpu.memory_space<vmem>>, vector<1x128x128xbf16>
    %190 = vector.shape_cast %189 : vector<1x128x128xbf16> to vector<128x128xbf16>
    %cst_161 = arith.constant dense<0.000000e+00> : vector<194x128xf32>
    %191 = tpu.matmul %188, %190, %cst_161 {dimension_numbers = #tpu.dot_dimension_numbers<[1], [0], [0], [1], [0, 0, 1, 1], [], []>} : vector<194x128xbf16>, vector<128x128xbf16>, vector<194x128xf32> -> vector<194x128xf32>
    %192 = arith.addf %186, %191 : vector<194x128xf32>
    %c33 = arith.constant 33 : index
    %c0_162 = arith.constant 0 : index
    %193 = vector.load %arg18[%c33, %c0_162] : memref<248x128xf32, #tpu.memory_space<vmem>>, vector<194x128xf32>
    %194 = arith.truncf %193 : vector<194x128xf32> to vector<194x128xbf16>
    %c15_163 = arith.constant 15 : index
    %c0_164 = arith.constant 0 : index
    %c0_165 = arith.constant 0 : index
    %195 = vector.load %arg3[%c15_163, %c0_164, %c0_165] : memref<25x128x128xbf16, #tpu.memory_space<vmem>>, vector<1x128x128xbf16>
    %196 = vector.shape_cast %195 : vector<1x128x128xbf16> to vector<128x128xbf16>
    %cst_166 = arith.constant dense<0.000000e+00> : vector<194x128xf32>
    %197 = tpu.matmul %194, %196, %cst_166 {dimension_numbers = #tpu.dot_dimension_numbers<[1], [0], [0], [1], [0, 0, 1, 1], [], []>} : vector<194x128xbf16>, vector<128x128xbf16>, vector<194x128xf32> -> vector<194x128xf32>
    %198 = arith.addf %192, %197 : vector<194x128xf32>
    %c34 = arith.constant 34 : index
    %c0_167 = arith.constant 0 : index
    %199 = vector.load %arg18[%c34, %c0_167] : memref<248x128xf32, #tpu.memory_space<vmem>>, vector<194x128xf32>
    %200 = arith.truncf %199 : vector<194x128xf32> to vector<194x128xbf16>
    %c16_168 = arith.constant 16 : index
    %c0_169 = arith.constant 0 : index
    %c0_170 = arith.constant 0 : index
    %201 = vector.load %arg3[%c16_168, %c0_169, %c0_170] : memref<25x128x128xbf16, #tpu.memory_space<vmem>>, vector<1x128x128xbf16>
    %202 = vector.shape_cast %201 : vector<1x128x128xbf16> to vector<128x128xbf16>
    %cst_171 = arith.constant dense<0.000000e+00> : vector<194x128xf32>
    %203 = tpu.matmul %200, %202, %cst_171 {dimension_numbers = #tpu.dot_dimension_numbers<[1], [0], [0], [1], [0, 0, 1, 1], [], []>} : vector<194x128xbf16>, vector<128x128xbf16>, vector<194x128xf32> -> vector<194x128xf32>
    %204 = arith.addf %198, %203 : vector<194x128xf32>
    %c35 = arith.constant 35 : index
    %c0_172 = arith.constant 0 : index
    %205 = vector.load %arg18[%c35, %c0_172] : memref<248x128xf32, #tpu.memory_space<vmem>>, vector<194x128xf32>
    %206 = arith.truncf %205 : vector<194x128xf32> to vector<194x128xbf16>
    %c17_173 = arith.constant 17 : index
    %c0_174 = arith.constant 0 : index
    %c0_175 = arith.constant 0 : index
    %207 = vector.load %arg3[%c17_173, %c0_174, %c0_175] : memref<25x128x128xbf16, #tpu.memory_space<vmem>>, vector<1x128x128xbf16>
    %208 = vector.shape_cast %207 : vector<1x128x128xbf16> to vector<128x128xbf16>
    %cst_176 = arith.constant dense<0.000000e+00> : vector<194x128xf32>
    %209 = tpu.matmul %206, %208, %cst_176 {dimension_numbers = #tpu.dot_dimension_numbers<[1], [0], [0], [1], [0, 0, 1, 1], [], []>} : vector<194x128xbf16>, vector<128x128xbf16>, vector<194x128xf32> -> vector<194x128xf32>
    %210 = arith.addf %204, %209 : vector<194x128xf32>
    %c36 = arith.constant 36 : index
    %c0_177 = arith.constant 0 : index
    %211 = vector.load %arg18[%c36, %c0_177] : memref<248x128xf32, #tpu.memory_space<vmem>>, vector<194x128xf32>
    %212 = arith.truncf %211 : vector<194x128xf32> to vector<194x128xbf16>
    %c18 = arith.constant 18 : index
    %c0_178 = arith.constant 0 : index
    %c0_179 = arith.constant 0 : index
    %213 = vector.load %arg3[%c18, %c0_178, %c0_179] : memref<25x128x128xbf16, #tpu.memory_space<vmem>>, vector<1x128x128xbf16>
    %214 = vector.shape_cast %213 : vector<1x128x128xbf16> to vector<128x128xbf16>
    %cst_180 = arith.constant dense<0.000000e+00> : vector<194x128xf32>
    %215 = tpu.matmul %212, %214, %cst_180 {dimension_numbers = #tpu.dot_dimension_numbers<[1], [0], [0], [1], [0, 0, 1, 1], [], []>} : vector<194x128xbf16>, vector<128x128xbf16>, vector<194x128xf32> -> vector<194x128xf32>
    %216 = arith.addf %210, %215 : vector<194x128xf32>
    %c37 = arith.constant 37 : index
    %c0_181 = arith.constant 0 : index
    %217 = vector.load %arg18[%c37, %c0_181] : memref<248x128xf32, #tpu.memory_space<vmem>>, vector<194x128xf32>
    %218 = arith.truncf %217 : vector<194x128xf32> to vector<194x128xbf16>
    %c19 = arith.constant 19 : index
    %c0_182 = arith.constant 0 : index
    %c0_183 = arith.constant 0 : index
    %219 = vector.load %arg3[%c19, %c0_182, %c0_183] : memref<25x128x128xbf16, #tpu.memory_space<vmem>>, vector<1x128x128xbf16>
    %220 = vector.shape_cast %219 : vector<1x128x128xbf16> to vector<128x128xbf16>
    %cst_184 = arith.constant dense<0.000000e+00> : vector<194x128xf32>
    %221 = tpu.matmul %218, %220, %cst_184 {dimension_numbers = #tpu.dot_dimension_numbers<[1], [0], [0], [1], [0, 0, 1, 1], [], []>} : vector<194x128xbf16>, vector<128x128xbf16>, vector<194x128xf32> -> vector<194x128xf32>
    %222 = arith.addf %216, %221 : vector<194x128xf32>
    %c44_185 = arith.constant 44 : index
    %c0_186 = arith.constant 0 : index
    %223 = vector.load %arg18[%c44_185, %c0_186] : memref<248x128xf32, #tpu.memory_space<vmem>>, vector<194x128xf32>
    %224 = arith.truncf %223 : vector<194x128xf32> to vector<194x128xbf16>
    %c20 = arith.constant 20 : index
    %c0_187 = arith.constant 0 : index
    %c0_188 = arith.constant 0 : index
    %225 = vector.load %arg3[%c20, %c0_187, %c0_188] : memref<25x128x128xbf16, #tpu.memory_space<vmem>>, vector<1x128x128xbf16>
    %226 = vector.shape_cast %225 : vector<1x128x128xbf16> to vector<128x128xbf16>
    %cst_189 = arith.constant dense<0.000000e+00> : vector<194x128xf32>
    %227 = tpu.matmul %224, %226, %cst_189 {dimension_numbers = #tpu.dot_dimension_numbers<[1], [0], [0], [1], [0, 0, 1, 1], [], []>} : vector<194x128xbf16>, vector<128x128xbf16>, vector<194x128xf32> -> vector<194x128xf32>
    %228 = arith.addf %222, %227 : vector<194x128xf32>
    %c45_190 = arith.constant 45 : index
    %c0_191 = arith.constant 0 : index
    %229 = vector.load %arg18[%c45_190, %c0_191] : memref<248x128xf32, #tpu.memory_space<vmem>>, vector<194x128xf32>
    %230 = arith.truncf %229 : vector<194x128xf32> to vector<194x128xbf16>
    %c21 = arith.constant 21 : index
    %c0_192 = arith.constant 0 : index
    %c0_193 = arith.constant 0 : index
    %231 = vector.load %arg3[%c21, %c0_192, %c0_193] : memref<25x128x128xbf16, #tpu.memory_space<vmem>>, vector<1x128x128xbf16>
    %232 = vector.shape_cast %231 : vector<1x128x128xbf16> to vector<128x128xbf16>
    %cst_194 = arith.constant dense<0.000000e+00> : vector<194x128xf32>
    %233 = tpu.matmul %230, %232, %cst_194 {dimension_numbers = #tpu.dot_dimension_numbers<[1], [0], [0], [1], [0, 0, 1, 1], [], []>} : vector<194x128xbf16>, vector<128x128xbf16>, vector<194x128xf32> -> vector<194x128xf32>
    %234 = arith.addf %228, %233 : vector<194x128xf32>
    %c46 = arith.constant 46 : index
    %c0_195 = arith.constant 0 : index
    %235 = vector.load %arg18[%c46, %c0_195] : memref<248x128xf32, #tpu.memory_space<vmem>>, vector<194x128xf32>
    %236 = arith.truncf %235 : vector<194x128xf32> to vector<194x128xbf16>
    %c22_196 = arith.constant 22 : index
    %c0_197 = arith.constant 0 : index
    %c0_198 = arith.constant 0 : index
    %237 = vector.load %arg3[%c22_196, %c0_197, %c0_198] : memref<25x128x128xbf16, #tpu.memory_space<vmem>>, vector<1x128x128xbf16>
    %238 = vector.shape_cast %237 : vector<1x128x128xbf16> to vector<128x128xbf16>
    %cst_199 = arith.constant dense<0.000000e+00> : vector<194x128xf32>
    %239 = tpu.matmul %236, %238, %cst_199 {dimension_numbers = #tpu.dot_dimension_numbers<[1], [0], [0], [1], [0, 0, 1, 1], [], []>} : vector<194x128xbf16>, vector<128x128xbf16>, vector<194x128xf32> -> vector<194x128xf32>
    %240 = arith.addf %234, %239 : vector<194x128xf32>
    %c47 = arith.constant 47 : index
    %c0_200 = arith.constant 0 : index
    %241 = vector.load %arg18[%c47, %c0_200] : memref<248x128xf32, #tpu.memory_space<vmem>>, vector<194x128xf32>
    %242 = arith.truncf %241 : vector<194x128xf32> to vector<194x128xbf16>
    %c23_201 = arith.constant 23 : index
    %c0_202 = arith.constant 0 : index
    %c0_203 = arith.constant 0 : index
    %243 = vector.load %arg3[%c23_201, %c0_202, %c0_203] : memref<25x128x128xbf16, #tpu.memory_space<vmem>>, vector<1x128x128xbf16>
    %244 = vector.shape_cast %243 : vector<1x128x128xbf16> to vector<128x128xbf16>
    %cst_204 = arith.constant dense<0.000000e+00> : vector<194x128xf32>
    %245 = tpu.matmul %242, %244, %cst_204 {dimension_numbers = #tpu.dot_dimension_numbers<[1], [0], [0], [1], [0, 0, 1, 1], [], []>} : vector<194x128xbf16>, vector<128x128xbf16>, vector<194x128xf32> -> vector<194x128xf32>
    %246 = arith.addf %240, %245 : vector<194x128xf32>
    %c48 = arith.constant 48 : index
    %c0_205 = arith.constant 0 : index
    %247 = vector.load %arg18[%c48, %c0_205] : memref<248x128xf32, #tpu.memory_space<vmem>>, vector<194x128xf32>
    %248 = arith.truncf %247 : vector<194x128xf32> to vector<194x128xbf16>
    %c24_206 = arith.constant 24 : index
    %c0_207 = arith.constant 0 : index
    %c0_208 = arith.constant 0 : index
    %249 = vector.load %arg3[%c24_206, %c0_207, %c0_208] : memref<25x128x128xbf16, #tpu.memory_space<vmem>>, vector<1x128x128xbf16>
    %250 = vector.shape_cast %249 : vector<1x128x128xbf16> to vector<128x128xbf16>
    %cst_209 = arith.constant dense<0.000000e+00> : vector<194x128xf32>
    %251 = tpu.matmul %248, %250, %cst_209 {dimension_numbers = #tpu.dot_dimension_numbers<[1], [0], [0], [1], [0, 0, 1, 1], [], []>} : vector<194x128xbf16>, vector<128x128xbf16>, vector<194x128xf32> -> vector<194x128xf32>
    %252 = arith.addf %246, %251 : vector<194x128xf32>
    %c0_210 = arith.constant 0 : index
    %c0_211 = arith.constant 0 : index
    %253 = vector.load %arg13[%c0_210, %c0_211] : memref<104x194xbf16, #tpu.memory_space<vmem>>, vector<104x194xbf16>
    %254 = arith.truncf %252 : vector<194x128xf32> to vector<194x128xbf16>
    %cst_212 = arith.constant dense<0.000000e+00> : vector<104x128xf32>
    %255 = tpu.matmul %253, %254, %cst_212 {dimension_numbers = #tpu.dot_dimension_numbers<[1], [0], [0], [1], [0, 0, 1, 1], [], []>} : vector<104x194xbf16>, vector<194x128xbf16>, vector<104x128xf32> -> vector<104x128xf32>
    %c0_213 = arith.constant 0 : index
    %c0_214 = arith.constant 0 : index
    %256 = vector.load %arg8[%c0_213, %c0_214] : memref<1x128xf32, #tpu.memory_space<vmem>>, vector<1x128xf32>
    %257 = vector.broadcast %256 : vector<1x128xf32> to vector<104x128xf32>
    %258 = arith.addf %255, %257 : vector<104x128xf32>
    %cst_215 = arith.constant 0.000000e+00 : f32
    %259 = vector.broadcast %cst_215 : f32 to vector<104x128xf32>
    %260 = arith.maximumf %258, %259 : vector<104x128xf32>
    %c0_216 = arith.constant 0 : index
    %c0_217 = arith.constant 0 : index
    %261 = vector.load %arg19[%c0_216, %c0_217] : memref<104x128xf32, #tpu.memory_space<vmem>>, vector<104x128xf32>
    tpu.vector_store %arg19[%c0_216, %c0_217], %260 {strides = array<i32>} : memref<104x128xf32, #tpu.memory_space<vmem>>, vector<104x128xf32>,
    %c0_218 = arith.constant 0 : index
    %c0_219 = arith.constant 0 : index
    %262 = vector.load %arg19[%c0_218, %c0_219] : memref<104x128xf32, #tpu.memory_space<vmem>>, vector<82x128xf32>
    %263 = arith.truncf %262 : vector<82x128xf32> to vector<82x128xbf16>
    %c0_220 = arith.constant 0 : index
    %c0_221 = arith.constant 0 : index
    %264 = vector.load %arg14[%c0_220, %c0_221] : memref<24x82xbf16, #tpu.memory_space<vmem>>, vector<24x82xbf16>
    %cst_222 = arith.constant dense<0.000000e+00> : vector<24x128xf32>
    %265 = tpu.matmul %264, %263, %cst_222 {dimension_numbers = #tpu.dot_dimension_numbers<[1], [0], [0], [1], [0, 0, 1, 1], [], []>} : vector<24x82xbf16>, vector<82x128xbf16>, vector<24x128xf32> -> vector<24x128xf32>
    %c1_223 = arith.constant 1 : index
    %c0_224 = arith.constant 0 : index
    %266 = vector.load %arg19[%c1_223, %c0_224] : memref<104x128xf32, #tpu.memory_space<vmem>>, vector<82x128xf32>
    %267 = arith.truncf %266 : vector<82x128xf32> to vector<82x128xbf16>
    %c0_225 = arith.constant 0 : index
    %c0_226 = arith.constant 0 : index
    %268 = vector.load %arg14[%c0_225, %c0_226] : memref<24x82xbf16, #tpu.memory_space<vmem>>, vector<24x82xbf16>
    %cst_227 = arith.constant dense<0.000000e+00> : vector<24x128xf32>
    %269 = tpu.matmul %268, %267, %cst_227 {dimension_numbers = #tpu.dot_dimension_numbers<[1], [0], [0], [1], [0, 0, 1, 1], [], []>} : vector<24x82xbf16>, vector<82x128xbf16>, vector<24x128xf32> -> vector<24x128xf32>
    %270 = arith.maximumf %265, %269 : vector<24x128xf32>
    %c7_228 = arith.constant 7 : index
    %c0_229 = arith.constant 0 : index
    %271 = vector.load %arg19[%c7_228, %c0_229] : memref<104x128xf32, #tpu.memory_space<vmem>>, vector<82x128xf32>
    %272 = arith.truncf %271 : vector<82x128xf32> to vector<82x128xbf16>
    %c0_230 = arith.constant 0 : index
    %c0_231 = arith.constant 0 : index
    %273 = vector.load %arg14[%c0_230, %c0_231] : memref<24x82xbf16, #tpu.memory_space<vmem>>, vector<24x82xbf16>
    %cst_232 = arith.constant dense<0.000000e+00> : vector<24x128xf32>
    %274 = tpu.matmul %273, %272, %cst_232 {dimension_numbers = #tpu.dot_dimension_numbers<[1], [0], [0], [1], [0, 0, 1, 1], [], []>} : vector<24x82xbf16>, vector<82x128xbf16>, vector<24x128xf32> -> vector<24x128xf32>
    %275 = arith.maximumf %270, %274 : vector<24x128xf32>
    %c8_233 = arith.constant 8 : index
    %c0_234 = arith.constant 0 : index
    %276 = vector.load %arg19[%c8_233, %c0_234] : memref<104x128xf32, #tpu.memory_space<vmem>>, vector<82x128xf32>
    %277 = arith.truncf %276 : vector<82x128xf32> to vector<82x128xbf16>
    %c0_235 = arith.constant 0 : index
    %c0_236 = arith.constant 0 : index
    %278 = vector.load %arg14[%c0_235, %c0_236] : memref<24x82xbf16, #tpu.memory_space<vmem>>, vector<24x82xbf16>
    %cst_237 = arith.constant dense<0.000000e+00> : vector<24x128xf32>
    %279 = tpu.matmul %278, %277, %cst_237 {dimension_numbers = #tpu.dot_dimension_numbers<[1], [0], [0], [1], [0, 0, 1, 1], [], []>} : vector<24x82xbf16>, vector<82x128xbf16>, vector<24x128xf32> -> vector<24x128xf32>
    %280 = arith.maximumf %275, %279 : vector<24x128xf32>
    %c0_238 = arith.constant 0 : index
    %c0_239 = arith.constant 0 : index
    %281 = vector.load %arg20[%c0_238, %c0_239] : memref<24x128xf32, #tpu.memory_space<vmem>>, vector<24x128xf32>
    tpu.vector_store %arg20[%c0_238, %c0_239], %280 {strides = array<i32>} : memref<24x128xf32, #tpu.memory_space<vmem>>, vector<24x128xf32>,
    %c0_240 = arith.constant 0 : index
    %c0_241 = arith.constant 0 : index
    %282 = vector.load %arg20[%c0_240, %c0_241] : memref<24x128xf32, #tpu.memory_space<vmem>>, vector<14x128xf32>
    %283 = arith.truncf %282 : vector<14x128xf32> to vector<14x128xbf16>
    %c0_242 = arith.constant 0 : index
    %c0_243 = arith.constant 0 : index
    %c0_244 = arith.constant 0 : index
    %284 = vector.load %arg4[%c0_242, %c0_243, %c0_244] : memref<4x128x128xbf16, #tpu.memory_space<vmem>>, vector<1x128x128xbf16>
    %285 = vector.shape_cast %284 : vector<1x128x128xbf16> to vector<128x128xbf16>
    %cst_245 = arith.constant dense<0.000000e+00> : vector<14x128xf32>
    %286 = tpu.matmul %283, %285, %cst_245 {dimension_numbers = #tpu.dot_dimension_numbers<[1], [0], [0], [1], [0, 0, 1, 1], [], []>} : vector<14x128xbf16>, vector<128x128xbf16>, vector<14x128xf32> -> vector<14x128xf32>
    %c1_246 = arith.constant 1 : index
    %c0_247 = arith.constant 0 : index
    %287 = vector.load %arg20[%c1_246, %c0_247] : memref<24x128xf32, #tpu.memory_space<vmem>>, vector<14x128xf32>
    %288 = arith.truncf %287 : vector<14x128xf32> to vector<14x128xbf16>
    %c1_248 = arith.constant 1 : index
    %c0_249 = arith.constant 0 : index
    %c0_250 = arith.constant 0 : index
    %289 = vector.load %arg4[%c1_248, %c0_249, %c0_250] : memref<4x128x128xbf16, #tpu.memory_space<vmem>>, vector<1x128x128xbf16>
    %290 = vector.shape_cast %289 : vector<1x128x128xbf16> to vector<128x128xbf16>
    %cst_251 = arith.constant dense<0.000000e+00> : vector<14x128xf32>
    %291 = tpu.matmul %288, %290, %cst_251 {dimension_numbers = #tpu.dot_dimension_numbers<[1], [0], [0], [1], [0, 0, 1, 1], [], []>} : vector<14x128xbf16>, vector<128x128xbf16>, vector<14x128xf32> -> vector<14x128xf32>
    %292 = arith.addf %286, %291 : vector<14x128xf32>
    %c3_252 = arith.constant 3 : index
    %c0_253 = arith.constant 0 : index
    %293 = vector.load %arg20[%c3_252, %c0_253] : memref<24x128xf32, #tpu.memory_space<vmem>>, vector<14x128xf32>
    %294 = arith.truncf %293 : vector<14x128xf32> to vector<14x128xbf16>
    %c2_254 = arith.constant 2 : index
    %c0_255 = arith.constant 0 : index
    %c0_256 = arith.constant 0 : index
    %295 = vector.load %arg4[%c2_254, %c0_255, %c0_256] : memref<4x128x128xbf16, #tpu.memory_space<vmem>>, vector<1x128x128xbf16>
    %296 = vector.shape_cast %295 : vector<1x128x128xbf16> to vector<128x128xbf16>
    %cst_257 = arith.constant dense<0.000000e+00> : vector<14x128xf32>
    %297 = tpu.matmul %294, %296, %cst_257 {dimension_numbers = #tpu.dot_dimension_numbers<[1], [0], [0], [1], [0, 0, 1, 1], [], []>} : vector<14x128xbf16>, vector<128x128xbf16>, vector<14x128xf32> -> vector<14x128xf32>
    %298 = arith.addf %292, %297 : vector<14x128xf32>
    %c4_258 = arith.constant 4 : index
    %c0_259 = arith.constant 0 : index
    %299 = vector.load %arg20[%c4_258, %c0_259] : memref<24x128xf32, #tpu.memory_space<vmem>>, vector<14x128xf32>
    %300 = arith.truncf %299 : vector<14x128xf32> to vector<14x128xbf16>
    %c3_260 = arith.constant 3 : index
    %c0_261 = arith.constant 0 : index
    %c0_262 = arith.constant 0 : index
    %301 = vector.load %arg4[%c3_260, %c0_261, %c0_262] : memref<4x128x128xbf16, #tpu.memory_space<vmem>>, vector<1x128x128xbf16>
    %302 = vector.shape_cast %301 : vector<1x128x128xbf16> to vector<128x128xbf16>
    %cst_263 = arith.constant dense<0.000000e+00> : vector<14x128xf32>
    %303 = tpu.matmul %300, %302, %cst_263 {dimension_numbers = #tpu.dot_dimension_numbers<[1], [0], [0], [1], [0, 0, 1, 1], [], []>} : vector<14x128xbf16>, vector<128x128xbf16>, vector<14x128xf32> -> vector<14x128xf32>
    %304 = arith.addf %298, %303 : vector<14x128xf32>
    %c0_264 = arith.constant 0 : index
    %c0_265 = arith.constant 0 : index
    %305 = vector.load %arg15[%c0_264, %c0_265] : memref<8x14xbf16, #tpu.memory_space<vmem>>, vector<8x14xbf16>
    %306 = arith.truncf %304 : vector<14x128xf32> to vector<14x128xbf16>
    %cst_266 = arith.constant dense<0.000000e+00> : vector<8x128xf32>
    %307 = tpu.matmul %305, %306, %cst_266 {dimension_numbers = #tpu.dot_dimension_numbers<[1], [0], [0], [1], [0, 0, 1, 1], [], []>} : vector<8x14xbf16>, vector<14x128xbf16>, vector<8x128xf32> -> vector<8x128xf32>
    %c0_267 = arith.constant 0 : index
    %c0_268 = arith.constant 0 : index
    %308 = vector.load %arg9[%c0_267, %c0_268] : memref<1x128xf32, #tpu.memory_space<vmem>>, vector<1x128xf32>
    %309 = vector.broadcast %308 : vector<1x128xf32> to vector<8x128xf32>
    %310 = arith.addf %307, %309 : vector<8x128xf32>
    %cst_269 = arith.constant 0.000000e+00 : f32
    %311 = vector.broadcast %cst_269 : f32 to vector<8x128xf32>
    %312 = arith.maximumf %310, %311 : vector<8x128xf32>
    %313 = arith.truncf %312 : vector<8x128xf32> to vector<8x128xbf16>
    %c0_270 = arith.constant 0 : index
    %c0_271 = arith.constant 0 : index
    %c0_272 = arith.constant 0 : index
    %314 = vector.load %arg16[%c0_270, %c0_271, %c0_272] : memref<4x8x8xbf16, #tpu.memory_space<vmem>>, vector<1x8x8xbf16>
    %315 = vector.shape_cast %314 : vector<1x8x8xbf16> to vector<8x8xbf16>
    %cst_273 = arith.constant dense<0.000000e+00> : vector<8x128xf32>
    %316 = tpu.matmul %315, %313, %cst_273 {dimension_numbers = #tpu.dot_dimension_numbers<[1], [0], [0], [1], [0, 0, 1, 1], [], []>} : vector<8x8xbf16>, vector<8x128xbf16>, vector<8x128xf32> -> vector<8x128xf32>
    %317 = arith.truncf %316 : vector<8x128xf32> to vector<8x128xbf16>
    %c0_274 = arith.constant 0 : index
    %c0_275 = arith.constant 0 : index
    %c0_276 = arith.constant 0 : index
    %318 = vector.load %arg5[%c0_274, %c0_275, %c0_276] : memref<4x128x128xbf16, #tpu.memory_space<vmem>>, vector<1x128x128xbf16>
    %319 = vector.shape_cast %318 : vector<1x128x128xbf16> to vector<128x128xbf16>
    %cst_277 = arith.constant dense<0.000000e+00> : vector<8x128xf32>
    %320 = tpu.matmul %317, %319, %cst_277 {dimension_numbers = #tpu.dot_dimension_numbers<[1], [0], [0], [1], [0, 0, 1, 1], [], []>} : vector<8x128xbf16>, vector<128x128xbf16>, vector<8x128xf32> -> vector<8x128xf32>
    %c1_278 = arith.constant 1 : index
    %c0_279 = arith.constant 0 : index
    %c0_280 = arith.constant 0 : index
    %321 = vector.load %arg16[%c1_278, %c0_279, %c0_280] : memref<4x8x8xbf16, #tpu.memory_space<vmem>>, vector<1x8x8xbf16>
    %322 = vector.shape_cast %321 : vector<1x8x8xbf16> to vector<8x8xbf16>
    %cst_281 = arith.constant dense<0.000000e+00> : vector<8x128xf32>
    %323 = tpu.matmul %322, %313, %cst_281 {dimension_numbers = #tpu.dot_dimension_numbers<[1], [0], [0], [1], [0, 0, 1, 1], [], []>} : vector<8x8xbf16>, vector<8x128xbf16>, vector<8x128xf32> -> vector<8x128xf32>
    %324 = arith.truncf %323 : vector<8x128xf32> to vector<8x128xbf16>
    %c1_282 = arith.constant 1 : index
    %c0_283 = arith.constant 0 : index
    %c0_284 = arith.constant 0 : index
    %325 = vector.load %arg5[%c1_282, %c0_283, %c0_284] : memref<4x128x128xbf16, #tpu.memory_space<vmem>>, vector<1x128x128xbf16>
    %326 = vector.shape_cast %325 : vector<1x128x128xbf16> to vector<128x128xbf16>
    %cst_285 = arith.constant dense<0.000000e+00> : vector<8x128xf32>
    %327 = tpu.matmul %324, %326, %cst_285 {dimension_numbers = #tpu.dot_dimension_numbers<[1], [0], [0], [1], [0, 0, 1, 1], [], []>} : vector<8x128xbf16>, vector<128x128xbf16>, vector<8x128xf32> -> vector<8x128xf32>
    %328 = arith.addf %320, %327 : vector<8x128xf32>
    %c2_286 = arith.constant 2 : index
    %c0_287 = arith.constant 0 : index
    %c0_288 = arith.constant 0 : index
    %329 = vector.load %arg16[%c2_286, %c0_287, %c0_288] : memref<4x8x8xbf16, #tpu.memory_space<vmem>>, vector<1x8x8xbf16>
    %330 = vector.shape_cast %329 : vector<1x8x8xbf16> to vector<8x8xbf16>
    %cst_289 = arith.constant dense<0.000000e+00> : vector<8x128xf32>
    %331 = tpu.matmul %330, %313, %cst_289 {dimension_numbers = #tpu.dot_dimension_numbers<[1], [0], [0], [1], [0, 0, 1, 1], [], []>} : vector<8x8xbf16>, vector<8x128xbf16>, vector<8x128xf32> -> vector<8x128xf32>
    %332 = arith.truncf %331 : vector<8x128xf32> to vector<8x128xbf16>
    %c2_290 = arith.constant 2 : index
    %c0_291 = arith.constant 0 : index
    %c0_292 = arith.constant 0 : index
    %333 = vector.load %arg5[%c2_290, %c0_291, %c0_292] : memref<4x128x128xbf16, #tpu.memory_space<vmem>>, vector<1x128x128xbf16>
    %334 = vector.shape_cast %333 : vector<1x128x128xbf16> to vector<128x128xbf16>
    %cst_293 = arith.constant dense<0.000000e+00> : vector<8x128xf32>
    %335 = tpu.matmul %332, %334, %cst_293 {dimension_numbers = #tpu.dot_dimension_numbers<[1], [0], [0], [1], [0, 0, 1, 1], [], []>} : vector<8x128xbf16>, vector<128x128xbf16>, vector<8x128xf32> -> vector<8x128xf32>
    %336 = arith.addf %328, %335 : vector<8x128xf32>
    %c3_294 = arith.constant 3 : index
    %c0_295 = arith.constant 0 : index
    %c0_296 = arith.constant 0 : index
    %337 = vector.load %arg16[%c3_294, %c0_295, %c0_296] : memref<4x8x8xbf16, #tpu.memory_space<vmem>>, vector<1x8x8xbf16>
    %338 = vector.shape_cast %337 : vector<1x8x8xbf16> to vector<8x8xbf16>
    %cst_297 = arith.constant dense<0.000000e+00> : vector<8x128xf32>
    %339 = tpu.matmul %338, %313, %cst_297 {dimension_numbers = #tpu.dot_dimension_numbers<[1], [0], [0], [1], [0, 0, 1, 1], [], []>} : vector<8x8xbf16>, vector<8x128xbf16>, vector<8x128xf32> -> vector<8x128xf32>
    %340 = arith.truncf %339 : vector<8x128xf32> to vector<8x128xbf16>
    %c3_298 = arith.constant 3 : index
    %c0_299 = arith.constant 0 : index
    %c0_300 = arith.constant 0 : index
    %341 = vector.load %arg5[%c3_298, %c0_299, %c0_300] : memref<4x128x128xbf16, #tpu.memory_space<vmem>>, vector<1x128x128xbf16>
    %342 = vector.shape_cast %341 : vector<1x128x128xbf16> to vector<128x128xbf16>
    %cst_301 = arith.constant dense<0.000000e+00> : vector<8x128xf32>
    %343 = tpu.matmul %340, %342, %cst_301 {dimension_numbers = #tpu.dot_dimension_numbers<[1], [0], [0], [1], [0, 0, 1, 1], [], []>} : vector<8x128xbf16>, vector<128x128xbf16>, vector<8x128xf32> -> vector<8x128xf32>
    %344 = arith.addf %336, %343 : vector<8x128xf32>
    %c0_302 = arith.constant 0 : index
    %c0_303 = arith.constant 0 : index
    %345 = vector.load %arg10[%c0_302, %c0_303] : memref<1x128xf32, #tpu.memory_space<vmem>>, vector<1x128xf32>
    %346 = vector.broadcast %345 : vector<1x128xf32> to vector<8x128xf32>
    %347 = arith.addf %344, %346 : vector<8x128xf32>
    %348 = arith.negf %347 : vector<8x128xf32>
    %349 = math.exp %348 : vector<8x128xf32>
    %cst_304 = arith.constant 1.000000e+00 : f32
    %350 = vector.broadcast %cst_304 : f32 to vector<8x128xf32>
    %351 = arith.addf %350, %349 : vector<8x128xf32>
    %352 = arith.divf %350, %351 : vector<8x128xf32>
    %353 = arith.truncf %352 : vector<8x128xf32> to vector<8x128xbf16>
    %c0_305 = arith.constant 0 : index
    %c0_306 = arith.constant 0 : index
    %354 = vector.load %arg6[%c0_305, %c0_306] : memref<128x128xbf16, #tpu.memory_space<vmem>>, vector<128x128xbf16>
    %cst_307 = arith.constant dense<0.000000e+00> : vector<8x128xf32>
    %355 = tpu.matmul %353, %354, %cst_307 {dimension_numbers = #tpu.dot_dimension_numbers<[1], [0], [0], [1], [0, 0, 1, 1], [], []>} : vector<8x128xbf16>, vector<128x128xbf16>, vector<8x128xf32> -> vector<8x128xf32>
    %c0_308 = arith.constant 0 : index
    %c0_309 = arith.constant 0 : index
    %356 = vector.load %arg11[%c0_308, %c0_309] : memref<1x128xf32, #tpu.memory_space<vmem>>, vector<1x128xf32>
    %357 = vector.broadcast %356 : vector<1x128xf32> to vector<8x128xf32>
    %358 = arith.addf %355, %357 : vector<8x128xf32>
    %c0_310 = arith.constant 0 : index
    %c0_311 = arith.constant 0 : index
    %359 = vector.load %arg17[%c0_310, %c0_311] : memref<8x128xf32, #tpu.memory_space<vmem>>, vector<8x128xf32>
    tpu.vector_store %arg17[%c0_310, %c0_311], %358 {strides = array<i32>} : memref<8x128xf32, #tpu.memory_space<vmem>>, vector<8x128xf32>,
    return
  }
  func.func @transform_0(%arg0: i32) -> (i32, i32) {
    %c0_i32 = arith.constant 0 : i32
    %c0_i32_0 = arith.constant 0 : i32
    %c0_i32_1 = arith.constant 0 : i32
    return %c0_i32, %c0_i32_0 : i32, i32
  }
  func.func @transform_1(%arg0: i32) -> (i32, i32, i32) {
    %c0_i32 = arith.constant 0 : i32
    %c0_i32_0 = arith.constant 0 : i32
    %c0_i32_1 = arith.constant 0 : i32
    %c0_i32_2 = arith.constant 0 : i32
    return %c0_i32, %c0_i32_0, %c0_i32_1 : i32, i32, i32
  }
  func.func @transform_2(%arg0: i32) -> (i32, i32, i32) {
    %c0_i32 = arith.constant 0 : i32
    %c0_i32_0 = arith.constant 0 : i32
    %c0_i32_1 = arith.constant 0 : i32
    %c0_i32_2 = arith.constant 0 : i32
    return %c0_i32, %c0_i32_0, %c0_i32_1 : i32, i32, i32
  }
  func.func @transform_3(%arg0: i32) -> (i32, i32, i32) {
    %c0_i32 = arith.constant 0 : i32
    %c0_i32_0 = arith.constant 0 : i32
    %c0_i32_1 = arith.constant 0 : i32
    %c0_i32_2 = arith.constant 0 : i32
    return %c0_i32, %c0_i32_0, %c0_i32_1 : i32, i32, i32
  }
  func.func @transform_4(%arg0: i32) -> (i32, i32, i32) {
    %c0_i32 = arith.constant 0 : i32
    %c0_i32_0 = arith.constant 0 : i32
    %c0_i32_1 = arith.constant 0 : i32
    %c0_i32_2 = arith.constant 0 : i32
    return %c0_i32, %c0_i32_0, %c0_i32_1 : i32, i32, i32
  }
  func.func @transform_5(%arg0: i32) -> (i32, i32) {
    %c0_i32 = arith.constant 0 : i32
    %c0_i32_0 = arith.constant 0 : i32
    %c0_i32_1 = arith.constant 0 : i32
    return %c0_i32, %c0_i32_0 : i32, i32
  }
  func.func @transform_6(%arg0: i32) -> (i32, i32) {
    %c0_i32 = arith.constant 0 : i32
    %c0_i32_0 = arith.constant 0 : i32
    %c0_i32_1 = arith.constant 0 : i32
    return %c0_i32, %c0_i32_0 : i32, i32
  }
  func.func @transform_7(%arg0: i32) -> (i32, i32) {
    %c0_i32 = arith.constant 0 : i32
    %c0_i32_0 = arith.constant 0 : i32
    %c0_i32_1 = arith.constant 0 : i32
    return %c0_i32, %c0_i32_0 : i32, i32
  }
  func.func @transform_8(%arg0: i32) -> (i32, i32) {
    %c0_i32 = arith.constant 0 : i32
    %c0_i32_0 = arith.constant 0 : i32
    %c0_i32_1 = arith.constant 0 : i32
    return %c0_i32, %c0_i32_0 : i32, i32
  }
  func.func @transform_9(%arg0: i32) -> (i32, i32) {
    %c0_i32 = arith.constant 0 : i32
    %c0_i32_0 = arith.constant 0 : i32
    %c0_i32_1 = arith.constant 0 : i32
    return %c0_i32, %c0_i32_0 : i32, i32
  }
  func.func @transform_10(%arg0: i32) -> (i32, i32) {
    %c0_i32 = arith.constant 0 : i32
    %c0_i32_0 = arith.constant 0 : i32
    %c0_i32_1 = arith.constant 0 : i32
    return %c0_i32, %c0_i32_0 : i32, i32
  }
  func.func @transform_11(%arg0: i32) -> (i32, i32) {
    %c0_i32 = arith.constant 0 : i32
    %c0_i32_0 = arith.constant 0 : i32
    %c0_i32_1 = arith.constant 0 : i32
    return %c0_i32, %c0_i32_0 : i32, i32
  }
  func.func @transform_12(%arg0: i32) -> (i32, i32) {
    %c0_i32 = arith.constant 0 : i32
    %c0_i32_0 = arith.constant 0 : i32
    %c0_i32_1 = arith.constant 0 : i32
    return %c0_i32, %c0_i32_0 : i32, i32
  }
  func.func @transform_13(%arg0: i32) -> (i32, i32) {
    %c0_i32 = arith.constant 0 : i32
    %c0_i32_0 = arith.constant 0 : i32
    %c0_i32_1 = arith.constant 0 : i32
    return %c0_i32, %c0_i32_0 : i32, i32
  }
  func.func @transform_14(%arg0: i32) -> (i32, i32) {
    %c0_i32 = arith.constant 0 : i32
    %c0_i32_0 = arith.constant 0 : i32
    %c0_i32_1 = arith.constant 0 : i32
    return %c0_i32, %c0_i32_0 : i32, i32
  }
  func.func @transform_15(%arg0: i32) -> (i32, i32, i32) {
    %c0_i32 = arith.constant 0 : i32
    %c0_i32_0 = arith.constant 0 : i32
    %c0_i32_1 = arith.constant 0 : i32
    %c0_i32_2 = arith.constant 0 : i32
    return %c0_i32, %c0_i32_0, %c0_i32_1 : i32, i32, i32
  }
  func.func @transform_16(%arg0: i32) -> (i32, i32) {
    %c0_i32 = arith.constant 0 : i32
    %c0_i32_0 = arith.constant 0 : i32
    %c0_i32_1 = arith.constant 0 : i32
    return %c0_i32, %c0_i32_0 : i32, i32
  }
}

</mosaic_0001>

<bundles_post_ra>
// kernel: convnet3_forward.1
= control target key start
LH: loop header
LB: loop body
LE: loop exit
PB: predicated region body
PF: predicated region fallthrough
CT: control target
= control target key end

     0   :  { %s28647_s0 = inlined_call_operand.vmem [shape: f32[392,128], index: 0, kind: input, shape index: {}]   ;;  %s28648_s1 = inlined_call_operand.hbm [shape: bf16[16,128,128], index: 1, kind: input, shape index: {}]   ;;  %s28649_s2 = inlined_call_operand.vmem [shape: bf16[25,128,128], index: 2, kind: input, shape index: {}]   ;;  %s28650_s3 = inlined_call_operand.vmem [shape: bf16[4,128,128], index: 3, kind: input, shape index: {}]   ;;  %s28651_s4 = inlined_call_operand.hbm [shape: bf16[4,128,128], index: 4, kind: input, shape index: {}]   ;;  %s28652_s5 = inlined_call_operand.hbm [shape: bf16[128,128], index: 5, kind: input, shape index: {}]   ;;  %s28653_s6 = inlined_call_operand.vmem [shape: f32[1,128], index: 6, kind: input, shape index: {}]   ;;  %s28654_s7 = inlined_call_operand.hbm [shape: f32[1,128], index: 7, kind: input, shape index: {}]   ;;  %s28655_s8 = inlined_call_operand.hbm [shape: f32[1,128], index: 8, kind: input, shape index: {}]   ;;  %s28656_s9 = inlined_call_operand.hbm [shape: f32[1,128], index: 9, kind: input, shape index: {}]   ;;  %s28657_s10 = inlined_call_operand.hbm [shape: f32[1,128], index: 10, kind: input, shape index: {}]   ;;  %s28658_s11 = inlined_call_operand.vmem [shape: bf16[248,347], index: 11, kind: input, shape index: {}]   ;;  %s28659_s12 = inlined_call_operand.vmem [shape: bf16[104,194], index: 12, kind: input, shape index: {}]   ;;  %s28660_s13 = inlined_call_operand.hbm [shape: bf16[24,82], index: 13, kind: input, shape index: {}]   ;;  %s28661_s14 = inlined_call_operand.hbm [shape: bf16[8,14], index: 14, kind: input, shape index: {}]   ;;  %s28662_s15 = inlined_call_operand.hbm [shape: bf16[4,8,8], index: 15, kind: input, shape index: {}]   ;;  %s28663_s16 = inlined_call_operand.vmem [shape: f32[8,128], index: 16, kind: output, shape index: {}]  }
   0x1   :  { %28788 = sst [smem:[#allocation148_spill]] %s28647_s0 }
   0x2   :  { %21 = vsyncpa [#allocation6], 0 }
   0x3   :  { %22 = vsyncpa [#allocation8], 0 }
   0x4   :  { %23 = vsyncpa [#allocation11], 0 }
   0x5   :  { %24 = vsyncpa [#allocation14], 0 }
   0x6   :  { %25 = vsyncpa [#allocation17], 0 }
   0x7   :  { %26 = vsyncpa [#allocation20], 0  ;;  %s23282_s21 = smov [#allocation7]   ;;  %s23283_s23 = smov [#allocation10]  }
   0x8   :  { %s50_s22 = sshll.u32 %s23282_s21, 4  ;;  %s77_s24 = sshll.u32 %s23283_s23, 4  ;;  %s51_s22 = int_to_ptr.vmem [resolvable:$true] %s50_s22  ;;  %s23383_s24 = int_to_ptr.vmem [resolvable:$true] %s77_s24 }
   0x9   :  { %s23050_s27 = scalar_lea.hbm %s28651_s4, 4096 }
   0xa   :  { %p23051_p0 = scmp.ne.s32.totalorder %s28651_s4, %s23050_s27  ;;  %p23054_p1 = scmp.lt.u32.totalorder %s23050_s27, %s28651_s4 }
   0xc   :  { %p23056_p2 = pnand %p23054_p1, %p23051_p0 }
   0xe   :  { %23059 = shalt.err (!%p23056_p2)
}
   0xf   :  { %s23060_s17 = scalar_lea.vmem %s51_s22, 4096  ;;  %p23065_p4 = scmp.lt.s32.totalorder %s51_s22, %s51_s22 }
  0x10   :  { %p23061_p3 = scmp.ne.s32.totalorder %s51_s22, %s23060_s17  ;;  %p23066_p5 = scmp.lt.s32.totalorder %s23060_s17, %s23060_s17 }
  0x12   :  { %p23067_p6 = por %p23066_p5, %p23065_p4 }
  0x14   :  { %p23068_p7 = pnand %p23067_p6, %p23061_p3 }
  0x16   :  { %23071 = shalt.err (!%p23068_p7)
}
  0x17   :  { %s23284_s18 = smov 64   ;;  %s23285_s19 = smov 4  }
  0x18   :  { %56 = dma.hbm_to_vmem [thread:$0]  %s28651_s4, 4096, %s51_s22, [#allocation8], %s23284_s18, %s23284_s18, %s23285_s19  }
  0x19   :  { %s23072_s26 = scalar_lea.hbm %s28654_s7, 16 }
  0x1a   :  { %p23073_p8 = scmp.ne.s32.totalorder %s28654_s7, %s23072_s26  ;;  %p23076_p9 = scmp.lt.u32.totalorder %s23072_s26, %s28654_s7 }
  0x1c   :  { %p23078_p10 = pnand %p23076_p9, %p23073_p8 }
  0x1e   :  { %23081 = shalt.err (!%p23078_p10)
}
  0x1f   :  { %s23082_s0 = scalar_lea.vmem %s23383_s24, 16  ;;  %s23086_s4 = scalar_lea.vmem %s23383_s24, 32 }
  0x20   :  { %p23083_p11 = scmp.ne.s32.totalorder %s23383_s24, %s23082_s0  ;;  %p23087_p12 = scmp.lt.s32.totalorder %s23383_s24, %s23383_s24 }
  0x21   :  { %p23088_p13 = scmp.lt.s32.totalorder %s23086_s4, %s23082_s0 }
  0x23   :  { %p23089_p0 = por %p23088_p13, %p23087_p12 }
  0x25   :  { %p23090_p1 = pnand %p23089_p0, %p23083_p11 }
  0x27   :  { %23093 = shalt.err (!%p23090_p1)
}
  0x28   :  { %80 = dma.hbm_to_vmem [thread:$0]  %s28654_s7, 16, %s23383_s24, [#allocation11]  }
  0x29   :  { %s23286_s20 = smov [#allocation13]   ;;  %s23287_s23 = smov [#allocation16]  }
  0x2a   :  { %s97_s21 = sshll.u32 %s23286_s20, 4  ;;  %s120_s25 = sshll.u32 %s23287_s23, 4  ;;  %s98_s21 = int_to_ptr.vmem [resolvable:$true] %s97_s21  ;;  %s23418_s25 = int_to_ptr.vmem [resolvable:$true] %s120_s25 }
  0x2b   :  { %s23094_s28 = scalar_lea.hbm %s28656_s9, 16 }
  0x2c   :  { %p23095_p2 = scmp.ne.s32.totalorder %s28656_s9, %s23094_s28  ;;  %p23098_p3 = scmp.lt.u32.totalorder %s23094_s28, %s28656_s9 }
  0x2e   :  { %p23100_p4 = pnand %p23098_p3, %p23095_p2 }
  0x30   :  { %23103 = shalt.err (!%p23100_p4)
}
  0x31   :  { %s23104_s7 = scalar_lea.vmem %s98_s21, 16  ;;  %s23108_s24 = scalar_lea.vmem %s98_s21, 32 }
  0x32   :  { %p23105_p5 = scmp.ne.s32.totalorder %s98_s21, %s23104_s7  ;;  %p23109_p6 = scmp.lt.s32.totalorder %s98_s21, %s98_s21 }
  0x33   :  { %p23110_p7 = scmp.lt.s32.totalorder %s23108_s24, %s23104_s7 }
  0x35   :  { %p23111_p8 = por %p23110_p7, %p23109_p6 }
  0x37   :  { %p23112_p9 = pnand %p23111_p8, %p23105_p5 }
  0x39   :  { %23115 = shalt.err (!%p23112_p9)
}
  0x3a   :  { %100 = dma.hbm_to_vmem [thread:$0]  %s28656_s9, 16, %s98_s21, [#allocation14]  }
  0x3b   :  { %s23116_s26 = scalar_lea.hbm %s28660_s13, 192 }
  0x3c   :  { %p23117_p10 = scmp.ne.s32.totalorder %s28660_s13, %s23116_s26  ;;  %p23120_p11 = scmp.lt.u32.totalorder %s23116_s26, %s28660_s13 }
  0x3e   :  { %p23122_p12 = pnand %p23120_p11, %p23117_p10 }
  0x40   :  { %23125 = shalt.err (!%p23122_p12)
}
  0x41   :  { %s23126_s0 = scalar_lea.vmem %s23418_s25, 192  ;;  %p23131_p0 = scmp.lt.s32.totalorder %s23418_s25, %s23418_s25 }
  0x42   :  { %p23127_p13 = scmp.ne.s32.totalorder %s23418_s25, %s23126_s0  ;;  %p23132_p1 = scmp.lt.s32.totalorder %s23126_s0, %s23126_s0 }
  0x44   :  { %p23133_p2 = por %p23132_p1, %p23131_p0 }
  0x46   :  { %p23134_p3 = pnand %p23133_p2, %p23127_p13 }
  0x48   :  { %23137 = shalt.err (!%p23134_p3)
}
  0x49   :  { %126 = dma.hbm_to_vmem [thread:$0]  %s28660_s13, 192, %s23418_s25, [#allocation17], %s23284_s18, %s23284_s18, %s23285_s19  }
  0x4a   :  { %s23288_s4 = smov [#allocation5]   ;;  %s23289_s24 = smov [#allocation9]  }
  0x4b   :  { %s34_s7 = sshll.u32 %s23288_s4, 4  ;;  %s62_s22 = sshll.u32 %s23289_s24, 4  ;;  %s35_s7 = int_to_ptr.vmem [resolvable:$true] %s34_s7  ;;  %s23452_s22 = int_to_ptr.vmem [resolvable:$true] %s62_s22 }
  0x4c   :  { %s23138_s23 = scalar_lea.hbm %s28648_s1, 16384 }
  0x4d   :  { %p23139_p4 = scmp.ne.s32.totalorder %s28648_s1, %s23138_s23  ;;  %p23142_p5 = scmp.lt.u32.totalorder %s23138_s23, %s28648_s1 }
  0x4f   :  { %p23144_p6 = pnand %p23142_p5, %p23139_p4 }
  0x51   :  { %23147 = shalt.err (!%p23144_p6)
}
  0x52   :  { %s23148_s13 = scalar_lea.vmem %s35_s7, 16384  ;;  %p23153_p8 = scmp.lt.s32.totalorder %s35_s7, %s35_s7 }
  0x53   :  { %p23149_p7 = scmp.ne.s32.totalorder %s35_s7, %s23148_s13  ;;  %p23154_p9 = scmp.lt.s32.totalorder %s23148_s13, %s23148_s13 }
  0x55   :  { %p23155_p10 = por %p23154_p9, %p23153_p8 }
  0x57   :  { %p23156_p11 = pnand %p23155_p10, %p23149_p7 }
  0x59   :  { %23159 = shalt.err (!%p23156_p11)
}
  0x5a   :  { %40 = dma.hbm_to_vmem [thread:$0]  %s28648_s1, 16384, %s35_s7, [#allocation6], %s23284_s18, %s23284_s18, %s23285_s19  }
  0x5b   :  { %s23160_s21 = scalar_lea.hbm %s28652_s5, 1024 }
  0x5c   :  { %p23161_p12 = scmp.ne.s32.totalorder %s28652_s5, %s23160_s21  ;;  %p23164_p13 = scmp.lt.u32.totalorder %s23160_s21, %s28652_s5 }
  0x5e   :  { %p23166_p0 = pnand %p23164_p13, %p23161_p12 }
  0x60   :  { %23169 = shalt.err (!%p23166_p0)
}
  0x61   :  { %s23170_s23 = scalar_lea.vmem %s23452_s22, 1024  ;;  %p23175_p2 = scmp.lt.s32.totalorder %s23452_s22, %s23452_s22 }
  0x62   :  { %p23171_p1 = scmp.ne.s32.totalorder %s23452_s22, %s23170_s23  ;;  %p23176_p3 = scmp.lt.s32.totalorder %s23170_s23, %s23170_s23 }
  0x64   :  { %p23177_p4 = por %p23176_p3, %p23175_p2 }
  0x66   :  { %p23178_p5 = pnand %p23177_p4, %p23171_p1 }
  0x68   :  { %23181 = shalt.err (!%p23178_p5)
}
  0x69   :  { %68 = dma.hbm_to_vmem [thread:$0]  %s28652_s5, 1024, %s23452_s22, [#allocation8], %s23284_s18, %s23284_s18, %s23285_s19  }
  0x6a   :  { %s23290_s26 = smov [#allocation12]   ;;  %s23291_s28 = smov [#allocation15]  }
  0x6b   :  { %s87_s27 = sshll.u32 %s23290_s26, 4  ;;  %s107_s29 = sshll.u32 %s23291_s28, 4  ;;  %s88_s27 = int_to_ptr.vmem [resolvable:$true] %s87_s27  ;;  %s108_s29 = int_to_ptr.vmem [resolvable:$true] %s107_s29 }
  0x6c   :  { %s23182_s30 = scalar_lea.hbm %s28655_s8, 16 }
  0x6d   :  { %p23183_p6 = scmp.ne.s32.totalorder %s28655_s8, %s23182_s30  ;;  %p23186_p7 = scmp.lt.u32.totalorder %s23182_s30, %s28655_s8 }
  0x6f   :  { %p23188_p8 = pnand %p23186_p7, %p23183_p6 }
  0x71   :  { %23191 = shalt.err (!%p23188_p8)
}
  0x72   :  { %s23192_s5 = scalar_lea.vmem %s88_s27, 16  ;;  %s23196_s22 = scalar_lea.vmem %s88_s27, 32 }
  0x73   :  { %p23193_p9 = scmp.ne.s32.totalorder %s88_s27, %s23192_s5  ;;  %p23197_p10 = scmp.lt.s32.totalorder %s88_s27, %s88_s27 }
  0x74   :  { %p23198_p11 = scmp.lt.s32.totalorder %s23196_s22, %s23192_s5 }
  0x76   :  { %p23199_p12 = por %p23198_p11, %p23197_p10 }
  0x78   :  { %p23200_p13 = pnand %p23199_p12, %p23193_p9 }
  0x7a   :  { %23203 = shalt.err (!%p23200_p13)
}
  0x7b   :  { %90 = dma.hbm_to_vmem [thread:$0]  %s28655_s8, 16, %s88_s27, [#allocation11]  }
  0x7c   :  { %s23204_s1 = scalar_lea.hbm %s28657_s10, 16 }
  0x7d   :  { %p23205_p0 = scmp.ne.s32.totalorder %s28657_s10, %s23204_s1  ;;  %p23208_p1 = scmp.lt.u32.totalorder %s23204_s1, %s28657_s10 }
  0x7f   :  { %p23210_p2 = pnand %p23208_p1, %p23205_p0 }
  0x81   :  { %23213 = shalt.err (!%p23210_p2)
}
  0x82   :  { %s23214_s25 = scalar_lea.vmem %s108_s29, 16  ;;  %s23218_s30 = scalar_lea.vmem %s108_s29, 32 }
  0x83   :  { %p23215_p3 = scmp.ne.s32.totalorder %s108_s29, %s23214_s25  ;;  %p23219_p4 = scmp.lt.s32.totalorder %s108_s29, %s108_s29 }
  0x84   :  { %p23220_p5 = scmp.lt.s32.totalorder %s23218_s30, %s23214_s25 }
  0x86   :  { %p23221_p6 = por %p23220_p5, %p23219_p4 }
  0x88   :  { %p23222_p7 = pnand %p23221_p6, %p23215_p3 }
  0x8a   :  { %23225 = shalt.err (!%p23222_p7)
}
  0x8b   :  { %110 = dma.hbm_to_vmem [thread:$0]  %s28657_s10, 16, %s108_s29, [#allocation14]  }
  0x8c   :  { %s23292_s0 = smov [#allocation18]   ;;  %s23293_s21 = smov [#allocation19]  }
  0x8d   :  { %s133_s9 = sshll.u32 %s23292_s0, 4  ;;  %s142_s4 = sshll.u32 %s23293_s21, 4  ;;  %s134_s9 = int_to_ptr.vmem [resolvable:$true] %s133_s9  ;;  %s23513_s4 = int_to_ptr.vmem [resolvable:$true] %s142_s4 }
  0x8e   :  { %s23226_s24 = scalar_lea.hbm %s28661_s14, 64 }
  0x8f   :  { %p23227_p8 = scmp.ne.s32.totalorder %s28661_s14, %s23226_s24  ;;  %p23230_p9 = scmp.lt.u32.totalorder %s23226_s24, %s28661_s14 }
  0x91   :  { %p23232_p10 = pnand %p23230_p9, %p23227_p8 }
  0x93   :  { %23235 = shalt.err (!%p23232_p10)
}
  0x94   :  { %s23236_s10 = scalar_lea.vmem %s134_s9, 64  ;;  %p23241_p12 = scmp.lt.s32.totalorder %s134_s9, %s134_s9 }
  0x95   :  { %p23237_p11 = scmp.ne.s32.totalorder %s134_s9, %s23236_s10  ;;  %p23242_p13 = scmp.lt.s32.totalorder %s23236_s10, %s23236_s10 }
  0x97   :  { %p23243_p0 = por %p23242_p13, %p23241_p12 }
  0x99   :  { %p23244_p1 = pnand %p23243_p0, %p23237_p11 }
  0x9b   :  { %23247 = shalt.err (!%p23244_p1)
}
  0x9c   :  { %136 = dma.hbm_to_vmem [thread:$0]  %s28661_s14, 64, %s134_s9, [#allocation17]  }
  0x9d   :  { %s23248_s13 = scalar_lea.hbm %s28662_s15, 256 }
  0x9e   :  { %p23249_p2 = scmp.ne.s32.totalorder %s28662_s15, %s23248_s13  ;;  %p23252_p3 = scmp.lt.u32.totalorder %s23248_s13, %s28662_s15 }
  0xa0   :  { %p23254_p4 = pnand %p23252_p3, %p23249_p2 }
  0xa2   :  { %23257 = shalt.err (!%p23254_p4)
}
  0xa3   :  { %s23258_s0 = scalar_lea.vmem %s23513_s4, 256  ;;  %p23263_p6 = scmp.lt.s32.totalorder %s23513_s4, %s23513_s4 }
  0xa4   :  { %p23259_p5 = scmp.ne.s32.totalorder %s23513_s4, %s23258_s0  ;;  %p23264_p7 = scmp.lt.s32.totalorder %s23258_s0, %s23258_s0 }
  0xa6   :  { %p23265_p8 = por %p23264_p7, %p23263_p6 }
  0xa8   :  { %p23266_p9 = pnand %p23265_p8, %p23259_p5 }
  0xaa   :  { %23269 = shalt.err (!%p23266_p9)
}
  0xab   :  { %148 = dma.hbm_to_vmem [thread:$0]  %s28662_s15, 256, %s23513_s4, [#allocation20], %s23284_s18, %s23284_s18, %s23285_s19  }
  0xac   :  { %23270 = dma.done.wait [#allocation6], 16384  }
  0xad   :  { %23271 = vsyncadd [#allocation6], 4294950912 }
  0xae   :  { %23272 = dma.done.wait [#allocation8], 5120  }
  0xaf   :  { %23273 = vsyncadd [#allocation8], 4294962176 }
  0xb0   :  { %23274 = dma.done.wait [#allocation11], 32  }
  0xb1   :  { %23275 = vsyncadd [#allocation11], 4294967264 }
  0xb2   :  { %23276 = dma.done.wait [#allocation14], 32  }
  0xb3   :  { %23277 = vsyncadd [#allocation14], 4294967264 }
  0xb4   :  { %23278 = dma.done.wait [#allocation17], 256  }
  0xb5   :  { %23279 = vsyncadd [#allocation17], 4294967040 }
  0xb6   :  { %23280 = dma.done.wait [#allocation20], 256  }
  0xb7   :  { %23281 = vsyncadd [#allocation20], 4294967040  ;;  %v22418_v0 = vld [vmem:[#allocation5 + $0x40] sm:$0xff]   ;;  %v22419_v1 = vld [vmem:[#allocation5 + $0x48] sm:$0xff]   ;;  %s28789_s19 = sld [smem:[#allocation148_spill]]  ;;  %vm6561_vm0 = vcmask 744448  }
  0xb8   :  { %17527 = vmatprep.subr.bf16.mxu0 %v22418_v0  ;;  %v22420_v2 = vld [vmem:[#allocation5 + $0x50] sm:$0xff]   ;;  %v22421_v3 = vld [vmem:[#allocation5 + $0x58] sm:$0xff]   ;;  %v22422_v7 = vld [vmem:[#allocation5 + $0x60] sm:$0xff]   ;;  %vm6610_vm1 = vcmask 1044480   ;;  %vm6611_vm2 = vcmask 1045504   ;;  %vm23296_vm3 = vmmov 0  }
  0xb9   :  { %17528 = vmatpush3.bf16.msra.mxu0 %v22418_v0  ;;  %v22423_v8 = vld [vmem:[#allocation5 + $0x68] sm:$0xff]   ;;  %v22424_v9 = vld [vmem:[#allocation5 + $0x70] sm:$0xff]   ;;  %v22425_v10 = vld [vmem:[#allocation5 + $0x78] sm:$0xff]   ;;  %vm13641_vm4 = vcmask 539648   ;;  %vm13663_vm5 = vcmask 1040384   ;;  %vm13809_vm6 = vcmask 670720  }
  0xba   :  { %17529 = vmatprep.subr.bf16.mxu0 %v22419_v1  ;;  %v22426_v15 = vld [vmem:[#allocation5] sm:$0xff]   ;;  %v22427_v18 = vld [vmem:[#allocation5 + $0x8] sm:$0xff]   ;;  %v22428_v23 = vld [vmem:[#allocation5 + $0x10] sm:$0xff]   ;;  %vm14535_vm7 = vcmask 1046528   ;;  %vm14531_vm8 = vcmask 113664   ;;  %vm14586_vm9 = vcmask 1043456  }
  0xbb   :  { %v22429_v26 = vld [vmem:[#allocation5 + $0x18] sm:$0xff]   ;;  %v22430_v31 = vld [vmem:[#allocation5 + $0x20] sm:$0xff]   ;;  %v22431_v33 = vld [vmem:[#allocation5 + $0x28] sm:$0xff]   ;;  %vm14582_vm10 = vcmask 64512  }
  0xbc   :  { %v22432_v39 = vld [vmem:[#allocation5 + $0x30] sm:$0xff]   ;;  %v22433_v42 = vld [vmem:[#allocation5 + $0x38] sm:$0xff]   ;;  %v23613_v47 = vld [vmem:[#allocation5 + $0x80] sm:$0xff]  }
  0xbd   :  { %17530 = vmatpush3.bf16.msra.mxu0 %v22419_v1  ;;  %v262_v4 = vld [vmem:[%s28789_s19 + $0x1] sm:$0xff]  ;;  %v263_v5 = vld [vmem:[%s28789_s19 + $0x9] sm:$0xff]  ;;  %v264_v11 = vld [vmem:[%s28789_s19 + $0x11] sm:$0xff] }
  0xbe   :  { %17531 = vmatprep.subr.bf16.mxu0 %v22420_v2  ;;  %v306_v6 = vpack.c.bf16 %v263_v5, %v262_v4  ;;  %v265_v12 = vld [vmem:[%s28789_s19 + $0x19] sm:$0xff]  ;;  %v266_v13 = vld [vmem:[%s28789_s19 + $0x21] sm:$0xff]  ;;  %v267_v14 = vld [vmem:[%s28789_s19 + $0x29] sm:$0xff] }
  0xbf   :  { %v307_v16 = vpack.c.bf16 %v265_v12, %v264_v11  ;;  %v308_v17 = vpack.c.bf16 %v267_v14, %v266_v13  ;;  %v268_v19 = vld [vmem:[%s28789_s19 + $0x31] sm:$0xff]  ;;  %v269_v20 = vld [vmem:[%s28789_s19 + $0x39] sm:$0xff]  ;;  %v270_v21 = vld [vmem:[%s28789_s19 + $0x41] sm:$0xff] }
  0xc0   :  { %17543 = vmatprep.mubr.bf16.mxu0 %v306_v6  ;;  %v271_v22 = vld [vmem:[%s28789_s19 + $0x49] sm:$0xff]  ;;  %v309_v24 = vpack.c.bf16 %v269_v20, %v268_v19  ;;  %v272_v27 = vld [vmem:[%s28789_s19 + $0x51] sm:$0xff]  ;;  %v273_v28 = vld [vmem:[%s28789_s19 + $0x59] sm:$0xff] }
  0xc1   :  { %17532 = vmatpush3.bf16.msra.mxu0 %v22420_v2  ;;  %v310_v25 = vpack.c.bf16 %v271_v22, %v270_v21  ;;  %v274_v29 = vld [vmem:[%s28789_s19 + $0x61] sm:$0xff]  ;;  %v275_v30 = vld [vmem:[%s28789_s19 + $0x69] sm:$0xff]  ;;  %v311_v32 = vpack.c.bf16 %v273_v28, %v272_v27  ;;  %v276_v35 = vld [vmem:[%s28789_s19 + $0x71] sm:$0xff] }
  0xc2   :  { %17533 = vmatprep.subr.bf16.mxu0 %v22421_v3  ;;  %v312_v34 = vpack.c.bf16 %v275_v30, %v274_v29  ;;  %v277_v36 = vld [vmem:[%s28789_s19 + $0x79] sm:$0xff]  ;;  %v278_v37 = vld [vmem:[%s28789_s19 + $0x81] sm:$0xff]  ;;  %v279_v38 = vld [vmem:[%s28789_s19 + $0x89] sm:$0xff] }
  0xc3   :  { %v313_v40 = vpack.c.bf16 %v277_v36, %v276_v35  ;;  %v314_v41 = vpack.c.bf16 %v279_v38, %v278_v37  ;;  %v280_v43 = vld [vmem:[%s28789_s19 + $0x91] sm:$0xff]  ;;  %v281_v44 = vld [vmem:[%s28789_s19 + $0x99] sm:$0xff]  ;;  %v282_v45 = vld [vmem:[%s28789_s19 + $0xa1] sm:$0xff] }
  0xc4   :  { %v283_v46 = vld [vmem:[%s28789_s19 + $0xa9] sm:$0xff]  ;;  %v315_v48 = vpack.c.bf16 %v281_v44, %v280_v43  ;;  %v284_v50 = vld [vmem:[%s28789_s19 + $0xb1] sm:$0xff]  ;;  %v285_v51 = vld [vmem:[%s28789_s19 + $0xb9] sm:$0xff] }
  0xc5   :  { %17534 = vmatpush3.bf16.msra.mxu0 %v22421_v3  ;;  %v316_v49 = vpack.c.bf16 %v283_v46, %v282_v45  ;;  %v286_v52 = vld [vmem:[%s28789_s19 + $0xc1] sm:$0xff]  ;;  %v287_v53 = vld [vmem:[%s28789_s19 + $0xc9] sm:$0xff]  ;;  %v317_v54 = vpack.c.bf16 %v285_v51, %v284_v50  ;;  %v288_v56 = vld [vmem:[%s28789_s19 + $0xd1] sm:$0xff] }
  0xc6   :  { %17535 = vmatprep.subr.bf16.mxu0 %v22422_v7  ;;  %v318_v55 = vpack.c.bf16 %v287_v53, %v286_v52  ;;  %v289_v57 = vld [vmem:[%s28789_s19 + $0xd9] sm:$0xff]  ;;  %v290_v58 = vld [vmem:[%s28789_s19 + $0xe1] sm:$0xff]  ;;  %v291_v59 = vld [vmem:[%s28789_s19 + $0xe9] sm:$0xff] }
  0xc7   :  { %v319_v60 = vpack.c.bf16 %v289_v57, %v288_v56  ;;  %v320_v61 = vpack.c.bf16 %v291_v59, %v290_v58  ;;  %v292_v62 = vld [vmem:[%s28789_s19 + $0xf1] sm:$0xff]  ;;  %v293_v63 = vld [vmem:[%s28789_s19 + $0xf9] sm:$0xff]  ;;  %v294_v0 = vld [vmem:[%s28789_s19 + $0x101] sm:$0xff] }
  0xc8   :  { %v295_v1 = vld [vmem:[%s28789_s19 + $0x109] sm:$0xff]  ;;  %v321_v2 = vpack.c.bf16 %v293_v63, %v292_v62  ;;  %v296_v4 = vld [vmem:[%s28789_s19 + $0x111] sm:$0xff]  ;;  %v297_v5 = vld [vmem:[%s28789_s19 + $0x119] sm:$0xff] }
  0xc9   :  { %17536 = vmatpush3.bf16.msra.mxu0 %v22422_v7  ;;  %v322_v3 = vpack.c.bf16 %v295_v1, %v294_v0  ;;  %v298_v6 = vld [vmem:[%s28789_s19 + $0x121] sm:$0xff]  ;;  %v299_v7 = vld [vmem:[%s28789_s19 + $0x129] sm:$0xff]  ;;  %v301_v11 = vld [vmem:[%s28789_s19 + $0x139] sm:$0xff] }
  0xca   :  { %17537 = vmatprep.subr.bf16.mxu0 %v22423_v8  ;;  %v302_v12 = vld [vmem:[%s28789_s19 + $0x141] sm:$0xff]  ;;  %v303_v13 = vld [vmem:[%s28789_s19 + $0x149] sm:$0xff]  ;;  %v187_v30 = vld [vmem:[%s28789_s19 + $0x38] sm:$0xff] }
  0xcb   :  { %v181_v19 = vld [vmem:[%s28789_s19 + $0x8] sm:$0xff]  ;;  %v182_v22 = vld [vmem:[%s28789_s19 + $0x10] sm:$0xff]  ;;  %v22435_v27 = vld [vmem:[#allocation5 + $0x88] sm:$0xff]  }
  0xcc   :  { %v186_v29 = vld [vmem:[%s28789_s19 + $0x30] sm:$0xff]  ;;  %v191_v38 = vld [vmem:[%s28789_s19 + $0x58] sm:$0xff]  ;;  %v22439_v43 = vld [vmem:[#allocation5 + $0xa8] sm:$0xff]  }
  0xcd   :  { %17538 = vmatpush3.bf16.msra.mxu0 %v22423_v8  ;;  %v323_v8 = vpack.c.bf16 %v297_v5, %v296_v4  ;;  %v22437_v35 = vld [vmem:[#allocation5 + $0x98] sm:$0xff]   ;;  %v195_v46 = vld [vmem:[%s28789_s19 + $0x78] sm:$0xff]  ;;  %v201_v56 = vld [vmem:[%s28789_s19 + $0xa8] sm:$0xff] }
  0xce   :  { %17539 = vmatprep.subr.bf16.mxu0 %v22424_v9  ;;  %v190_v37 = vld [vmem:[%s28789_s19 + $0x50] sm:$0xff]  ;;  %v23749_v57 = vld [vmem:[#allocation5 + $0xc0] sm:$0xff]   ;;  %v204_v62 = vld [vmem:[%s28789_s19 + $0xc0] sm:$0xff] }
  0xcf   :  { %v194_v45 = vld [vmem:[%s28789_s19 + $0x70] sm:$0xff]  ;;  %v205_v63 = vld [vmem:[%s28789_s19 + $0xc8] sm:$0xff]  ;;  %v208_v4 = vld [vmem:[%s28789_s19 + $0xe0] sm:$0xff] }
  0xd0   :  { %v231_v50 = vpack.c.bf16 %v195_v46, %v194_v45  ;;  %v22441_v52 = vld [vmem:[#allocation5 + $0xb8] sm:$0xff]   ;;  %v236_v1 = vpack.c.bf16 %v205_v63, %v204_v62  ;;  %v209_v5 = vld [vmem:[%s28789_s19 + $0xe8] sm:$0xff] }
  0xd1   :  { %17540 = vmatpush3.bf16.msra.mxu0 %v22424_v9  ;;  %v324_v9 = vpack.c.bf16 %v299_v7, %v298_v6  ;;  %v198_v53 = vld [vmem:[%s28789_s19 + $0x90] sm:$0xff]  ;;  %v238_v7 = vpack.c.bf16 %v209_v5, %v208_v4 }
  0xd2   :  { %17541 = vmatprep.subr.bf16.mxu0 %v22425_v10  ;;  %v22445_v45 = vld [vmem:[#allocation5 + $0xd8] sm:$0xff]  }
  0xd3   :  { %v22449_v62 = vld [vmem:[#allocation5 + $0xf8] sm:$0xff]  }
  0xd4   :  { %v877_v63 = vld [vmem:[%s28789_s19 + $0x92] sm:$0xff] }
  0xd5   :  { %17542 = vmatpush3.bf16.msra.mxu0 %v22425_v10  ;;  %v300_v10 = vld [vmem:[%s28789_s19 + $0x131] sm:$0xff] }
  0xd6   :  { %17587 = vmatprep.subr.bf16.mxu0 %v22426_v15  ;;  %v325_v14 = vpack.c.bf16 %v301_v11, %v300_v10  ;;  %v212_v10 = vld [vmem:[%s28789_s19 + $0x100] sm:$0xff]  ;;  %v213_v11 = vld [vmem:[%s28789_s19 + $0x108] sm:$0xff] }
  0xd8   :  { %17544 = vmatmul.mubr.bf16.vlgmr.msra.gmra.mrb[0].mxu0 %v307_v16  ;;  %v304_v16 = vld [vmem:[%s28789_s19 + $0x151] sm:$0xff] }
  0xd9   :  { %17547 = vmatprep.mubr.bf16.mxu0 %v308_v17  ;;  %17588 = vmatpush3.bf16.msra.mxu0 %v22426_v15  ;;  %v326_v15 = vpack.c.bf16 %v303_v13, %v302_v12  ;;  %v305_v17 = vld [vmem:[%s28789_s19 + $0x159] sm:$0x7]  ;;  %v240_v13 = vpack.c.bf16 %v213_v11, %v212_v10 }
  0xda   :  { %17589 = vmatprep.subr.bf16.mxu0 %v22427_v18  ;;  %v327_v20 = vpack.c.bf16 %v305_v17, %v304_v16  ;;  %v216_v16 = vld [vmem:[%s28789_s19 + $0x120] sm:$0xff]  ;;  %v217_v17 = vld [vmem:[%s28789_s19 + $0x128] sm:$0xff] }
  0xdd   :  { %17590 = vmatpush3.bf16.msra.mxu0 %v22427_v18  ;;  %v180_v18 = vld [vmem:[%s28789_s19] sm:$0xff] }
  0xde   :  { %17591 = vmatprep.subr.bf16.mxu0 %v22428_v23  ;;  %v224_v21 = vpack.c.bf16 %v181_v19, %v180_v18  ;;  %v242_v19 = vpack.c.bf16 %v217_v17, %v216_v16 }
  0xe0   :  { %17548 = vmatmul.mubr.bf16.gmra.mrb[4].mxu0 %v309_v24  ;;  %v184_v24 = vld [vmem:[%s28789_s19 + $0x20] sm:$0xff] }
  0xe1   :  { %17551 = vmatprep.mubr.bf16.mxu0 %v310_v25  ;;  %17592 = vmatpush3.bf16.msra.mxu0 %v22428_v23  ;;  %v183_v23 = vld [vmem:[%s28789_s19 + $0x18] sm:$0xff]  ;;  %v185_v25 = vld [vmem:[%s28789_s19 + $0x28] sm:$0xff] }
  0xe2   :  { %17593 = vmatprep.subr.bf16.mxu0 %v22429_v26  ;;  %v226_v28 = vpack.c.bf16 %v185_v25, %v184_v24 }
  0xe5   :  { %17594 = vmatpush3.bf16.msra.mxu0 %v22429_v26  ;;  %v225_v26 = vpack.c.bf16 %v183_v23, %v182_v22  ;;  %v220_v22 = vld [vmem:[%s28789_s19 + $0x140] sm:$0xff]  ;;  %v221_v23 = vld [vmem:[%s28789_s19 + $0x148] sm:$0xff] }
  0xe6   :  { %17595 = vmatprep.subr.bf16.mxu0 %v22430_v31  ;;  %v244_v25 = vpack.c.bf16 %v221_v23, %v220_v22 }
  0xe8   :  { %17552 = vmatmul.mubr.bf16.gmra.mrb[8].mxu0 %v311_v32  ;;  %v189_v32 = vld [vmem:[%s28789_s19 + $0x48] sm:$0xff] }
  0xe9   :  { %17555 = vmatprep.mubr.bf16.mxu0 %v312_v34  ;;  %17596 = vmatpush3.bf16.msra.mxu0 %v22430_v31  ;;  %v188_v31 = vld [vmem:[%s28789_s19 + $0x40] sm:$0xff]  ;;  %v227_v34 = vpack.c.bf16 %v187_v30, %v186_v29  ;;  %v860_v29 = vld [vmem:[%s28789_s19 + $0xa] sm:$0xff] }
  0xea   :  { %17597 = vmatprep.subr.bf16.mxu0 %v22431_v33  ;;  %v228_v36 = vpack.c.bf16 %v189_v32, %v188_v31  ;;  %v861_v32 = vld [vmem:[%s28789_s19 + $0x12] sm:$0xff] }
  0xed   :  { %17598 = vmatpush3.bf16.msra.mxu0 %v22431_v33  ;;  %v22436_v33 = vld [vmem:[#allocation5 + $0x90] sm:$0xff]  }
  0xee   :  { %17599 = vmatprep.subr.bf16.mxu0 %v22432_v39 }
  0xf0   :  { %17556 = vmatmul.mubr.bf16.gmra.mrb[12].mxu0 %v313_v40  ;;  %v193_v40 = vld [vmem:[%s28789_s19 + $0x68] sm:$0xff] }
  0xf1   :  { %17559 = vmatprep.mubr.bf16.mxu0 %v314_v41  ;;  %17600 = vmatpush3.bf16.msra.mxu0 %v22432_v39  ;;  %v192_v39 = vld [vmem:[%s28789_s19 + $0x60] sm:$0xff]  ;;  %v22438_v41 = vld [vmem:[#allocation5 + $0xa0] sm:$0xff]  }
  0xf2   :  { %17601 = vmatprep.subr.bf16.mxu0 %v22433_v42  ;;  %v230_v44 = vpack.c.bf16 %v193_v40, %v192_v39  ;;  %v865_v39 = vld [vmem:[%s28789_s19 + $0x32] sm:$0xff]  ;;  %v866_v40 = vld [vmem:[%s28789_s19 + $0x3a] sm:$0xff] }
  0xf5   :  { %17602 = vmatpush3.bf16.msra.mxu0 %v22433_v42  ;;  %v229_v42 = vpack.c.bf16 %v191_v38, %v190_v37  ;;  %v22443_v37 = vld [vmem:[#allocation5 + $0xc8] sm:$0xff]  }
  0xf6   :  { %17647 = vmatprep.subr.bf16.mxu0 %v23613_v47 }
  0xf8   :  { %17560 = vmatmul.mubr.bf16.gmra.mrb[16].mxu0 %v315_v48  ;;  %v197_v48 = vld [vmem:[%s28789_s19 + $0x88] sm:$0xff] }
  0xf9   :  { %17563 = vmatprep.mubr.bf16.mxu0 %v316_v49  ;;  %v22440_v49 = vld [vmem:[#allocation5 + $0xb0] sm:$0xff]  }
 0x100   :  { %17564 = vmatmul.mubr.bf16.gmra.mrb[20].mxu0 %v317_v54  ;;  %v199_v54 = vld [vmem:[%s28789_s19 + $0x98] sm:$0xff] }
 0x101   :  { %17567 = vmatprep.mubr.bf16.mxu0 %v318_v55  ;;  %v200_v55 = vld [vmem:[%s28789_s19 + $0xa0] sm:$0xff]  ;;  %v233_v58 = vpack.c.bf16 %v199_v54, %v198_v53 }
 0x102   :  { %v234_v59 = vpack.c.bf16 %v201_v56, %v200_v55  ;;  %v22447_v53 = vld [vmem:[#allocation5 + $0xe8] sm:$0xff]   ;;  %v873_v55 = vld [vmem:[%s28789_s19 + $0x72] sm:$0xff] }
 0x103   :  { %v874_v56 = vld [vmem:[%s28789_s19 + $0x7a] sm:$0xff] }
 0x108   :  { %17568 = vmatmul.mubr.bf16.gmra.mrb[24].mxu0 %v319_v60  ;;  %v202_v60 = vld [vmem:[%s28789_s19 + $0xb0] sm:$0xff] }
 0x109   :  { %17571 = vmatprep.mubr.bf16.mxu0 %v320_v61  ;;  %v203_v61 = vld [vmem:[%s28789_s19 + $0xb8] sm:$0xff] }
 0x10a   :  { %v235_v0 = vpack.c.bf16 %v203_v61, %v202_v60  ;;  %v910_v60 = vpack.c.bf16 %v874_v56, %v873_v55  ;;  %v22453_v55 = vld [vmem:[#allocation5 + $0x118] sm:$0xff]  }
 0x110   :  { %17572 = vmatmul.mubr.bf16.gmra.mrb[28].mxu0 %v321_v2  ;;  %v206_v2 = vld [vmem:[%s28789_s19 + $0xd0] sm:$0xff] }
 0x111   :  { %17575 = vmatprep.mubr.bf16.mxu0 %v322_v3  ;;  %v207_v3 = vld [vmem:[%s28789_s19 + $0xd8] sm:$0xff] }
 0x112   :  { %v237_v6 = vpack.c.bf16 %v207_v3, %v206_v2  ;;  %v880_v2 = vld [vmem:[%s28789_s19 + $0xaa] sm:$0xff]  ;;  %v23885_v3 = vld [vmem:[#allocation5 + $0x100] sm:$0xff]  }
 0x118   :  { %17576 = vmatmul.mubr.bf16.gmra.mrb[32].mxu0 %v323_v8  ;;  %v210_v8 = vld [vmem:[%s28789_s19 + $0xf0] sm:$0xff] }
 0x119   :  { %17579 = vmatprep.mubr.bf16.mxu0 %v324_v9  ;;  %v211_v9 = vld [vmem:[%s28789_s19 + $0xf8] sm:$0xff] }
 0x11a   :  { %v239_v12 = vpack.c.bf16 %v211_v9, %v210_v8  ;;  %v883_v8 = vld [vmem:[%s28789_s19 + $0xc2] sm:$0xff]  ;;  %v884_v9 = vld [vmem:[%s28789_s19 + $0xca] sm:$0xff] }
 0x11b   :  { %v915_v11 = vpack.c.bf16 %v884_v9, %v883_v8  ;;  %v22457_v8 = vld [vmem:[#allocation5 + $0x138] sm:$0xff]  }
 0x11c   :  { %v1261_v9 = vld [vmem:[%s28789_s19 + $0x93] sm:$0xff] }
 0x120   :  { %17580 = vmatmul.mubr.bf16.gmra.mrb[36].mxu0 %v325_v14  ;;  %v214_v14 = vld [vmem:[%s28789_s19 + $0x110] sm:$0xff] }
 0x121   :  { %17583 = vmatprep.mubr.bf16.mxu0 %v326_v15  ;;  %v215_v15 = vld [vmem:[%s28789_s19 + $0x118] sm:$0xff] }
 0x122   :  { %v241_v18 = vpack.c.bf16 %v215_v15, %v214_v14  ;;  %v887_v14 = vld [vmem:[%s28789_s19 + $0xe2] sm:$0xff]  ;;  %v888_v15 = vld [vmem:[%s28789_s19 + $0xea] sm:$0xff] }
 0x123   :  { %v917_v17 = vpack.c.bf16 %v888_v15, %v887_v14 }
 0x128   :  { %17584 = vmatmul.mubr.bf16.gmra.mrb[40].mxu0 %v327_v20  ;;  %v218_v20 = vld [vmem:[%s28789_s19 + $0x130] sm:$0xff] }
 0x129   :  { %17603 = vmatprep.mubr.bf16.mxu0 %v224_v21  ;;  %v219_v21 = vld [vmem:[%s28789_s19 + $0x138] sm:$0xff] }
 0x12a   :  { %v243_v24 = vpack.c.bf16 %v219_v21, %v218_v20  ;;  %v891_v20 = vld [vmem:[%s28789_s19 + $0x102] sm:$0xff]  ;;  %v892_v21 = vld [vmem:[%s28789_s19 + $0x10a] sm:$0xff] }
 0x12b   :  { %v919_v23 = vpack.c.bf16 %v892_v21, %v891_v20 }
 0x130   :  { %17604 = vmatmul.mubr.bf16.vlgmr.msra.gmra.mrb[0].mxu0 %v225_v26  ;;  %v222_v26 = vld [vmem:[%s28789_s19 + $0x150] sm:$0xff] }
 0x131   :  { %17607 = vmatprep.mubr.bf16.mxu0 %v226_v28  ;;  %17648 = vmatpush3.bf16.msra.mxu0 %v23613_v47  ;;  %v196_v47 = vld [vmem:[%s28789_s19 + $0x80] sm:$0xff] }
 0x132   :  { %17649 = vmatprep.subr.bf16.mxu0 %v22435_v27  ;;  %v232_v51 = vpack.c.bf16 %v197_v48, %v196_v47  ;;  %v859_v28 = vld [vmem:[%s28789_s19 + $0x2] sm:$0xff]  ;;  %v869_v47 = vld [vmem:[%s28789_s19 + $0x52] sm:$0xff]  ;;  %v870_v48 = vld [vmem:[%s28789_s19 + $0x5a] sm:$0xff] }
 0x133   :  { %v903_v31 = vpack.c.bf16 %v860_v29, %v859_v28 }
 0x135   :  { %17650 = vmatpush3.bf16.msra.mxu0 %v22435_v27  ;;  %v223_v27 = vld [vmem:[%s28789_s19 + $0x158] sm:$0x7] }
 0x136   :  { %17651 = vmatprep.subr.bf16.mxu0 %v22436_v33  ;;  %v245_v30 = vpack.c.bf16 %v223_v27, %v222_v26  ;;  %v895_v26 = vld [vmem:[%s28789_s19 + $0x122] sm:$0xff]  ;;  %v896_v27 = vld [vmem:[%s28789_s19 + $0x12a] sm:$0xff] }
 0x137   :  { %v921_v29 = vpack.c.bf16 %v896_v27, %v895_v26 }
 0x138   :  { %17608 = vmatmul.mubr.bf16.gmra.mrb[4].mxu0 %v227_v34  ;;  %v863_v34 = vld [vmem:[%s28789_s19 + $0x22] sm:$0xff] }
 0x139   :  { %17611 = vmatprep.mubr.bf16.mxu0 %v228_v36  ;;  %17652 = vmatpush3.bf16.msra.mxu0 %v22436_v33  ;;  %v862_v33 = vld [vmem:[%s28789_s19 + $0x1a] sm:$0xff] }
 0x13a   :  { %17653 = vmatprep.subr.bf16.mxu0 %v22437_v35  ;;  %v904_v36 = vpack.c.bf16 %v862_v33, %v861_v32  ;;  %v899_v32 = vld [vmem:[%s28789_s19 + $0x142] sm:$0xff]  ;;  %v900_v33 = vld [vmem:[%s28789_s19 + $0x14a] sm:$0xff] }
 0x13d   :  { %17654 = vmatpush3.bf16.msra.mxu0 %v22437_v35  ;;  %v864_v35 = vld [vmem:[%s28789_s19 + $0x2a] sm:$0xff] }
 0x13e   :  { %17655 = vmatprep.subr.bf16.mxu0 %v22438_v41  ;;  %v905_v38 = vpack.c.bf16 %v864_v35, %v863_v34  ;;  %v923_v35 = vpack.c.bf16 %v900_v33, %v899_v32 }
 0x140   :  { %17612 = vmatmul.mubr.bf16.gmra.mrb[8].mxu0 %v229_v42  ;;  %v868_v42 = vld [vmem:[%s28789_s19 + $0x4a] sm:$0xff] }
 0x141   :  { %17615 = vmatprep.mubr.bf16.mxu0 %v230_v44  ;;  %17656 = vmatpush3.bf16.msra.mxu0 %v22438_v41  ;;  %v867_v41 = vld [vmem:[%s28789_s19 + $0x42] sm:$0xff]  ;;  %v906_v44 = vpack.c.bf16 %v866_v40, %v865_v39  ;;  %v1244_v39 = vld [vmem:[%s28789_s19 + $0xb] sm:$0xff] }
 0x142   :  { %17657 = vmatprep.subr.bf16.mxu0 %v22439_v43  ;;  %v907_v46 = vpack.c.bf16 %v868_v42, %v867_v41  ;;  %v1245_v42 = vld [vmem:[%s28789_s19 + $0x13] sm:$0xff] }
 0x145   :  { %17658 = vmatpush3.bf16.msra.mxu0 %v22439_v43  ;;  %v22444_v43 = vld [vmem:[#allocation5 + $0xd0] sm:$0xff]  }
 0x146   :  { %17659 = vmatprep.subr.bf16.mxu0 %v22440_v49 }
 0x148   :  { %17616 = vmatmul.mubr.bf16.gmra.mrb[12].mxu0 %v231_v50  ;;  %v872_v50 = vld [vmem:[%s28789_s19 + $0x6a] sm:$0xff] }
 0x149   :  { %17619 = vmatprep.mubr.bf16.mxu0 %v232_v51  ;;  %17660 = vmatpush3.bf16.msra.mxu0 %v22440_v49  ;;  %v871_v49 = vld [vmem:[%s28789_s19 + $0x62] sm:$0xff]  ;;  %v22446_v51 = vld [vmem:[#allocation5 + $0xe0] sm:$0xff]  }
 0x14a   :  { %17661 = vmatprep.subr.bf16.mxu0 %v22441_v52  ;;  %v909_v54 = vpack.c.bf16 %v872_v50, %v871_v49  ;;  %v1249_v49 = vld [vmem:[%s28789_s19 + $0x33] sm:$0xff]  ;;  %v1250_v50 = vld [vmem:[%s28789_s19 + $0x3b] sm:$0xff] }
 0x14d   :  { %17662 = vmatpush3.bf16.msra.mxu0 %v22441_v52  ;;  %v908_v52 = vpack.c.bf16 %v870_v48, %v869_v47  ;;  %v22451_v47 = vld [vmem:[#allocation5 + $0x108] sm:$0xff]  }
 0x14e   :  { %17707 = vmatprep.subr.bf16.mxu0 %v23749_v57 }
 0x150   :  { %17620 = vmatmul.mubr.bf16.gmra.mrb[16].mxu0 %v233_v58  ;;  %v876_v58 = vld [vmem:[%s28789_s19 + $0x8a] sm:$0xff] }
 0x151   :  { %17623 = vmatprep.mubr.bf16.mxu0 %v234_v59  ;;  %v22448_v59 = vld [vmem:[#allocation5 + $0xf0] sm:$0xff]  }
 0x158   :  { %17624 = vmatmul.mubr.bf16.gmra.mrb[20].mxu0 %v235_v0  ;;  %v878_v0 = vld [vmem:[%s28789_s19 + $0x9a] sm:$0xff] }
 0x159   :  { %17627 = vmatprep.mubr.bf16.mxu0 %v236_v1  ;;  %v879_v1 = vld [vmem:[%s28789_s19 + $0xa2] sm:$0xff]  ;;  %v912_v4 = vpack.c.bf16 %v878_v0, %v877_v63 }
 0x15a   :  { %v913_v5 = vpack.c.bf16 %v880_v2, %v879_v1  ;;  %v22455_v63 = vld [vmem:[#allocation5 + $0x128] sm:$0xff]   ;;  %v1257_v1 = vld [vmem:[%s28789_s19 + $0x73] sm:$0xff] }
 0x15b   :  { %v1258_v2 = vld [vmem:[%s28789_s19 + $0x7b] sm:$0xff] }
 0x160   :  { %17628 = vmatmul.mubr.bf16.gmra.mrb[24].mxu0 %v237_v6  ;;  %v881_v6 = vld [vmem:[%s28789_s19 + $0xb2] sm:$0xff] }
 0x161   :  { %17631 = vmatprep.mubr.bf16.mxu0 %v238_v7  ;;  %v882_v7 = vld [vmem:[%s28789_s19 + $0xba] sm:$0xff] }
 0x162   :  { %v914_v10 = vpack.c.bf16 %v882_v7, %v881_v6  ;;  %v1294_v6 = vpack.c.bf16 %v1258_v2, %v1257_v1  ;;  %v22461_v2 = vld [vmem:[#allocation5 + $0x158] sm:$0xff]  }
 0x168   :  { %17632 = vmatmul.mubr.bf16.gmra.mrb[28].mxu0 %v239_v12  ;;  %v885_v12 = vld [vmem:[%s28789_s19 + $0xd2] sm:$0xff] }
 0x169   :  { %17635 = vmatprep.mubr.bf16.mxu0 %v240_v13  ;;  %v886_v13 = vld [vmem:[%s28789_s19 + $0xda] sm:$0xff] }
 0x16a   :  { %v916_v16 = vpack.c.bf16 %v886_v13, %v885_v12  ;;  %v1264_v12 = vld [vmem:[%s28789_s19 + $0xab] sm:$0xff]  ;;  %v24021_v13 = vld [vmem:[#allocation5 + $0x140] sm:$0xff]  }
 0x170   :  { %17636 = vmatmul.mubr.bf16.gmra.mrb[32].mxu0 %v241_v18  ;;  %v889_v18 = vld [vmem:[%s28789_s19 + $0xf2] sm:$0xff] }
 0x171   :  { %17639 = vmatprep.mubr.bf16.mxu0 %v242_v19  ;;  %v890_v19 = vld [vmem:[%s28789_s19 + $0xfa] sm:$0xff] }
 0x172   :  { %v918_v22 = vpack.c.bf16 %v890_v19, %v889_v18  ;;  %v1267_v18 = vld [vmem:[%s28789_s19 + $0xc3] sm:$0xff]  ;;  %v1268_v19 = vld [vmem:[%s28789_s19 + $0xcb] sm:$0xff] }
 0x173   :  { %v1299_v21 = vpack.c.bf16 %v1268_v19, %v1267_v18  ;;  %v22465_v18 = vld [vmem:[#allocation5 + $0x178] sm:$0xff]   ;;  %v1645_v19 = vld [vmem:[%s28789_s19 + $0x9e] sm:$0xff] }
 0x178   :  { %17640 = vmatmul.mubr.bf16.gmra.mrb[36].mxu0 %v243_v24  ;;  %v893_v24 = vld [vmem:[%s28789_s19 + $0x112] sm:$0xff] }
 0x179   :  { %17643 = vmatprep.mubr.bf16.mxu0 %v244_v25  ;;  %v894_v25 = vld [vmem:[%s28789_s19 + $0x11a] sm:$0xff] }
 0x17a   :  { %v920_v28 = vpack.c.bf16 %v894_v25, %v893_v24  ;;  %v1271_v24 = vld [vmem:[%s28789_s19 + $0xe3] sm:$0xff]  ;;  %v1272_v25 = vld [vmem:[%s28789_s19 + $0xeb] sm:$0xff] }
 0x17b   :  { %v1301_v27 = vpack.c.bf16 %v1272_v25, %v1271_v24 }
 0x180   :  { %17644 = vmatmul.mubr.bf16.gmra.mrb[40].mxu0 %v245_v30  ;;  %v897_v30 = vld [vmem:[%s28789_s19 + $0x132] sm:$0xff] }
 0x181   :  { %17663 = vmatprep.mubr.bf16.mxu0 %v903_v31  ;;  %v898_v31 = vld [vmem:[%s28789_s19 + $0x13a] sm:$0xff] }
 0x182   :  { %v922_v34 = vpack.c.bf16 %v898_v31, %v897_v30  ;;  %v1275_v30 = vld [vmem:[%s28789_s19 + $0x103] sm:$0xff]  ;;  %v1276_v31 = vld [vmem:[%s28789_s19 + $0x10b] sm:$0xff] }
 0x183   :  { %v1303_v33 = vpack.c.bf16 %v1276_v31, %v1275_v30 }
 0x188   :  { %17664 = vmatmul.mubr.bf16.vlgmr.msra.gmra.mrb[0].mxu0 %v904_v36  ;;  %v901_v36 = vld [vmem:[%s28789_s19 + $0x152] sm:$0xff] }
 0x189   :  { %17667 = vmatprep.mubr.bf16.mxu0 %v905_v38  ;;  %17708 = vmatpush3.bf16.msra.mxu0 %v23749_v57  ;;  %v875_v57 = vld [vmem:[%s28789_s19 + $0x82] sm:$0xff] }
 0x18a   :  { %17709 = vmatprep.subr.bf16.mxu0 %v22443_v37  ;;  %v911_v61 = vpack.c.bf16 %v876_v58, %v875_v57  ;;  %v1243_v38 = vld [vmem:[%s28789_s19 + $0x3] sm:$0xff]  ;;  %v1253_v57 = vld [vmem:[%s28789_s19 + $0x53] sm:$0xff]  ;;  %v1254_v58 = vld [vmem:[%s28789_s19 + $0x5b] sm:$0xff] }
 0x18b   :  { %v1287_v41 = vpack.c.bf16 %v1244_v39, %v1243_v38 }
 0x18d   :  { %17710 = vmatpush3.bf16.msra.mxu0 %v22443_v37  ;;  %v902_v37 = vld [vmem:[%s28789_s19 + $0x15a] sm:$0x7] }
 0x18e   :  { %17711 = vmatprep.subr.bf16.mxu0 %v22444_v43  ;;  %v924_v40 = vpack.c.bf16 %v902_v37, %v901_v36  ;;  %v1279_v36 = vld [vmem:[%s28789_s19 + $0x123] sm:$0xff]  ;;  %v1280_v37 = vld [vmem:[%s28789_s19 + $0x12b] sm:$0xff] }
 0x18f   :  { %v1305_v39 = vpack.c.bf16 %v1280_v37, %v1279_v36 }
 0x190   :  { %17668 = vmatmul.mubr.bf16.gmra.mrb[4].mxu0 %v906_v44  ;;  %v1247_v44 = vld [vmem:[%s28789_s19 + $0x23] sm:$0xff] }
 0x191   :  { %17671 = vmatprep.mubr.bf16.mxu0 %v907_v46  ;;  %17712 = vmatpush3.bf16.msra.mxu0 %v22444_v43  ;;  %v1246_v43 = vld [vmem:[%s28789_s19 + $0x1b] sm:$0xff] }
 0x192   :  { %17713 = vmatprep.subr.bf16.mxu0 %v22445_v45  ;;  %v1288_v46 = vpack.c.bf16 %v1246_v43, %v1245_v42  ;;  %v1283_v42 = vld [vmem:[%s28789_s19 + $0x143] sm:$0xff]  ;;  %v1284_v43 = vld [vmem:[%s28789_s19 + $0x14b] sm:$0xff] }
 0x195   :  { %17714 = vmatpush3.bf16.msra.mxu0 %v22445_v45  ;;  %v1248_v45 = vld [vmem:[%s28789_s19 + $0x2b] sm:$0xff] }
 0x196   :  { %17715 = vmatprep.subr.bf16.mxu0 %v22446_v51  ;;  %v1289_v48 = vpack.c.bf16 %v1248_v45, %v1247_v44  ;;  %v1307_v45 = vpack.c.bf16 %v1284_v43, %v1283_v42 }
 0x198   :  { %17672 = vmatmul.mubr.bf16.gmra.mrb[8].mxu0 %v908_v52  ;;  %v1252_v52 = vld [vmem:[%s28789_s19 + $0x4b] sm:$0xff] }
 0x199   :  { %17675 = vmatprep.mubr.bf16.mxu0 %v909_v54  ;;  %17716 = vmatpush3.bf16.msra.mxu0 %v22446_v51  ;;  %v1251_v51 = vld [vmem:[%s28789_s19 + $0x43] sm:$0xff]  ;;  %v1290_v54 = vpack.c.bf16 %v1250_v50, %v1249_v49  ;;  %v1628_v49 = vld [vmem:[%s28789_s19 + $0x16] sm:$0xff] }
 0x19a   :  { %17717 = vmatprep.subr.bf16.mxu0 %v22447_v53  ;;  %v1291_v56 = vpack.c.bf16 %v1252_v52, %v1251_v51  ;;  %v1629_v52 = vld [vmem:[%s28789_s19 + $0x1e] sm:$0xff] }
 0x19d   :  { %17718 = vmatpush3.bf16.msra.mxu0 %v22447_v53  ;;  %v22452_v53 = vld [vmem:[#allocation5 + $0x110] sm:$0xff]  }
 0x19e   :  { %17719 = vmatprep.subr.bf16.mxu0 %v22448_v59 }
 0x1a0   :  { %17676 = vmatmul.mubr.bf16.gmra.mrb[12].mxu0 %v910_v60  ;;  %v1256_v60 = vld [vmem:[%s28789_s19 + $0x6b] sm:$0xff] }
 0x1a1   :  { %17679 = vmatprep.mubr.bf16.mxu0 %v911_v61  ;;  %17720 = vmatpush3.bf16.msra.mxu0 %v22448_v59  ;;  %v1255_v59 = vld [vmem:[%s28789_s19 + $0x63] sm:$0xff]  ;;  %v22454_v61 = vld [vmem:[#allocation5 + $0x120] sm:$0xff]  }
 0x1a2   :  { %17721 = vmatprep.subr.bf16.mxu0 %v22449_v62  ;;  %v1293_v0 = vpack.c.bf16 %v1256_v60, %v1255_v59  ;;  %v1633_v59 = vld [vmem:[%s28789_s19 + $0x3e] sm:$0xff]  ;;  %v1634_v60 = vld [vmem:[%s28789_s19 + $0x46] sm:$0xff] }
 0x1a5   :  { %17722 = vmatpush3.bf16.msra.mxu0 %v22449_v62  ;;  %v1292_v62 = vpack.c.bf16 %v1254_v58, %v1253_v57  ;;  %v22459_v57 = vld [vmem:[#allocation5 + $0x148] sm:$0xff]  }
 0x1a6   :  { %17767 = vmatprep.subr.bf16.mxu0 %v23885_v3 }
 0x1a8   :  { %17680 = vmatmul.mubr.bf16.gmra.mrb[16].mxu0 %v912_v4  ;;  %v1260_v4 = vld [vmem:[%s28789_s19 + $0x8b] sm:$0xff] }
 0x1a9   :  { %17683 = vmatprep.mubr.bf16.mxu0 %v913_v5  ;;  %v22456_v5 = vld [vmem:[#allocation5 + $0x130] sm:$0xff]  }
 0x1b0   :  { %17684 = vmatmul.mubr.bf16.gmra.mrb[20].mxu0 %v914_v10  ;;  %v1262_v10 = vld [vmem:[%s28789_s19 + $0x9b] sm:$0xff] }
 0x1b1   :  { %17687 = vmatprep.mubr.bf16.mxu0 %v915_v11  ;;  %v1263_v11 = vld [vmem:[%s28789_s19 + $0xa3] sm:$0xff]  ;;  %v1296_v14 = vpack.c.bf16 %v1262_v10, %v1261_v9 }
 0x1b2   :  { %v1297_v15 = vpack.c.bf16 %v1264_v12, %v1263_v11  ;;  %v22463_v10 = vld [vmem:[#allocation5 + $0x168] sm:$0xff]  }
 0x1b3   :  { %v1641_v11 = vld [vmem:[%s28789_s19 + $0x7e] sm:$0xff]  ;;  %v1642_v12 = vld [vmem:[%s28789_s19 + $0x86] sm:$0xff] }
 0x1b8   :  { %17688 = vmatmul.mubr.bf16.gmra.mrb[24].mxu0 %v916_v16  ;;  %v1265_v16 = vld [vmem:[%s28789_s19 + $0xb3] sm:$0xff] }
 0x1b9   :  { %17691 = vmatprep.mubr.bf16.mxu0 %v917_v17  ;;  %v1266_v17 = vld [vmem:[%s28789_s19 + $0xbb] sm:$0xff] }
 0x1ba   :  { %v1298_v20 = vpack.c.bf16 %v1266_v17, %v1265_v16  ;;  %v1678_v16 = vpack.c.bf16 %v1642_v12, %v1641_v11  ;;  %v22469_v12 = vld [vmem:[#allocation5 + $0x198] sm:$0xff]  }
 0x1c0   :  { %17692 = vmatmul.mubr.bf16.gmra.mrb[28].mxu0 %v918_v22  ;;  %v1269_v22 = vld [vmem:[%s28789_s19 + $0xd3] sm:$0xff] }
 0x1c1   :  { %17695 = vmatprep.mubr.bf16.mxu0 %v919_v23  ;;  %v1270_v23 = vld [vmem:[%s28789_s19 + $0xdb] sm:$0xff] }
 0x1c2   :  { %v1300_v26 = vpack.c.bf16 %v1270_v23, %v1269_v22  ;;  %v1648_v22 = vld [vmem:[%s28789_s19 + $0xb6] sm:$0xff] }
 0x1c3   :  { %v24157_v23 = vld [vmem:[#allocation5 + $0x180] sm:$0xff]  }
 0x1c8   :  { %17696 = vmatmul.mubr.bf16.gmra.mrb[32].mxu0 %v920_v28  ;;  %v1273_v28 = vld [vmem:[%s28789_s19 + $0xf3] sm:$0xff] }
 0x1c9   :  { %17699 = vmatprep.mubr.bf16.mxu0 %v921_v29  ;;  %v1274_v29 = vld [vmem:[%s28789_s19 + $0xfb] sm:$0xff] }
 0x1ca   :  { %v1302_v32 = vpack.c.bf16 %v1274_v29, %v1273_v28  ;;  %v1651_v28 = vld [vmem:[%s28789_s19 + $0xce] sm:$0xff]  ;;  %v1652_v29 = vld [vmem:[%s28789_s19 + $0xd6] sm:$0xff] }
 0x1cb   :  { %v1683_v31 = vpack.c.bf16 %v1652_v29, %v1651_v28  ;;  %v22473_v28 = vld [vmem:[#allocation5 + $0x1b8] sm:$0xff]   ;;  %v2029_v29 = vld [vmem:[%s28789_s19 + $0x9f] sm:$0xff] }
 0x1d0   :  { %17700 = vmatmul.mubr.bf16.gmra.mrb[36].mxu0 %v922_v34  ;;  %v1277_v34 = vld [vmem:[%s28789_s19 + $0x113] sm:$0xff] }
 0x1d1   :  { %17703 = vmatprep.mubr.bf16.mxu0 %v923_v35  ;;  %v1278_v35 = vld [vmem:[%s28789_s19 + $0x11b] sm:$0xff] }
 0x1d2   :  { %v1304_v38 = vpack.c.bf16 %v1278_v35, %v1277_v34  ;;  %v1655_v34 = vld [vmem:[%s28789_s19 + $0xee] sm:$0xff]  ;;  %v1656_v35 = vld [vmem:[%s28789_s19 + $0xf6] sm:$0xff] }
 0x1d3   :  { %v1685_v37 = vpack.c.bf16 %v1656_v35, %v1655_v34 }
 0x1d8   :  { %17704 = vmatmul.mubr.bf16.gmra.mrb[40].mxu0 %v924_v40  ;;  %v1281_v40 = vld [vmem:[%s28789_s19 + $0x133] sm:$0xff] }
 0x1d9   :  { %17723 = vmatprep.mubr.bf16.mxu0 %v1287_v41  ;;  %v1282_v41 = vld [vmem:[%s28789_s19 + $0x13b] sm:$0xff] }
 0x1da   :  { %v1306_v44 = vpack.c.bf16 %v1282_v41, %v1281_v40  ;;  %v1659_v40 = vld [vmem:[%s28789_s19 + $0x10e] sm:$0xff]  ;;  %v1660_v41 = vld [vmem:[%s28789_s19 + $0x116] sm:$0xff] }
 0x1db   :  { %v1687_v43 = vpack.c.bf16 %v1660_v41, %v1659_v40 }
 0x1e0   :  { %17724 = vmatmul.mubr.bf16.vlgmr.msra.gmra.mrb[0].mxu0 %v1288_v46  ;;  %v1285_v46 = vld [vmem:[%s28789_s19 + $0x153] sm:$0xff] }
 0x1e1   :  { %17727 = vmatprep.mubr.bf16.mxu0 %v1289_v48  ;;  %17768 = vmatpush3.bf16.msra.mxu0 %v23885_v3  ;;  %v1259_v3 = vld [vmem:[%s28789_s19 + $0x83] sm:$0xff]  ;;  %v1627_v48 = vld [vmem:[%s28789_s19 + $0xe] sm:$0xff] }
 0x1e2   :  { %17769 = vmatprep.subr.bf16.mxu0 %v22451_v47  ;;  %v1295_v7 = vpack.c.bf16 %v1260_v4, %v1259_v3  ;;  %v1671_v51 = vpack.c.bf16 %v1628_v49, %v1627_v48  ;;  %v1637_v3 = vld [vmem:[%s28789_s19 + $0x5e] sm:$0xff]  ;;  %v1638_v4 = vld [vmem:[%s28789_s19 + $0x66] sm:$0xff] }
 0x1e5   :  { %17770 = vmatpush3.bf16.msra.mxu0 %v22451_v47  ;;  %v1286_v47 = vld [vmem:[%s28789_s19 + $0x15b] sm:$0x7] }
 0x1e6   :  { %17771 = vmatprep.subr.bf16.mxu0 %v22452_v53  ;;  %v1308_v50 = vpack.c.bf16 %v1286_v47, %v1285_v46  ;;  %v1663_v46 = vld [vmem:[%s28789_s19 + $0x12e] sm:$0xff]  ;;  %v1664_v47 = vld [vmem:[%s28789_s19 + $0x136] sm:$0xff] }
 0x1e7   :  { %v1689_v49 = vpack.c.bf16 %v1664_v47, %v1663_v46 }
 0x1e8   :  { %17728 = vmatmul.mubr.bf16.gmra.mrb[4].mxu0 %v1290_v54  ;;  %v1631_v54 = vld [vmem:[%s28789_s19 + $0x2e] sm:$0xff] }
 0x1e9   :  { %17731 = vmatprep.mubr.bf16.mxu0 %v1291_v56  ;;  %17772 = vmatpush3.bf16.msra.mxu0 %v22452_v53  ;;  %v1630_v53 = vld [vmem:[%s28789_s19 + $0x26] sm:$0xff] }
 0x1ea   :  { %17773 = vmatprep.subr.bf16.mxu0 %v22453_v55  ;;  %v1672_v56 = vpack.c.bf16 %v1630_v53, %v1629_v52  ;;  %v1667_v52 = vld [vmem:[%s28789_s19 + $0x14e] sm:$0xff]  ;;  %v1668_v53 = vld [vmem:[%s28789_s19 + $0x156] sm:$0xff] }
 0x1ed   :  { %17774 = vmatpush3.bf16.msra.mxu0 %v22453_v55  ;;  %v1632_v55 = vld [vmem:[%s28789_s19 + $0x36] sm:$0xff] }
 0x1ee   :  { %17775 = vmatprep.subr.bf16.mxu0 %v22454_v61  ;;  %v1673_v58 = vpack.c.bf16 %v1632_v55, %v1631_v54  ;;  %v1691_v55 = vpack.c.bf16 %v1668_v53, %v1667_v52 }
 0x1f0   :  { %17732 = vmatmul.mubr.bf16.gmra.mrb[8].mxu0 %v1292_v62  ;;  %v1636_v62 = vld [vmem:[%s28789_s19 + $0x56] sm:$0xff] }
 0x1f1   :  { %17735 = vmatprep.mubr.bf16.mxu0 %v1293_v0  ;;  %17776 = vmatpush3.bf16.msra.mxu0 %v22454_v61  ;;  %v1635_v61 = vld [vmem:[%s28789_s19 + $0x4e] sm:$0xff]  ;;  %v1674_v0 = vpack.c.bf16 %v1634_v60, %v1633_v59  ;;  %v2012_v59 = vld [vmem:[%s28789_s19 + $0x17] sm:$0xff] }
 0x1f2   :  { %17777 = vmatprep.subr.bf16.mxu0 %v22455_v63  ;;  %v1675_v1 = vpack.c.bf16 %v1636_v62, %v1635_v61  ;;  %v2013_v62 = vld [vmem:[%s28789_s19 + $0x1f] sm:$0xff] }
 0x1f5   :  { %17778 = vmatpush3.bf16.msra.mxu0 %v22455_v63  ;;  %v22460_v63 = vld [vmem:[#allocation5 + $0x150] sm:$0xff]  }
 0x1f6   :  { %17779 = vmatprep.subr.bf16.mxu0 %v22456_v5 }
 0x1f8   :  { %17736 = vmatmul.mubr.bf16.gmra.mrb[12].mxu0 %v1294_v6  ;;  %v1640_v6 = vld [vmem:[%s28789_s19 + $0x76] sm:$0xff] }
 0x1f9   :  { %17739 = vmatprep.mubr.bf16.mxu0 %v1295_v7  ;;  %17780 = vmatpush3.bf16.msra.mxu0 %v22456_v5  ;;  %v1639_v5 = vld [vmem:[%s28789_s19 + $0x6e] sm:$0xff]  ;;  %v22462_v7 = vld [vmem:[#allocation5 + $0x160] sm:$0xff]  }
 0x1fa   :  { %17781 = vmatprep.subr.bf16.mxu0 %v22457_v8  ;;  %v1677_v9 = vpack.c.bf16 %v1640_v6, %v1639_v5  ;;  %v2017_v5 = vld [vmem:[%s28789_s19 + $0x3f] sm:$0xff]  ;;  %v2018_v6 = vld [vmem:[%s28789_s19 + $0x47] sm:$0xff] }
 0x1fd   :  { %17782 = vmatpush3.bf16.msra.mxu0 %v22457_v8  ;;  %v1676_v8 = vpack.c.bf16 %v1638_v4, %v1637_v3  ;;  %v22467_v4 = vld [vmem:[#allocation5 + $0x188] sm:$0xff]  }
 0x1fe   :  { %17827 = vmatprep.subr.bf16.mxu0 %v24021_v13 }
 0x200   :  { %17740 = vmatmul.mubr.bf16.gmra.mrb[16].mxu0 %v1296_v14  ;;  %v1644_v14 = vld [vmem:[%s28789_s19 + $0x96] sm:$0xff] }
 0x201   :  { %17743 = vmatprep.mubr.bf16.mxu0 %v1297_v15  ;;  %v22464_v15 = vld [vmem:[#allocation5 + $0x170] sm:$0xff]  }
 0x208   :  { %17744 = vmatmul.mubr.bf16.gmra.mrb[20].mxu0 %v1298_v20  ;;  %v1646_v20 = vld [vmem:[%s28789_s19 + $0xa6] sm:$0xff] }
 0x209   :  { %17747 = vmatprep.mubr.bf16.mxu0 %v1299_v21  ;;  %v1647_v21 = vld [vmem:[%s28789_s19 + $0xae] sm:$0xff]  ;;  %v1680_v24 = vpack.c.bf16 %v1646_v20, %v1645_v19  ;;  %v22471_v20 = vld [vmem:[#allocation5 + $0x1a8] sm:$0xff]  }
 0x20a   :  { %v1681_v25 = vpack.c.bf16 %v1648_v22, %v1647_v21  ;;  %v2025_v21 = vld [vmem:[%s28789_s19 + $0x7f] sm:$0xff]  ;;  %v2026_v22 = vld [vmem:[%s28789_s19 + $0x87] sm:$0xff] }
 0x210   :  { %17748 = vmatmul.mubr.bf16.gmra.mrb[24].mxu0 %v1300_v26  ;;  %v1649_v26 = vld [vmem:[%s28789_s19 + $0xbe] sm:$0xff] }
 0x211   :  { %17751 = vmatprep.mubr.bf16.mxu0 %v1301_v27  ;;  %v1650_v27 = vld [vmem:[%s28789_s19 + $0xc6] sm:$0xff] }
 0x212   :  { %v1682_v30 = vpack.c.bf16 %v1650_v27, %v1649_v26  ;;  %v2062_v26 = vpack.c.bf16 %v2026_v22, %v2025_v21  ;;  %v22477_v22 = vld [vmem:[#allocation5 + $0x1d8] sm:$0xff]  }
 0x218   :  { %17752 = vmatmul.mubr.bf16.gmra.mrb[28].mxu0 %v1302_v32  ;;  %v1653_v32 = vld [vmem:[%s28789_s19 + $0xde] sm:$0xff] }
 0x219   :  { %17755 = vmatprep.mubr.bf16.mxu0 %v1303_v33  ;;  %v1654_v33 = vld [vmem:[%s28789_s19 + $0xe6] sm:$0xff] }
 0x21a   :  { %v1684_v36 = vpack.c.bf16 %v1654_v33, %v1653_v32  ;;  %v2032_v32 = vld [vmem:[%s28789_s19 + $0xb7] sm:$0xff] }
 0x21b   :  { %v24293_v33 = vld [vmem:[#allocation5 + $0x1c0] sm:$0xff]  }
 0x220   :  { %17756 = vmatmul.mubr.bf16.gmra.mrb[32].mxu0 %v1304_v38  ;;  %v1657_v38 = vld [vmem:[%s28789_s19 + $0xfe] sm:$0xff] }
 0x221   :  { %17759 = vmatprep.mubr.bf16.mxu0 %v1305_v39  ;;  %v1658_v39 = vld [vmem:[%s28789_s19 + $0x106] sm:$0xff] }
 0x222   :  { %v1686_v42 = vpack.c.bf16 %v1658_v39, %v1657_v38  ;;  %v2035_v38 = vld [vmem:[%s28789_s19 + $0xcf] sm:$0xff]  ;;  %v2036_v39 = vld [vmem:[%s28789_s19 + $0xd7] sm:$0xff] }
 0x223   :  { %v2067_v41 = vpack.c.bf16 %v2036_v39, %v2035_v38  ;;  %v22481_v38 = vld [vmem:[#allocation5 + $0x1f8] sm:$0xff]   ;;  %v2413_v39 = vld [vmem:[%s28789_s19 + $0xa0] sm:$0xff] }
 0x228   :  { %17760 = vmatmul.mubr.bf16.gmra.mrb[36].mxu0 %v1306_v44  ;;  %v1661_v44 = vld [vmem:[%s28789_s19 + $0x11e] sm:$0xff] }
 0x229   :  { %17763 = vmatprep.mubr.bf16.mxu0 %v1307_v45  ;;  %v1662_v45 = vld [vmem:[%s28789_s19 + $0x126] sm:$0xff] }
 0x22a   :  { %v1688_v48 = vpack.c.bf16 %v1662_v45, %v1661_v44  ;;  %v2039_v44 = vld [vmem:[%s28789_s19 + $0xef] sm:$0xff]  ;;  %v2040_v45 = vld [vmem:[%s28789_s19 + $0xf7] sm:$0xff] }
 0x22b   :  { %v2069_v47 = vpack.c.bf16 %v2040_v45, %v2039_v44 }
 0x230   :  { %17764 = vmatmul.mubr.bf16.gmra.mrb[40].mxu0 %v1308_v50  ;;  %v1665_v50 = vld [vmem:[%s28789_s19 + $0x13e] sm:$0xff] }
 0x231   :  { %17783 = vmatprep.mubr.bf16.mxu0 %v1671_v51  ;;  %v1666_v51 = vld [vmem:[%s28789_s19 + $0x146] sm:$0xff] }
 0x232   :  { %v1690_v54 = vpack.c.bf16 %v1666_v51, %v1665_v50  ;;  %v2043_v50 = vld [vmem:[%s28789_s19 + $0x10f] sm:$0xff]  ;;  %v2044_v51 = vld [vmem:[%s28789_s19 + $0x117] sm:$0xff] }
 0x233   :  { %v2071_v53 = vpack.c.bf16 %v2044_v51, %v2043_v50 }
 0x238   :  { %17784 = vmatmul.mubr.bf16.vlgmr.msra.gmra.mrb[0].mxu0 %v1672_v56  ;;  %v1669_v56 = vld [vmem:[%s28789_s19 + $0x15e] sm:$0xff] }
 0x239   :  { %17787 = vmatprep.mubr.bf16.mxu0 %v1673_v58  ;;  %17828 = vmatpush3.bf16.msra.mxu0 %v24021_v13  ;;  %v1643_v13 = vld [vmem:[%s28789_s19 + $0x8e] sm:$0xff] }
 0x23a   :  { %17829 = vmatprep.subr.bf16.mxu0 %v22459_v57  ;;  %v1679_v17 = vpack.c.bf16 %v1644_v14, %v1643_v13  ;;  %v2011_v58 = vld [vmem:[%s28789_s19 + $0xf] sm:$0xff]  ;;  %v2021_v13 = vld [vmem:[%s28789_s19 + $0x5f] sm:$0xff]  ;;  %v2022_v14 = vld [vmem:[%s28789_s19 + $0x67] sm:$0xff] }
 0x23b   :  { %v2055_v61 = vpack.c.bf16 %v2012_v59, %v2011_v58 }
 0x23d   :  { %17830 = vmatpush3.bf16.msra.mxu0 %v22459_v57  ;;  %v1670_v57 = vld [vmem:[%s28789_s19 + $0x166] sm:$0x7] }
 0x23e   :  { %17831 = vmatprep.subr.bf16.mxu0 %v22460_v63  ;;  %v1692_v60 = vpack.c.bf16 %v1670_v57, %v1669_v56  ;;  %v2047_v56 = vld [vmem:[%s28789_s19 + $0x12f] sm:$0xff]  ;;  %v2048_v57 = vld [vmem:[%s28789_s19 + $0x137] sm:$0xff] }
 0x23f   :  { %v2073_v59 = vpack.c.bf16 %v2048_v57, %v2047_v56 }
 0x240   :  { %17788 = vmatmul.mubr.bf16.gmra.mrb[4].mxu0 %v1674_v0  ;;  %v2015_v0 = vld [vmem:[%s28789_s19 + $0x2f] sm:$0xff] }
 0x241   :  { %17791 = vmatprep.mubr.bf16.mxu0 %v1675_v1  ;;  %17832 = vmatpush3.bf16.msra.mxu0 %v22460_v63  ;;  %v2014_v63 = vld [vmem:[%s28789_s19 + $0x27] sm:$0xff]  ;;  %v2016_v1 = vld [vmem:[%s28789_s19 + $0x37] sm:$0xff] }
 0x242   :  { %17833 = vmatprep.subr.bf16.mxu0 %v22461_v2  ;;  %v2057_v3 = vpack.c.bf16 %v2016_v1, %v2015_v0 }
 0x245   :  { %17834 = vmatpush3.bf16.msra.mxu0 %v22461_v2  ;;  %v2056_v2 = vpack.c.bf16 %v2014_v63, %v2013_v62  ;;  %v2051_v62 = vld [vmem:[%s28789_s19 + $0x14f] sm:$0xff]  ;;  %v2052_v63 = vld [vmem:[%s28789_s19 + $0x157] sm:$0xff] }
 0x246   :  { %17835 = vmatprep.subr.bf16.mxu0 %v22462_v7  ;;  %v2075_v1 = vpack.c.bf16 %v2052_v63, %v2051_v62 }
 0x248   :  { %17792 = vmatmul.mubr.bf16.gmra.mrb[8].mxu0 %v1676_v8  ;;  %v2020_v8 = vld [vmem:[%s28789_s19 + $0x57] sm:$0xff] }
 0x249   :  { %17795 = vmatprep.mubr.bf16.mxu0 %v1677_v9  ;;  %17836 = vmatpush3.bf16.msra.mxu0 %v22462_v7  ;;  %v2019_v7 = vld [vmem:[%s28789_s19 + $0x4f] sm:$0xff] }
 0x24a   :  { %17837 = vmatprep.subr.bf16.mxu0 %v22463_v10  ;;  %v22468_v9 = vld [vmem:[#allocation5 + $0x190] sm:$0xff]   ;;  %v2059_v11 = vpack.c.bf16 %v2020_v8, %v2019_v7  ;;  %v2397_v8 = vld [vmem:[%s28789_s19 + $0x20] sm:$0xff] }
 0x24d   :  { %17838 = vmatpush3.bf16.msra.mxu0 %v22463_v10  ;;  %v2058_v10 = vpack.c.bf16 %v2018_v6, %v2017_v5  ;;  %v2396_v5 = vld [vmem:[%s28789_s19 + $0x18] sm:$0xff] }
 0x24e   :  { %17839 = vmatprep.subr.bf16.mxu0 %v22464_v15 }
 0x250   :  { %17796 = vmatmul.mubr.bf16.gmra.mrb[12].mxu0 %v1678_v16  ;;  %v2024_v16 = vld [vmem:[%s28789_s19 + $0x77] sm:$0xff] }
 0x251   :  { %17799 = vmatprep.mubr.bf16.mxu0 %v1679_v17  ;;  %17840 = vmatpush3.bf16.msra.mxu0 %v22464_v15  ;;  %v2023_v15 = vld [vmem:[%s28789_s19 + $0x6f] sm:$0xff]  ;;  %v22470_v17 = vld [vmem:[#allocation5 + $0x1a0] sm:$0xff]  }
 0x252   :  { %17841 = vmatprep.subr.bf16.mxu0 %v22465_v18  ;;  %v2061_v19 = vpack.c.bf16 %v2024_v16, %v2023_v15  ;;  %v2401_v15 = vld [vmem:[%s28789_s19 + $0x40] sm:$0xff]  ;;  %v2402_v16 = vld [vmem:[%s28789_s19 + $0x48] sm:$0xff] }
 0x255   :  { %17842 = vmatpush3.bf16.msra.mxu0 %v22465_v18  ;;  %v2060_v18 = vpack.c.bf16 %v2022_v14, %v2021_v13  ;;  %v22475_v14 = vld [vmem:[#allocation5 + $0x1c8] sm:$0xff]  }
 0x256   :  { %17887 = vmatprep.subr.bf16.mxu0 %v24157_v23 }
 0x258   :  { %17800 = vmatmul.mubr.bf16.gmra.mrb[16].mxu0 %v1680_v24  ;;  %v2028_v24 = vld [vmem:[%s28789_s19 + $0x97] sm:$0xff] }
 0x259   :  { %17803 = vmatprep.mubr.bf16.mxu0 %v1681_v25  ;;  %v22472_v25 = vld [vmem:[#allocation5 + $0x1b0] sm:$0xff]  }
 0x260   :  { %17804 = vmatmul.mubr.bf16.gmra.mrb[20].mxu0 %v1682_v30  ;;  %v2030_v30 = vld [vmem:[%s28789_s19 + $0xa7] sm:$0xff] }
 0x261   :  { %17807 = vmatprep.mubr.bf16.mxu0 %v1683_v31  ;;  %v2031_v31 = vld [vmem:[%s28789_s19 + $0xaf] sm:$0xff]  ;;  %v2064_v34 = vpack.c.bf16 %v2030_v30, %v2029_v29  ;;  %v22479_v30 = vld [vmem:[#allocation5 + $0x1e8] sm:$0xff]  }
 0x262   :  { %v2065_v35 = vpack.c.bf16 %v2032_v32, %v2031_v31  ;;  %v2409_v31 = vld [vmem:[%s28789_s19 + $0x80] sm:$0xff]  ;;  %v2410_v32 = vld [vmem:[%s28789_s19 + $0x88] sm:$0xff] }
 0x268   :  { %17808 = vmatmul.mubr.bf16.gmra.mrb[24].mxu0 %v1684_v36  ;;  %v2033_v36 = vld [vmem:[%s28789_s19 + $0xbf] sm:$0xff] }
 0x269   :  { %17811 = vmatprep.mubr.bf16.mxu0 %v1685_v37  ;;  %v2034_v37 = vld [vmem:[%s28789_s19 + $0xc7] sm:$0xff] }
 0x26a   :  { %v2066_v40 = vpack.c.bf16 %v2034_v37, %v2033_v36  ;;  %v2446_v36 = vpack.c.bf16 %v2410_v32, %v2409_v31  ;;  %v22485_v32 = vld [vmem:[#allocation5 + $0x218] sm:$0xff]  }
 0x270   :  { %17812 = vmatmul.mubr.bf16.gmra.mrb[28].mxu0 %v1686_v42  ;;  %v2037_v42 = vld [vmem:[%s28789_s19 + $0xdf] sm:$0xff] }
 0x271   :  { %17815 = vmatprep.mubr.bf16.mxu0 %v1687_v43  ;;  %v2038_v43 = vld [vmem:[%s28789_s19 + $0xe7] sm:$0xff] }
 0x272   :  { %v2068_v46 = vpack.c.bf16 %v2038_v43, %v2037_v42  ;;  %v2416_v42 = vld [vmem:[%s28789_s19 + $0xb8] sm:$0xff] }
 0x273   :  { %v24429_v43 = vld [vmem:[#allocation5 + $0x200] sm:$0xff]  }
 0x278   :  { %17816 = vmatmul.mubr.bf16.gmra.mrb[32].mxu0 %v1688_v48  ;;  %v2041_v48 = vld [vmem:[%s28789_s19 + $0xff] sm:$0xff] }
 0x279   :  { %17819 = vmatprep.mubr.bf16.mxu0 %v1689_v49  ;;  %v2042_v49 = vld [vmem:[%s28789_s19 + $0x107] sm:$0xff] }
 0x27a   :  { %v2070_v52 = vpack.c.bf16 %v2042_v49, %v2041_v48  ;;  %v2419_v48 = vld [vmem:[%s28789_s19 + $0xd0] sm:$0xff]  ;;  %v2420_v49 = vld [vmem:[%s28789_s19 + $0xd8] sm:$0xff] }
 0x27b   :  { %v2451_v51 = vpack.c.bf16 %v2420_v49, %v2419_v48  ;;  %v22489_v48 = vld [vmem:[#allocation5 + $0x238] sm:$0xff]   ;;  %v2797_v49 = vld [vmem:[%s28789_s19 + $0xa1] sm:$0xff] }
 0x280   :  { %17820 = vmatmul.mubr.bf16.gmra.mrb[36].mxu0 %v1690_v54  ;;  %v2045_v54 = vld [vmem:[%s28789_s19 + $0x11f] sm:$0xff] }
 0x281   :  { %17823 = vmatprep.mubr.bf16.mxu0 %v1691_v55  ;;  %v2046_v55 = vld [vmem:[%s28789_s19 + $0x127] sm:$0xff] }
 0x282   :  { %v2072_v58 = vpack.c.bf16 %v2046_v55, %v2045_v54  ;;  %v2423_v54 = vld [vmem:[%s28789_s19 + $0xf0] sm:$0xff]  ;;  %v2424_v55 = vld [vmem:[%s28789_s19 + $0xf8] sm:$0xff] }
 0x283   :  { %v2453_v57 = vpack.c.bf16 %v2424_v55, %v2423_v54 }
 0x288   :  { %17824 = vmatmul.mubr.bf16.gmra.mrb[40].mxu0 %v1692_v60  ;;  %v2049_v60 = vld [vmem:[%s28789_s19 + $0x13f] sm:$0xff] }
 0x289   :  { %17843 = vmatprep.mubr.bf16.mxu0 %v2055_v61  ;;  %v2050_v61 = vld [vmem:[%s28789_s19 + $0x147] sm:$0xff] }
 0x28a   :  { %v2074_v0 = vpack.c.bf16 %v2050_v61, %v2049_v60  ;;  %v2427_v60 = vld [vmem:[%s28789_s19 + $0x110] sm:$0xff]  ;;  %v2428_v61 = vld [vmem:[%s28789_s19 + $0x118] sm:$0xff] }
 0x28b   :  { %v2455_v63 = vpack.c.bf16 %v2428_v61, %v2427_v60 }
 0x290   :  { %17844 = vmatmul.mubr.bf16.vlgmr.msra.gmra.mrb[0].mxu0 %v2056_v2  ;;  %v2053_v2 = vld [vmem:[%s28789_s19 + $0x15f] sm:$0xff] }
 0x291   :  { %17847 = vmatprep.mubr.bf16.mxu0 %v2057_v3  ;;  %17888 = vmatpush3.bf16.msra.mxu0 %v24157_v23  ;;  %v2027_v23 = vld [vmem:[%s28789_s19 + $0x8f] sm:$0xff]  ;;  %v2054_v3 = vld [vmem:[%s28789_s19 + $0x167] sm:$0x7] }
 0x292   :  { %17889 = vmatprep.subr.bf16.mxu0 %v22467_v4  ;;  %v2063_v27 = vpack.c.bf16 %v2028_v24, %v2027_v23  ;;  %v2076_v6 = vpack.c.bf16 %v2054_v3, %v2053_v2  ;;  %v2405_v23 = vld [vmem:[%s28789_s19 + $0x60] sm:$0xff]  ;;  %v2406_v24 = vld [vmem:[%s28789_s19 + $0x68] sm:$0xff]  ;;  %v2431_v2 = vld [vmem:[%s28789_s19 + $0x130] sm:$0xff] }
 0x293   :  { %v2432_v3 = vld [vmem:[%s28789_s19 + $0x138] sm:$0xff] }
 0x295   :  { %17890 = vmatpush3.bf16.msra.mxu0 %v22467_v4  ;;  %v2395_v4 = vld [vmem:[%s28789_s19 + $0x10] sm:$0xff] }
 0x296   :  { %17891 = vmatprep.subr.bf16.mxu0 %v22468_v9  ;;  %v2439_v7 = vpack.c.bf16 %v2396_v5, %v2395_v4  ;;  %v2457_v5 = vpack.c.bf16 %v2432_v3, %v2431_v2 }
 0x298   :  { %17848 = vmatmul.mubr.bf16.gmra.mrb[4].mxu0 %v2058_v10  ;;  %v2399_v10 = vld [vmem:[%s28789_s19 + $0x30] sm:$0xff] }
 0x299   :  { %17851 = vmatprep.mubr.bf16.mxu0 %v2059_v11  ;;  %17892 = vmatpush3.bf16.msra.mxu0 %v22468_v9  ;;  %v2398_v9 = vld [vmem:[%s28789_s19 + $0x28] sm:$0xff]  ;;  %v2400_v11 = vld [vmem:[%s28789_s19 + $0x38] sm:$0xff] }
 0x29a   :  { %17893 = vmatprep.subr.bf16.mxu0 %v22469_v12  ;;  %v2441_v13 = vpack.c.bf16 %v2400_v11, %v2399_v10 }
 0x29d   :  { %17894 = vmatpush3.bf16.msra.mxu0 %v22469_v12  ;;  %v2440_v12 = vpack.c.bf16 %v2398_v9, %v2397_v8  ;;  %v2435_v8 = vld [vmem:[%s28789_s19 + $0x150] sm:$0xff]  ;;  %v2436_v9 = vld [vmem:[%s28789_s19 + $0x158] sm:$0xff] }
 0x29e   :  { %17895 = vmatprep.subr.bf16.mxu0 %v22470_v17  ;;  %v2459_v11 = vpack.c.bf16 %v2436_v9, %v2435_v8 }
 0x2a0   :  { %17852 = vmatmul.mubr.bf16.gmra.mrb[8].mxu0 %v2060_v18  ;;  %v2404_v18 = vld [vmem:[%s28789_s19 + $0x58] sm:$0xff] }
 0x2a1   :  { %17855 = vmatprep.mubr.bf16.mxu0 %v2061_v19  ;;  %17896 = vmatpush3.bf16.msra.mxu0 %v22470_v17  ;;  %v2403_v17 = vld [vmem:[%s28789_s19 + $0x50] sm:$0xff]  ;;  %v22476_v19 = vld [vmem:[#allocation5 + $0x1d0] sm:$0xff]  }
 0x2a2   :  { %17897 = vmatprep.subr.bf16.mxu0 %v22471_v20  ;;  %v2443_v21 = vpack.c.bf16 %v2404_v18, %v2403_v17  ;;  %v2781_v18 = vld [vmem:[%s28789_s19 + $0x21] sm:$0xff] }
 0x2a5   :  { %17898 = vmatpush3.bf16.msra.mxu0 %v22471_v20  ;;  %v2442_v20 = vpack.c.bf16 %v2402_v16, %v2401_v15  ;;  %v2780_v15 = vld [vmem:[%s28789_s19 + $0x19] sm:$0xff] }
 0x2a6   :  { %17899 = vmatprep.subr.bf16.mxu0 %v22472_v25 }
 0x2a8   :  { %17856 = vmatmul.mubr.bf16.gmra.mrb[12].mxu0 %v2062_v26  ;;  %v2408_v26 = vld [vmem:[%s28789_s19 + $0x78] sm:$0xff] }
 0x2a9   :  { %17859 = vmatprep.mubr.bf16.mxu0 %v2063_v27  ;;  %17900 = vmatpush3.bf16.msra.mxu0 %v22472_v25  ;;  %v2407_v25 = vld [vmem:[%s28789_s19 + $0x70] sm:$0xff]  ;;  %v22478_v27 = vld [vmem:[#allocation5 + $0x1e0] sm:$0xff]  }
 0x2aa   :  { %17901 = vmatprep.subr.bf16.mxu0 %v22473_v28  ;;  %v2445_v29 = vpack.c.bf16 %v2408_v26, %v2407_v25  ;;  %v2785_v25 = vld [vmem:[%s28789_s19 + $0x41] sm:$0xff]  ;;  %v2786_v26 = vld [vmem:[%s28789_s19 + $0x49] sm:$0xff] }
 0x2ad   :  { %17902 = vmatpush3.bf16.msra.mxu0 %v22473_v28  ;;  %v2444_v28 = vpack.c.bf16 %v2406_v24, %v2405_v23  ;;  %v22483_v24 = vld [vmem:[#allocation5 + $0x208] sm:$0xff]  }
 0x2ae   :  { %17947 = vmatprep.subr.bf16.mxu0 %v24293_v33 }
 0x2b0   :  { %17860 = vmatmul.mubr.bf16.gmra.mrb[16].mxu0 %v2064_v34  ;;  %v2412_v34 = vld [vmem:[%s28789_s19 + $0x98] sm:$0xff] }
 0x2b1   :  { %17863 = vmatprep.mubr.bf16.mxu0 %v2065_v35  ;;  %v22480_v35 = vld [vmem:[#allocation5 + $0x1f0] sm:$0xff]  }
 0x2b8   :  { %17864 = vmatmul.mubr.bf16.gmra.mrb[20].mxu0 %v2066_v40  ;;  %v2414_v40 = vld [vmem:[%s28789_s19 + $0xa8] sm:$0xff] }
 0x2b9   :  { %17867 = vmatprep.mubr.bf16.mxu0 %v2067_v41  ;;  %v2415_v41 = vld [vmem:[%s28789_s19 + $0xb0] sm:$0xff]  ;;  %v2448_v44 = vpack.c.bf16 %v2414_v40, %v2413_v39  ;;  %v22487_v40 = vld [vmem:[#allocation5 + $0x228] sm:$0xff]  }
 0x2ba   :  { %v2449_v45 = vpack.c.bf16 %v2416_v42, %v2415_v41  ;;  %v2793_v41 = vld [vmem:[%s28789_s19 + $0x81] sm:$0xff]  ;;  %v2794_v42 = vld [vmem:[%s28789_s19 + $0x89] sm:$0xff] }
 0x2c0   :  { %17868 = vmatmul.mubr.bf16.gmra.mrb[24].mxu0 %v2068_v46  ;;  %v2417_v46 = vld [vmem:[%s28789_s19 + $0xc0] sm:$0xff] }
 0x2c1   :  { %17871 = vmatprep.mubr.bf16.mxu0 %v2069_v47  ;;  %v2418_v47 = vld [vmem:[%s28789_s19 + $0xc8] sm:$0xff] }
 0x2c2   :  { %v2450_v50 = vpack.c.bf16 %v2418_v47, %v2417_v46  ;;  %v2830_v46 = vpack.c.bf16 %v2794_v42, %v2793_v41  ;;  %v22493_v42 = vld [vmem:[#allocation5 + $0x258] sm:$0xff]  }
 0x2c8   :  { %17872 = vmatmul.mubr.bf16.gmra.mrb[28].mxu0 %v2070_v52  ;;  %v2421_v52 = vld [vmem:[%s28789_s19 + $0xe0] sm:$0xff] }
 0x2c9   :  { %17875 = vmatprep.mubr.bf16.mxu0 %v2071_v53  ;;  %v2422_v53 = vld [vmem:[%s28789_s19 + $0xe8] sm:$0xff] }
 0x2ca   :  { %v2452_v56 = vpack.c.bf16 %v2422_v53, %v2421_v52  ;;  %v2800_v52 = vld [vmem:[%s28789_s19 + $0xb9] sm:$0xff] }
 0x2cb   :  { %v24565_v53 = vld [vmem:[#allocation5 + $0x240] sm:$0xff]  }
 0x2d0   :  { %17876 = vmatmul.mubr.bf16.gmra.mrb[32].mxu0 %v2072_v58  ;;  %v2425_v58 = vld [vmem:[%s28789_s19 + $0x100] sm:$0xff] }
 0x2d1   :  { %17879 = vmatprep.mubr.bf16.mxu0 %v2073_v59  ;;  %v2426_v59 = vld [vmem:[%s28789_s19 + $0x108] sm:$0xff] }
 0x2d2   :  { %v2454_v62 = vpack.c.bf16 %v2426_v59, %v2425_v58  ;;  %v2803_v58 = vld [vmem:[%s28789_s19 + $0xd1] sm:$0xff]  ;;  %v2804_v59 = vld [vmem:[%s28789_s19 + $0xd9] sm:$0xff] }
 0x2d3   :  { %v2835_v61 = vpack.c.bf16 %v2804_v59, %v2803_v58  ;;  %v22497_v58 = vld [vmem:[#allocation5 + $0x278] sm:$0xff]  }
 0x2d4   :  { %v3181_v59 = vld [vmem:[%s28789_s19 + $0xac] sm:$0xff] }
 0x2d8   :  { %17880 = vmatmul.mubr.bf16.gmra.mrb[36].mxu0 %v2074_v0  ;;  %v2429_v0 = vld [vmem:[%s28789_s19 + $0x120] sm:$0xff] }
 0x2d9   :  { %17883 = vmatprep.mubr.bf16.mxu0 %v2075_v1  ;;  %v2430_v1 = vld [vmem:[%s28789_s19 + $0x128] sm:$0xff] }
 0x2da   :  { %v2456_v4 = vpack.c.bf16 %v2430_v1, %v2429_v0  ;;  %v2807_v0 = vld [vmem:[%s28789_s19 + $0xf1] sm:$0xff]  ;;  %v2808_v1 = vld [vmem:[%s28789_s19 + $0xf9] sm:$0xff] }
 0x2db   :  { %v2837_v3 = vpack.c.bf16 %v2808_v1, %v2807_v0 }
 0x2e0   :  { %17884 = vmatmul.mubr.bf16.gmra.mrb[40].mxu0 %v2076_v6  ;;  %v2433_v6 = vld [vmem:[%s28789_s19 + $0x140] sm:$0xff] }
 0x2e1   :  { %17903 = vmatprep.mubr.bf16.mxu0 %v2439_v7  ;;  %v2434_v7 = vld [vmem:[%s28789_s19 + $0x148] sm:$0xff] }
 0x2e2   :  { %v2458_v10 = vpack.c.bf16 %v2434_v7, %v2433_v6  ;;  %v2811_v6 = vld [vmem:[%s28789_s19 + $0x111] sm:$0xff]  ;;  %v2812_v7 = vld [vmem:[%s28789_s19 + $0x119] sm:$0xff] }
 0x2e3   :  { %v2839_v9 = vpack.c.bf16 %v2812_v7, %v2811_v6 }
 0x2e8   :  { %17904 = vmatmul.mubr.bf16.vlgmr.msra.gmra.mrb[0].mxu0 %v2440_v12  ;;  %v2437_v12 = vld [vmem:[%s28789_s19 + $0x160] sm:$0xff] }
 0x2e9   :  { %17907 = vmatprep.mubr.bf16.mxu0 %v2441_v13  ;;  %17948 = vmatpush3.bf16.msra.mxu0 %v24293_v33  ;;  %v2411_v33 = vld [vmem:[%s28789_s19 + $0x90] sm:$0xff]  ;;  %v2438_v13 = vld [vmem:[%s28789_s19 + $0x168] sm:$0x7] }
 0x2ea   :  { %17949 = vmatprep.subr.bf16.mxu0 %v22475_v14  ;;  %v2447_v37 = vpack.c.bf16 %v2412_v34, %v2411_v33  ;;  %v2460_v16 = vpack.c.bf16 %v2438_v13, %v2437_v12  ;;  %v2789_v33 = vld [vmem:[%s28789_s19 + $0x61] sm:$0xff]  ;;  %v2790_v34 = vld [vmem:[%s28789_s19 + $0x69] sm:$0xff]  ;;  %v2815_v12 = vld [vmem:[%s28789_s19 + $0x131] sm:$0xff] }
 0x2eb   :  { %v2816_v13 = vld [vmem:[%s28789_s19 + $0x139] sm:$0xff] }
 0x2ed   :  { %17950 = vmatpush3.bf16.msra.mxu0 %v22475_v14  ;;  %v2779_v14 = vld [vmem:[%s28789_s19 + $0x11] sm:$0xff] }
 0x2ee   :  { %17951 = vmatprep.subr.bf16.mxu0 %v22476_v19  ;;  %v2823_v17 = vpack.c.bf16 %v2780_v15, %v2779_v14  ;;  %v2841_v15 = vpack.c.bf16 %v2816_v13, %v2815_v12 }
 0x2f0   :  { %17908 = vmatmul.mubr.bf16.gmra.mrb[4].mxu0 %v2442_v20  ;;  %v2783_v20 = vld [vmem:[%s28789_s19 + $0x31] sm:$0xff] }
 0x2f1   :  { %17911 = vmatprep.mubr.bf16.mxu0 %v2443_v21  ;;  %17952 = vmatpush3.bf16.msra.mxu0 %v22476_v19  ;;  %v2782_v19 = vld [vmem:[%s28789_s19 + $0x29] sm:$0xff]  ;;  %v2784_v21 = vld [vmem:[%s28789_s19 + $0x39] sm:$0xff] }
 0x2f2   :  { %17953 = vmatprep.subr.bf16.mxu0 %v22477_v22  ;;  %v2825_v23 = vpack.c.bf16 %v2784_v21, %v2783_v20 }
 0x2f5   :  { %17954 = vmatpush3.bf16.msra.mxu0 %v22477_v22  ;;  %v2824_v22 = vpack.c.bf16 %v2782_v19, %v2781_v18  ;;  %v2819_v18 = vld [vmem:[%s28789_s19 + $0x151] sm:$0xff]  ;;  %v2820_v19 = vld [vmem:[%s28789_s19 + $0x159] sm:$0xff] }
 0x2f6   :  { %17955 = vmatprep.subr.bf16.mxu0 %v22478_v27  ;;  %v2843_v21 = vpack.c.bf16 %v2820_v19, %v2819_v18 }
 0x2f8   :  { %17912 = vmatmul.mubr.bf16.gmra.mrb[8].mxu0 %v2444_v28  ;;  %v2788_v28 = vld [vmem:[%s28789_s19 + $0x59] sm:$0xff] }
 0x2f9   :  { %17915 = vmatprep.mubr.bf16.mxu0 %v2445_v29  ;;  %17956 = vmatpush3.bf16.msra.mxu0 %v22478_v27  ;;  %v2787_v27 = vld [vmem:[%s28789_s19 + $0x51] sm:$0xff]  ;;  %v22484_v29 = vld [vmem:[#allocation5 + $0x210] sm:$0xff]  }
 0x2fa   :  { %17957 = vmatprep.subr.bf16.mxu0 %v22479_v30  ;;  %v2827_v31 = vpack.c.bf16 %v2788_v28, %v2787_v27  ;;  %v3165_v28 = vld [vmem:[%s28789_s19 + $0x2c] sm:$0xff] }
 0x2fd   :  { %17958 = vmatpush3.bf16.msra.mxu0 %v22479_v30  ;;  %v2826_v30 = vpack.c.bf16 %v2786_v26, %v2785_v25  ;;  %v3164_v25 = vld [vmem:[%s28789_s19 + $0x24] sm:$0xff] }
 0x2fe   :  { %17959 = vmatprep.subr.bf16.mxu0 %v22480_v35 }
 0x300   :  { %17916 = vmatmul.mubr.bf16.gmra.mrb[12].mxu0 %v2446_v36  ;;  %v2792_v36 = vld [vmem:[%s28789_s19 + $0x79] sm:$0xff] }
 0x301   :  { %17919 = vmatprep.mubr.bf16.mxu0 %v2447_v37  ;;  %17960 = vmatpush3.bf16.msra.mxu0 %v22480_v35  ;;  %v2791_v35 = vld [vmem:[%s28789_s19 + $0x71] sm:$0xff] }
 0x302   :  { %17961 = vmatprep.subr.bf16.mxu0 %v22481_v38  ;;  %v22486_v37 = vld [vmem:[#allocation5 + $0x220] sm:$0xff]   ;;  %v2829_v39 = vpack.c.bf16 %v2792_v36, %v2791_v35  ;;  %v3169_v35 = vld [vmem:[%s28789_s19 + $0x4c] sm:$0xff] }
 0x303   :  { %v3170_v36 = vld [vmem:[%s28789_s19 + $0x54] sm:$0xff] }
 0x305   :  { %17962 = vmatpush3.bf16.msra.mxu0 %v22481_v38  ;;  %v2828_v38 = vpack.c.bf16 %v2790_v34, %v2789_v33  ;;  %v22491_v34 = vld [vmem:[#allocation5 + $0x248] sm:$0xff]  }
 0x306   :  { %18007 = vmatprep.subr.bf16.mxu0 %v24429_v43 }
 0x308   :  { %17920 = vmatmul.mubr.bf16.gmra.mrb[16].mxu0 %v2448_v44  ;;  %v2796_v44 = vld [vmem:[%s28789_s19 + $0x99] sm:$0xff] }
 0x309   :  { %17923 = vmatprep.mubr.bf16.mxu0 %v2449_v45  ;;  %v22488_v45 = vld [vmem:[#allocation5 + $0x230] sm:$0xff]  }
 0x310   :  { %17924 = vmatmul.mubr.bf16.gmra.mrb[20].mxu0 %v2450_v50  ;;  %v2798_v50 = vld [vmem:[%s28789_s19 + $0xa9] sm:$0xff] }
 0x311   :  { %17927 = vmatprep.mubr.bf16.mxu0 %v2451_v51  ;;  %v2799_v51 = vld [vmem:[%s28789_s19 + $0xb1] sm:$0xff]  ;;  %v2832_v54 = vpack.c.bf16 %v2798_v50, %v2797_v49  ;;  %v22495_v50 = vld [vmem:[#allocation5 + $0x268] sm:$0xff]  }
 0x312   :  { %v2833_v55 = vpack.c.bf16 %v2800_v52, %v2799_v51  ;;  %v3177_v51 = vld [vmem:[%s28789_s19 + $0x8c] sm:$0xff]  ;;  %v3178_v52 = vld [vmem:[%s28789_s19 + $0x94] sm:$0xff] }
 0x318   :  { %17928 = vmatmul.mubr.bf16.gmra.mrb[24].mxu0 %v2452_v56  ;;  %v2801_v56 = vld [vmem:[%s28789_s19 + $0xc1] sm:$0xff] }
 0x319   :  { %17931 = vmatprep.mubr.bf16.mxu0 %v2453_v57  ;;  %v2802_v57 = vld [vmem:[%s28789_s19 + $0xc9] sm:$0xff] }
 0x31a   :  { %v2834_v60 = vpack.c.bf16 %v2802_v57, %v2801_v56  ;;  %v3214_v56 = vpack.c.bf16 %v3178_v52, %v3177_v51  ;;  %v22501_v52 = vld [vmem:[#allocation5 + $0x298] sm:$0xff]  }
 0x320   :  { %17932 = vmatmul.mubr.bf16.gmra.mrb[28].mxu0 %v2454_v62  ;;  %v2805_v62 = vld [vmem:[%s28789_s19 + $0xe1] sm:$0xff] }
 0x321   :  { %17935 = vmatprep.mubr.bf16.mxu0 %v2455_v63  ;;  %v2806_v63 = vld [vmem:[%s28789_s19 + $0xe9] sm:$0xff] }
 0x322   :  { %v2836_v2 = vpack.c.bf16 %v2806_v63, %v2805_v62  ;;  %v3184_v62 = vld [vmem:[%s28789_s19 + $0xc4] sm:$0xff]  ;;  %v24701_v63 = vld [vmem:[#allocation5 + $0x280] sm:$0xff]  }
 0x328   :  { %17936 = vmatmul.mubr.bf16.gmra.mrb[32].mxu0 %v2456_v4  ;;  %v2809_v4 = vld [vmem:[%s28789_s19 + $0x101] sm:$0xff] }
 0x329   :  { %17939 = vmatprep.mubr.bf16.mxu0 %v2457_v5  ;;  %v2810_v5 = vld [vmem:[%s28789_s19 + $0x109] sm:$0xff] }
 0x32a   :  { %v2838_v8 = vpack.c.bf16 %v2810_v5, %v2809_v4  ;;  %v3187_v4 = vld [vmem:[%s28789_s19 + $0xdc] sm:$0xff]  ;;  %v3188_v5 = vld [vmem:[%s28789_s19 + $0xe4] sm:$0xff] }
 0x32b   :  { %v3219_v7 = vpack.c.bf16 %v3188_v5, %v3187_v4  ;;  %v22505_v4 = vld [vmem:[#allocation5 + $0x2b8] sm:$0xff]  }
 0x32c   :  { %v3565_v5 = vld [vmem:[%s28789_s19 + $0xad] sm:$0xff] }
 0x330   :  { %17940 = vmatmul.mubr.bf16.gmra.mrb[36].mxu0 %v2458_v10  ;;  %v2813_v10 = vld [vmem:[%s28789_s19 + $0x121] sm:$0xff] }
 0x331   :  { %17943 = vmatprep.mubr.bf16.mxu0 %v2459_v11  ;;  %v2814_v11 = vld [vmem:[%s28789_s19 + $0x129] sm:$0xff] }
 0x332   :  { %v2840_v14 = vpack.c.bf16 %v2814_v11, %v2813_v10  ;;  %v3191_v10 = vld [vmem:[%s28789_s19 + $0xfc] sm:$0xff]  ;;  %v3192_v11 = vld [vmem:[%s28789_s19 + $0x104] sm:$0xff] }
 0x333   :  { %v3221_v13 = vpack.c.bf16 %v3192_v11, %v3191_v10 }
 0x338   :  { %17944 = vmatmul.mubr.bf16.gmra.mrb[40].mxu0 %v2460_v16  ;;  %v2817_v16 = vld [vmem:[%s28789_s19 + $0x141] sm:$0xff] }
 0x339   :  { %17963 = vmatprep.mubr.bf16.mxu0 %v2823_v17  ;;  %v2818_v17 = vld [vmem:[%s28789_s19 + $0x149] sm:$0xff] }
 0x33a   :  { %v2842_v20 = vpack.c.bf16 %v2818_v17, %v2817_v16  ;;  %v3195_v16 = vld [vmem:[%s28789_s19 + $0x11c] sm:$0xff]  ;;  %v3196_v17 = vld [vmem:[%s28789_s19 + $0x124] sm:$0xff] }
 0x33b   :  { %v3223_v19 = vpack.c.bf16 %v3196_v17, %v3195_v16 }
 0x340   :  { %17964 = vmatmul.mubr.bf16.vlgmr.msra.gmra.mrb[0].mxu0 %v2824_v22  ;;  %v2821_v22 = vld [vmem:[%s28789_s19 + $0x161] sm:$0xff] }
 0x341   :  { %17967 = vmatprep.mubr.bf16.mxu0 %v2825_v23  ;;  %18008 = vmatpush3.bf16.msra.mxu0 %v24429_v43  ;;  %v2795_v43 = vld [vmem:[%s28789_s19 + $0x91] sm:$0xff]  ;;  %v2822_v23 = vld [vmem:[%s28789_s19 + $0x169] sm:$0x7] }
 0x342   :  { %18009 = vmatprep.subr.bf16.mxu0 %v22483_v24  ;;  %v2831_v47 = vpack.c.bf16 %v2796_v44, %v2795_v43  ;;  %v2844_v26 = vpack.c.bf16 %v2822_v23, %v2821_v22  ;;  %v3173_v43 = vld [vmem:[%s28789_s19 + $0x6c] sm:$0xff]  ;;  %v3174_v44 = vld [vmem:[%s28789_s19 + $0x74] sm:$0xff]  ;;  %v3199_v22 = vld [vmem:[%s28789_s19 + $0x13c] sm:$0xff] }
 0x343   :  { %v3200_v23 = vld [vmem:[%s28789_s19 + $0x144] sm:$0xff] }
 0x345   :  { %18010 = vmatpush3.bf16.msra.mxu0 %v22483_v24  ;;  %v3163_v24 = vld [vmem:[%s28789_s19 + $0x1c] sm:$0xff] }
 0x346   :  { %18011 = vmatprep.subr.bf16.mxu0 %v22484_v29  ;;  %v3207_v27 = vpack.c.bf16 %v3164_v25, %v3163_v24  ;;  %v3225_v25 = vpack.c.bf16 %v3200_v23, %v3199_v22 }
 0x348   :  { %17968 = vmatmul.mubr.bf16.gmra.mrb[4].mxu0 %v2826_v30  ;;  %v3167_v30 = vld [vmem:[%s28789_s19 + $0x3c] sm:$0xff] }
 0x349   :  { %17971 = vmatprep.mubr.bf16.mxu0 %v2827_v31  ;;  %18012 = vmatpush3.bf16.msra.mxu0 %v22484_v29  ;;  %v3166_v29 = vld [vmem:[%s28789_s19 + $0x34] sm:$0xff]  ;;  %v3168_v31 = vld [vmem:[%s28789_s19 + $0x44] sm:$0xff] }
 0x34a   :  { %18013 = vmatprep.subr.bf16.mxu0 %v22485_v32  ;;  %v3209_v33 = vpack.c.bf16 %v3168_v31, %v3167_v30 }
 0x34d   :  { %18014 = vmatpush3.bf16.msra.mxu0 %v22485_v32  ;;  %v3208_v32 = vpack.c.bf16 %v3166_v29, %v3165_v28  ;;  %v3203_v28 = vld [vmem:[%s28789_s19 + $0x15c] sm:$0xff]  ;;  %v3204_v29 = vld [vmem:[%s28789_s19 + $0x164] sm:$0xff] }
 0x34e   :  { %18015 = vmatprep.subr.bf16.mxu0 %v22486_v37  ;;  %v3227_v31 = vpack.c.bf16 %v3204_v29, %v3203_v28 }
 0x350   :  { %17972 = vmatmul.mubr.bf16.gmra.mrb[8].mxu0 %v2828_v38  ;;  %v3172_v38 = vld [vmem:[%s28789_s19 + $0x64] sm:$0xff] }
 0x351   :  { %17975 = vmatprep.mubr.bf16.mxu0 %v2829_v39  ;;  %18016 = vmatpush3.bf16.msra.mxu0 %v22486_v37  ;;  %v3171_v37 = vld [vmem:[%s28789_s19 + $0x5c] sm:$0xff]  ;;  %v22492_v39 = vld [vmem:[#allocation5 + $0x250] sm:$0xff]  }
 0x352   :  { %18017 = vmatprep.subr.bf16.mxu0 %v22487_v40  ;;  %v3211_v41 = vpack.c.bf16 %v3172_v38, %v3171_v37  ;;  %v3549_v38 = vld [vmem:[%s28789_s19 + $0x2d] sm:$0xff] }
 0x355   :  { %18018 = vmatpush3.bf16.msra.mxu0 %v22487_v40  ;;  %v3210_v40 = vpack.c.bf16 %v3170_v36, %v3169_v35  ;;  %v3548_v35 = vld [vmem:[%s28789_s19 + $0x25] sm:$0xff] }
 0x356   :  { %18019 = vmatprep.subr.bf16.mxu0 %v22488_v45 }
 0x358   :  { %17976 = vmatmul.mubr.bf16.gmra.mrb[12].mxu0 %v2830_v46  ;;  %v3176_v46 = vld [vmem:[%s28789_s19 + $0x84] sm:$0xff] }
 0x359   :  { %17979 = vmatprep.mubr.bf16.mxu0 %v2831_v47  ;;  %18020 = vmatpush3.bf16.msra.mxu0 %v22488_v45  ;;  %v3175_v45 = vld [vmem:[%s28789_s19 + $0x7c] sm:$0xff] }
 0x35a   :  { %18021 = vmatprep.subr.bf16.mxu0 %v22489_v48  ;;  %v22494_v47 = vld [vmem:[#allocation5 + $0x260] sm:$0xff]   ;;  %v3213_v49 = vpack.c.bf16 %v3176_v46, %v3175_v45  ;;  %v3553_v45 = vld [vmem:[%s28789_s19 + $0x4d] sm:$0xff] }
 0x35b   :  { %v3554_v46 = vld [vmem:[%s28789_s19 + $0x55] sm:$0xff] }
 0x35d   :  { %18022 = vmatpush3.bf16.msra.mxu0 %v22489_v48  ;;  %v3212_v48 = vpack.c.bf16 %v3174_v44, %v3173_v43  ;;  %v22499_v44 = vld [vmem:[#allocation5 + $0x288] sm:$0xff]  }
 0x35e   :  { %18067 = vmatprep.subr.bf16.mxu0 %v24565_v53 }
 0x360   :  { %17980 = vmatmul.mubr.bf16.gmra.mrb[16].mxu0 %v2832_v54  ;;  %v3180_v54 = vld [vmem:[%s28789_s19 + $0xa4] sm:$0xff] }
 0x361   :  { %17983 = vmatprep.mubr.bf16.mxu0 %v2833_v55  ;;  %v22496_v55 = vld [vmem:[#allocation5 + $0x270] sm:$0xff]  }
 0x368   :  { %17984 = vmatmul.mubr.bf16.gmra.mrb[20].mxu0 %v2834_v60  ;;  %v3182_v60 = vld [vmem:[%s28789_s19 + $0xb4] sm:$0xff] }
 0x369   :  { %17987 = vmatprep.mubr.bf16.mxu0 %v2835_v61  ;;  %v3183_v61 = vld [vmem:[%s28789_s19 + $0xbc] sm:$0xff]  ;;  %v3216_v0 = vpack.c.bf16 %v3182_v60, %v3181_v59 }
 0x36a   :  { %v3217_v1 = vpack.c.bf16 %v3184_v62, %v3183_v61  ;;  %v22503_v60 = vld [vmem:[#allocation5 + $0x2a8] sm:$0xff]   ;;  %v3561_v61 = vld [vmem:[%s28789_s19 + $0x8d] sm:$0xff]  ;;  %v3562_v62 = vld [vmem:[%s28789_s19 + $0x95] sm:$0xff] }
 0x370   :  { %17988 = vmatmul.mubr.bf16.gmra.mrb[24].mxu0 %v2836_v2  ;;  %v3185_v2 = vld [vmem:[%s28789_s19 + $0xcc] sm:$0xff] }
 0x371   :  { %17991 = vmatprep.mubr.bf16.mxu0 %v2837_v3  ;;  %v3186_v3 = vld [vmem:[%s28789_s19 + $0xd4] sm:$0xff] }
 0x372   :  { %v3218_v6 = vpack.c.bf16 %v3186_v3, %v3185_v2  ;;  %v3598_v2 = vpack.c.bf16 %v3562_v62, %v3561_v61  ;;  %v22509_v62 = vld [vmem:[#allocation5 + $0x2d8] sm:$0xff]  }
 0x378   :  { %17992 = vmatmul.mubr.bf16.gmra.mrb[28].mxu0 %v2838_v8  ;;  %v3189_v8 = vld [vmem:[%s28789_s19 + $0xec] sm:$0xff] }
 0x379   :  { %17995 = vmatprep.mubr.bf16.mxu0 %v2839_v9  ;;  %v3190_v9 = vld [vmem:[%s28789_s19 + $0xf4] sm:$0xff] }
 0x37a   :  { %v3220_v12 = vpack.c.bf16 %v3190_v9, %v3189_v8  ;;  %v3568_v8 = vld [vmem:[%s28789_s19 + $0xc5] sm:$0xff]  ;;  %v24837_v9 = vld [vmem:[#allocation5 + $0x2c0] sm:$0xff]  }
 0x380   :  { %17996 = vmatmul.mubr.bf16.gmra.mrb[32].mxu0 %v2840_v14  ;;  %v3193_v14 = vld [vmem:[%s28789_s19 + $0x10c] sm:$0xff] }
 0x381   :  { %17999 = vmatprep.mubr.bf16.mxu0 %v2841_v15  ;;  %v3194_v15 = vld [vmem:[%s28789_s19 + $0x114] sm:$0xff] }
 0x382   :  { %v3222_v18 = vpack.c.bf16 %v3194_v15, %v3193_v14  ;;  %v3571_v14 = vld [vmem:[%s28789_s19 + $0xdd] sm:$0xff]  ;;  %v3572_v15 = vld [vmem:[%s28789_s19 + $0xe5] sm:$0xff] }
 0x383   :  { %v3603_v17 = vpack.c.bf16 %v3572_v15, %v3571_v14  ;;  %v22513_v14 = vld [vmem:[#allocation5 + $0x2f8] sm:$0xff]  }
 0x384   :  { %v3949_v15 = vld [vmem:[%s28789_s19 + $0xae] sm:$0xff] }
 0x388   :  { %18000 = vmatmul.mubr.bf16.gmra.mrb[36].mxu0 %v2842_v20  ;;  %v3197_v20 = vld [vmem:[%s28789_s19 + $0x12c] sm:$0xff] }
 0x389   :  { %18003 = vmatprep.mubr.bf16.mxu0 %v2843_v21  ;;  %v3198_v21 = vld [vmem:[%s28789_s19 + $0x134] sm:$0xff] }
 0x38a   :  { %v3224_v24 = vpack.c.bf16 %v3198_v21, %v3197_v20  ;;  %v3575_v20 = vld [vmem:[%s28789_s19 + $0xfd] sm:$0xff]  ;;  %v3576_v21 = vld [vmem:[%s28789_s19 + $0x105] sm:$0xff] }
 0x38b   :  { %v3605_v23 = vpack.c.bf16 %v3576_v21, %v3575_v20 }
 0x390   :  { %18004 = vmatmul.mubr.bf16.gmra.mrb[40].mxu0 %v2844_v26  ;;  %v3201_v26 = vld [vmem:[%s28789_s19 + $0x14c] sm:$0xff] }
 0x391   :  { %18023 = vmatprep.mubr.bf16.mxu0 %v3207_v27  ;;  %v3202_v27 = vld [vmem:[%s28789_s19 + $0x154] sm:$0xff] }
 0x392   :  { %v3226_v30 = vpack.c.bf16 %v3202_v27, %v3201_v26  ;;  %v3579_v26 = vld [vmem:[%s28789_s19 + $0x11d] sm:$0xff]  ;;  %v3580_v27 = vld [vmem:[%s28789_s19 + $0x125] sm:$0xff] }
 0x393   :  { %v3607_v29 = vpack.c.bf16 %v3580_v27, %v3579_v26 }
 0x398   :  { %18024 = vmatmul.mubr.bf16.vlgmr.msra.gmra.mrb[0].mxu0 %v3208_v32  ;;  %v3205_v32 = vld [vmem:[%s28789_s19 + $0x16c] sm:$0xff] }
 0x399   :  { %18027 = vmatprep.mubr.bf16.mxu0 %v3209_v33  ;;  %18068 = vmatpush3.bf16.msra.mxu0 %v24565_v53  ;;  %v3179_v53 = vld [vmem:[%s28789_s19 + $0x9c] sm:$0xff]  ;;  %v3206_v33 = vld [vmem:[%s28789_s19 + $0x174] sm:$0x7] }
 0x39a   :  { %18069 = vmatprep.subr.bf16.mxu0 %v22491_v34  ;;  %v3215_v57 = vpack.c.bf16 %v3180_v54, %v3179_v53  ;;  %v3228_v36 = vpack.c.bf16 %v3206_v33, %v3205_v32  ;;  %v3557_v53 = vld [vmem:[%s28789_s19 + $0x6d] sm:$0xff]  ;;  %v3558_v54 = vld [vmem:[%s28789_s19 + $0x75] sm:$0xff]  ;;  %v3583_v32 = vld [vmem:[%s28789_s19 + $0x13d] sm:$0xff] }
 0x39b   :  { %v3584_v33 = vld [vmem:[%s28789_s19 + $0x145] sm:$0xff] }
 0x39d   :  { %18070 = vmatpush3.bf16.msra.mxu0 %v22491_v34  ;;  %v3547_v34 = vld [vmem:[%s28789_s19 + $0x1d] sm:$0xff] }
 0x39e   :  { %18071 = vmatprep.subr.bf16.mxu0 %v22492_v39  ;;  %v3591_v37 = vpack.c.bf16 %v3548_v35, %v3547_v34  ;;  %v3609_v35 = vpack.c.bf16 %v3584_v33, %v3583_v32 }
 0x3a0   :  { %18028 = vmatmul.mubr.bf16.gmra.mrb[4].mxu0 %v3210_v40  ;;  %v3551_v40 = vld [vmem:[%s28789_s19 + $0x3d] sm:$0xff] }
 0x3a1   :  { %18031 = vmatprep.mubr.bf16.mxu0 %v3211_v41  ;;  %18072 = vmatpush3.bf16.msra.mxu0 %v22492_v39  ;;  %v3550_v39 = vld [vmem:[%s28789_s19 + $0x35] sm:$0xff]  ;;  %v3552_v41 = vld [vmem:[%s28789_s19 + $0x45] sm:$0xff] }
 0x3a2   :  { %18073 = vmatprep.subr.bf16.mxu0 %v22493_v42  ;;  %v3593_v43 = vpack.c.bf16 %v3552_v41, %v3551_v40 }
 0x3a5   :  { %18074 = vmatpush3.bf16.msra.mxu0 %v22493_v42  ;;  %v3592_v42 = vpack.c.bf16 %v3550_v39, %v3549_v38  ;;  %v3587_v38 = vld [vmem:[%s28789_s19 + $0x15d] sm:$0xff]  ;;  %v3588_v39 = vld [vmem:[%s28789_s19 + $0x165] sm:$0xff] }
 0x3a6   :  { %18075 = vmatprep.subr.bf16.mxu0 %v22494_v47  ;;  %v3611_v41 = vpack.c.bf16 %v3588_v39, %v3587_v38 }
 0x3a8   :  { %18032 = vmatmul.mubr.bf16.gmra.mrb[8].mxu0 %v3212_v48  ;;  %v3556_v48 = vld [vmem:[%s28789_s19 + $0x65] sm:$0xff] }
 0x3a9   :  { %18035 = vmatprep.mubr.bf16.mxu0 %v3213_v49  ;;  %18076 = vmatpush3.bf16.msra.mxu0 %v22494_v47  ;;  %v3555_v47 = vld [vmem:[%s28789_s19 + $0x5d] sm:$0xff]  ;;  %v22500_v49 = vld [vmem:[#allocation5 + $0x290] sm:$0xff]  }
 0x3aa   :  { %18077 = vmatprep.subr.bf16.mxu0 %v22495_v50  ;;  %v3595_v51 = vpack.c.bf16 %v3556_v48, %v3555_v47  ;;  %v3933_v48 = vld [vmem:[%s28789_s19 + $0x2e] sm:$0xff] }
 0x3ad   :  { %18078 = vmatpush3.bf16.msra.mxu0 %v22495_v50  ;;  %v3594_v50 = vpack.c.bf16 %v3554_v46, %v3553_v45  ;;  %v3932_v45 = vld [vmem:[%s28789_s19 + $0x26] sm:$0xff] }
 0x3ae   :  { %18079 = vmatprep.subr.bf16.mxu0 %v22496_v55 }
 0x3b0   :  { %18036 = vmatmul.mubr.bf16.gmra.mrb[12].mxu0 %v3214_v56  ;;  %v3560_v56 = vld [vmem:[%s28789_s19 + $0x85] sm:$0xff] }
 0x3b1   :  { %18039 = vmatprep.mubr.bf16.mxu0 %v3215_v57  ;;  %18080 = vmatpush3.bf16.msra.mxu0 %v22496_v55  ;;  %v3559_v55 = vld [vmem:[%s28789_s19 + $0x7d] sm:$0xff] }
 0x3b2   :  { %18081 = vmatprep.subr.bf16.mxu0 %v22497_v58  ;;  %v22502_v57 = vld [vmem:[#allocation5 + $0x2a0] sm:$0xff]   ;;  %v3597_v59 = vpack.c.bf16 %v3560_v56, %v3559_v55  ;;  %v3937_v55 = vld [vmem:[%s28789_s19 + $0x4e] sm:$0xff] }
 0x3b3   :  { %v3938_v56 = vld [vmem:[%s28789_s19 + $0x56] sm:$0xff] }
 0x3b5   :  { %18082 = vmatpush3.bf16.msra.mxu0 %v22497_v58  ;;  %v3596_v58 = vpack.c.bf16 %v3558_v54, %v3557_v53  ;;  %v22507_v54 = vld [vmem:[#allocation5 + $0x2c8] sm:$0xff]  }
 0x3b6   :  { %18127 = vmatprep.subr.bf16.mxu0 %v24701_v63 }
 0x3b8   :  { %18040 = vmatmul.mubr.bf16.gmra.mrb[16].mxu0 %v3216_v0  ;;  %v3564_v0 = vld [vmem:[%s28789_s19 + $0xa5] sm:$0xff] }
 0x3b9   :  { %18043 = vmatprep.mubr.bf16.mxu0 %v3217_v1  ;;  %v22504_v1 = vld [vmem:[#allocation5 + $0x2b0] sm:$0xff]  }
 0x3c0   :  { %18044 = vmatmul.mubr.bf16.gmra.mrb[20].mxu0 %v3218_v6  ;;  %v3566_v6 = vld [vmem:[%s28789_s19 + $0xb5] sm:$0xff] }
 0x3c1   :  { %18047 = vmatprep.mubr.bf16.mxu0 %v3219_v7  ;;  %v3567_v7 = vld [vmem:[%s28789_s19 + $0xbd] sm:$0xff]  ;;  %v3600_v10 = vpack.c.bf16 %v3566_v6, %v3565_v5 }
 0x3c2   :  { %v3601_v11 = vpack.c.bf16 %v3568_v8, %v3567_v7  ;;  %v22511_v6 = vld [vmem:[#allocation5 + $0x2e8] sm:$0xff]   ;;  %v3945_v7 = vld [vmem:[%s28789_s19 + $0x8e] sm:$0xff]  ;;  %v3946_v8 = vld [vmem:[%s28789_s19 + $0x96] sm:$0xff] }
 0x3c8   :  { %18048 = vmatmul.mubr.bf16.gmra.mrb[24].mxu0 %v3220_v12  ;;  %v3569_v12 = vld [vmem:[%s28789_s19 + $0xcd] sm:$0xff] }
 0x3c9   :  { %18051 = vmatprep.mubr.bf16.mxu0 %v3221_v13  ;;  %v3570_v13 = vld [vmem:[%s28789_s19 + $0xd5] sm:$0xff] }
 0x3ca   :  { %v3602_v16 = vpack.c.bf16 %v3570_v13, %v3569_v12  ;;  %v3982_v12 = vpack.c.bf16 %v3946_v8, %v3945_v7  ;;  %v22517_v8 = vld [vmem:[#allocation5 + $0x318] sm:$0xff]  }
 0x3d0   :  { %18052 = vmatmul.mubr.bf16.gmra.mrb[28].mxu0 %v3222_v18  ;;  %v3573_v18 = vld [vmem:[%s28789_s19 + $0xed] sm:$0xff] }
 0x3d1   :  { %18055 = vmatprep.mubr.bf16.mxu0 %v3223_v19  ;;  %v3574_v19 = vld [vmem:[%s28789_s19 + $0xf5] sm:$0xff] }
 0x3d2   :  { %v3604_v22 = vpack.c.bf16 %v3574_v19, %v3573_v18  ;;  %v3952_v18 = vld [vmem:[%s28789_s19 + $0xc6] sm:$0xff]  ;;  %v24973_v19 = vld [vmem:[#allocation5 + $0x300] sm:$0xff]  }
 0x3d8   :  { %18056 = vmatmul.mubr.bf16.gmra.mrb[32].mxu0 %v3224_v24  ;;  %v3577_v24 = vld [vmem:[%s28789_s19 + $0x10d] sm:$0xff] }
 0x3d9   :  { %18059 = vmatprep.mubr.bf16.mxu0 %v3225_v25  ;;  %v3578_v25 = vld [vmem:[%s28789_s19 + $0x115] sm:$0xff] }
 0x3da   :  { %v3606_v28 = vpack.c.bf16 %v3578_v25, %v3577_v24  ;;  %v3955_v24 = vld [vmem:[%s28789_s19 + $0xde] sm:$0xff]  ;;  %v3956_v25 = vld [vmem:[%s28789_s19 + $0xe6] sm:$0xff] }
 0x3db   :  { %v3987_v27 = vpack.c.bf16 %v3956_v25, %v3955_v24  ;;  %v22521_v24 = vld [vmem:[#allocation5 + $0x338] sm:$0xff]  }
 0x3dc   :  { %v4333_v25 = vld [vmem:[%s28789_s19 + $0xaf] sm:$0xff] }
 0x3e0   :  { %18060 = vmatmul.mubr.bf16.gmra.mrb[36].mxu0 %v3226_v30  ;;  %v3581_v30 = vld [vmem:[%s28789_s19 + $0x12d] sm:$0xff] }
 0x3e1   :  { %18063 = vmatprep.mubr.bf16.mxu0 %v3227_v31  ;;  %v3582_v31 = vld [vmem:[%s28789_s19 + $0x135] sm:$0xff] }
 0x3e2   :  { %v3608_v34 = vpack.c.bf16 %v3582_v31, %v3581_v30  ;;  %v3959_v30 = vld [vmem:[%s28789_s19 + $0xfe] sm:$0xff]  ;;  %v3960_v31 = vld [vmem:[%s28789_s19 + $0x106] sm:$0xff] }
 0x3e3   :  { %v3989_v33 = vpack.c.bf16 %v3960_v31, %v3959_v30 }
 0x3e8   :  { %18064 = vmatmul.mubr.bf16.gmra.mrb[40].mxu0 %v3228_v36  ;;  %v3585_v36 = vld [vmem:[%s28789_s19 + $0x14d] sm:$0xff] }
 0x3e9   :  { %18083 = vmatprep.mubr.bf16.mxu0 %v3591_v37  ;;  %v3586_v37 = vld [vmem:[%s28789_s19 + $0x155] sm:$0xff] }
 0x3ea   :  { %v3610_v40 = vpack.c.bf16 %v3586_v37, %v3585_v36  ;;  %v3963_v36 = vld [vmem:[%s28789_s19 + $0x11e] sm:$0xff]  ;;  %v3964_v37 = vld [vmem:[%s28789_s19 + $0x126] sm:$0xff] }
 0x3eb   :  { %v3991_v39 = vpack.c.bf16 %v3964_v37, %v3963_v36 }
 0x3f0   :  { %18084 = vmatmul.mubr.bf16.vlgmr.msra.gmra.mrb[0].mxu0 %v3592_v42  ;;  %v3589_v42 = vld [vmem:[%s28789_s19 + $0x16d] sm:$0xff] }
 0x3f1   :  { %18087 = vmatprep.mubr.bf16.mxu0 %v3593_v43  ;;  %18128 = vmatpush3.bf16.msra.mxu0 %v24701_v63  ;;  %v3563_v63 = vld [vmem:[%s28789_s19 + $0x9d] sm:$0xff]  ;;  %v3590_v43 = vld [vmem:[%s28789_s19 + $0x175] sm:$0x7] }
 0x3f2   :  { %18129 = vmatprep.subr.bf16.mxu0 %v22499_v44  ;;  %v3599_v3 = vpack.c.bf16 %v3564_v0, %v3563_v63  ;;  %v3612_v46 = vpack.c.bf16 %v3590_v43, %v3589_v42  ;;  %v3941_v63 = vld [vmem:[%s28789_s19 + $0x6e] sm:$0xff]  ;;  %v3942_v0 = vld [vmem:[%s28789_s19 + $0x76] sm:$0xff]  ;;  %v3967_v42 = vld [vmem:[%s28789_s19 + $0x13e] sm:$0xff] }
 0x3f3   :  { %v3968_v43 = vld [vmem:[%s28789_s19 + $0x146] sm:$0xff] }
 0x3f5   :  { %18130 = vmatpush3.bf16.msra.mxu0 %v22499_v44  ;;  %v3931_v44 = vld [vmem:[%s28789_s19 + $0x1e] sm:$0xff] }
 0x3f6   :  { %18131 = vmatprep.subr.bf16.mxu0 %v22500_v49  ;;  %v3975_v47 = vpack.c.bf16 %v3932_v45, %v3931_v44  ;;  %v3993_v45 = vpack.c.bf16 %v3968_v43, %v3967_v42 }
 0x3f8   :  { %18088 = vmatmul.mubr.bf16.gmra.mrb[4].mxu0 %v3594_v50  ;;  %v3935_v50 = vld [vmem:[%s28789_s19 + $0x3e] sm:$0xff] }
 0x3f9   :  { %18091 = vmatprep.mubr.bf16.mxu0 %v3595_v51  ;;  %18132 = vmatpush3.bf16.msra.mxu0 %v22500_v49  ;;  %v3934_v49 = vld [vmem:[%s28789_s19 + $0x36] sm:$0xff]  ;;  %v3936_v51 = vld [vmem:[%s28789_s19 + $0x46] sm:$0xff] }
 0x3fa   :  { %18133 = vmatprep.subr.bf16.mxu0 %v22501_v52  ;;  %v3977_v53 = vpack.c.bf16 %v3936_v51, %v3935_v50 }
 0x3fd   :  { %18134 = vmatpush3.bf16.msra.mxu0 %v22501_v52  ;;  %v3976_v52 = vpack.c.bf16 %v3934_v49, %v3933_v48  ;;  %v3971_v48 = vld [vmem:[%s28789_s19 + $0x15e] sm:$0xff]  ;;  %v3972_v49 = vld [vmem:[%s28789_s19 + $0x166] sm:$0xff] }
 0x3fe   :  { %18135 = vmatprep.subr.bf16.mxu0 %v22502_v57  ;;  %v3995_v51 = vpack.c.bf16 %v3972_v49, %v3971_v48 }
 0x400   :  { %18092 = vmatmul.mubr.bf16.gmra.mrb[8].mxu0 %v3596_v58  ;;  %v3940_v58 = vld [vmem:[%s28789_s19 + $0x66] sm:$0xff] }
 0x401   :  { %18095 = vmatprep.mubr.bf16.mxu0 %v3597_v59  ;;  %18136 = vmatpush3.bf16.msra.mxu0 %v22502_v57  ;;  %v3939_v57 = vld [vmem:[%s28789_s19 + $0x5e] sm:$0xff]  ;;  %v22508_v59 = vld [vmem:[#allocation5 + $0x2d0] sm:$0xff]  }
 0x402   :  { %18137 = vmatprep.subr.bf16.mxu0 %v22503_v60  ;;  %v3979_v61 = vpack.c.bf16 %v3940_v58, %v3939_v57  ;;  %v4317_v58 = vld [vmem:[%s28789_s19 + $0x2f] sm:$0xff] }
 0x405   :  { %18138 = vmatpush3.bf16.msra.mxu0 %v22503_v60  ;;  %v3978_v60 = vpack.c.bf16 %v3938_v56, %v3937_v55  ;;  %v4316_v55 = vld [vmem:[%s28789_s19 + $0x27] sm:$0xff] }
 0x406   :  { %18139 = vmatprep.subr.bf16.mxu0 %v22504_v1 }
 0x408   :  { %18096 = vmatmul.mubr.bf16.gmra.mrb[12].mxu0 %v3598_v2  ;;  %v3944_v2 = vld [vmem:[%s28789_s19 + $0x86] sm:$0xff] }
 0x409   :  { %18099 = vmatprep.mubr.bf16.mxu0 %v3599_v3  ;;  %18140 = vmatpush3.bf16.msra.mxu0 %v22504_v1  ;;  %v3943_v1 = vld [vmem:[%s28789_s19 + $0x7e] sm:$0xff] }
 0x40a   :  { %18141 = vmatprep.subr.bf16.mxu0 %v22505_v4  ;;  %v22510_v3 = vld [vmem:[#allocation5 + $0x2e0] sm:$0xff]   ;;  %v3981_v5 = vpack.c.bf16 %v3944_v2, %v3943_v1  ;;  %v4321_v1 = vld [vmem:[%s28789_s19 + $0x4f] sm:$0xff] }
 0x40b   :  { %v4322_v2 = vld [vmem:[%s28789_s19 + $0x57] sm:$0xff] }
 0x40d   :  { %18142 = vmatpush3.bf16.msra.mxu0 %v22505_v4  ;;  %v3980_v4 = vpack.c.bf16 %v3942_v0, %v3941_v63  ;;  %v22515_v0 = vld [vmem:[#allocation5 + $0x308] sm:$0xff]  }
 0x40e   :  { %18187 = vmatprep.subr.bf16.mxu0 %v24837_v9 }
 0x410   :  { %18100 = vmatmul.mubr.bf16.gmra.mrb[16].mxu0 %v3600_v10  ;;  %v3948_v10 = vld [vmem:[%s28789_s19 + $0xa6] sm:$0xff] }
 0x411   :  { %18103 = vmatprep.mubr.bf16.mxu0 %v3601_v11  ;;  %v22512_v11 = vld [vmem:[#allocation5 + $0x2f0] sm:$0xff]  }
 0x418   :  { %18104 = vmatmul.mubr.bf16.gmra.mrb[20].mxu0 %v3602_v16  ;;  %v3950_v16 = vld [vmem:[%s28789_s19 + $0xb6] sm:$0xff] }
 0x419   :  { %18107 = vmatprep.mubr.bf16.mxu0 %v3603_v17  ;;  %v3951_v17 = vld [vmem:[%s28789_s19 + $0xbe] sm:$0xff]  ;;  %v3984_v20 = vpack.c.bf16 %v3950_v16, %v3949_v15 }
 0x41a   :  { %v3985_v21 = vpack.c.bf16 %v3952_v18, %v3951_v17  ;;  %v22519_v16 = vld [vmem:[#allocation5 + $0x328] sm:$0xff]   ;;  %v4329_v17 = vld [vmem:[%s28789_s19 + $0x8f] sm:$0xff]  ;;  %v4330_v18 = vld [vmem:[%s28789_s19 + $0x97] sm:$0xff] }
 0x420   :  { %18108 = vmatmul.mubr.bf16.gmra.mrb[24].mxu0 %v3604_v22  ;;  %v3953_v22 = vld [vmem:[%s28789_s19 + $0xce] sm:$0xff] }
 0x421   :  { %18111 = vmatprep.mubr.bf16.mxu0 %v3605_v23  ;;  %v3954_v23 = vld [vmem:[%s28789_s19 + $0xd6] sm:$0xff] }
 0x422   :  { %v3986_v26 = vpack.c.bf16 %v3954_v23, %v3953_v22  ;;  %v4366_v22 = vpack.c.bf16 %v4330_v18, %v4329_v17  ;;  %v22525_v18 = vld [vmem:[#allocation5 + $0x358] sm:$0xff]  }
 0x428   :  { %18112 = vmatmul.mubr.bf16.gmra.mrb[28].mxu0 %v3606_v28  ;;  %v3957_v28 = vld [vmem:[%s28789_s19 + $0xee] sm:$0xff] }
 0x429   :  { %18115 = vmatprep.mubr.bf16.mxu0 %v3607_v29  ;;  %v3958_v29 = vld [vmem:[%s28789_s19 + $0xf6] sm:$0xff] }
 0x42a   :  { %v3988_v32 = vpack.c.bf16 %v3958_v29, %v3957_v28  ;;  %v4336_v28 = vld [vmem:[%s28789_s19 + $0xc7] sm:$0xff]  ;;  %v25109_v29 = vld [vmem:[#allocation5 + $0x340] sm:$0xff]  }
 0x430   :  { %18116 = vmatmul.mubr.bf16.gmra.mrb[32].mxu0 %v3608_v34  ;;  %v3961_v34 = vld [vmem:[%s28789_s19 + $0x10e] sm:$0xff] }
 0x431   :  { %18119 = vmatprep.mubr.bf16.mxu0 %v3609_v35  ;;  %v3962_v35 = vld [vmem:[%s28789_s19 + $0x116] sm:$0xff] }
 0x432   :  { %v3990_v38 = vpack.c.bf16 %v3962_v35, %v3961_v34  ;;  %v4339_v34 = vld [vmem:[%s28789_s19 + $0xdf] sm:$0xff]  ;;  %v4340_v35 = vld [vmem:[%s28789_s19 + $0xe7] sm:$0xff] }
 0x433   :  { %v4371_v37 = vpack.c.bf16 %v4340_v35, %v4339_v34  ;;  %v22529_v34 = vld [vmem:[#allocation5 + $0x378] sm:$0xff]   ;;  %v4717_v35 = vld [vmem:[%s28789_s19 + $0xba] sm:$0xff] }
 0x438   :  { %18120 = vmatmul.mubr.bf16.gmra.mrb[36].mxu0 %v3610_v40  ;;  %v3965_v40 = vld [vmem:[%s28789_s19 + $0x12e] sm:$0xff] }
 0x439   :  { %18123 = vmatprep.mubr.bf16.mxu0 %v3611_v41  ;;  %v3966_v41 = vld [vmem:[%s28789_s19 + $0x136] sm:$0xff] }
 0x43a   :  { %v3992_v44 = vpack.c.bf16 %v3966_v41, %v3965_v40  ;;  %v4343_v40 = vld [vmem:[%s28789_s19 + $0xff] sm:$0xff]  ;;  %v4344_v41 = vld [vmem:[%s28789_s19 + $0x107] sm:$0xff] }
 0x43b   :  { %v4373_v43 = vpack.c.bf16 %v4344_v41, %v4343_v40 }
 0x440   :  { %18124 = vmatmul.mubr.bf16.gmra.mrb[40].mxu0 %v3612_v46  ;;  %v3969_v46 = vld [vmem:[%s28789_s19 + $0x14e] sm:$0xff] }
 0x441   :  { %18143 = vmatprep.mubr.bf16.mxu0 %v3975_v47  ;;  %v3970_v47 = vld [vmem:[%s28789_s19 + $0x156] sm:$0xff] }
 0x442   :  { %v3994_v50 = vpack.c.bf16 %v3970_v47, %v3969_v46  ;;  %v4347_v46 = vld [vmem:[%s28789_s19 + $0x11f] sm:$0xff]  ;;  %v4348_v47 = vld [vmem:[%s28789_s19 + $0x127] sm:$0xff] }
 0x443   :  { %v4375_v49 = vpack.c.bf16 %v4348_v47, %v4347_v46 }
 0x448   :  { %18144 = vmatmul.mubr.bf16.vlgmr.msra.gmra.mrb[0].mxu0 %v3976_v52  ;;  %v3973_v52 = vld [vmem:[%s28789_s19 + $0x16e] sm:$0xff] }
 0x449   :  { %18147 = vmatprep.mubr.bf16.mxu0 %v3977_v53  ;;  %18188 = vmatpush3.bf16.msra.mxu0 %v24837_v9  ;;  %v3947_v9 = vld [vmem:[%s28789_s19 + $0x9e] sm:$0xff]  ;;  %v3974_v53 = vld [vmem:[%s28789_s19 + $0x176] sm:$0x7] }
 0x44a   :  { %18189 = vmatprep.subr.bf16.mxu0 %v22507_v54  ;;  %v3983_v13 = vpack.c.bf16 %v3948_v10, %v3947_v9  ;;  %v3996_v56 = vpack.c.bf16 %v3974_v53, %v3973_v52  ;;  %v4325_v9 = vld [vmem:[%s28789_s19 + $0x6f] sm:$0xff]  ;;  %v4326_v10 = vld [vmem:[%s28789_s19 + $0x77] sm:$0xff]  ;;  %v4351_v52 = vld [vmem:[%s28789_s19 + $0x13f] sm:$0xff] }
 0x44b   :  { %v4352_v53 = vld [vmem:[%s28789_s19 + $0x147] sm:$0xff] }
 0x44d   :  { %18190 = vmatpush3.bf16.msra.mxu0 %v22507_v54  ;;  %v4315_v54 = vld [vmem:[%s28789_s19 + $0x1f] sm:$0xff] }
 0x44e   :  { %18191 = vmatprep.subr.bf16.mxu0 %v22508_v59  ;;  %v4359_v57 = vpack.c.bf16 %v4316_v55, %v4315_v54  ;;  %v4377_v55 = vpack.c.bf16 %v4352_v53, %v4351_v52 }
 0x450   :  { %18148 = vmatmul.mubr.bf16.gmra.mrb[4].mxu0 %v3978_v60  ;;  %v4319_v60 = vld [vmem:[%s28789_s19 + $0x3f] sm:$0xff] }
 0x451   :  { %18151 = vmatprep.mubr.bf16.mxu0 %v3979_v61  ;;  %18192 = vmatpush3.bf16.msra.mxu0 %v22508_v59  ;;  %v4318_v59 = vld [vmem:[%s28789_s19 + $0x37] sm:$0xff]  ;;  %v4320_v61 = vld [vmem:[%s28789_s19 + $0x47] sm:$0xff] }
 0x452   :  { %18193 = vmatprep.subr.bf16.mxu0 %v22509_v62  ;;  %v4361_v63 = vpack.c.bf16 %v4320_v61, %v4319_v60 }
 0x455   :  { %18194 = vmatpush3.bf16.msra.mxu0 %v22509_v62  ;;  %v4360_v62 = vpack.c.bf16 %v4318_v59, %v4317_v58  ;;  %v4355_v58 = vld [vmem:[%s28789_s19 + $0x15f] sm:$0xff]  ;;  %v4356_v59 = vld [vmem:[%s28789_s19 + $0x167] sm:$0xff] }
 0x456   :  { %18195 = vmatprep.subr.bf16.mxu0 %v22510_v3  ;;  %v4379_v61 = vpack.c.bf16 %v4356_v59, %v4355_v58 }
 0x458   :  { %18152 = vmatmul.mubr.bf16.gmra.mrb[8].mxu0 %v3980_v4  ;;  %v4324_v4 = vld [vmem:[%s28789_s19 + $0x67] sm:$0xff] }
 0x459   :  { %18155 = vmatprep.mubr.bf16.mxu0 %v3981_v5  ;;  %18196 = vmatpush3.bf16.msra.mxu0 %v22510_v3  ;;  %v4323_v3 = vld [vmem:[%s28789_s19 + $0x5f] sm:$0xff]  ;;  %v22516_v5 = vld [vmem:[#allocation5 + $0x310] sm:$0xff]  }
 0x45a   :  { %18197 = vmatprep.subr.bf16.mxu0 %v22511_v6  ;;  %v4363_v7 = vpack.c.bf16 %v4324_v4, %v4323_v3  ;;  %v4701_v4 = vld [vmem:[%s28789_s19 + $0x3a] sm:$0xff] }
 0x45d   :  { %18198 = vmatpush3.bf16.msra.mxu0 %v22511_v6  ;;  %v4362_v6 = vpack.c.bf16 %v4322_v2, %v4321_v1  ;;  %v4700_v1 = vld [vmem:[%s28789_s19 + $0x32] sm:$0xff] }
 0x45e   :  { %18199 = vmatprep.subr.bf16.mxu0 %v22512_v11 }
 0x460   :  { %18156 = vmatmul.mubr.bf16.gmra.mrb[12].mxu0 %v3982_v12  ;;  %v4328_v12 = vld [vmem:[%s28789_s19 + $0x87] sm:$0xff] }
 0x461   :  { %18159 = vmatprep.mubr.bf16.mxu0 %v3983_v13  ;;  %18200 = vmatpush3.bf16.msra.mxu0 %v22512_v11  ;;  %v4327_v11 = vld [vmem:[%s28789_s19 + $0x7f] sm:$0xff] }
 0x462   :  { %18201 = vmatprep.subr.bf16.mxu0 %v22513_v14  ;;  %v22518_v13 = vld [vmem:[#allocation5 + $0x320] sm:$0xff]   ;;  %v4365_v15 = vpack.c.bf16 %v4328_v12, %v4327_v11  ;;  %v4706_v12 = vld [vmem:[%s28789_s19 + $0x62] sm:$0xff] }
 0x463   :  { %v4705_v11 = vld [vmem:[%s28789_s19 + $0x5a] sm:$0xff] }
 0x465   :  { %18202 = vmatpush3.bf16.msra.mxu0 %v22513_v14  ;;  %v4364_v14 = vpack.c.bf16 %v4326_v10, %v4325_v9  ;;  %v22523_v10 = vld [vmem:[#allocation5 + $0x348] sm:$0xff]  }
 0x466   :  { %18247 = vmatprep.subr.bf16.mxu0 %v24973_v19 }
 0x468   :  { %18160 = vmatmul.mubr.bf16.gmra.mrb[16].mxu0 %v3984_v20  ;;  %v4332_v20 = vld [vmem:[%s28789_s19 + $0xa7] sm:$0xff] }
 0x469   :  { %18163 = vmatprep.mubr.bf16.mxu0 %v3985_v21  ;;  %v22520_v21 = vld [vmem:[#allocation5 + $0x330] sm:$0xff]  }
 0x470   :  { %18164 = vmatmul.mubr.bf16.gmra.mrb[20].mxu0 %v3986_v26  ;;  %v4334_v26 = vld [vmem:[%s28789_s19 + $0xb7] sm:$0xff] }
 0x471   :  { %18167 = vmatprep.mubr.bf16.mxu0 %v3987_v27  ;;  %v4335_v27 = vld [vmem:[%s28789_s19 + $0xbf] sm:$0xff]  ;;  %v4368_v30 = vpack.c.bf16 %v4334_v26, %v4333_v25 }
 0x472   :  { %v4369_v31 = vpack.c.bf16 %v4336_v28, %v4335_v27  ;;  %v22527_v26 = vld [vmem:[#allocation5 + $0x368] sm:$0xff]  }
 0x473   :  { %v4713_v27 = vld [vmem:[%s28789_s19 + $0x9a] sm:$0xff]  ;;  %v4714_v28 = vld [vmem:[%s28789_s19 + $0xa2] sm:$0xff] }
 0x478   :  { %18168 = vmatmul.mubr.bf16.gmra.mrb[24].mxu0 %v3988_v32  ;;  %v4337_v32 = vld [vmem:[%s28789_s19 + $0xcf] sm:$0xff] }
 0x479   :  { %18171 = vmatprep.mubr.bf16.mxu0 %v3989_v33  ;;  %v4338_v33 = vld [vmem:[%s28789_s19 + $0xd7] sm:$0xff] }
 0x47a   :  { %v4370_v36 = vpack.c.bf16 %v4338_v33, %v4337_v32  ;;  %v4750_v32 = vpack.c.bf16 %v4714_v28, %v4713_v27  ;;  %v22533_v28 = vld [vmem:[#allocation5 + $0x398] sm:$0xff]  }
 0x480   :  { %18172 = vmatmul.mubr.bf16.gmra.mrb[28].mxu0 %v3990_v38  ;;  %v4341_v38 = vld [vmem:[%s28789_s19 + $0xef] sm:$0xff] }
 0x481   :  { %18175 = vmatprep.mubr.bf16.mxu0 %v3991_v39  ;;  %v4342_v39 = vld [vmem:[%s28789_s19 + $0xf7] sm:$0xff] }
 0x482   :  { %v4372_v42 = vpack.c.bf16 %v4342_v39, %v4341_v38  ;;  %v4720_v38 = vld [vmem:[%s28789_s19 + $0xd2] sm:$0xff] }
 0x483   :  { %v25245_v39 = vld [vmem:[#allocation5 + $0x380] sm:$0xff]  }
 0x488   :  { %18176 = vmatmul.mubr.bf16.gmra.mrb[32].mxu0 %v3992_v44  ;;  %v4345_v44 = vld [vmem:[%s28789_s19 + $0x10f] sm:$0xff] }
 0x489   :  { %18179 = vmatprep.mubr.bf16.mxu0 %v3993_v45  ;;  %v4346_v45 = vld [vmem:[%s28789_s19 + $0x117] sm:$0xff] }
 0x48a   :  { %v4374_v48 = vpack.c.bf16 %v4346_v45, %v4345_v44  ;;  %v4723_v44 = vld [vmem:[%s28789_s19 + $0xea] sm:$0xff]  ;;  %v4724_v45 = vld [vmem:[%s28789_s19 + $0xf2] sm:$0xff] }
 0x48b   :  { %v4755_v47 = vpack.c.bf16 %v4724_v45, %v4723_v44  ;;  %v22537_v44 = vld [vmem:[#allocation5 + $0x3b8] sm:$0xff]   ;;  %v5101_v45 = vld [vmem:[%s28789_s19 + $0xbb] sm:$0xff] }
 0x490   :  { %18180 = vmatmul.mubr.bf16.gmra.mrb[36].mxu0 %v3994_v50  ;;  %v4349_v50 = vld [vmem:[%s28789_s19 + $0x12f] sm:$0xff] }
 0x491   :  { %18183 = vmatprep.mubr.bf16.mxu0 %v3995_v51  ;;  %v4350_v51 = vld [vmem:[%s28789_s19 + $0x137] sm:$0xff] }
 0x492   :  { %v4376_v54 = vpack.c.bf16 %v4350_v51, %v4349_v50  ;;  %v4727_v50 = vld [vmem:[%s28789_s19 + $0x10a] sm:$0xff]  ;;  %v4728_v51 = vld [vmem:[%s28789_s19 + $0x112] sm:$0xff] }
 0x493   :  { %v4757_v53 = vpack.c.bf16 %v4728_v51, %v4727_v50 }
 0x498   :  { %18184 = vmatmul.mubr.bf16.gmra.mrb[40].mxu0 %v3996_v56  ;;  %v4353_v56 = vld [vmem:[%s28789_s19 + $0x14f] sm:$0xff] }
 0x499   :  { %18203 = vmatprep.mubr.bf16.mxu0 %v4359_v57  ;;  %v4354_v57 = vld [vmem:[%s28789_s19 + $0x157] sm:$0xff] }
 0x49a   :  { %v4378_v60 = vpack.c.bf16 %v4354_v57, %v4353_v56  ;;  %v4731_v56 = vld [vmem:[%s28789_s19 + $0x12a] sm:$0xff]  ;;  %v4732_v57 = vld [vmem:[%s28789_s19 + $0x132] sm:$0xff] }
 0x49b   :  { %v4759_v59 = vpack.c.bf16 %v4732_v57, %v4731_v56 }
 0x4a0   :  { %18204 = vmatmul.mubr.bf16.vlgmr.msra.gmra.mrb[0].mxu0 %v4360_v62  ;;  %v4357_v62 = vld [vmem:[%s28789_s19 + $0x16f] sm:$0xff] }
 0x4a1   :  { %18207 = vmatprep.mubr.bf16.mxu0 %v4361_v63  ;;  %18248 = vmatpush3.bf16.msra.mxu0 %v24973_v19  ;;  %v4331_v19 = vld [vmem:[%s28789_s19 + $0x9f] sm:$0xff]  ;;  %v4358_v63 = vld [vmem:[%s28789_s19 + $0x177] sm:$0x7] }
 0x4a2   :  { %18249 = vmatprep.subr.bf16.mxu0 %v22515_v0  ;;  %v4367_v23 = vpack.c.bf16 %v4332_v20, %v4331_v19  ;;  %v4380_v2 = vpack.c.bf16 %v4358_v63, %v4357_v62  ;;  %v4709_v19 = vld [vmem:[%s28789_s19 + $0x7a] sm:$0xff]  ;;  %v4710_v20 = vld [vmem:[%s28789_s19 + $0x82] sm:$0xff]  ;;  %v4735_v62 = vld [vmem:[%s28789_s19 + $0x14a] sm:$0xff] }
 0x4a3   :  { %v4736_v63 = vld [vmem:[%s28789_s19 + $0x152] sm:$0xff] }
 0x4a5   :  { %18250 = vmatpush3.bf16.msra.mxu0 %v22515_v0  ;;  %v4699_v0 = vld [vmem:[%s28789_s19 + $0x2a] sm:$0xff] }
 0x4a6   :  { %18251 = vmatprep.subr.bf16.mxu0 %v22516_v5  ;;  %v4743_v3 = vpack.c.bf16 %v4700_v1, %v4699_v0  ;;  %v4761_v1 = vpack.c.bf16 %v4736_v63, %v4735_v62 }
 0x4a8   :  { %18208 = vmatmul.mubr.bf16.gmra.mrb[4].mxu0 %v4362_v6  ;;  %v4703_v6 = vld [vmem:[%s28789_s19 + $0x4a] sm:$0xff] }
 0x4a9   :  { %18211 = vmatprep.mubr.bf16.mxu0 %v4363_v7  ;;  %18252 = vmatpush3.bf16.msra.mxu0 %v22516_v5  ;;  %v4702_v5 = vld [vmem:[%s28789_s19 + $0x42] sm:$0xff]  ;;  %v4704_v7 = vld [vmem:[%s28789_s19 + $0x52] sm:$0xff] }
 0x4aa   :  { %18253 = vmatprep.subr.bf16.mxu0 %v22517_v8  ;;  %v4745_v9 = vpack.c.bf16 %v4704_v7, %v4703_v6 }
 0x4ad   :  { %18254 = vmatpush3.bf16.msra.mxu0 %v22517_v8  ;;  %v4744_v8 = vpack.c.bf16 %v4702_v5, %v4701_v4  ;;  %v4739_v4 = vld [vmem:[%s28789_s19 + $0x16a] sm:$0xff]  ;;  %v4740_v5 = vld [vmem:[%s28789_s19 + $0x172] sm:$0xff] }
 0x4ae   :  { %18255 = vmatprep.subr.bf16.mxu0 %v22518_v13  ;;  %v4763_v7 = vpack.c.bf16 %v4740_v5, %v4739_v4 }
 0x4b0   :  { %18212 = vmatmul.mubr.bf16.gmra.mrb[8].mxu0 %v4364_v14  ;;  %v4708_v14 = vld [vmem:[%s28789_s19 + $0x72] sm:$0xff] }
 0x4b1   :  { %18215 = vmatprep.mubr.bf16.mxu0 %v4365_v15  ;;  %18256 = vmatpush3.bf16.msra.mxu0 %v22518_v13  ;;  %v4707_v13 = vld [vmem:[%s28789_s19 + $0x6a] sm:$0xff] }
 0x4b2   :  { %18257 = vmatprep.subr.bf16.mxu0 %v22519_v16  ;;  %v22524_v15 = vld [vmem:[#allocation5 + $0x350] sm:$0xff]   ;;  %v4747_v17 = vpack.c.bf16 %v4708_v14, %v4707_v13  ;;  %v5085_v14 = vld [vmem:[%s28789_s19 + $0x3b] sm:$0xff] }
 0x4b5   :  { %18258 = vmatpush3.bf16.msra.mxu0 %v22519_v16  ;;  %v4746_v16 = vpack.c.bf16 %v4706_v12, %v4705_v11  ;;  %v5084_v11 = vld [vmem:[%s28789_s19 + $0x33] sm:$0xff] }
 0x4b6   :  { %18259 = vmatprep.subr.bf16.mxu0 %v22520_v21 }
 0x4b8   :  { %18216 = vmatmul.mubr.bf16.gmra.mrb[12].mxu0 %v4366_v22  ;;  %v4712_v22 = vld [vmem:[%s28789_s19 + $0x92] sm:$0xff] }
 0x4b9   :  { %18219 = vmatprep.mubr.bf16.mxu0 %v4367_v23  ;;  %18260 = vmatpush3.bf16.msra.mxu0 %v22520_v21  ;;  %v4711_v21 = vld [vmem:[%s28789_s19 + $0x8a] sm:$0xff]  ;;  %v22526_v23 = vld [vmem:[#allocation5 + $0x360] sm:$0xff]  }
 0x4ba   :  { %18261 = vmatprep.subr.bf16.mxu0 %v22521_v24  ;;  %v4749_v25 = vpack.c.bf16 %v4712_v22, %v4711_v21  ;;  %v5089_v21 = vld [vmem:[%s28789_s19 + $0x5b] sm:$0xff]  ;;  %v5090_v22 = vld [vmem:[%s28789_s19 + $0x63] sm:$0xff] }
 0x4bd   :  { %18262 = vmatpush3.bf16.msra.mxu0 %v22521_v24  ;;  %v4748_v24 = vpack.c.bf16 %v4710_v20, %v4709_v19  ;;  %v22531_v20 = vld [vmem:[#allocation5 + $0x388] sm:$0xff]  }
 0x4be   :  { %18307 = vmatprep.subr.bf16.mxu0 %v25109_v29 }
 0x4c0   :  { %18220 = vmatmul.mubr.bf16.gmra.mrb[16].mxu0 %v4368_v30  ;;  %v4716_v30 = vld [vmem:[%s28789_s19 + $0xb2] sm:$0xff] }
 0x4c1   :  { %18223 = vmatprep.mubr.bf16.mxu0 %v4369_v31  ;;  %v22528_v31 = vld [vmem:[#allocation5 + $0x370] sm:$0xff]  }
 0x4c8   :  { %18224 = vmatmul.mubr.bf16.gmra.mrb[20].mxu0 %v4370_v36  ;;  %v4718_v36 = vld [vmem:[%s28789_s19 + $0xc2] sm:$0xff] }
 0x4c9   :  { %18227 = vmatprep.mubr.bf16.mxu0 %v4371_v37  ;;  %v4719_v37 = vld [vmem:[%s28789_s19 + $0xca] sm:$0xff]  ;;  %v4752_v40 = vpack.c.bf16 %v4718_v36, %v4717_v35  ;;  %v22535_v36 = vld [vmem:[#allocation5 + $0x3a8] sm:$0xff]  }
 0x4ca   :  { %v4753_v41 = vpack.c.bf16 %v4720_v38, %v4719_v37  ;;  %v5097_v37 = vld [vmem:[%s28789_s19 + $0x9b] sm:$0xff]  ;;  %v5098_v38 = vld [vmem:[%s28789_s19 + $0xa3] sm:$0xff] }
 0x4d0   :  { %18228 = vmatmul.mubr.bf16.gmra.mrb[24].mxu0 %v4372_v42  ;;  %v4721_v42 = vld [vmem:[%s28789_s19 + $0xda] sm:$0xff] }
 0x4d1   :  { %18231 = vmatprep.mubr.bf16.mxu0 %v4373_v43  ;;  %v4722_v43 = vld [vmem:[%s28789_s19 + $0xe2] sm:$0xff] }
 0x4d2   :  { %v4754_v46 = vpack.c.bf16 %v4722_v43, %v4721_v42  ;;  %v5134_v42 = vpack.c.bf16 %v5098_v38, %v5097_v37  ;;  %v22541_v38 = vld [vmem:[#allocation5 + $0x3d8] sm:$0xff]  }
 0x4d8   :  { %18232 = vmatmul.mubr.bf16.gmra.mrb[28].mxu0 %v4374_v48  ;;  %v4725_v48 = vld [vmem:[%s28789_s19 + $0xfa] sm:$0xff] }
 0x4d9   :  { %18235 = vmatprep.mubr.bf16.mxu0 %v4375_v49  ;;  %v4726_v49 = vld [vmem:[%s28789_s19 + $0x102] sm:$0xff] }
 0x4da   :  { %v4756_v52 = vpack.c.bf16 %v4726_v49, %v4725_v48  ;;  %v5104_v48 = vld [vmem:[%s28789_s19 + $0xd3] sm:$0xff] }
 0x4db   :  { %v25381_v49 = vld [vmem:[#allocation5 + $0x3c0] sm:$0xff]  }
 0x4e0   :  { %18236 = vmatmul.mubr.bf16.gmra.mrb[32].mxu0 %v4376_v54  ;;  %v4729_v54 = vld [vmem:[%s28789_s19 + $0x11a] sm:$0xff] }
 0x4e1   :  { %18239 = vmatprep.mubr.bf16.mxu0 %v4377_v55  ;;  %v4730_v55 = vld [vmem:[%s28789_s19 + $0x122] sm:$0xff] }
 0x4e2   :  { %v4758_v58 = vpack.c.bf16 %v4730_v55, %v4729_v54  ;;  %v5107_v54 = vld [vmem:[%s28789_s19 + $0xeb] sm:$0xff]  ;;  %v5108_v55 = vld [vmem:[%s28789_s19 + $0xf3] sm:$0xff] }
 0x4e3   :  { %v5139_v57 = vpack.c.bf16 %v5108_v55, %v5107_v54  ;;  %v22545_v54 = vld [vmem:[#allocation5 + $0x3f8] sm:$0xff]   ;;  %v5485_v55 = vld [vmem:[%s28789_s19 + $0xbc] sm:$0xff] }
 0x4e8   :  { %18240 = vmatmul.mubr.bf16.gmra.mrb[36].mxu0 %v4378_v60  ;;  %v4733_v60 = vld [vmem:[%s28789_s19 + $0x13a] sm:$0xff] }
 0x4e9   :  { %18243 = vmatprep.mubr.bf16.mxu0 %v4379_v61  ;;  %v4734_v61 = vld [vmem:[%s28789_s19 + $0x142] sm:$0xff] }
 0x4ea   :  { %v4760_v0 = vpack.c.bf16 %v4734_v61, %v4733_v60  ;;  %v5111_v60 = vld [vmem:[%s28789_s19 + $0x10b] sm:$0xff]  ;;  %v5112_v61 = vld [vmem:[%s28789_s19 + $0x113] sm:$0xff] }
 0x4eb   :  { %v5141_v63 = vpack.c.bf16 %v5112_v61, %v5111_v60  ;;  %v5489_v61 = vld [vmem:[%s28789_s19 + $0xdc] sm:$0xff] }
 0x4f0   :  { %18244 = vmatmul.mubr.bf16.gmra.mrb[40].mxu0 %v4380_v2  ;;  %v4737_v2 = vld [vmem:[%s28789_s19 + $0x15a] sm:$0xff] }
 0x4f1   :  { %18263 = vmatprep.mubr.bf16.mxu0 %v4743_v3  ;;  %v4738_v3 = vld [vmem:[%s28789_s19 + $0x162] sm:$0xff] }
 0x4f2   :  { %v4762_v6 = vpack.c.bf16 %v4738_v3, %v4737_v2  ;;  %v5115_v2 = vld [vmem:[%s28789_s19 + $0x12b] sm:$0xff]  ;;  %v5116_v3 = vld [vmem:[%s28789_s19 + $0x133] sm:$0xff] }
 0x4f3   :  { %v5143_v5 = vpack.c.bf16 %v5116_v3, %v5115_v2  ;;  %v5493_v3 = vld [vmem:[%s28789_s19 + $0xfc] sm:$0xff] }
 0x4f8   :  { %18264 = vmatmul.mubr.bf16.vlgmr.msra.gmra.mrb[0].mxu0 %v4744_v8  ;;  %v4741_v8 = vld [vmem:[%s28789_s19 + $0x17a] sm:$0xff] }
 0x4f9   :  { %18267 = vmatprep.mubr.bf16.mxu0 %v4745_v9  ;;  %18308 = vmatpush3.bf16.msra.mxu0 %v25109_v29  ;;  %v4715_v29 = vld [vmem:[%s28789_s19 + $0xaa] sm:$0xff]  ;;  %v4742_v9 = vld [vmem:[%s28789_s19 + $0x182] sm:$0x7] }
 0x4fa   :  { %18309 = vmatprep.subr.bf16.mxu0 %v22523_v10  ;;  %v4751_v33 = vpack.c.bf16 %v4716_v30, %v4715_v29  ;;  %v4764_v12 = vpack.c.bf16 %v4742_v9, %v4741_v8  ;;  %v5093_v29 = vld [vmem:[%s28789_s19 + $0x7b] sm:$0xff]  ;;  %v5094_v30 = vld [vmem:[%s28789_s19 + $0x83] sm:$0xff]  ;;  %v5119_v8 = vld [vmem:[%s28789_s19 + $0x14b] sm:$0xff] }
 0x4fb   :  { %v5120_v9 = vld [vmem:[%s28789_s19 + $0x153] sm:$0xff] }
 0x4fd   :  { %18310 = vmatpush3.bf16.msra.mxu0 %v22523_v10  ;;  %v5083_v10 = vld [vmem:[%s28789_s19 + $0x2b] sm:$0xff] }
 0x4fe   :  { %18311 = vmatprep.subr.bf16.mxu0 %v22524_v15  ;;  %v5127_v13 = vpack.c.bf16 %v5084_v11, %v5083_v10  ;;  %v5145_v11 = vpack.c.bf16 %v5120_v9, %v5119_v8  ;;  %v5497_v9 = vld [vmem:[%s28789_s19 + $0x11c] sm:$0xff] }
 0x500   :  { %18268 = vmatmul.mubr.bf16.gmra.mrb[4].mxu0 %v4746_v16  ;;  %v5087_v16 = vld [vmem:[%s28789_s19 + $0x4b] sm:$0xff] }
 0x501   :  { %18271 = vmatprep.mubr.bf16.mxu0 %v4747_v17  ;;  %18312 = vmatpush3.bf16.msra.mxu0 %v22524_v15  ;;  %v5086_v15 = vld [vmem:[%s28789_s19 + $0x43] sm:$0xff]  ;;  %v5088_v17 = vld [vmem:[%s28789_s19 + $0x53] sm:$0xff] }
 0x502   :  { %18313 = vmatprep.subr.bf16.mxu0 %v22525_v18  ;;  %v5129_v19 = vpack.c.bf16 %v5088_v17, %v5087_v16 }
 0x505   :  { %18314 = vmatpush3.bf16.msra.mxu0 %v22525_v18  ;;  %v5128_v18 = vpack.c.bf16 %v5086_v15, %v5085_v14  ;;  %v5123_v14 = vld [vmem:[%s28789_s19 + $0x16b] sm:$0xff]  ;;  %v5124_v15 = vld [vmem:[%s28789_s19 + $0x173] sm:$0xff] }
 0x506   :  { %18315 = vmatprep.subr.bf16.mxu0 %v22526_v23  ;;  %v5147_v17 = vpack.c.bf16 %v5124_v15, %v5123_v14  ;;  %v5501_v15 = vld [vmem:[%s28789_s19 + $0x13c] sm:$0xff] }
 0x508   :  { %18272 = vmatmul.mubr.bf16.gmra.mrb[8].mxu0 %v4748_v24  ;;  %v5092_v24 = vld [vmem:[%s28789_s19 + $0x73] sm:$0xff] }
 0x509   :  { %18275 = vmatprep.mubr.bf16.mxu0 %v4749_v25  ;;  %18316 = vmatpush3.bf16.msra.mxu0 %v22526_v23  ;;  %v5091_v23 = vld [vmem:[%s28789_s19 + $0x6b] sm:$0xff] }
 0x50a   :  { %18317 = vmatprep.subr.bf16.mxu0 %v22527_v26  ;;  %v22532_v25 = vld [vmem:[#allocation5 + $0x390] sm:$0xff]   ;;  %v5131_v27 = vpack.c.bf16 %v5092_v24, %v5091_v23  ;;  %v5469_v24 = vld [vmem:[%s28789_s19 + $0x3c] sm:$0xff] }
 0x50d   :  { %18318 = vmatpush3.bf16.msra.mxu0 %v22527_v26  ;;  %v5130_v26 = vpack.c.bf16 %v5090_v22, %v5089_v21  ;;  %v5468_v21 = vld [vmem:[%s28789_s19 + $0x34] sm:$0xff] }
 0x50e   :  { %18319 = vmatprep.subr.bf16.mxu0 %v22528_v31 }
 0x510   :  { %18276 = vmatmul.mubr.bf16.gmra.mrb[12].mxu0 %v4750_v32  ;;  %v5096_v32 = vld [vmem:[%s28789_s19 + $0x93] sm:$0xff] }
 0x511   :  { %18279 = vmatprep.mubr.bf16.mxu0 %v4751_v33  ;;  %18320 = vmatpush3.bf16.msra.mxu0 %v22528_v31  ;;  %v5095_v31 = vld [vmem:[%s28789_s19 + $0x8b] sm:$0xff]  ;;  %v22534_v33 = vld [vmem:[#allocation5 + $0x3a0] sm:$0xff]  }
 0x512   :  { %18321 = vmatprep.subr.bf16.mxu0 %v22529_v34  ;;  %v5133_v35 = vpack.c.bf16 %v5096_v32, %v5095_v31  ;;  %v5473_v31 = vld [vmem:[%s28789_s19 + $0x5c] sm:$0xff]  ;;  %v5474_v32 = vld [vmem:[%s28789_s19 + $0x64] sm:$0xff] }
 0x515   :  { %18322 = vmatpush3.bf16.msra.mxu0 %v22529_v34  ;;  %v5132_v34 = vpack.c.bf16 %v5094_v30, %v5093_v29  ;;  %v22539_v30 = vld [vmem:[#allocation5 + $0x3c8] sm:$0xff]  }
 0x516   :  { %18367 = vmatprep.subr.bf16.mxu0 %v25245_v39 }
 0x518   :  { %18280 = vmatmul.mubr.bf16.gmra.mrb[16].mxu0 %v4752_v40  ;;  %v5100_v40 = vld [vmem:[%s28789_s19 + $0xb3] sm:$0xff] }
 0x519   :  { %18283 = vmatprep.mubr.bf16.mxu0 %v4753_v41  ;;  %v22536_v41 = vld [vmem:[#allocation5 + $0x3b0] sm:$0xff]  }
 0x520   :  { %18284 = vmatmul.mubr.bf16.gmra.mrb[20].mxu0 %v4754_v46  ;;  %v5102_v46 = vld [vmem:[%s28789_s19 + $0xc3] sm:$0xff] }
 0x521   :  { %18287 = vmatprep.mubr.bf16.mxu0 %v4755_v47  ;;  %v5103_v47 = vld [vmem:[%s28789_s19 + $0xcb] sm:$0xff]  ;;  %v5136_v50 = vpack.c.bf16 %v5102_v46, %v5101_v45  ;;  %v22543_v46 = vld [vmem:[#allocation5 + $0x3e8] sm:$0xff]  }
 0x522   :  { %v5137_v51 = vpack.c.bf16 %v5104_v48, %v5103_v47  ;;  %v5481_v47 = vld [vmem:[%s28789_s19 + $0x9c] sm:$0xff]  ;;  %v5482_v48 = vld [vmem:[%s28789_s19 + $0xa4] sm:$0xff] }
 0x528   :  { %18288 = vmatmul.mubr.bf16.gmra.mrb[24].mxu0 %v4756_v52  ;;  %v5105_v52 = vld [vmem:[%s28789_s19 + $0xdb] sm:$0xff] }
 0x529   :  { %18291 = vmatprep.mubr.bf16.mxu0 %v4757_v53  ;;  %v5106_v53 = vld [vmem:[%s28789_s19 + $0xe3] sm:$0xff] }
 0x52a   :  { %v5138_v56 = vpack.c.bf16 %v5106_v53, %v5105_v52  ;;  %v5518_v52 = vpack.c.bf16 %v5482_v48, %v5481_v47  ;;  %v5863_v47 = vld [vmem:[%s28789_s19 + $0x8d] sm:$0xff]  ;;  %v5864_v48 = vld [vmem:[%s28789_s19 + $0x95] sm:$0xff] }
 0x530   :  { %18292 = vmatmul.mubr.bf16.gmra.mrb[28].mxu0 %v4758_v58  ;;  %v5109_v58 = vld [vmem:[%s28789_s19 + $0xfb] sm:$0xff] }
 0x531   :  { %18295 = vmatprep.mubr.bf16.mxu0 %v4759_v59  ;;  %v5110_v59 = vld [vmem:[%s28789_s19 + $0x103] sm:$0xff] }
 0x532   :  { %v5140_v62 = vpack.c.bf16 %v5110_v59, %v5109_v58  ;;  %v5488_v58 = vld [vmem:[%s28789_s19 + $0xd4] sm:$0xff] }
 0x538   :  { %18296 = vmatmul.mubr.bf16.gmra.mrb[32].mxu0 %v4760_v0  ;;  %v5113_v0 = vld [vmem:[%s28789_s19 + $0x11b] sm:$0xff] }
 0x539   :  { %18299 = vmatprep.mubr.bf16.mxu0 %v4761_v1  ;;  %v5114_v1 = vld [vmem:[%s28789_s19 + $0x123] sm:$0xff] }
 0x53a   :  { %v5142_v4 = vpack.c.bf16 %v5114_v1, %v5113_v0  ;;  %v5492_v0 = vld [vmem:[%s28789_s19 + $0xf4] sm:$0xff] }
 0x540   :  { %18300 = vmatmul.mubr.bf16.gmra.mrb[36].mxu0 %v4762_v6  ;;  %v5117_v6 = vld [vmem:[%s28789_s19 + $0x13b] sm:$0xff] }
 0x541   :  { %18303 = vmatprep.mubr.bf16.mxu0 %v4763_v7  ;;  %v5118_v7 = vld [vmem:[%s28789_s19 + $0x143] sm:$0xff] }
 0x542   :  { %v5144_v10 = vpack.c.bf16 %v5118_v7, %v5117_v6  ;;  %v5496_v6 = vld [vmem:[%s28789_s19 + $0x114] sm:$0xff] }
 0x548   :  { %18304 = vmatmul.mubr.bf16.gmra.mrb[40].mxu0 %v4764_v12  ;;  %v5121_v12 = vld [vmem:[%s28789_s19 + $0x15b] sm:$0xff] }
 0x549   :  { %18323 = vmatprep.mubr.bf16.mxu0 %v5127_v13  ;;  %v5122_v13 = vld [vmem:[%s28789_s19 + $0x163] sm:$0xff] }
 0x54a   :  { %v5146_v16 = vpack.c.bf16 %v5122_v13, %v5121_v12  ;;  %v5500_v12 = vld [vmem:[%s28789_s19 + $0x134] sm:$0xff] }
 0x550   :  { %18324 = vmatmul.mubr.bf16.vlgmr.msra.gmra.mrb[0].mxu0 %v5128_v18  ;;  %v5125_v18 = vld [vmem:[%s28789_s19 + $0x17b] sm:$0xff] }
 0x551   :  { %18327 = vmatprep.mubr.bf16.mxu0 %v5129_v19  ;;  %18368 = vmatpush3.bf16.msra.mxu0 %v25245_v39  ;;  %v5099_v39 = vld [vmem:[%s28789_s19 + $0xab] sm:$0xff]  ;;  %v5126_v19 = vld [vmem:[%s28789_s19 + $0x183] sm:$0x7] }
 0x552   :  { %18369 = vmatprep.subr.bf16.mxu0 %v22531_v20  ;;  %v5135_v43 = vpack.c.bf16 %v5100_v40, %v5099_v39  ;;  %v5148_v22 = vpack.c.bf16 %v5126_v19, %v5125_v18  ;;  %v5477_v39 = vld [vmem:[%s28789_s19 + $0x7c] sm:$0xff]  ;;  %v5478_v40 = vld [vmem:[%s28789_s19 + $0x84] sm:$0xff]  ;;  %v5504_v18 = vld [vmem:[%s28789_s19 + $0x154] sm:$0xff] }
 0x555   :  { %18370 = vmatpush3.bf16.msra.mxu0 %v22531_v20  ;;  %v5467_v20 = vld [vmem:[%s28789_s19 + $0x2c] sm:$0xff] }
 0x556   :  { %18371 = vmatprep.subr.bf16.mxu0 %v22532_v25  ;;  %v5511_v23 = vpack.c.bf16 %v5468_v21, %v5467_v20  ;;  %v5505_v21 = vld [vmem:[%s28789_s19 + $0x15c] sm:$0xff] }
 0x558   :  { %18328 = vmatmul.mubr.bf16.gmra.mrb[4].mxu0 %v5130_v26  ;;  %v5471_v26 = vld [vmem:[%s28789_s19 + $0x4c] sm:$0xff] }
 0x559   :  { %18331 = vmatprep.mubr.bf16.mxu0 %v5131_v27  ;;  %18372 = vmatpush3.bf16.msra.mxu0 %v22532_v25  ;;  %v5470_v25 = vld [vmem:[%s28789_s19 + $0x44] sm:$0xff]  ;;  %v5472_v27 = vld [vmem:[%s28789_s19 + $0x54] sm:$0xff] }
 0x55a   :  { %18373 = vmatprep.subr.bf16.mxu0 %v22533_v28  ;;  %v5513_v29 = vpack.c.bf16 %v5472_v27, %v5471_v26  ;;  %v5509_v27 = vld [vmem:[%s28789_s19 + $0x17c] sm:$0xff] }
 0x55d   :  { %18374 = vmatpush3.bf16.msra.mxu0 %v22533_v28  ;;  %v5512_v28 = vpack.c.bf16 %v5470_v25, %v5469_v24  ;;  %v5508_v24 = vld [vmem:[%s28789_s19 + $0x174] sm:$0xff] }
 0x55e   :  { %18375 = vmatprep.subr.bf16.mxu0 %v22534_v33 }
 0x560   :  { %18332 = vmatmul.mubr.bf16.gmra.mrb[8].mxu0 %v5132_v34  ;;  %v5476_v34 = vld [vmem:[%s28789_s19 + $0x74] sm:$0xff] }
 0x561   :  { %18335 = vmatprep.mubr.bf16.mxu0 %v5133_v35  ;;  %18376 = vmatpush3.bf16.msra.mxu0 %v22534_v33  ;;  %v5475_v33 = vld [vmem:[%s28789_s19 + $0x6c] sm:$0xff] }
 0x562   :  { %18377 = vmatprep.subr.bf16.mxu0 %v22535_v36  ;;  %v22540_v35 = vld [vmem:[#allocation5 + $0x3d0] sm:$0xff]   ;;  %v5515_v37 = vpack.c.bf16 %v5476_v34, %v5475_v33  ;;  %v5853_v33 = vld [vmem:[%s28789_s19 + $0x3d] sm:$0xff] }
 0x563   :  { %v5854_v34 = vld [vmem:[%s28789_s19 + $0x45] sm:$0xff] }
 0x565   :  { %18378 = vmatpush3.bf16.msra.mxu0 %v22535_v36  ;;  %v5514_v36 = vpack.c.bf16 %v5474_v32, %v5473_v31 }
 0x566   :  { %18379 = vmatprep.subr.bf16.mxu0 %v22536_v41 }
 0x568   :  { %18336 = vmatmul.mubr.bf16.gmra.mrb[12].mxu0 %v5134_v42  ;;  %v5480_v42 = vld [vmem:[%s28789_s19 + $0x94] sm:$0xff] }
 0x569   :  { %18339 = vmatprep.mubr.bf16.mxu0 %v5135_v43  ;;  %18380 = vmatpush3.bf16.msra.mxu0 %v22536_v41  ;;  %v5479_v41 = vld [vmem:[%s28789_s19 + $0x8c] sm:$0xff]  ;;  %v22542_v43 = vld [vmem:[#allocation5 + $0x3e0] sm:$0xff]  }
 0x56a   :  { %18381 = vmatprep.subr.bf16.mxu0 %v22537_v44  ;;  %v5517_v45 = vpack.c.bf16 %v5480_v42, %v5479_v41  ;;  %v5859_v41 = vld [vmem:[%s28789_s19 + $0x6d] sm:$0xff]  ;;  %v5860_v42 = vld [vmem:[%s28789_s19 + $0x75] sm:$0xff] }
 0x56d   :  { %18382 = vmatpush3.bf16.msra.mxu0 %v22537_v44  ;;  %v5516_v44 = vpack.c.bf16 %v5478_v40, %v5477_v39  ;;  %v5857_v39 = vld [vmem:[%s28789_s19 + $0x5d] sm:$0xff]  ;;  %v5858_v40 = vld [vmem:[%s28789_s19 + $0x65] sm:$0xff] }
 0x56e   :  { %18427 = vmatprep.subr.bf16.mxu0 %v25381_v49 }
 0x570   :  { %18340 = vmatmul.mubr.bf16.gmra.mrb[16].mxu0 %v5136_v50  ;;  %v5484_v50 = vld [vmem:[%s28789_s19 + $0xb4] sm:$0xff] }
 0x571   :  { %18343 = vmatprep.mubr.bf16.mxu0 %v5137_v51  ;;  %v22544_v51 = vld [vmem:[#allocation5 + $0x3f0] sm:$0xff]  }
 0x578   :  { %18344 = vmatmul.mubr.bf16.gmra.mrb[20].mxu0 %v5138_v56  ;;  %v5486_v56 = vld [vmem:[%s28789_s19 + $0xc4] sm:$0xff] }
 0x579   :  { %18347 = vmatprep.mubr.bf16.mxu0 %v5139_v57  ;;  %v5487_v57 = vld [vmem:[%s28789_s19 + $0xcc] sm:$0xff]  ;;  %v5520_v59 = vpack.c.bf16 %v5486_v56, %v5485_v55 }
 0x57a   :  { %v5521_v60 = vpack.c.bf16 %v5488_v58, %v5487_v57  ;;  %v5869_v57 = vld [vmem:[%s28789_s19 + $0xbd] sm:$0xff]  ;;  %v5870_v58 = vld [vmem:[%s28789_s19 + $0xc5] sm:$0xff] }
 0x580   :  { %18348 = vmatmul.mubr.bf16.gmra.mrb[24].mxu0 %v5140_v62  ;;  %v5490_v62 = vld [vmem:[%s28789_s19 + $0xe4] sm:$0xff] }
 0x581   :  { %18351 = vmatprep.mubr.bf16.mxu0 %v5141_v63  ;;  %v5491_v63 = vld [vmem:[%s28789_s19 + $0xec] sm:$0xff]  ;;  %v5522_v1 = vpack.c.bf16 %v5490_v62, %v5489_v61  ;;  %v5904_v61 = vpack.c.bf16 %v5870_v58, %v5869_v57 }
 0x582   :  { %v5523_v2 = vpack.c.bf16 %v5492_v0, %v5491_v63  ;;  %v5873_v63 = vld [vmem:[%s28789_s19 + $0xdd] sm:$0xff]  ;;  %v5874_v0 = vld [vmem:[%s28789_s19 + $0xe5] sm:$0xff] }
 0x588   :  { %18352 = vmatmul.mubr.bf16.gmra.mrb[28].mxu0 %v5142_v4  ;;  %v5494_v4 = vld [vmem:[%s28789_s19 + $0x104] sm:$0xff] }
 0x589   :  { %18355 = vmatprep.mubr.bf16.mxu0 %v5143_v5  ;;  %v5495_v5 = vld [vmem:[%s28789_s19 + $0x10c] sm:$0xff]  ;;  %v5524_v7 = vpack.c.bf16 %v5494_v4, %v5493_v3  ;;  %v5906_v3 = vpack.c.bf16 %v5874_v0, %v5873_v63 }
 0x58a   :  { %v5525_v8 = vpack.c.bf16 %v5496_v6, %v5495_v5  ;;  %v5877_v5 = vld [vmem:[%s28789_s19 + $0xfd] sm:$0xff]  ;;  %v5878_v6 = vld [vmem:[%s28789_s19 + $0x105] sm:$0xff] }
 0x590   :  { %18356 = vmatmul.mubr.bf16.gmra.mrb[32].mxu0 %v5144_v10  ;;  %v5498_v10 = vld [vmem:[%s28789_s19 + $0x124] sm:$0xff] }
 0x591   :  { %18359 = vmatprep.mubr.bf16.mxu0 %v5145_v11  ;;  %v5499_v11 = vld [vmem:[%s28789_s19 + $0x12c] sm:$0xff]  ;;  %v5526_v13 = vpack.c.bf16 %v5498_v10, %v5497_v9  ;;  %v5908_v9 = vpack.c.bf16 %v5878_v6, %v5877_v5 }
 0x592   :  { %v5527_v14 = vpack.c.bf16 %v5500_v12, %v5499_v11  ;;  %v5881_v11 = vld [vmem:[%s28789_s19 + $0x11d] sm:$0xff]  ;;  %v5882_v12 = vld [vmem:[%s28789_s19 + $0x125] sm:$0xff] }
 0x598   :  { %18360 = vmatmul.mubr.bf16.gmra.mrb[36].mxu0 %v5146_v16  ;;  %v5502_v16 = vld [vmem:[%s28789_s19 + $0x144] sm:$0xff] }
 0x599   :  { %18363 = vmatprep.mubr.bf16.mxu0 %v5147_v17  ;;  %v5503_v17 = vld [vmem:[%s28789_s19 + $0x14c] sm:$0xff]  ;;  %v5528_v19 = vpack.c.bf16 %v5502_v16, %v5501_v15  ;;  %v5910_v15 = vpack.c.bf16 %v5882_v12, %v5881_v11 }
 0x59a   :  { %v5529_v20 = vpack.c.bf16 %v5504_v18, %v5503_v17  ;;  %v5885_v17 = vld [vmem:[%s28789_s19 + $0x13d] sm:$0xff]  ;;  %v5886_v18 = vld [vmem:[%s28789_s19 + $0x145] sm:$0xff] }
 0x5a0   :  { %18364 = vmatmul.mubr.bf16.gmra.mrb[40].mxu0 %v5148_v22  ;;  %v5506_v22 = vld [vmem:[%s28789_s19 + $0x164] sm:$0xff] }
 0x5a1   :  { %18383 = vmatprep.mubr.bf16.mxu0 %v5511_v23  ;;  %v5507_v23 = vld [vmem:[%s28789_s19 + $0x16c] sm:$0xff]  ;;  %v5530_v25 = vpack.c.bf16 %v5506_v22, %v5505_v21  ;;  %v5912_v21 = vpack.c.bf16 %v5886_v18, %v5885_v17 }
 0x5a2   :  { %v5531_v26 = vpack.c.bf16 %v5508_v24, %v5507_v23  ;;  %v5889_v23 = vld [vmem:[%s28789_s19 + $0x15d] sm:$0xff]  ;;  %v5890_v24 = vld [vmem:[%s28789_s19 + $0x165] sm:$0xff] }
 0x5a8   :  { %18384 = vmatmul.mubr.bf16.vlgmr.msra.gmra.mrb[0].mxu0 %v5512_v28  ;;  %v5510_v28 = vld [vmem:[%s28789_s19 + $0x184] sm:$0x7] }
 0x5a9   :  { %18387 = vmatprep.mubr.bf16.mxu0 %v5513_v29  ;;  %18428 = vmatpush3.bf16.msra.mxu0 %v25381_v49  ;;  %v5483_v49 = vld [vmem:[%s28789_s19 + $0xac] sm:$0xff]  ;;  %v5532_v31 = vpack.c.bf16 %v5510_v28, %v5509_v27  ;;  %v5914_v27 = vpack.c.bf16 %v5890_v24, %v5889_v23  ;;  %v22549_v24 = vld [vmem:[%s28658_s11 + $0x1c] ss:$12 sps:$4 sm:$0xff]  }
 0x5aa   :  { %18429 = vmatprep.subr.bf16.mxu0 %v22539_v30  ;;  %v5519_v53 = vpack.c.bf16 %v5484_v50, %v5483_v49  ;;  %v5851_v29 = vld [vmem:[%s28789_s19 + $0x2d] sm:$0xff]  ;;  %v5901_v50 = vpack.c.bf16 %v5864_v48, %v5863_v47 }
 0x5ad   :  { %18430 = vmatpush3.bf16.msra.mxu0 %v22539_v30  ;;  %v5852_v30 = vld [vmem:[%s28789_s19 + $0x35] sm:$0xff] }
 0x5ae   :  { %18431 = vmatprep.subr.bf16.mxu0 %v22540_v35  ;;  %v5895_v32 = vpack.c.bf16 %v5852_v30, %v5851_v29  ;;  %v5893_v29 = vld [vmem:[%s28789_s19 + $0x17d] sm:$0xff]  ;;  %v5894_v30 = vld [vmem:[%s28789_s19 + $0x185] sm:$0x7] }
 0x5b0   :  { %18388 = vmatmul.mubr.bf16.gmra.mrb[4].mxu0 %v5514_v36  ;;  %v5856_v36 = vld [vmem:[%s28789_s19 + $0x55] sm:$0xff] }
 0x5b1   :  { %18391 = vmatprep.mubr.bf16.mxu0 %v5515_v37  ;;  %18432 = vmatpush3.bf16.msra.mxu0 %v22540_v35  ;;  %v5855_v35 = vld [vmem:[%s28789_s19 + $0x4d] sm:$0xff]  ;;  %v5896_v37 = vpack.c.bf16 %v5854_v34, %v5853_v33 }
 0x5b2   :  { %18433 = vmatprep.subr.bf16.mxu0 %v22541_v38  ;;  %v22552_v33 = vld [vmem:[%s28658_s11 + $0x8] ss:$12 sps:$4 sm:$0xff]  }
 0x5b3   :  { %18499 = vmatprep.mubr.msk.bf16.mxu1 %vm6561_vm0, %v22552_v33 }
 0x5b5   :  { %18434 = vmatpush3.bf16.msra.mxu0 %v22541_v38  ;;  %v5897_v38 = vpack.c.bf16 %v5856_v36, %v5855_v35 }
 0x5b6   :  { %18435 = vmatprep.subr.bf16.mxu0 %v22542_v43 }
 0x5b8   :  { %18392 = vmatmul.mubr.bf16.gmra.mrb[8].mxu0 %v5516_v44  ;;  %v5899_v44 = vpack.c.bf16 %v5860_v42, %v5859_v41 }
 0x5b9   :  { %18395 = vmatprep.mubr.bf16.mxu0 %v5517_v45  ;;  %18436 = vmatpush3.bf16.msra.mxu0 %v22542_v43  ;;  %v5898_v43 = vpack.c.bf16 %v5858_v40, %v5857_v39  ;;  %v5861_v45 = vld [vmem:[%s28789_s19 + $0x7d] sm:$0xff] }
 0x5ba   :  { %18437 = vmatprep.subr.bf16.mxu0 %v22543_v46 }
 0x5bd   :  { %18438 = vmatpush3.bf16.msra.mxu0 %v22543_v46  ;;  %v5862_v46 = vld [vmem:[%s28789_s19 + $0x85] sm:$0xff] }
 0x5be   :  { %18439 = vmatprep.subr.bf16.mxu0 %v22544_v51  ;;  %v5900_v49 = vpack.c.bf16 %v5862_v46, %v5861_v45 }
 0x5c0   :  { %18396 = vmatmul.mubr.bf16.gmra.mrb[12].mxu0 %v5518_v52  ;;  %v5866_v52 = vld [vmem:[%s28789_s19 + $0xa5] sm:$0xff] }
 0x5c1   :  { %18399 = vmatprep.mubr.bf16.mxu0 %v5519_v53  ;;  %18440 = vmatpush3.bf16.msra.mxu0 %v22544_v51  ;;  %v5865_v51 = vld [vmem:[%s28789_s19 + $0x9d] sm:$0xff]  ;;  %v5867_v53 = vld [vmem:[%s28789_s19 + $0xad] sm:$0xff] }
 0x5c2   :  { %18441 = vmatprep.subr.bf16.mxu0 %v22545_v54  ;;  %v5902_v55 = vpack.c.bf16 %v5866_v52, %v5865_v51 }
 0x5c5   :  { %18442 = vmatpush3.bf16.msra.mxu0 %v22545_v54  ;;  %v5868_v54 = vld [vmem:[%s28789_s19 + $0xb5] sm:$0xff] }
 0x5c6   :  { %v5903_v56 = vpack.c.bf16 %v5868_v54, %v5867_v53 }
 0x5c8   :  { %18400 = vmatmul.mubr.bf16.gmra.mrb[16].mxu0 %v5520_v59  ;;  %v5871_v59 = vld [vmem:[%s28789_s19 + $0xcd] sm:$0xff] }
 0x5c9   :  { %18403 = vmatprep.mubr.bf16.mxu0 %v5521_v60  ;;  %v5872_v60 = vld [vmem:[%s28789_s19 + $0xd5] sm:$0xff] }
 0x5ca   :  { %v5905_v62 = vpack.c.bf16 %v5872_v60, %v5871_v59 }
 0x5d0   :  { %18404 = vmatmul.mubr.bf16.gmra.mrb[20].mxu0 %v5522_v1  ;;  %v5875_v1 = vld [vmem:[%s28789_s19 + $0xed] sm:$0xff] }
 0x5d1   :  { %18407 = vmatprep.mubr.bf16.mxu0 %v5523_v2  ;;  %v5876_v2 = vld [vmem:[%s28789_s19 + $0xf5] sm:$0xff] }
 0x5d2   :  { %v5907_v4 = vpack.c.bf16 %v5876_v2, %v5875_v1 }
 0x5d8   :  { %18408 = vmatmul.mubr.bf16.gmra.mrb[24].mxu0 %v5524_v7  ;;  %v5879_v7 = vld [vmem:[%s28789_s19 + $0x10d] sm:$0xff] }
 0x5d9   :  { %18411 = vmatprep.mubr.bf16.mxu0 %v5525_v8  ;;  %v5880_v8 = vld [vmem:[%s28789_s19 + $0x115] sm:$0xff] }
 0x5da   :  { %v5909_v10 = vpack.c.bf16 %v5880_v8, %v5879_v7 }
 0x5e0   :  { %18412 = vmatmul.mubr.bf16.gmra.mrb[28].mxu0 %v5526_v13  ;;  %v5883_v13 = vld [vmem:[%s28789_s19 + $0x12d] sm:$0xff] }
 0x5e1   :  { %18415 = vmatprep.mubr.bf16.mxu0 %v5527_v14  ;;  %v5884_v14 = vld [vmem:[%s28789_s19 + $0x135] sm:$0xff] }
 0x5e2   :  { %v5911_v16 = vpack.c.bf16 %v5884_v14, %v5883_v13 }
 0x5e8   :  { %18416 = vmatmul.mubr.bf16.gmra.mrb[32].mxu0 %v5528_v19  ;;  %v5887_v19 = vld [vmem:[%s28789_s19 + $0x14d] sm:$0xff] }
 0x5e9   :  { %18419 = vmatprep.mubr.bf16.mxu0 %v5529_v20  ;;  %v5888_v20 = vld [vmem:[%s28789_s19 + $0x155] sm:$0xff] }
 0x5ea   :  { %v5913_v22 = vpack.c.bf16 %v5888_v20, %v5887_v19 }
 0x5f0   :  { %18420 = vmatmul.mubr.bf16.gmra.mrb[36].mxu0 %v5530_v25  ;;  %v5891_v25 = vld [vmem:[%s28789_s19 + $0x16d] sm:$0xff] }
 0x5f1   :  { %18423 = vmatprep.mubr.bf16.mxu0 %v5531_v26  ;;  %v5892_v26 = vld [vmem:[%s28789_s19 + $0x175] sm:$0xff] }
 0x5f2   :  { %v5915_v28 = vpack.c.bf16 %v5892_v26, %v5891_v25  ;;  %v28665_v26 = vmov 0.0  }
 0x5f8   :  { %18424 = vmatmul.mubr.bf16.gmra.mrb[40].mxu0 %v5532_v31  ;;  %v5916_v31 = vpack.c.bf16 %v5894_v30, %v5893_v29  ;;  %v22609_v29 = vld [vmem:[%s28649_s2 + $0x48] sm:$0xff]  }
 0x5f9   :  { %18443 = vmatprep.mubr.bf16.mxu0 %v5895_v32  ;;  %v22548_v32 = vld [vmem:[%s28658_s11 + $0x4] ss:$12 sps:$4 sm:$0xff]  }
 0x600   :  { %18444 = vmatmul.mubr.bf16.vlgmr.msra.gmra.mrb[0].mxu0 %v5896_v37 }
 0x601   :  { %18447 = vmatprep.mubr.bf16.mxu0 %v5897_v38 }
 0x608   :  { %18448 = vmatmul.mubr.bf16.gmra.mrb[4].mxu0 %v5898_v43 }
 0x609   :  { %18451 = vmatprep.mubr.bf16.mxu0 %v5899_v44 }
 0x610   :  { %18452 = vmatmul.mubr.bf16.gmra.mrb[8].mxu0 %v5900_v49 }
 0x611   :  { %18455 = vmatprep.mubr.bf16.mxu0 %v5901_v50 }
 0x618   :  { %18456 = vmatmul.mubr.bf16.gmra.mrb[12].mxu0 %v5902_v55 }
 0x619   :  { %18459 = vmatprep.mubr.bf16.mxu0 %v5903_v56 }
 0x620   :  { %18460 = vmatmul.mubr.bf16.gmra.mrb[16].mxu0 %v5904_v61 }
 0x621   :  { %18463 = vmatprep.mubr.bf16.mxu0 %v5905_v62 }
 0x628   :  { %18464 = vmatmul.mubr.bf16.gmra.mrb[20].mxu0 %v5906_v3 }
 0x629   :  { %18467 = vmatprep.mubr.bf16.mxu0 %v5907_v4 }
 0x630   :  { %18468 = vmatmul.mubr.bf16.gmra.mrb[24].mxu0 %v5908_v9 }
 0x631   :  { %18471 = vmatprep.mubr.bf16.mxu0 %v5909_v10 }
 0x638   :  { %18472 = vmatmul.mubr.bf16.gmra.mrb[28].mxu0 %v5910_v15 }
 0x639   :  { %18475 = vmatprep.mubr.bf16.mxu0 %v5911_v16 }
 0x640   :  { %18476 = vmatmul.mubr.bf16.gmra.mrb[32].mxu0 %v5912_v21  ;;  %v22546_v21 = vld [vmem:[%s28658_s11] ss:$12 sps:$4 sm:$0xff]  }
 0x641   :  { %18479 = vmatprep.mubr.bf16.mxu0 %v5913_v22 }
 0x648   :  { %18480 = vmatmul.mubr.bf16.gmra.mrb[36].mxu0 %v5914_v27  ;;  %v22607_v27 = vld [vmem:[%s28649_s2 + $0x40] sm:$0xff]  }
 0x649   :  { %18483 = vmatprep.mubr.bf16.mxu0 %v5915_v28 }
 0x650   :  { %18484 = vmatmul.mubr.bf16.gmra.mrb[40].mxu0 %v5916_v31 }
 0x651   :  { %6649 = vmatprep.mubr.bf16.mxu0 %v22548_v32  ;;  %v22551_v32 = vld [vmem:[%s28658_s11 + $0x18] ss:$12 sps:$4 sm:$0xff]  }
 0x6d3   :  { %v18445_v34 = vpop.f32.mrb[0].mxu0 }
 0x6d4   :  { %v6016_v35 = vpop.f32.mrb[1].mxu0 }
 0x6d5   :  { %v18446_v36 = vpop.f32.mrb[2].mxu0 }
 0x6d6   :  { %v6298_v37 = vpack.c.bf16 %v18446_v36, %v18445_v34  ;;  %v6019_v38 = vpop.f32.mrb[3].mxu0 }
 0x6d7   :  { %v6297_v39 = vpack.c.bf16 %v6019_v38, %v6016_v35  ;;  %v22554_v35 = vld [vmem:[%s28658_s11 + $0x34] ss:$12 sps:$4 sm:$0xff]  }
 0x6db   :  { %v18449_v40 = vpop.f32.mrb[4].mxu0 }
 0x6dc   :  { %v6032_v41 = vpop.f32.mrb[5].mxu0 }
 0x6dd   :  { %v18450_v42 = vpop.f32.mrb[6].mxu0 }
 0x6de   :  { %v6300_v43 = vpack.c.bf16 %v18450_v42, %v18449_v40  ;;  %v6035_v44 = vpop.f32.mrb[7].mxu0 }
 0x6df   :  { %v6299_v45 = vpack.c.bf16 %v6035_v44, %v6032_v41 }
 0x6e3   :  { %v18453_v46 = vpop.f32.mrb[8].mxu0 }
 0x6e4   :  { %v6048_v47 = vpop.f32.mrb[9].mxu0 }
 0x6e5   :  { %v18454_v48 = vpop.f32.mrb[10].mxu0 }
 0x6e6   :  { %v6302_v49 = vpack.c.bf16 %v18454_v48, %v18453_v46  ;;  %v6051_v50 = vpop.f32.mrb[11].mxu0  ;;  %v22559_v46 = vld [vmem:[%s28658_s11 + $0x4c] ss:$12 sps:$4 sm:$0xff]  }
 0x6e7   :  { %v6301_v51 = vpack.c.bf16 %v6051_v50, %v6048_v47  ;;  %v22561_v50 = vld [vmem:[%s28658_s11 + $0x48] ss:$12 sps:$4 sm:$0xff]  }
 0x6eb   :  { %v18457_v52 = vpop.f32.mrb[12].mxu0 }
 0x6ec   :  { %v6064_v53 = vpop.f32.mrb[13].mxu0 }
 0x6ed   :  { %v18458_v54 = vpop.f32.mrb[14].mxu0 }
 0x6ee   :  { %v6304_v55 = vpack.c.bf16 %v18458_v54, %v18457_v52  ;;  %v6067_v56 = vpop.f32.mrb[15].mxu0  ;;  %v22562_v52 = vld [vmem:[%s28658_s11 + $0x64] ss:$12 sps:$4 sm:$0xff]   ;;  %v22610_v54 = vld [vmem:[%s28649_s2 + $0xc8] sm:$0xff]  }
 0x6ef   :  { %v6303_v57 = vpack.c.bf16 %v6067_v56, %v6064_v53  ;;  %v22608_v53 = vld [vmem:[%s28649_s2 + $0xc0] sm:$0xff]  }
 0x6f0   :  { %v22564_v56 = vld [vmem:[%s28658_s11 + $0x60] ss:$12 sps:$4 sm:$0xff]  }
 0x6f3   :  { %v18461_v58 = vpop.f32.mrb[16].mxu0 }
 0x6f4   :  { %v6080_v59 = vpop.f32.mrb[17].mxu0 }
 0x6f5   :  { %v18462_v60 = vpop.f32.mrb[18].mxu0 }
 0x6f6   :  { %v6306_v61 = vpack.c.bf16 %v18462_v60, %v18461_v58  ;;  %v6083_v62 = vpop.f32.mrb[19].mxu0  ;;  %v22567_v58 = vld [vmem:[%s28658_s11 + $0x7c] ss:$12 sps:$4 sm:$0xff]   ;;  %v22569_v60 = vld [vmem:[%s28658_s11 + $0x78] ss:$12 sps:$4 sm:$0xff]  }
 0x6f7   :  { %v6305_v63 = vpack.c.bf16 %v6083_v62, %v6080_v59  ;;  %v22566_v59 = vld [vmem:[%s28658_s11 + $0x80] ss:$12 sps:$4 sm:$0xff]   ;;  %v22573_v62 = vld [vmem:[%s28658_s11 + $0x98] ss:$12 sps:$4 sm:$0xff]  }
 0x6f9   :  { %16745 = vmatprep.subr.bf16.mxu0 %v6305_v63  ;;  %v22572_v63 = vld [vmem:[%s28658_s11 + $0x90] ss:$12 sps:$4 sm:$0xff]  }
 0x6fa   :  { %16746 = vmatpush3.bf16.msra.mxu0 %v6297_v39 }
 0x6fb   :  { %v18465_v0 = vpop.f32.mrb[20].mxu0  ;;  %16747 = vmatprep.subr.bf16.mxu0 %v6306_v61  ;;  %v22570_v61 = vld [vmem:[%s28658_s11 + $0x94] ss:$12 sps:$4 sm:$0xff]  }
 0x6fc   :  { %v6096_v1 = vpop.f32.mrb[21].mxu0 }
 0x6fd   :  { %v18466_v2 = vpop.f32.mrb[22].mxu0 }
 0x6fe   :  { %v6308_v3 = vpack.c.bf16 %v18466_v2, %v18465_v0  ;;  %v6099_v4 = vpop.f32.mrb[23].mxu0  ;;  %16748 = vmatpush3.bf16.msra.mxu0 %v6298_v37  ;;  %v23295_v37 = vmov 65535   ;;  %v22574_v0 = vld [vmem:[%s28658_s11 + $0xb0] ss:$12 sps:$4 sm:$0xff]   ;;  %v22581_v2 = vld [vmem:[%s28658_s11 + $0xc8] ss:$12 sps:$4 sm:$0xff]  }
 0x6ff   :  { %v6307_v5 = vpack.c.bf16 %v6099_v4, %v6096_v1  ;;  %v6612_v38 = vsel %vm6610_vm1, 4294967295, %v23295_v37  ;;  %v22575_v1 = vld [vmem:[%s28658_s11 + $0xac] ss:$12 sps:$4 sm:$0xff]   ;;  %v22621_v37 = vld [vmem:[%s28649_s2 + $0x70] sm:$0xff]  }
 0x700   :  { %v6613_v42 = vsel %vm6611_vm2, %v6612_v38, 0  ;;  %v22582_v4 = vld [vmem:[%s28658_s11 + $0xe0] ss:$12 sps:$4 sm:$0xff]   ;;  %v22622_v38 = vld [vmem:[%s28649_s2 + $0xf0] sm:$0xff]  }
 0x701   :  { %16749 = vmatprep.subr.bf16.mxu0 %v6307_v5  ;;  %v22578_v5 = vld [vmem:[%s28658_s11 + $0xc4] ss:$12 sps:$4 sm:$0xff]  }
 0x702   :  { %16750 = vmatpush3.bf16.msra.mxu0 %v6299_v45 }
 0x703   :  { %v18469_v6 = vpop.f32.mrb[24].mxu0  ;;  %16751 = vmatprep.subr.bf16.mxu0 %v6308_v3  ;;  %v22577_v3 = vld [vmem:[%s28658_s11 + $0xa8] ss:$12 sps:$4 sm:$0xff]  }
 0x704   :  { %v6112_v7 = vpop.f32.mrb[25].mxu0 }
 0x705   :  { %v18470_v8 = vpop.f32.mrb[26].mxu0 }
 0x706   :  { %v6310_v9 = vpack.c.bf16 %v18470_v8, %v18469_v6  ;;  %v6115_v10 = vpop.f32.mrb[27].mxu0  ;;  %16752 = vmatpush3.bf16.msra.mxu0 %v6300_v43  ;;  %v22556_v43 = vld [vmem:[%s28658_s11 + $0x30] ss:$12 sps:$4 sm:$0xff]   ;;  %v22589_v6 = vld [vmem:[%s28658_s11 + $0xf8] ss:$12 sps:$4 sm:$0xff]  }
 0x707   :  { %v6309_v11 = vpack.c.bf16 %v6115_v10, %v6112_v7  ;;  %v22580_v7 = vld [vmem:[%s28658_s11 + $0xc0] ss:$12 sps:$4 sm:$0xff]   ;;  %v22590_v8 = vld [vmem:[%s28658_s11 + $0x110] ss:$12 sps:$4 sm:$0xff]   ;;  %v22597_v10 = vld [vmem:[%s28658_s11 + $0x128] ss:$12 sps:$4 sm:$0xff]  }
 0x709   :  { %16753 = vmatprep.subr.bf16.mxu0 %v6309_v11  ;;  %v22585_v11 = vld [vmem:[%s28658_s11 + $0xd8] ss:$12 sps:$4 sm:$0xff]  }
 0x70a   :  { %16754 = vmatpush3.bf16.msra.mxu0 %v6301_v51  ;;  %v22557_v51 = vld [vmem:[%s28658_s11 + $0x38] ss:$12 sps:$4 sm:$0xff]  }
 0x70b   :  { %v18473_v12 = vpop.f32.mrb[28].mxu0  ;;  %16755 = vmatprep.subr.bf16.mxu0 %v6310_v9  ;;  %v22583_v9 = vld [vmem:[%s28658_s11 + $0xdc] ss:$12 sps:$4 sm:$0xff]  }
 0x70c   :  { %v6128_v13 = vpop.f32.mrb[29].mxu0 }
 0x70d   :  { %v18474_v14 = vpop.f32.mrb[30].mxu0 }
 0x70e   :  { %v6312_v15 = vpack.c.bf16 %v18474_v14, %v18473_v12  ;;  %v6131_v16 = vpop.f32.mrb[31].mxu0  ;;  %16756 = vmatpush3.bf16.msra.mxu0 %v6302_v49  ;;  %v22553_v49 = vld [vmem:[%s28658_s11 + $0x20] ss:$12 sps:$4 sm:$0xff]   ;;  %v22605_v14 = vld [vmem:[%s28658_s11 + $0x158] ss:$12 sps:$4 sm:$0xff]  }
 0x70f   :  { %v6311_v17 = vpack.c.bf16 %v6131_v16, %v6128_v13  ;;  %v22598_v12 = vld [vmem:[%s28658_s11 + $0x140] ss:$12 sps:$4 sm:$0xff]   ;;  %v22606_v16 = vld [vmem:[%s28658_s11 + $0x170] ss:$0 sps:$4 sm:$0xff]  }
 0x710   :  { %v22586_v13 = vld [vmem:[%s28658_s11 + $0xf4] ss:$12 sps:$4 sm:$0xff]  }
 0x711   :  { %16757 = vmatprep.subr.bf16.mxu0 %v6311_v17  ;;  %v22591_v17 = vld [vmem:[%s28658_s11 + $0x10c] ss:$12 sps:$4 sm:$0xff]  }
 0x712   :  { %16758 = vmatpush3.bf16.msra.mxu0 %v6303_v57  ;;  %v22565_v57 = vld [vmem:[%s28658_s11 + $0x68] ss:$12 sps:$4 sm:$0xff]  }
 0x713   :  { %v18477_v18 = vpop.f32.mrb[32].mxu0  ;;  %16759 = vmatprep.subr.bf16.mxu0 %v6312_v15  ;;  %v22588_v15 = vld [vmem:[%s28658_s11 + $0xf0] ss:$12 sps:$4 sm:$0xff]  }
 0x714   :  { %v6144_v19 = vpop.f32.mrb[33].mxu0 }
 0x715   :  { %v18478_v20 = vpop.f32.mrb[34].mxu0 }
 0x716   :  { %v6314_v22 = vpack.c.bf16 %v18478_v20, %v18477_v18  ;;  %v6147_v23 = vpop.f32.mrb[35].mxu0  ;;  %16760 = vmatpush3.bf16.msra.mxu0 %v6304_v55  ;;  %v22558_v55 = vld [vmem:[%s28658_s11 + $0x50] ss:$12 sps:$4 sm:$0xff]   ;;  %v22593_v18 = vld [vmem:[%s28658_s11 + $0x108] ss:$12 sps:$4 sm:$0xff]  }
 0x717   :  { %v6313_v25 = vpack.c.bf16 %v6147_v23, %v6144_v19  ;;  %18531 = vmatprep.subr.bf16.mxu0 %v28665_v26  ;;  %v22594_v19 = vld [vmem:[%s28658_s11 + $0x124] ss:$12 sps:$4 sm:$0xff]   ;;  %v22599_v23 = vld [vmem:[%s28658_s11 + $0x13c] ss:$12 sps:$4 sm:$0xff]  }
 0x718   :  { %v22611_v20 = vld [vmem:[%s28649_s2 + $0x50] sm:$0xff]  }
 0x719   :  { %18487 = vmatprep.subr.bf16.mxu1 %v6313_v25  ;;  %6650 = vmatmul.mubr.bf16.vlgmr.msra.gmra.mrb[44].mxu0 %v22546_v21  ;;  %v22612_v21 = vld [vmem:[%s28649_s2 + $0xd0] sm:$0xff]  }
 0x71a   :  { %18488 = vmatpush3.bf16.msra.mxu1 %v6313_v25  ;;  %6657 = vmatprep.mubr.bf16.mxu0 %v22549_v24  ;;  %v22613_v24 = vld [vmem:[%s28649_s2 + $0x58] sm:$0xff]  }
 0x71b   :  { %v18481_v28 = vpop.f32.mrb[36].mxu0  ;;  %18489 = vmatprep.subr.bf16.mxu1 %v6314_v22  ;;  %18532 = vmatpush3.bf16.msra.mxu0 %v22607_v27  ;;  %v22614_v25 = vld [vmem:[%s28649_s2 + $0xd8] sm:$0xff]  }
 0x71c   :  { %v6160_v30 = vpop.f32.mrb[37].mxu0  ;;  %18533 = vmatprep.subr.bf16.mxu0 %v28665_v26  ;;  %v22601_v27 = vld [vmem:[%s28658_s11 + $0x138] ss:$12 sps:$4 sm:$0xff]  }
 0x71d   :  { %v18482_v31 = vpop.f32.mrb[38].mxu0 }
 0x71e   :  { %v6316_v33 = vpack.c.bf16 %v18482_v31, %v18481_v28  ;;  %v6163_v34 = vpop.f32.mrb[39].mxu0  ;;  %18490 = vmatpush3.bf16.msra.mxu1 %v6314_v22  ;;  %v22596_v22 = vld [vmem:[%s28658_s11 + $0x120] ss:$12 sps:$4 sm:$0xff]  }
 0x71f   :  { %v6315_v36 = vpack.c.bf16 %v6163_v34, %v6160_v30  ;;  %18534 = vmatpush3.bf16.msra.mxu0 %v22609_v29  ;;  %v22602_v28 = vld [vmem:[%s28658_s11 + $0x154] ss:$12 sps:$4 sm:$0xff]   ;;  %v22604_v29 = vld [vmem:[%s28658_s11 + $0x150] ss:$12 sps:$4 sm:$0xff]   ;;  %v22617_v34 = vld [vmem:[%s28649_s2 + $0x68] sm:$0xff]  }
 0x720   :  { %18535 = vmatprep.subr.bf16.mxu0 %v28665_v26  ;;  %v22615_v30 = vld [vmem:[%s28649_s2 + $0x60] sm:$0xff]  }
 0x721   :  { %18491 = vmatprep.subr.bf16.mxu1 %v6315_v36  ;;  %6658 = vmatmul.mubr.bf16.gmra.mrb[48].mxu0 %v22551_v32  ;;  %v22616_v31 = vld [vmem:[%s28649_s2 + $0xe0] sm:$0xff]   ;;  %v6295_v32 = vld [vmem:[%s28658_s11 + $0x168] sm:$0xff] }
 0x722   :  { %18492 = vmatpush3.bf16.msra.mxu1 %v6315_v36  ;;  %6665 = vmatprep.mubr.bf16.mxu0 %v22554_v35  ;;  %v22618_v35 = vld [vmem:[%s28649_s2 + $0xe8] sm:$0xff]   ;;  %v15501_v36 = vcombine.low %v6295_v32, %v6295_v32 }
 0x723   :  { %v18485_v39 = vpop.f32.mrb[40].mxu0  ;;  %18493 = vmatprep.subr.bf16.mxu1 %v6316_v33  ;;  %18536 = vmatpush3.bf16.msra.mxu0 %v22611_v20 }
 0x724   :  { %v6176_v40 = vpop.f32.mrb[41].mxu0  ;;  %18537 = vmatprep.subr.bf16.mxu0 %v28665_v26 }
 0x725   :  { %v18486_v41 = vpop.f32.mrb[42].mxu0 }
 0x726   :  { %v6318_v44 = vpack.c.bf16 %v18486_v41, %v18485_v39  ;;  %v6179_v45 = vpop.f32.mrb[43].mxu0  ;;  %18494 = vmatpush3.bf16.msra.mxu1 %v6316_v33  ;;  %v15502_v33 = vcombine.high %v6295_v32, %v6295_v32  ;;  %v22623_v39 = vld [vmem:[%s28649_s2 + $0x78] sm:$0xff]  }
 0x727   :  { %v6317_v47 = vpack.c.bf16 %v6179_v45, %v6176_v40  ;;  %18538 = vmatpush3.bf16.msra.mxu0 %v22613_v24  ;;  %v22624_v40 = vld [vmem:[%s28649_s2 + $0xf8] sm:$0xff]  }
 0x728   :  { %v6615_v48 = vand.u32 %v6613_v42, %v6318_v44  ;;  %18539 = vmatprep.subr.bf16.mxu0 %v28665_v26 }
 0x729   :  { %18495 = vmatprep.subr.bf16.mxu1 %v6317_v47  ;;  %6666 = vmatmul.mubr.bf16.gmra.mrb[52].mxu0 %v22556_v43 }
 0x72a   :  { %18496 = vmatpush3.bf16.msra.mxu1 %v6317_v47  ;;  %6673 = vmatprep.mubr.bf16.mxu0 %v22559_v46 }
 0x72b   :  { %18497 = vmatprep.subr.bf16.mxu1 %v6615_v48  ;;  %18540 = vmatpush3.bf16.msra.mxu0 %v22615_v30 }
 0x72c   :  { %18541 = vmatprep.subr.bf16.mxu0 %v28665_v26 }
 0x72e   :  { %18498 = vmatpush3.bf16.msra.mxu1 %v6615_v48 }
 0x72f   :  { %18735 = vmatprep.subr.bf16.mxu1 %v28665_v26  ;;  %18542 = vmatpush3.bf16.msra.mxu0 %v22617_v34 }
 0x730   :  { %18543 = vmatprep.subr.bf16.mxu0 %v28665_v26 }
 0x731   :  { %18500 = vmatmul.mubr.msk.bf16.vlgmr.msra.gmra.mrb[0].mxu1 %vm6561_vm0, %v22553_v49  ;;  %6674 = vmatmul.mubr.bf16.gmra.mrb[56].mxu0 %v22561_v50 }
 0x732   :  { %18503 = vmatprep.mubr.msk.bf16.mxu1 %vm6561_vm0, %v22557_v51  ;;  %6681 = vmatprep.mubr.bf16.mxu0 %v22562_v52 }
 0x733   :  { %18736 = vmatpush3.bf16.msra.mxu1 %v22608_v53  ;;  %18544 = vmatpush3.bf16.msra.mxu0 %v22621_v37 }
 0x734   :  { %18737 = vmatprep.subr.bf16.mxu1 %v28665_v26  ;;  %18545 = vmatprep.subr.bf16.mxu0 %v28665_v26 }
 0x737   :  { %18738 = vmatpush3.bf16.msra.mxu1 %v22610_v54  ;;  %18546 = vmatpush3.bf16.msra.mxu0 %v22623_v39 }
 0x738   :  { %18739 = vmatprep.subr.bf16.mxu1 %v28665_v26  ;;  %18599 = vmatprep.subr.bf16.mxu0 %v28665_v26 }
 0x739   :  { %18504 = vmatmul.mubr.msk.bf16.gmra.mrb[4].mxu1 %vm6561_vm0, %v22558_v55  ;;  %6682 = vmatmul.mubr.bf16.gmra.mrb[60].mxu0 %v22564_v56 }
 0x73a   :  { %18507 = vmatprep.mubr.msk.bf16.mxu1 %vm6561_vm0, %v22565_v57  ;;  %6689 = vmatprep.mubr.bf16.mxu0 %v22567_v58  ;;  %v25945_v58 = vld [vmem:[%s28653_s6] ss:$0 sm:$0xff] }
 0x73b   :  { %18740 = vmatpush3.bf16.msra.mxu1 %v22612_v21 }
 0x73c   :  { %18741 = vmatprep.subr.bf16.mxu1 %v28665_v26 }
 0x73f   :  { %18742 = vmatpush3.bf16.msra.mxu1 %v22614_v25 }
 0x740   :  { %18743 = vmatprep.subr.bf16.mxu1 %v28665_v26 }
 0x741   :  { %18508 = vmatmul.mubr.msk.bf16.gmra.mrb[8].mxu1 %vm6561_vm0, %v22566_v59  ;;  %6690 = vmatmul.mubr.bf16.gmra.mrb[64].mxu0 %v22569_v60 }
 0x742   :  { %6697 = vmatprep.mubr.bf16.mxu0 %v22570_v61  ;;  %18511 = vmatprep.mubr.msk.bf16.mxu1 %vm6561_vm0, %v22573_v62 }
 0x743   :  { %18744 = vmatpush3.bf16.msra.mxu1 %v22616_v31 }
 0x744   :  { %18745 = vmatprep.subr.bf16.mxu1 %v28665_v26 }
 0x747   :  { %18746 = vmatpush3.bf16.msra.mxu1 %v22618_v35 }
 0x748   :  { %18747 = vmatprep.subr.bf16.mxu1 %v28665_v26 }
 0x749   :  { %6698 = vmatmul.mubr.bf16.gmra.mrb[68].mxu0 %v22572_v63  ;;  %18512 = vmatmul.mubr.msk.bf16.gmra.mrb[12].mxu1 %vm6561_vm0, %v22574_v0 }
 0x74a   :  { %6705 = vmatprep.mubr.bf16.mxu0 %v22575_v1  ;;  %18515 = vmatprep.mubr.msk.bf16.mxu1 %vm6561_vm0, %v22581_v2 }
 0x74b   :  { %18748 = vmatpush3.bf16.msra.mxu1 %v22622_v38 }
 0x74c   :  { %18749 = vmatprep.subr.bf16.mxu1 %v28665_v26 }
 0x74f   :  { %18750 = vmatpush3.bf16.msra.mxu1 %v22624_v40 }
 0x750   :  { %18803 = vmatprep.subr.bf16.mxu1 %v28665_v26 }
 0x751   :  { %6706 = vmatmul.mubr.bf16.gmra.mrb[72].mxu0 %v22577_v3  ;;  %18516 = vmatmul.mubr.msk.bf16.gmra.mrb[16].mxu1 %vm6561_vm0, %v22582_v4 }
 0x752   :  { %6713 = vmatprep.mubr.bf16.mxu0 %v22578_v5  ;;  %18519 = vmatprep.mubr.msk.bf16.mxu1 %vm6561_vm0, %v22589_v6 }
 0x759   :  { %6714 = vmatmul.mubr.bf16.gmra.mrb[76].mxu0 %v22580_v7  ;;  %18520 = vmatmul.mubr.msk.bf16.gmra.mrb[20].mxu1 %vm6561_vm0, %v22590_v8 }
 0x75a   :  { %6721 = vmatprep.mubr.bf16.mxu0 %v22583_v9  ;;  %18523 = vmatprep.mubr.msk.bf16.mxu1 %vm6561_vm0, %v22597_v10 }
 0x761   :  { %6722 = vmatmul.mubr.bf16.gmra.mrb[80].mxu0 %v22585_v11  ;;  %18524 = vmatmul.mubr.msk.bf16.gmra.mrb[24].mxu1 %vm6561_vm0, %v22598_v12 }
 0x762   :  { %6729 = vmatprep.mubr.bf16.mxu0 %v22586_v13  ;;  %18527 = vmatprep.mubr.msk.bf16.mxu1 %vm6561_vm0, %v22605_v14 }
 0x769   :  { %6730 = vmatmul.mubr.bf16.gmra.mrb[84].mxu0 %v22588_v15  ;;  %18528 = vmatmul.mubr.msk.bf16.gmra.mrb[28].mxu1 %vm6561_vm0, %v22606_v16 }
 0x76a   :  { %6737 = vmatprep.mubr.bf16.mxu0 %v22591_v17  ;;  %18751 = vmatprep.mubr.msk.bf16.mxu1 %vm23296_vm3, %v28665_v26 }
 0x771   :  { %6738 = vmatmul.mubr.bf16.gmra.mrb[88].mxu0 %v22593_v18 }
 0x772   :  { %6745 = vmatprep.mubr.bf16.mxu0 %v22594_v19 }
 0x779   :  { %6746 = vmatmul.mubr.bf16.gmra.mrb[92].mxu0 %v22596_v22 }
 0x77a   :  { %6753 = vmatprep.mubr.bf16.mxu0 %v22599_v23 }
 0x781   :  { %6754 = vmatmul.mubr.bf16.gmra.mrb[96].mxu0 %v22601_v27 }
 0x782   :  { %6761 = vmatprep.mubr.bf16.mxu0 %v22602_v28 }
 0x789   :  { %6762 = vmatmul.mubr.bf16.gmra.mrb[100].mxu0 %v22604_v29 }
 0x78a   :  { %6769 = vmatprep.mubr.bf16.mxu0 %v15502_v33 }
 0x791   :  { %6770 = vmatmul.mubr.bf16.gmra.mrb[104].mxu0 %v15501_v36 }
 0x792   :  { %18547 = vmatprep.mubr.msk.bf16.mxu0 %vm23296_vm3, %v28665_v26 }
 0x7ec   :  { %v16761_v41 = vpop.f32.mrb[44].mxu0 }
 0x7ed   :  { %v16762_v42 = vpop.f32.mrb[45].mxu0 }
 0x7ee   :  { %v16763_v43 = vadd.f32 %v16762_v42, %v16761_v41  ;;  %v16764_v44 = vpop.f32.mrb[46].mxu0 }
 0x7ef   :  { %v16765_v45 = vpop.f32.mrb[47].mxu0 }
 0x7f0   :  { %v16766_v46 = vadd.f32 %v16765_v45, %v16764_v44  ;;  %v6652_v63 = vadd.f32 %v16763_v43, %v25945_v58 }
 0x7f2   :  { %v6655_v6 = vadd.f32 %v16766_v46, %v25945_v58 }
 0x7f4   :  { %v16767_v47 = vpop.f32.mrb[48].mxu0 }
 0x7f5   :  { %v16768_v48 = vpop.f32.mrb[49].mxu0 }
 0x7f6   :  { %v16769_v49 = vadd.f32 %v16768_v48, %v16767_v47  ;;  %v16770_v50 = vpop.f32.mrb[50].mxu0 }
 0x7f7   :  { %v16771_v51 = vpop.f32.mrb[51].mxu0 }
 0x7f8   :  { %v16772_v52 = vadd.f32 %v16771_v51, %v16770_v50  ;;  %v6660_v60 = vadd.f32 %v16769_v49, %v25945_v58 }
 0x7fa   :  { %v6663_v61 = vadd.f32 %v16772_v52, %v25945_v58 }
 0x7fc   :  { %v16773_v53 = vpop.f32.mrb[52].mxu0 }
 0x7fd   :  { %v16774_v54 = vpop.f32.mrb[53].mxu0 }
 0x7fe   :  { %v16775_v55 = vadd.f32 %v16774_v54, %v16773_v53  ;;  %v16776_v56 = vpop.f32.mrb[54].mxu0  ;;  %v22625_v54 = vld [vmem:[%s28649_s2 + $0x100] sm:$0xff]  }
 0x7ff   :  { %v16777_v57 = vpop.f32.mrb[55].mxu0 }
 0x800   :  { %v16778_v59 = vadd.f32 %v16777_v57, %v16776_v56  ;;  %v6668_v19 = vadd.f32 %v16775_v55, %v25945_v58 }
 0x802   :  { %v6671_v23 = vadd.f32 %v16778_v59, %v25945_v58 }
 0x804   :  { %v18501_v62 = vpop.f32.mrb[0].mxu1  ;;  %v16779_v0 = vpop.f32.mrb[56].mxu0 }
 0x805   :  { %v6820_v1 = vadd.f32 %v18501_v62, %v6660_v60  ;;  %v6811_v2 = vpop.f32.mrb[1].mxu1  ;;  %v16780_v3 = vpop.f32.mrb[57].mxu0 }
 0x806   :  { %v6812_v4 = vadd.f32 %v6811_v2, %v6652_v63  ;;  %v18502_v5 = vpop.f32.mrb[2].mxu1  ;;  %v16781_v7 = vadd.f32 %v16780_v3, %v16779_v0  ;;  %v16782_v8 = vpop.f32.mrb[58].mxu0 }
 0x807   :  { %v6939_v9 = vmax.f32 %v6820_v1, 0.0  ;;  %v6814_v10 = vpop.f32.mrb[3].mxu1  ;;  %v6823_v11 = vadd.f32 %v18502_v5, %v6663_v61  ;;  %v16783_v12 = vpop.f32.mrb[59].mxu0  ;;  %v22628_v61 = vld [vmem:[%s28649_s2] sm:$0xff]  }
 0x808   :  { %v6937_v13 = vmax.f32 %v6812_v4, 0.0  ;;  %v6815_v14 = vadd.f32 %v6814_v10, %v6655_v6  ;;  %v16784_v15 = vadd.f32 %v16783_v12, %v16782_v8  ;;  %v6676_v17 = vadd.f32 %v16781_v7, %v25945_v58 }
 0x809   :  { %6970 = vst [vmem:[#allocation2 + $0x10] sm:$0xff] %v6939_v9  ;;  %v6940_v16 = vmax.f32 %v6823_v11, 0.0  ;;  %v22629_v11 = vld [vmem:[%s28649_s2 + $0x8] sm:$0xff]  }
 0x80a   :  { %6968 = vst [vmem:[#allocation2] sm:$0xff] %v6937_v13  ;;  %v6938_v18 = vmax.f32 %v6815_v14, 0.0  ;;  %v6679_v20 = vadd.f32 %v16784_v15, %v25945_v58 }
 0x80b   :  { %6971 = vst [vmem:[#allocation2 + $0x18] sm:$0xff] %v6940_v16  ;;  %v25954_v21 = vpack.c.bf16 %v6940_v16, %v6939_v9  ;;  %v22626_v9 = vld [vmem:[%s28649_s2 + $0x108] sm:$0xff]  }
 0x80c   :  { %6969 = vst [vmem:[#allocation2 + $0x8] sm:$0xff] %v6938_v18  ;;  %v18505_v22 = vpop.f32.mrb[4].mxu1  ;;  %v16785_v24 = vpop.f32.mrb[60].mxu0  ;;  %v25957_v25 = vpack.c.bf16 %v6938_v18, %v6937_v13  ;;  %v22627_v18 = vld [vmem:[%s28649_s2 + $0x110] sm:$0xff]  }
 0x80d   :  { %v6827_v27 = vpop.f32.mrb[5].mxu1  ;;  %v6836_v28 = vadd.f32 %v18505_v22, %v6676_v17  ;;  %v16786_v29 = vpop.f32.mrb[61].mxu0 }
 0x80e   :  { %v6828_v30 = vadd.f32 %v6827_v27, %v6668_v19  ;;  %v18506_v31 = vpop.f32.mrb[6].mxu1  ;;  %v16787_v32 = vadd.f32 %v16786_v29, %v16785_v24  ;;  %v16788_v33 = vpop.f32.mrb[62].mxu0 }
 0x80f   :  { %v6943_v34 = vmax.f32 %v6836_v28, 0.0  ;;  %v6830_v35 = vpop.f32.mrb[7].mxu1  ;;  %v6839_v36 = vadd.f32 %v18506_v31, %v6679_v20  ;;  %v16789_v37 = vpop.f32.mrb[63].mxu0 }
 0x810   :  { %v6941_v38 = vmax.f32 %v6828_v30, 0.0  ;;  %v6831_v39 = vadd.f32 %v6830_v35, %v6671_v23  ;;  %v16790_v40 = vadd.f32 %v16789_v37, %v16788_v33  ;;  %v6684_v43 = vadd.f32 %v16787_v32, %v25945_v58 }
 0x811   :  { %6974 = vst [vmem:[#allocation2 + $0x30] sm:$0xff] %v6943_v34  ;;  %v6944_v41 = vmax.f32 %v6839_v36, 0.0 }
 0x812   :  { %6972 = vst [vmem:[#allocation2 + $0x20] sm:$0xff] %v6941_v38  ;;  %v6942_v42 = vmax.f32 %v6831_v39, 0.0  ;;  %v25960_v44 = vld [vmem:[#allocation2 + $0x14] sm:$0xff]  ;;  %v6687_v53 = vadd.f32 %v16790_v40, %v25945_v58 }
 0x813   :  { %v7053_v45 = vld [vmem:[#allocation2 + $0x1] sm:$0xff]  ;;  %v7054_v46 = vld [vmem:[#allocation2 + $0x9] sm:$0xff]  ;;  %6975 = vst [vmem:[#allocation2 + $0x38] sm:$0xff] %v6944_v41  ;;  %v25962_v48 = vpack.c.bf16 %v6944_v41, %v6943_v34  ;;  %v7055_v15 = vld [vmem:[#allocation2 + $0x11] sm:$0xff] }
 0x814   :  { %v7740_v47 = vld [vmem:[#allocation2 + $0x3] sm:$0xff]  ;;  %v7078_v49 = vpack.c.bf16 %v7054_v46, %v7053_v45  ;;  %v7741_v50 = vld [vmem:[#allocation2 + $0xb] sm:$0xff]  ;;  %6973 = vst [vmem:[#allocation2 + $0x28] sm:$0xff] %v6942_v42  ;;  %v18509_v51 = vpop.f32.mrb[8].mxu1  ;;  %v16791_v52 = vpop.f32.mrb[64].mxu0  ;;  %v25970_v56 = vpack.c.bf16 %v6942_v42, %v6941_v38  ;;  %v7742_v16 = vld [vmem:[#allocation2 + $0x13] sm:$0xff] }
 0x815   :  { %v25968_v55 = vld [vmem:[#allocation2 + $0xc] sm:$0xff]  ;;  %v7765_v57 = vpack.c.bf16 %v7741_v50, %v7740_v47  ;;  %v6843_v59 = vpop.f32.mrb[9].mxu1  ;;  %v16792_v60 = vpop.f32.mrb[65].mxu0  ;;  %v22631_v47 = vld [vmem:[%s28649_s2 + $0x118] sm:$0xff]  }
 0x816   :  { %18548 = vmatmul.mubr.bf16.vlgmr.msra.gmra.mrb[108].mxu0 %v7078_v49  ;;  %v6844_v63 = vadd.f32 %v6843_v59, %v6684_v43  ;;  %v16793_v0 = vadd.f32 %v16792_v60, %v16791_v52  ;;  %v18510_v1 = vpop.f32.mrb[10].mxu1  ;;  %v16794_v2 = vpop.f32.mrb[66].mxu0  ;;  %v22630_v34 = vld [vmem:[%s28649_s2 + $0x10] sm:$0xff]  }
 0x817   :  { %18752 = vmatmul.mubr.bf16.vlgmr.msra.gmra.mrb[32].mxu1 %v7765_v57  ;;  %18551 = vmatprep.mubr.msk.bf16.mxu0 %vm23296_vm3, %v28665_v26  ;;  %v6846_v3 = vpop.f32.mrb[11].mxu1  ;;  %v16795_v4 = vpop.f32.mrb[67].mxu0 }
 0x818   :  { %18755 = vmatprep.mubr.msk.bf16.mxu1 %vm23296_vm3, %v28665_v26  ;;  %v6945_v5 = vmax.f32 %v6844_v63, 0.0  ;;  %v6692_v6 = vadd.f32 %v16793_v0, %v25945_v58  ;;  %v6847_v7 = vadd.f32 %v6846_v3, %v6687_v53  ;;  %v16796_v8 = vadd.f32 %v16795_v4, %v16794_v2  ;;  %18804 = vmatpush3.bf16.msra.mxu1 %v22625_v54  ;;  %v22634_v4 = vld [vmem:[%s28649_s2 + $0x120] sm:$0xff]  }
 0x819   :  { %v7056_v10 = vld [vmem:[#allocation2 + $0x19] sm:$0xff]  ;;  %18805 = vmatprep.subr.bf16.mxu1 %v28665_v26  ;;  %18600 = vmatpush3.bf16.msra.mxu0 %v22628_v61 }
 0x81a   :  { %v7743_v12 = vld [vmem:[#allocation2 + $0x1b] sm:$0xff]  ;;  %6976 = vst [vmem:[#allocation2 + $0x40] sm:$0xff] %v6945_v5  ;;  %v6852_v13 = vadd.f32 %v18509_v51, %v6692_v6  ;;  %v6946_v14 = vmax.f32 %v6847_v7, 0.0  ;;  %18601 = vmatprep.subr.bf16.mxu0 %v28665_v26  ;;  %v6695_v17 = vadd.f32 %v16796_v8, %v25945_v58  ;;  %v7079_v19 = vpack.c.bf16 %v7056_v10, %v7055_v15 }
 0x81b   :  { %v25996_v24 = vld [vmem:[#allocation2 + $0x24] sm:$0xff]  ;;  %v25998_v27 = vld [vmem:[#allocation2 + $0x2c] sm:$0xff]  ;;  %v26000_v28 = vld [vmem:[#allocation2 + $0x34] sm:$0xff]  ;;  %v7766_v30 = vpack.c.bf16 %v7743_v12, %v7742_v16 }
 0x81c   :  { %v6947_v20 = vmax.f32 %v6852_v13, 0.0  ;;  %6977 = vst [vmem:[#allocation2 + $0x48] sm:$0xff] %v6946_v14  ;;  %v16797_v22 = vpop.f32.mrb[68].mxu0  ;;  %v25994_v23 = vpop.f32.mrb[12].mxu1  ;;  %18806 = vmatpush3.bf16.msra.mxu1 %v22626_v9  ;;  %v26002_v29 = vpack.c.bf16 %v6946_v14, %v6945_v5  ;;  %v6855_v31 = vadd.f32 %v18510_v1, %v6695_v17  ;;  %v26011_v38 = vld [vmem:[#allocation2 + $0x1c] sm:$0xff]  ;;  %v7058_v50 = vld [vmem:[#allocation2 + $0x29] sm:$0xff] }
 0x81d   :  { %v16798_v32 = vpop.f32.mrb[69].mxu0  ;;  %v6859_v33 = vpop.f32.mrb[13].mxu1  ;;  %18807 = vmatprep.subr.bf16.mxu1 %v28665_v26  ;;  %18602 = vmatpush3.bf16.msra.mxu0 %v22629_v11  ;;  %v7057_v49 = vld [vmem:[#allocation2 + $0x21] sm:$0xff]  ;;  %v22632_v51 = vld [vmem:[%s28649_s2 + $0x18] sm:$0xff]   ;;  %v7745_v54 = vld [vmem:[#allocation2 + $0x2b] sm:$0xff] }
 0x81e   :  { %18552 = vmatmul.mubr.bf16.gmra.mrb[112].mxu0 %v7079_v19  ;;  %6978 = vst [vmem:[#allocation2 + $0x50] sm:$0xff] %v6947_v20  ;;  %v16799_v35 = vadd.f32 %v16798_v32, %v16797_v22  ;;  %v16800_v36 = vpop.f32.mrb[70].mxu0  ;;  %v26008_v37 = vpop.f32.mrb[14].mxu1  ;;  %18603 = vmatprep.subr.bf16.mxu0 %v28665_v26  ;;  %v6948_v39 = vmax.f32 %v6855_v31, 0.0  ;;  %v7744_v53 = vld [vmem:[#allocation2 + $0x23] sm:$0xff]  ;;  %v7080_v63 = vpack.c.bf16 %v7058_v50, %v7057_v49  ;;  %v26074_v32 = vld [vmem:[#allocation2 + $0x16] sm:$0xff] }
 0x81f   :  { %18756 = vmatmul.mubr.bf16.gmra.mrb[36].mxu1 %v7766_v30  ;;  %18555 = vmatprep.mubr.msk.bf16.mxu0 %vm23296_vm3, %v28665_v26  ;;  %v16801_v40 = vpop.f32.mrb[71].mxu0  ;;  %v6862_v41 = vpop.f32.mrb[15].mxu1  ;;  %v7767_v6 = vpack.c.bf16 %v7745_v54, %v7744_v53  ;;  %v22633_v9 = vld [vmem:[%s28649_s2 + $0x20] sm:$0xff]   ;;  %v22635_v17 = vld [vmem:[%s28649_s2 + $0x28] sm:$0xff]   ;;  %28795 = vst [vmem:[#allocation32_spill] sm:$0xff] %v26074_v32  ;;  %v26091_v49 = vld [vmem:[#allocation2 + $0x36] sm:$0xff] }
 0x820   :  { %18759 = vmatprep.mubr.msk.bf16.mxu1 %vm23296_vm3, %v28665_v26  ;;  %v6700_v45 = vadd.f32 %v16799_v35, %v25945_v58  ;;  %v16802_v46 = vadd.f32 %v16801_v40, %v16800_v36  ;;  %18808 = vmatpush3.bf16.msra.mxu1 %v22627_v18  ;;  %6979 = vst [vmem:[#allocation2 + $0x58] sm:$0xff] %v6948_v39  ;;  %v22636_v18 = vld [vmem:[%s28649_s2 + $0x128] sm:$0xff]   ;;  %v26065_v19 = vld [vmem:[#allocation2 + $0x1e] sm:$0xff]  ;;  %28798 = vst [vmem:[#allocation35_spill] sm:$0xff] %v26091_v49 }
 0x821   :  { %18604 = vmatpush3.bf16.msra.mxu0 %v22630_v34  ;;  %18809 = vmatprep.subr.bf16.mxu1 %v28665_v26  ;;  %v26029_v52 = vpack.c.bf16 %v6948_v39, %v6947_v20  ;;  %v26033_v60 = vld [vmem:[#allocation2 + $0x3c] sm:$0xff]  ;;  %28793 = vst [vmem:[#allocation30_spill] sm:$0xff] %v26065_v19  ;;  %v7059_v34 = vld [vmem:[#allocation2 + $0x31] sm:$0xff] }
 0x822   :  { %v6860_v57 = vadd.f32 %v6859_v33, %v6700_v45  ;;  %v6703_v59 = vadd.f32 %v16802_v46, %v25945_v58  ;;  %18605 = vmatprep.subr.bf16.mxu0 %v28665_v26  ;;  %28790 = vst [vmem:[#allocation27_spill] sm:$0xff] %v26033_v60  ;;  %v26076_v33 = vld [vmem:[#allocation2 + $0x26] sm:$0xff]  ;;  %v7060_v35 = vld [vmem:[#allocation2 + $0x39] sm:$0xff]  ;;  %v22638_v46 = vld [vmem:[%s28649_s2 + $0x130] sm:$0xff]  }
 0x823   :  { %v26035_v61 = vld [vmem:[#allocation2 + $0x44] sm:$0xff]  ;;  %28796 = vst [vmem:[#allocation33_spill] sm:$0xff] %v26076_v33  ;;  %v7747_v36 = vld [vmem:[#allocation2 + $0x3b] sm:$0xff]  ;;  %v7746_v53 = vld [vmem:[#allocation2 + $0x33] sm:$0xff] }
 0x824   :  { %28791 = vst [vmem:[#allocation28_spill] sm:$0xff] %v26035_v61  ;;  %v6949_v0 = vmax.f32 %v6860_v57, 0.0  ;;  %v16803_v1 = vpop.f32.mrb[72].mxu0  ;;  %v6863_v2 = vadd.f32 %v6862_v41, %v6703_v59  ;;  %v26037_v3 = vpop.f32.mrb[16].mxu1  ;;  %18810 = vmatpush3.bf16.msra.mxu1 %v22631_v47  ;;  %v26089_v47 = vld [vmem:[#allocation2 + $0x2e] sm:$0xff]  ;;  %v26093_v50 = vld [vmem:[#allocation2 + $0x3e] sm:$0xff] }
 0x825   :  { %v16804_v7 = vpop.f32.mrb[73].mxu0  ;;  %v26044_v8 = vpop.f32.mrb[17].mxu1  ;;  %18606 = vmatpush3.bf16.msra.mxu0 %v22632_v51  ;;  %18811 = vmatprep.subr.bf16.mxu1 %v28665_v26  ;;  %v26053_v14 = vld [vmem:[#allocation2 + $0x4c] sm:$0xff]  ;;  %28797 = vst [vmem:[#allocation34_spill] sm:$0xff] %v26089_v47  ;;  %28799 = vst [vmem:[#allocation36_spill] sm:$0xff] %v26093_v50  ;;  %v26095_v51 = vld [vmem:[#allocation2 + $0x17] sm:$0xff] }
 0x826   :  { %18556 = vmatmul.mubr.bf16.gmra.mrb[116].mxu0 %v7080_v63  ;;  %6980 = vst [vmem:[#allocation2 + $0x60] sm:$0xff] %v6949_v0  ;;  %v16805_v10 = vadd.f32 %v16804_v7, %v16803_v1  ;;  %v6950_v11 = vmax.f32 %v6863_v2, 0.0  ;;  %v16806_v12 = vpop.f32.mrb[74].mxu0  ;;  %v26050_v13 = vpop.f32.mrb[18].mxu1  ;;  %18607 = vmatprep.subr.bf16.mxu0 %v28665_v26  ;;  %28792 = vst [vmem:[#allocation29_spill] sm:$0xff] %v26053_v14  ;;  %v26097_v54 = vld [vmem:[#allocation2 + $0x46] sm:$0xff]  ;;  %v7081_v63 = vpack.c.bf16 %v7060_v35, %v7059_v34 }
 0x827   :  { %18760 = vmatmul.mubr.bf16.gmra.mrb[40].mxu1 %v7767_v6  ;;  %18559 = vmatprep.mubr.msk.bf16.mxu0 %vm23296_vm3, %v28665_v26  ;;  %v16807_v15 = vpop.f32.mrb[75].mxu0  ;;  %v26057_v16 = vpop.f32.mrb[19].mxu1  ;;  %v26070_v30 = vld [vmem:[#allocation2 + $0x54] sm:$0xff]  ;;  %28800 = vst [vmem:[#allocation37_spill] sm:$0xff] %v26095_v51  ;;  %28801 = vst [vmem:[#allocation38_spill] sm:$0xff] %v26097_v54  ;;  %v26108_v6 = vld [vmem:[#allocation2 + $0x1f] sm:$0xff] }
 0x828   :  { %18763 = vmatprep.mubr.msk.bf16.mxu1 %vm23296_vm3, %v28665_v26  ;;  %v6708_v20 = vadd.f32 %v16805_v10, %v25945_v58  ;;  %6981 = vst [vmem:[#allocation2 + $0x68] sm:$0xff] %v6950_v11  ;;  %v16808_v22 = vadd.f32 %v16807_v15, %v16806_v12  ;;  %18812 = vmatpush3.bf16.msra.mxu1 %v22634_v4  ;;  %28794 = vst [vmem:[#allocation31_spill] sm:$0xff] %v26070_v30  ;;  %v26110_v7 = vld [vmem:[#allocation2 + $0x27] sm:$0xff]  ;;  %v26153_v39 = vld [vmem:[#allocation2 + $0x3f] sm:$0xff] }
 0x829   :  { %v26072_v31 = vpack.c.bf16 %v6950_v11, %v6949_v0  ;;  %18608 = vmatpush3.bf16.msra.mxu0 %v22633_v9  ;;  %18813 = vmatprep.subr.bf16.mxu1 %v28665_v26  ;;  %28803 = vst [vmem:[#allocation40_spill] sm:$0xff] %v26108_v6  ;;  %28804 = vst [vmem:[#allocation41_spill] sm:$0xff] %v26110_v7  ;;  %v26112_v9 = vld [vmem:[#allocation2 + $0x2f] sm:$0xff]  ;;  %v7768_v10 = vpack.c.bf16 %v7747_v36, %v7746_v53  ;;  %v22640_v53 = vld [vmem:[%s28649_s2 + $0x138] sm:$0xff]  }
 0x82a   :  { %v6868_v41 = vadd.f32 %v25994_v23, %v6708_v20  ;;  %v6711_v45 = vadd.f32 %v16808_v22, %v25945_v58  ;;  %18609 = vmatprep.subr.bf16.mxu0 %v28665_v26  ;;  %v26099_v23 = vld [vmem:[#allocation2 + $0x4e] sm:$0xff]  ;;  %28805 = vst [vmem:[#allocation42_spill] sm:$0xff] %v26112_v9  ;;  %28807 = vst [vmem:[#allocation44_spill] sm:$0xff] %v26153_v39  ;;  %v26175_v62 = vld [vmem:[#allocation2 + $0x57] sm:$0xff] }
 0x82b   :  { %28802 = vst [vmem:[#allocation39_spill] sm:$0xff] %v26099_v23  ;;  %v7062_v57 = vld [vmem:[#allocation2 + $0x49] sm:$0xff]  ;;  %28813 = vst [vmem:[#allocation50_spill] sm:$0xff] %v26175_v62  ;;  %v26265_v50 = vld [vmem:[#allocation2 + $0x39] sm:$0xff] }
 0x82c   :  { %v6951_v0 = vmax.f32 %v6868_v41, 0.0  ;;  %v6871_v1 = vadd.f32 %v26008_v37, %v6711_v45  ;;  %v16809_v2 = vpop.f32.mrb[76].mxu0  ;;  %v26106_v4 = vpop.f32.mrb[20].mxu1  ;;  %18814 = vmatpush3.bf16.msra.mxu1 %v22636_v18  ;;  %v22637_v37 = vld [vmem:[%s28649_s2 + $0x30] sm:$0xff]   ;;  %v22639_v45 = vld [vmem:[%s28649_s2 + $0x38] sm:$0xff]   ;;  %28826 = vst [vmem:[#allocation62_spill] sm:$0xff] %v26265_v50 }
 0x82d   :  { %v16810_v11 = vpop.f32.mrb[77].mxu0  ;;  %v26114_v12 = vpop.f32.mrb[21].mxu1  ;;  %18610 = vmatpush3.bf16.msra.mxu0 %v22635_v17  ;;  %18815 = vmatprep.subr.bf16.mxu1 %v28665_v26  ;;  %v7061_v17 = vld [vmem:[#allocation2 + $0x41] sm:$0xff]  ;;  %v7749_v40 = vld [vmem:[#allocation2 + $0x4b] sm:$0xff] }
 0x82e   :  { %18560 = vmatmul.mubr.bf16.gmra.mrb[120].mxu0 %v7081_v63  ;;  %6982 = vst [vmem:[#allocation2 + $0x70] sm:$0xff] %v6951_v0  ;;  %v6952_v20 = vmax.f32 %v6871_v1, 0.0  ;;  %v16811_v22 = vadd.f32 %v16810_v11, %v16809_v2  ;;  %v16812_v34 = vpop.f32.mrb[78].mxu0  ;;  %v26124_v35 = vpop.f32.mrb[22].mxu1  ;;  %18611 = vmatprep.subr.bf16.mxu0 %v28665_v26  ;;  %v7748_v2 = vld [vmem:[#allocation2 + $0x43] sm:$0xff]  ;;  %v28814_v1 = vmov 0.0  }
 0x82f   :  { %18764 = vmatmul.mubr.bf16.gmra.mrb[44].mxu1 %v7768_v10  ;;  %18563 = vmatprep.mubr.msk.bf16.mxu0 %vm23296_vm3, %v28665_v26  ;;  %v16813_v36 = vpop.f32.mrb[79].mxu0  ;;  %v26129_v41 = vpop.f32.mrb[23].mxu1  ;;  %v26137_v63 = vld [vmem:[#allocation2 + $0x64] sm:$0xff]  ;;  %v26144_v18 = vld [vmem:[#allocation2 + $0x5c] sm:$0xff]  ;;  %v7769_v7 = vpack.c.bf16 %v7749_v40, %v7748_v2 }
 0x830   :  { %18767 = vmatprep.mubr.msk.bf16.mxu1 %vm23296_vm3, %v28665_v26  ;;  %6983 = vst [vmem:[#allocation2 + $0x78] sm:$0xff] %v6952_v20  ;;  %v6716_v10 = vadd.f32 %v16811_v22, %v25945_v58  ;;  %v16814_v11 = vadd.f32 %v16813_v36, %v16812_v34  ;;  %18816 = vmatpush3.bf16.msra.mxu1 %v22638_v46  ;;  %v26148_v59 = vld [vmem:[#allocation2 + $0x5e] sm:$0xff]  ;;  %v26162_v34 = vld [vmem:[#allocation2 + $0x4f] sm:$0xff] }
 0x831   :  { %v26146_v15 = vpack.c.bf16 %v6952_v20, %v6951_v0  ;;  %28806 = vst [vmem:[#allocation43_spill] sm:$0xff] %v26148_v59  ;;  %18612 = vmatpush3.bf16.msra.mxu0 %v22637_v37  ;;  %18817 = vmatprep.subr.bf16.mxu1 %v28665_v26  ;;  %v26158_v0 = vld [vmem:[#allocation2 + $0x56] sm:$0xff]  ;;  %28810 = vst [vmem:[#allocation47_spill] sm:$0xff] %v26162_v34  ;;  %v26164_v37 = vld [vmem:[#allocation2 + $0x47] sm:$0xff] }
 0x832   :  { %v6876_v22 = vadd.f32 %v26044_v8, %v6716_v10  ;;  %v6719_v46 = vadd.f32 %v16814_v11, %v25945_v58  ;;  %18613 = vmatprep.subr.bf16.mxu0 %v28665_v26  ;;  %28808 = vst [vmem:[#allocation45_spill] sm:$0xff] %v26158_v0  ;;  %v26160_v20 = vld [vmem:[#allocation2 + $0x37] sm:$0xff]  ;;  %28811 = vst [vmem:[#allocation48_spill] sm:$0xff] %v26164_v37  ;;  %v26166_v36 = vld [vmem:[#allocation2 + $0x5f] sm:$0xff]  ;;  %v7082_v10 = vpack.c.bf16 %v7062_v57, %v7061_v17 }
 0x833   :  { %28809 = vst [vmem:[#allocation46_spill] sm:$0xff] %v26160_v20  ;;  %28812 = vst [vmem:[#allocation49_spill] sm:$0xff] %v26166_v36  ;;  %v26202_v57 = vld [vmem:[#allocation2 + $0x66] sm:$0xff]  ;;  %v7751_v62 = vld [vmem:[#allocation2 + $0x5b] sm:$0xff] }
 0x834   :  { %v6953_v11 = vmax.f32 %v6876_v22, 0.0  ;;  %v16815_v5 = vpop.f32.mrb[80].mxu0  ;;  %v6879_v43 = vadd.f32 %v26057_v16, %v6719_v46  ;;  %v26173_v42 = vpop.f32.mrb[24].mxu1  ;;  %18818 = vmatpush3.bf16.msra.mxu1 %v22640_v53  ;;  %28815 = vst [vmem:[#allocation51_spill] sm:$0xff] %v26202_v57  ;;  %v26210_v34 = vld [vmem:[#allocation2 + $0x67] sm:$0xff] }
 0x835   :  { %v16816_v9 = vpop.f32.mrb[81].mxu0  ;;  %v26179_v51 = vpop.f32.mrb[25].mxu1  ;;  %18614 = vmatpush3.bf16.msra.mxu0 %v22639_v45  ;;  %18871 = vmatprep.subr.bf16.mxu1 %v28814_v1  ;;  %v26186_v46 = vld [vmem:[#allocation2 + $0x6c] sm:$0xff]  ;;  %28818 = vst [vmem:[#allocation54_spill] sm:$0xff] %v26210_v34 }
 0x836   :  { %18564 = vmatmul.mubr.bf16.gmra.mrb[124].mxu0 %v7082_v10  ;;  %6984 = vst [vmem:[#allocation2 + $0x80] sm:$0xff] %v6953_v11  ;;  %v16817_v16 = vadd.f32 %v16816_v9, %v16815_v5  ;;  %v6954_v17 = vmax.f32 %v6879_v43, 0.0  ;;  %v16818_v53 = vpop.f32.mrb[82].mxu0  ;;  %v26184_v22 = vpop.f32.mrb[26].mxu1  ;;  %18667 = vmatprep.subr.bf16.mxu0 %v28814_v1  ;;  %v7064_v43 = vld [vmem:[#allocation2 + $0x59] sm:$0xff]  ;;  %v26204_v26 = vld [vmem:[#allocation2 + $0x6e] sm:$0xff] }
 0x837   :  { %18768 = vmatmul.mubr.bf16.gmra.mrb[48].mxu1 %v7769_v7  ;;  %18567 = vmatprep.mubr.msk.bf16.mxu0 %vm23296_vm3, %v28814_v1  ;;  %v16819_v40 = vpop.f32.mrb[83].mxu0  ;;  %v26191_v45 = vpop.f32.mrb[27].mxu1  ;;  %v26193_v2 = vld [vmem:[#allocation2 + $0x74] sm:$0xff]  ;;  %28816 = vst [vmem:[#allocation52_spill] sm:$0xff] %v26204_v26 }
 0x838   :  { %18771 = vmatprep.mubr.msk.bf16.mxu1 %vm23296_vm3, %v28814_v1  ;;  %v6724_v5 = vadd.f32 %v16817_v16, %v25945_v58  ;;  %6985 = vst [vmem:[#allocation2 + $0x88] sm:$0xff] %v6954_v17  ;;  %v16820_v9 = vadd.f32 %v16819_v40, %v16818_v53  ;;  %v26198_v10 = vpack.c.bf16 %v6954_v17, %v6953_v11  ;;  %v26206_v8 = vld [vmem:[#allocation2 + $0x6f] sm:$0xff] }
 0x839   :  { %28817 = vst [vmem:[#allocation53_spill] sm:$0xff] %v26206_v8  ;;  %v7063_v16 = vld [vmem:[#allocation2 + $0x51] sm:$0xff]  ;;  %v7066_v17 = vld [vmem:[#allocation2 + $0x69] sm:$0xff] }
 0x83a   :  { %v6884_v36 = vadd.f32 %v26037_v3, %v6724_v5  ;;  %v6727_v37 = vadd.f32 %v16820_v9, %v25945_v58  ;;  %v7083_v53 = vpack.c.bf16 %v7064_v43, %v7063_v16  ;;  %v7750_v40 = vld [vmem:[#allocation2 + $0x53] sm:$0xff]  ;;  %v26250_v8 = vld [vmem:[#allocation2 + $0x63] sm:$0xff] }
 0x83b   :  { %v7770_v3 = vpack.c.bf16 %v7751_v62, %v7750_v40  ;;  %v26221_v59 = vld [vmem:[#allocation2 + $0x76] sm:$0xff] }
 0x83c   :  { %v6955_v7 = vmax.f32 %v6884_v36, 0.0  ;;  %v6887_v20 = vadd.f32 %v26050_v13, %v6727_v37  ;;  %v16821_v39 = vpop.f32.mrb[84].mxu0  ;;  %v26217_v6 = vpop.f32.mrb[28].mxu1  ;;  %28819 = vst [vmem:[#allocation55_spill] sm:$0xff] %v26221_v59  ;;  %v7753_v59 = vld [vmem:[#allocation2 + $0x6b] sm:$0xff]  ;;  %v26303_v50 = vld [vmem:[#allocation2 + $0x73] sm:$0xff] }
 0x83d   :  { %v16822_v5 = vpop.f32.mrb[85].mxu0  ;;  %v26219_v9 = vpop.f32.mrb[29].mxu1  ;;  %v26223_v43 = vld [vmem:[#allocation2 + $0x7e] sm:$0xff]  ;;  %v26322_v19 = vld [vmem:[#allocation2 + $0x71] sm:$0xff] }
 0x83e   :  { %18568 = vmatmul.mubr.bf16.gmra.mrb[128].mxu0 %v7083_v53  ;;  %6986 = vst [vmem:[#allocation2 + $0x90] sm:$0xff] %v6955_v7  ;;  %v6956_v0 = vmax.f32 %v6887_v20, 0.0  ;;  %v16823_v11 = vadd.f32 %v16822_v5, %v16821_v39  ;;  %v16824_v57 = vpop.f32.mrb[86].mxu0  ;;  %v18530_v26 = vpop.f32.mrb[30].mxu1  ;;  %28820 = vst [vmem:[#allocation56_spill] sm:$0xff] %v26223_v43  ;;  %v26227_v13 = vld [vmem:[#allocation2 + $0x7b] sm:$0xff] }
 0x83f   :  { %18772 = vmatmul.mubr.bf16.gmra.mrb[52].mxu1 %v7770_v3  ;;  %18571 = vmatprep.mubr.msk.bf16.mxu0 %vm23296_vm3, %v28814_v1  ;;  %v16825_v62 = vpop.f32.mrb[87].mxu0  ;;  %v26229_v37 = vld [vmem:[#allocation2 + $0x83] sm:$0xff]  ;;  %v26231_v36 = vpop.f32.mrb[31].mxu1  ;;  %v26262_v43 = vld [vmem:[#allocation2 + $0x31] sm:$0xff]  ;;  %28837 = vst [vmem:[#allocation73_spill] sm:$0xff] %v26322_v19  ;;  %v26324_v14 = vld [vmem:[#allocation2 + $0x79] sm:$0xff] }
 0x840   :  { %v26233_v16 = vld [vmem:[#allocation2 + $0x84] sm:$0xff]  ;;  %18775 = vmatprep.mubr.msk.bf16.mxu1 %vm23296_vm3, %v28814_v1  ;;  %6987 = vst [vmem:[#allocation2 + $0x98] sm:$0xff] %v6956_v0  ;;  %v6732_v39 = vadd.f32 %v16823_v11, %v25945_v58  ;;  %v16826_v20 = vadd.f32 %v16825_v62, %v16824_v57  ;;  %v26240_v53 = vld [vmem:[#allocation2 + $0x7c] sm:$0xff]  ;;  %v26242_v40 = vpack.c.bf16 %v6956_v0, %v6955_v7  ;;  %28825 = vst [vmem:[#allocation61_spill] sm:$0xff] %v26262_v43 }
 0x841   :  { %v7065_v5 = vld [vmem:[#allocation2 + $0x61] sm:$0xff]  ;;  %v26254_v62 = vld [vmem:[#allocation2 + $0x77] sm:$0xff]  ;;  %v26260_v3 = vld [vmem:[#allocation2 + $0x29] sm:$0xff]  ;;  %28838 = vst [vmem:[#allocation74_spill] sm:$0xff] %v26324_v14 }
 0x842   :  { %v26248_v26 = vld [vmem:[#allocation2 + $0x7f] sm:$0xff]  ;;  %v6892_v11 = vadd.f32 %v26114_v12, %v6732_v39  ;;  %v6735_v57 = vadd.f32 %v16826_v20, %v25945_v58  ;;  %28822 = vst [vmem:[#allocation58_spill] sm:$0xff] %v26254_v62  ;;  %28824 = vst [vmem:[#allocation60_spill] sm:$0xff] %v26260_v3  ;;  %v7084_v34 = vpack.c.bf16 %v7066_v17, %v7065_v5  ;;  %v26269_v39 = vld [vmem:[#allocation2 + $0x49] sm:$0xff] }
 0x843   :  { %28821 = vst [vmem:[#allocation57_spill] sm:$0xff] %v26248_v26  ;;  %v26258_v7 = vld [vmem:[#allocation2 + $0x21] sm:$0xff]  ;;  %28828 = vst [vmem:[#allocation64_spill] sm:$0xff] %v26269_v39  ;;  %v7771_v20 = vpack.c.bf16 %v7753_v59, %v26250_v8  ;;  %v7067_v43 = vld [vmem:[#allocation2 + $0x71] sm:$0xff] }
 0x844   :  { %28823 = vst [vmem:[#allocation59_spill] sm:$0xff] %v26258_v7  ;;  %v6957_v54 = vmax.f32 %v6892_v11, 0.0  ;;  %v16827_v23 = vpop.f32.mrb[88].mxu0  ;;  %v6895_v49 = vadd.f32 %v26129_v41, %v6735_v57  ;;  %v26267_v12 = vld [vmem:[#allocation2 + $0x41] sm:$0xff]  ;;  %v7068_v41 = vld [vmem:[#allocation2 + $0x79] sm:$0xff] }
 0x845   :  { %28827 = vst [vmem:[#allocation63_spill] sm:$0xff] %v26267_v12  ;;  %v16828_v0 = vpop.f32.mrb[89].mxu0  ;;  %v26272_v62 = vld [vmem:[#allocation2 + $0x8b] sm:$0xff]  ;;  %v26317_v7 = vld [vmem:[#allocation2 + $0x61] sm:$0xff]  ;;  %v7085_v3 = vpack.c.bf16 %v7068_v41, %v7067_v43 }
 0x846   :  { %18572 = vmatmul.mubr.bf16.gmra.mrb[132].mxu0 %v7084_v34  ;;  %6988 = vst [vmem:[#allocation2 + $0xa0] sm:$0xff] %v6957_v54  ;;  %v16829_v5 = vadd.f32 %v16828_v0, %v16827_v23  ;;  %v6958_v11 = vmax.f32 %v6895_v49, 0.0  ;;  %v16830_v57 = vpop.f32.mrb[90].mxu0  ;;  %v26280_v33 = vld [vmem:[#allocation2 + $0x8c] sm:$0xff]  ;;  %v26315_v0 = vld [vmem:[#allocation2 + $0x59] sm:$0xff]  ;;  %28835 = vst [vmem:[#allocation71_spill] sm:$0xff] %v26317_v7 }
 0x847   :  { %18776 = vmatmul.mubr.bf16.gmra.mrb[56].mxu1 %v7771_v20  ;;  %18575 = vmatprep.mubr.msk.bf16.mxu0 %vm23296_vm3, %v28814_v1  ;;  %v16831_v59 = vpop.f32.mrb[91].mxu0  ;;  %v26284_v47 = vld [vmem:[#allocation2 + $0x93] sm:$0xff]  ;;  %v26297_v17 = vld [vmem:[#allocation2 + $0x86] sm:$0xff]  ;;  %28834 = vst [vmem:[#allocation70_spill] sm:$0xff] %v26315_v0 }
 0x848   :  { %v26286_v26 = vld [vmem:[#allocation2 + $0x94] sm:$0xff]  ;;  %18779 = vmatprep.mubr.msk.bf16.mxu1 %vm23296_vm3, %v28814_v1  ;;  %v6740_v34 = vadd.f32 %v16829_v5, %v25945_v58  ;;  %6989 = vst [vmem:[#allocation2 + $0xa8] sm:$0xff] %v6958_v11  ;;  %v16832_v49 = vadd.f32 %v16831_v59, %v16830_v57  ;;  %v26291_v23 = vpack.c.bf16 %v6958_v11, %v6957_v54  ;;  %28829 = vst [vmem:[#allocation65_spill] sm:$0xff] %v26297_v17  ;;  %v26307_v11 = vld [vmem:[#allocation2 + $0x87] sm:$0xff] }
 0x849   :  { %v26299_v12 = vld [vmem:[#allocation2 + $0x8e] sm:$0xff]  ;;  %28832 = vst [vmem:[#allocation68_spill] sm:$0xff] %v26307_v11  ;;  %v7772_v59 = vpack.c.bf16 %v26227_v13, %v26303_v50 }
 0x84a   :  { %28830 = vst [vmem:[#allocation66_spill] sm:$0xff] %v26299_v12  ;;  %v26301_v39 = vld [vmem:[#allocation2 + $0x8f] sm:$0xff]  ;;  %v6900_v5 = vadd.f32 %v26106_v4, %v6740_v34  ;;  %v6743_v54 = vadd.f32 %v16832_v49, %v25945_v58 }
 0x84b   :  { %28831 = vst [vmem:[#allocation67_spill] sm:$0xff] %v26301_v39  ;;  %v26313_v20 = vld [vmem:[#allocation2 + $0x51] sm:$0xff]  ;;  %v26320_v49 = vld [vmem:[#allocation2 + $0x69] sm:$0xff] }
 0x84c   :  { %28833 = vst [vmem:[#allocation69_spill] sm:$0xff] %v26313_v20  ;;  %v6959_v32 = vmax.f32 %v6900_v5, 0.0  ;;  %v6903_v4 = vadd.f32 %v26124_v35, %v6743_v54  ;;  %v16833_v34 = vpop.f32.mrb[92].mxu0  ;;  %28836 = vst [vmem:[#allocation72_spill] sm:$0xff] %v26320_v49  ;;  %v7069_v35 = vld [vmem:[#allocation2 + $0x81] sm:$0xff]  ;;  %v7070_v43 = vld [vmem:[#allocation2 + $0x89] sm:$0xff] }
 0x84d   :  { %v16834_v57 = vpop.f32.mrb[93].mxu0  ;;  %v26336_v39 = vld [vmem:[#allocation2 + $0x9b] sm:$0xff]  ;;  %v26369_v19 = vld [vmem:[#allocation2 + $0x89] sm:$0xff]  ;;  %v7086_v0 = vpack.c.bf16 %v7070_v43, %v7069_v35  ;;  %v26372_v12 = vld [vmem:[#allocation2 + $0x91] sm:$0xff] }
 0x84e   :  { %18576 = vmatmul.mubr.bf16.gmra.mrb[136].mxu0 %v7085_v3  ;;  %6990 = vst [vmem:[#allocation2 + $0xb0] sm:$0xff] %v6959_v32  ;;  %v6960_v41 = vmax.f32 %v6903_v4, 0.0  ;;  %v16835_v5 = vadd.f32 %v16834_v57, %v16833_v34  ;;  %v16836_v54 = vpop.f32.mrb[94].mxu0  ;;  %v26345_v57 = vld [vmem:[#allocation2 + $0x9c] sm:$0xff]  ;;  %28844 = vst [vmem:[#allocation80_spill] sm:$0xff] %v26369_v19  ;;  %v7774_v61 = vpack.c.bf16 %v26336_v39, %v26284_v47 }
 0x84f   :  { %18780 = vmatmul.mubr.bf16.gmra.mrb[60].mxu1 %v7772_v59  ;;  %18579 = vmatprep.mubr.msk.bf16.mxu0 %vm23296_vm3, %v28814_v1  ;;  %v26338_v17 = vld [vmem:[#allocation2 + $0xa3] sm:$0xff]  ;;  %v16837_v11 = vpop.f32.mrb[95].mxu0  ;;  %28845 = vst [vmem:[#allocation81_spill] sm:$0xff] %v26372_v12  ;;  %v26374_v30 = vld [vmem:[#allocation2 + $0x99] sm:$0xff] }
 0x850   :  { %v26340_v20 = vld [vmem:[#allocation2 + $0xa4] sm:$0xff]  ;;  %18783 = vmatprep.mubr.msk.bf16.mxu1 %vm23296_vm3, %v28814_v1  ;;  %6991 = vst [vmem:[#allocation2 + $0xb8] sm:$0xff] %v6960_v41  ;;  %v6748_v3 = vadd.f32 %v16835_v5, %v25945_v58  ;;  %v16838_v4 = vadd.f32 %v16837_v11, %v16836_v54  ;;  %v26347_v59 = vpack.c.bf16 %v6960_v41, %v6959_v32  ;;  %v26357_v5 = vld [vmem:[#allocation2 + $0x96] sm:$0xff]  ;;  %28846 = vst [vmem:[#allocation82_spill] sm:$0xff] %v26374_v30 }
 0x851   :  { %v26353_v14 = vld [vmem:[#allocation2 + $0x9e] sm:$0xff]  ;;  %28840 = vst [vmem:[#allocation76_spill] sm:$0xff] %v26357_v5  ;;  %v7773_v41 = vpack.c.bf16 %v26272_v62, %v26229_v37  ;;  %v26405_v19 = vld [vmem:[#allocation2 + $0xa7] sm:$0xff] }
 0x852   :  { %28839 = vst [vmem:[#allocation75_spill] sm:$0xff] %v26353_v14  ;;  %v6908_v7 = vadd.f32 %v26179_v51, %v6748_v3  ;;  %v6751_v49 = vadd.f32 %v16838_v4, %v25945_v58  ;;  %v26359_v11 = vld [vmem:[#allocation2 + $0x97] sm:$0xff]  ;;  %v26361_v32 = vld [vmem:[#allocation2 + $0x9f] sm:$0xff]  ;;  %28848 = vst [vmem:[#allocation84_spill] sm:$0xff] %v26405_v19 }
 0x853   :  { %28841 = vst [vmem:[#allocation77_spill] sm:$0xff] %v26359_v11  ;;  %28842 = vst [vmem:[#allocation78_spill] sm:$0xff] %v26361_v32  ;;  %v26367_v34 = vld [vmem:[#allocation2 + $0x81] sm:$0xff] }
 0x854   :  { %28843 = vst [vmem:[#allocation79_spill] sm:$0xff] %v26367_v34  ;;  %v6961_v51 = vmax.f32 %v6908_v7, 0.0  ;;  %v6911_v3 = vadd.f32 %v26191_v45, %v6751_v49  ;;  %v16839_v4 = vpop.f32.mrb[96].mxu0 }
 0x855   :  { %v26380_v54 = vld [vmem:[#allocation2 + $0xab] sm:$0xff]  ;;  %v16840_v11 = vpop.f32.mrb[97].mxu0 }
 0x856   :  { %v26382_v32 = vld [vmem:[#allocation2 + $0xac] sm:$0xff]  ;;  %18580 = vmatmul.mubr.bf16.gmra.mrb[140].mxu0 %v7086_v0  ;;  %6992 = vst [vmem:[#allocation2 + $0xc0] sm:$0xff] %v6961_v51  ;;  %v6962_v45 = vmax.f32 %v6911_v3, 0.0  ;;  %v16841_v49 = vadd.f32 %v16840_v11, %v16839_v4  ;;  %v16842_v43 = vpop.f32.mrb[98].mxu0  ;;  %v7072_v51 = vld [vmem:[#allocation2 + $0x99] sm:$0xff] }
 0x857   :  { %18784 = vmatmul.mubr.bf16.gmra.mrb[64].mxu1 %v7773_v41  ;;  %18583 = vmatprep.mubr.msk.bf16.mxu0 %vm23296_vm3, %v28814_v1  ;;  %v26388_v35 = vld [vmem:[#allocation2 + $0xb3] sm:$0xff]  ;;  %v16843_v60 = vpop.f32.mrb[99].mxu0  ;;  %v26399_v3 = vld [vmem:[#allocation2 + $0xa6] sm:$0xff] }
 0x858   :  { %v26390_v34 = vld [vmem:[#allocation2 + $0xb4] sm:$0xff]  ;;  %18787 = vmatprep.mubr.msk.bf16.mxu1 %vm23296_vm3, %v28814_v1  ;;  %6993 = vst [vmem:[#allocation2 + $0xc8] sm:$0xff] %v6962_v45  ;;  %v6756_v7 = vadd.f32 %v16841_v49, %v25945_v58  ;;  %v16844_v0 = vadd.f32 %v16843_v60, %v16842_v43  ;;  %28847 = vst [vmem:[#allocation83_spill] sm:$0xff] %v26399_v3  ;;  %v26413_v41 = vld [vmem:[#allocation2 + $0xa1] sm:$0xff] }
 0x859   :  { %v26401_v4 = vld [vmem:[#allocation2 + $0xae] sm:$0xff]  ;;  %28850 = vst [vmem:[#allocation86_spill] sm:$0xff] %v26413_v41  ;;  %v26432_v41 = vld [vmem:[#allocation2 + $0xb6] sm:$0xff] }
 0x85a   :  { %v6916_v12 = vadd.f32 %v26173_v42, %v6756_v7  ;;  %v6759_v30 = vadd.f32 %v16844_v0, %v25945_v58  ;;  %v26407_v45 = vld [vmem:[#allocation2 + $0xaf] sm:$0xff]  ;;  %28852 = vst [vmem:[#allocation88_spill] sm:$0xff] %v26432_v41 }
 0x85b   :  { %28849 = vst [vmem:[#allocation85_spill] sm:$0xff] %v26407_v45  ;;  %v7071_v49 = vld [vmem:[#allocation2 + $0x91] sm:$0xff]  ;;  %v26415_v11 = vld [vmem:[#allocation2 + $0xa9] sm:$0xff] }
 0x85c   :  { %28851 = vst [vmem:[#allocation87_spill] sm:$0xff] %v26415_v11  ;;  %v7087_v5 = vpack.c.bf16 %v7072_v51, %v7071_v49  ;;  %v6963_v14 = vmax.f32 %v6916_v12, 0.0  ;;  %v6919_v42 = vadd.f32 %v26184_v22, %v6759_v30  ;;  %v16845_v7 = vpop.f32.mrb[100].mxu0  ;;  %v7073_v51 = vld [vmem:[#allocation2 + $0xa1] sm:$0xff]  ;;  %v7074_v49 = vld [vmem:[#allocation2 + $0xa9] sm:$0xff]  ;;  %v26434_v11 = vld [vmem:[#allocation2 + $0xb7] sm:$0xff] }
 0x85d   :  { %v16846_v60 = vpop.f32.mrb[101].mxu0  ;;  %28853 = vst [vmem:[#allocation89_spill] sm:$0xff] %v26434_v11  ;;  %v26476_v11 = vld [vmem:[#allocation2 + $0x4a] sm:$0xff]  ;;  %v26486_v45 = vld [vmem:[#allocation2 + $0x62] sm:$0xff] }
 0x85e   :  { %18584 = vmatmul.mubr.bf16.gmra.mrb[144].mxu0 %v7087_v5  ;;  %6994 = vst [vmem:[#allocation2 + $0xd0] sm:$0xff] %v6963_v14  ;;  %v6964_v3 = vmax.f32 %v6919_v42, 0.0  ;;  %v16847_v43 = vadd.f32 %v16846_v60, %v16845_v7  ;;  %v16848_v19 = vpop.f32.mrb[102].mxu0  ;;  %v26429_v60 = vld [vmem:[#allocation2 + $0xbe] sm:$0xff]  ;;  %28862 = vst [vmem:[#allocation98_spill] sm:$0xff] %v26476_v11  ;;  %v26488_v41 = vld [vmem:[#allocation2 + $0x6a] sm:$0xff] }
 0x85f   :  { %18788 = vmatmul.mubr.bf16.gmra.mrb[68].mxu1 %v7774_v61  ;;  %18587 = vmatprep.mubr.msk.bf16.mxu0 %vm23296_vm3, %v28814_v1  ;;  %v16849_v12 = vpop.f32.mrb[103].mxu0  ;;  %v7088_v61 = vpack.c.bf16 %v7074_v49, %v7073_v51  ;;  %v26446_v51 = vld [vmem:[#allocation2 + $0xb1] sm:$0xff]  ;;  %v7076_v49 = vld [vmem:[#allocation2 + $0xb9] sm:$0xff]  ;;  %28865 = vst [vmem:[#allocation101_spill] sm:$0xff] %v26486_v45  ;;  %28866 = vst [vmem:[#allocation102_spill] sm:$0xff] %v26488_v41 }
 0x860   :  { %18791 = vmatprep.mubr.msk.bf16.mxu1 %vm23296_vm3, %v28814_v1  ;;  %6995 = vst [vmem:[#allocation2 + $0xd8] sm:$0xff] %v6964_v3  ;;  %v16850_v30 = vadd.f32 %v16849_v12, %v16848_v19  ;;  %v6764_v22 = vadd.f32 %v16847_v43, %v25945_v58  ;;  %v26436_v19 = vld [vmem:[#allocation2 + $0xbf] sm:$0xff]  ;;  %v7775_v3 = vpack.c.bf16 %v26380_v54, %v26338_v17  ;;  %28855 = vst [vmem:[#allocation91_spill] sm:$0xff] %v26446_v51  ;;  %v26545_v41 = vld [vmem:[#allocation2 + $0x2c] sm:$0xff] }
 0x861   :  { %28854 = vst [vmem:[#allocation90_spill] sm:$0xff] %v26436_v19  ;;  %v26478_v19 = vld [vmem:[#allocation2 + $0x52] sm:$0xff]  ;;  %v26514_v11 = vld [vmem:[#allocation2 + $0xa2] sm:$0xff]  ;;  %28879 = vst [vmem:[#allocation115_spill] sm:$0xff] %v26545_v41 }
 0x862   :  { %v6924_v5 = vadd.f32 %v26219_v9, %v6764_v22  ;;  %v6767_v14 = vadd.f32 %v16850_v30, %v25945_v58  ;;  %v26468_v9 = vld [vmem:[#allocation2 + $0x32] sm:$0xff]  ;;  %v26474_v58 = vld [vmem:[#allocation2 + $0x42] sm:$0xff]  ;;  %28863 = vst [vmem:[#allocation99_spill] sm:$0xff] %v26478_v19  ;;  %28873 = vst [vmem:[#allocation109_spill] sm:$0xff] %v26514_v11 }
 0x863   :  { %28860 = vst [vmem:[#allocation96_spill] sm:$0xff] %v26468_v9  ;;  %28861 = vst [vmem:[#allocation97_spill] sm:$0xff] %v26474_v58  ;;  %v26526_v58 = vld [vmem:[#allocation2 + $0xba] sm:$0xff]  ;;  %v22908_v11 = vld [vmem:[#allocation2 + $0xc] sm:$0xff] }
 0x864   :  { %v6965_v42 = vmax.f32 %v6924_v5, 0.0  ;;  %v6927_v7 = vadd.f32 %v26231_v36, %v6767_v14  ;;  %v16851_v0 = vpop.f32.mrb[104].mxu0  ;;  %v22907_v5 = vld [vmem:[%s28653_s6] ss:$0 sm:$0xff]  ;;  %28876 = vst [vmem:[#allocation112_spill] sm:$0xff] %v26526_v58  ;;  %v26568_v19 = vld [vmem:[#allocation2 + $0x6c] sm:$0xff] }
 0x865   :  { %v16852_v43 = vpop.f32.mrb[105].mxu0  ;;  %v7077_v45 = vld [vmem:[#allocation2 + $0xc1] sm:$0x3]  ;;  %28887 = vst [vmem:[#allocation123_spill] sm:$0xff] %v26568_v19  ;;  %v26580_v58 = vld [vmem:[#allocation2 + $0x84] sm:$0xff]  ;;  %v26593_v9 = vld [vmem:[#allocation2 + $0x94] sm:$0xff] }
 0x866   :  { %18588 = vmatmul.mubr.bf16.gmra.mrb[148].mxu0 %v7088_v61  ;;  %6996 = vst [vmem:[#allocation2 + $0xe0] sm:$0xff] %v6965_v42  ;;  %v6966_v36 = vmax.f32 %v6927_v7, 0.0  ;;  %v16853_v12 = vadd.f32 %v16852_v43, %v16851_v0  ;;  %v16854_v30 = vpop.f32.mrb[106].mxu0  ;;  %v26453_v61 = vld [vmem:[#allocation2 + $0xb9] sm:$0xff]  ;;  %v26455_v0 = vld [vmem:[#allocation2 + $0x22] sm:$0xff]  ;;  %v7075_v42 = vld [vmem:[#allocation2 + $0xb1] sm:$0xff] }
 0x867   :  { %18792 = vmatmul.mubr.bf16.gmra.mrb[72].mxu1 %v7775_v3  ;;  %18591 = vmatprep.mubr.msk.bf16.mxu0 %vm23296_vm3, %v28814_v1  ;;  %v16855_v22 = vpop.f32.mrb[107].mxu0  ;;  %28856 = vst [vmem:[#allocation92_spill] sm:$0xff] %v26453_v61  ;;  %28857 = vst [vmem:[#allocation93_spill] sm:$0xff] %v26455_v0  ;;  %v26457_v7 = vld [vmem:[#allocation2 + $0xbb] sm:$0xff]  ;;  %v26461_v43 = vld [vmem:[#allocation2 + $0xc9] sm:$0xff] }
 0x868   :  { %18795 = vmatprep.mubr.msk.bf16.mxu1 %vm23296_vm3, %v28814_v1  ;;  %6997 = vst [vmem:[#allocation2 + $0xe8] sm:$0xff] %v6966_v36  ;;  %v6772_v14 = vadd.f32 %v22907_v5, %v16853_v12  ;;  %v26459_v3 = vld [vmem:[#allocation2 + $0xc1] sm:$0xff]  ;;  %28859 = vst [vmem:[#allocation95_spill] sm:$0xff] %v26461_v43  ;;  %v26466_v22 = vld [vmem:[#allocation2 + $0x2a] sm:$0xff] }
 0x869   :  { %28858 = vst [vmem:[#allocation94_spill] sm:$0xff] %v26459_v3  ;;  %v26470_v12 = vld [vmem:[#allocation2 + $0x3a] sm:$0xff]  ;;  %v7776_v3 = vpack.c.bf16 %v26457_v7, %v26388_v35  ;;  %v26494_v43 = vld [vmem:[#allocation2 + $0x72] sm:$0xff]  ;;  %v26498_v0 = vld [vmem:[#allocation2 + $0x82] sm:$0xff] }
 0x86a   :  { %v6932_v36 = vadd.f32 %v26217_v6, %v6772_v14  ;;  %v7089_v14 = vpack.c.bf16 %v7076_v49, %v7075_v42  ;;  %v26484_v61 = vld [vmem:[#allocation2 + $0x5a] sm:$0xff]  ;;  %28867 = vst [vmem:[#allocation103_spill] sm:$0xff] %v26494_v43  ;;  %28869 = vst [vmem:[#allocation105_spill] sm:$0xff] %v26498_v0  ;;  %v26506_v5 = vld [vmem:[#allocation2 + $0x92] sm:$0xff] }
 0x86b   :  { %28864 = vst [vmem:[#allocation100_spill] sm:$0xff] %v26484_v61  ;;  %v26496_v30 = vld [vmem:[#allocation2 + $0x7a] sm:$0xff]  ;;  %28871 = vst [vmem:[#allocation107_spill] sm:$0xff] %v26506_v5  ;;  %v26516_v49 = vld [vmem:[#allocation2 + $0xaa] sm:$0xff]  ;;  %v7090_v5 = vpack.c.bf16 %v7077_v45, %v7077_v45 }
 0x86c   :  { %v6967_v51 = vmax.f32 %v6932_v36, 0.0  ;;  %28868 = vst [vmem:[#allocation104_spill] sm:$0xff] %v26496_v30  ;;  %v26504_v36 = vld [vmem:[#allocation2 + $0x8a] sm:$0xff]  ;;  %v26508_v6 = vld [vmem:[#allocation2 + $0x9a] sm:$0xff]  ;;  %28874 = vst [vmem:[#allocation110_spill] sm:$0xff] %v26516_v49 }
 0x86d   :  { %28870 = vst [vmem:[#allocation106_spill] sm:$0xff] %v26504_v36  ;;  %28872 = vst [vmem:[#allocation108_spill] sm:$0xff] %v26508_v6  ;;  %v26518_v42 = vld [vmem:[#allocation2 + $0xb2] sm:$0xff]  ;;  %v26530_v43 = vld [vmem:[#allocation2 + $0xca] sm:$0xff] }
 0x86e   :  { %18592 = vmatmul.mubr.bf16.gmra.mrb[152].mxu0 %v7089_v14  ;;  %6998 = vst [vmem:[#allocation2 + $0xf0] sm:$0xff] %v6967_v51  ;;  %28875 = vst [vmem:[#allocation111_spill] sm:$0xff] %v26518_v42  ;;  %v7764_v14 = vld [vmem:[#allocation2 + $0xc3] sm:$0x3]  ;;  %v26556_v51 = vld [vmem:[#allocation2 + $0x4c] sm:$0xff] }
 0x86f   :  { %18796 = vmatmul.mubr.bf16.gmra.mrb[76].mxu1 %v7776_v3  ;;  %18595 = vmatprep.mubr.msk.bf16.mxu0 %vm23296_vm3, %v28814_v1  ;;  %v26528_v3 = vld [vmem:[#allocation2 + $0xc2] sm:$0xff]  ;;  %28878 = vst [vmem:[#allocation114_spill] sm:$0xff] %v26530_v43  ;;  %v7777_v6 = vpack.c.bf16 %v7764_v14, %v7764_v14  ;;  %v26550_v14 = vld [vmem:[#allocation2 + $0x34] sm:$0xff]  ;;  %28883 = vst [vmem:[#allocation119_spill] sm:$0xff] %v26556_v51 }
 0x870   :  { %18799 = vmatprep.mubr.msk.bf16.mxu1 %vm23296_vm3, %v28814_v1  ;;  %28877 = vst [vmem:[#allocation113_spill] sm:$0xff] %v26528_v3  ;;  %v8004_v0 = vld [vmem:[#allocation2 + $0x4] sm:$0xff]  ;;  %28880 = vst [vmem:[#allocation116_spill] sm:$0xff] %v26550_v14  ;;  %v26558_v3 = vld [vmem:[#allocation2 + $0x54] sm:$0xff] }
 0x871   :  { %v22641_v30 = vld [vmem:[%s28649_s2 + $0x140] sm:$0xff]   ;;  %28884 = vst [vmem:[#allocation120_spill] sm:$0xff] %v26558_v3  ;;  %v8029_v49 = vpack.c.bf16 %v22908_v11, %v8004_v0  ;;  %v26570_v61 = vld [vmem:[#allocation2 + $0x74] sm:$0xff]  ;;  %v22642_v42 = vld [vmem:[%s28649_s2 + $0x148] sm:$0xff]  }
 0x872   :  { %v22644_v45 = vld [vmem:[%s28649_s2 + $0x80] sm:$0xff]   ;;  %28888 = vst [vmem:[#allocation124_spill] sm:$0xff] %v26570_v61  ;;  %28890 = vst [vmem:[#allocation126_spill] sm:$0xff] %v26580_v58  ;;  %v26582_v11 = vld [vmem:[#allocation2 + $0x8c] sm:$0xff] }
 0x873   :  { %v26560_v43 = vld [vmem:[#allocation2 + $0x5c] sm:$0xff]  ;;  %v26566_v36 = vld [vmem:[#allocation2 + $0x64] sm:$0xff]  ;;  %28891 = vst [vmem:[#allocation127_spill] sm:$0xff] %v26582_v11  ;;  %28892 = vst [vmem:[#allocation128_spill] sm:$0xff] %v26593_v9 }
 0x874   :  { %28885 = vst [vmem:[#allocation121_spill] sm:$0xff] %v26560_v43  ;;  %28886 = vst [vmem:[#allocation122_spill] sm:$0xff] %v26566_v36  ;;  %v26578_v41 = vld [vmem:[#allocation2 + $0x7c] sm:$0xff]  ;;  %v26597_v3 = vld [vmem:[#allocation2 + $0xa4] sm:$0xff] }
 0x875   :  { %28889 = vst [vmem:[#allocation125_spill] sm:$0xff] %v26578_v41  ;;  %v26595_v51 = vld [vmem:[#allocation2 + $0x9c] sm:$0xff]  ;;  %28894 = vst [vmem:[#allocation130_spill] sm:$0xff] %v26597_v3  ;;  %v26614_v0 = vld [vmem:[#allocation2 + $0xc4] sm:$0xff] }
 0x876   :  { %18596 = vmatmul.mubr.bf16.gmra.mrb[156].mxu0 %v7090_v5  ;;  %v26552_v5 = vld [vmem:[#allocation2 + $0x3c] sm:$0xff]  ;;  %28893 = vst [vmem:[#allocation129_spill] sm:$0xff] %v26595_v51  ;;  %28898 = vst [vmem:[#allocation134_spill] sm:$0xff] %v26614_v0  ;;  %v26616_v41 = vld [vmem:[#allocation2 + $0xcc] sm:$0xff] }
 0x877   :  { %18800 = vmatmul.mubr.bf16.gmra.mrb[80].mxu1 %v7777_v6  ;;  %18615 = vmatprep.mubr.msk.bf16.mxu0 %vm23296_vm3, %v28814_v1  ;;  %28881 = vst [vmem:[#allocation117_spill] sm:$0xff] %v26552_v5  ;;  %v26554_v6 = vld [vmem:[#allocation2 + $0x44] sm:$0xff]  ;;  %v26605_v5 = vld [vmem:[#allocation2 + $0xb4] sm:$0xff]  ;;  %v26607_v19 = vld [vmem:[#allocation2 + $0xbc] sm:$0xff] }
 0x878   :  { %18819 = vmatprep.mubr.msk.bf16.mxu1 %vm23296_vm3, %v28814_v1  ;;  %28882 = vst [vmem:[#allocation118_spill] sm:$0xff] %v26554_v6  ;;  %28896 = vst [vmem:[#allocation132_spill] sm:$0xff] %v26605_v5  ;;  %v22643_v36 = vld [vmem:[%s28649_s2 + $0x150] sm:$0xff]   ;;  %v26637_v58 = vld [vmem:[#allocation2 + $0x3d] sm:$0xff] }
 0x879   :  { %28897 = vst [vmem:[#allocation133_spill] sm:$0xff] %v26607_v19  ;;  %28899 = vst [vmem:[#allocation135_spill] sm:$0xff] %v26616_v41  ;;  %v26626_v61 = vld [vmem:[#allocation2 + $0x2d] sm:$0xff]  ;;  %v26635_v3 = vld [vmem:[#allocation2 + $0x35] sm:$0xff] }
 0x87a   :  { %v22646_v51 = vld [vmem:[%s28649_s2 + $0x90] sm:$0xff]   ;;  %28901 = vst [vmem:[#allocation137_spill] sm:$0xff] %v26637_v58  ;;  %v26645_v9 = vld [vmem:[#allocation2 + $0x5d] sm:$0xff]  ;;  %v26652_v0 = vld [vmem:[#allocation2 + $0x65] sm:$0xff] }
 0x87b   :  { %v26641_v5 = vld [vmem:[#allocation2 + $0x4d] sm:$0xff]  ;;  %v26643_v11 = vld [vmem:[#allocation2 + $0x55] sm:$0xff]  ;;  %28904 = vst [vmem:[#allocation140_spill] sm:$0xff] %v26645_v9  ;;  %v26684_v58 = vld [vmem:[#allocation2 + $0xa5] sm:$0xff] }
 0x87c   :  { %28902 = vst [vmem:[#allocation138_spill] sm:$0xff] %v26641_v5  ;;  %28903 = vst [vmem:[#allocation139_spill] sm:$0xff] %v26643_v11  ;;  %v22909_v41 = vld [vmem:[#allocation2 + $0x14] sm:$0xff]  ;;  %v26682_v11 = vld [vmem:[#allocation2 + $0x9d] sm:$0xff] }
 0x87d   :  { %v26656_v6 = vld [vmem:[#allocation2 + $0x75] sm:$0xff]  ;;  %28910 = vst [vmem:[#allocation146_spill] sm:$0xff] %v26682_v11  ;;  %28911 = vst [vmem:[#allocation147_spill] sm:$0xff] %v26684_v58  ;;  %v26701_v43 = vld [vmem:[#allocation2 + $0xc5] sm:$0xff] }
 0x87e   :  { %18616 = vmatmul.mubr.bf16.vlgmr.msra.gmra.mrb[108].mxu0 %v25957_v25  ;;  %v22645_v25 = vld [vmem:[%s28649_s2 + $0x88] sm:$0xff]   ;;  %28906 = vst [vmem:[#allocation142_spill] sm:$0xff] %v26656_v6  ;;  %v26680_v5 = vld [vmem:[#allocation2 + $0x95] sm:$0xff] }
 0x87f   :  { %18820 = vmatmul.mubr.bf16.vlgmr.msra.gmra.mrb[32].mxu1 %v8029_v49  ;;  %18619 = vmatprep.mubr.msk.bf16.mxu0 %vm23296_vm3, %v28814_v1  ;;  %v26603_v49 = vld [vmem:[#allocation2 + $0xac] sm:$0xff]  ;;  %v26692_v14 = vld [vmem:[#allocation2 + $0xb5] sm:$0xff]  ;;  %v22911_v11 = vld [vmem:[#allocation2 + $0x24] sm:$0xff] }
 0x880   :  { %18823 = vmatprep.mubr.msk.bf16.mxu1 %vm23296_vm3, %v28814_v1  ;;  %18872 = vmatpush3.bf16.msra.mxu1 %v22641_v30  ;;  %28895 = vst [vmem:[#allocation131_spill] sm:$0xff] %v26603_v49  ;;  %v26618_v30 = vld [vmem:[#allocation2 + $0xd4] sm:$0xff]  ;;  %v26639_v49 = vld [vmem:[#allocation2 + $0x45] sm:$0xff] }
 0x881   :  { %18873 = vmatprep.subr.bf16.mxu1 %v28814_v1  ;;  %18668 = vmatpush3.bf16.msra.mxu0 %v22644_v45  ;;  %28900 = vst [vmem:[#allocation136_spill] sm:$0xff] %v26618_v30  ;;  %v22910_v30 = vld [vmem:[#allocation2 + $0x1c] sm:$0xff]  ;;  %v26669_v45 = vld [vmem:[#allocation2 + $0x8d] sm:$0xff] }
 0x882   :  { %18669 = vmatprep.subr.bf16.mxu0 %v28814_v1  ;;  %v8030_v19 = vpack.c.bf16 %v22910_v30, %v22909_v41  ;;  %v22647_v41 = vld [vmem:[%s28649_s2 + $0x158] sm:$0xff]   ;;  %28909 = vst [vmem:[#allocation145_spill] sm:$0xff] %v26669_v45  ;;  %v22912_v58 = vld [vmem:[#allocation2 + $0x2c] sm:$0xff] }
 0x883   :  { %v26665_v30 = vld [vmem:[#allocation2 + $0x7d] sm:$0xff]  ;;  %v8031_v45 = vpack.c.bf16 %v22912_v58, %v22911_v11  ;;  %v22652_v58 = vld [vmem:[%s28649_s2 + $0x168] sm:$0xff]   ;;  %v22654_v11 = vld [vmem:[%s28649_s2 + $0x170] sm:$0xff]  }
 0x884   :  { %18874 = vmatpush3.bf16.msra.mxu1 %v22642_v42  ;;  %v26654_v42 = vld [vmem:[#allocation2 + $0x6d] sm:$0xff]  ;;  %28907 = vst [vmem:[#allocation143_spill] sm:$0xff] %v26665_v30 }
 0x885   :  { %18875 = vmatprep.subr.bf16.mxu1 %v28814_v1  ;;  %18670 = vmatpush3.bf16.msra.mxu0 %v22645_v25  ;;  %28905 = vst [vmem:[#allocation141_spill] sm:$0xff] %v26654_v42  ;;  %v26667_v25 = vld [vmem:[#allocation2 + $0x85] sm:$0xff]  ;;  %v26694_v42 = vld [vmem:[#allocation2 + $0xbd] sm:$0xff]  ;;  %v26703_v30 = vld [vmem:[#allocation2 + $0xcd] sm:$0xff] }
 0x886   :  { %18620 = vmatmul.mubr.bf16.gmra.mrb[112].mxu0 %v25954_v21  ;;  %18671 = vmatprep.subr.bf16.mxu0 %v28814_v1  ;;  %28908 = vst [vmem:[#allocation144_spill] sm:$0xff] %v26667_v25  ;;  %v22648_v21 = vld [vmem:[%s28649_s2 + $0x98] sm:$0xff]   ;;  %v12526_v6 = vpack.c.bf16 %v26701_v43, %v26694_v42  ;;  %v22649_v25 = vld [vmem:[%s28649_s2 + $0xa0] sm:$0xff]  }
 0x887   :  { %18824 = vmatmul.mubr.bf16.gmra.mrb[36].mxu1 %v8030_v19  ;;  %18623 = vmatprep.mubr.msk.bf16.mxu0 %vm23296_vm3, %v28814_v1  ;;  %v26690_v19 = vld [vmem:[#allocation2 + $0xad] sm:$0xff]  ;;  %v12757_v42 = vld [vmem:[#allocation2 + $0x36] sm:$0xff] }
 0x888   :  { %18827 = vmatprep.mubr.msk.bf16.mxu1 %vm23296_vm3, %v28814_v1  ;;  %18876 = vmatpush3.bf16.msra.mxu1 %v22643_v36  ;;  %v26705_v36 = vld [vmem:[#allocation2 + $0xd5] sm:$0xff] }
 0x889   :  { %18672 = vmatpush3.bf16.msra.mxu0 %v22646_v51  ;;  %18877 = vmatprep.subr.bf16.mxu1 %v28814_v1  ;;  %v12527_v9 = vpack.c.bf16 %v26705_v36, %v26703_v30  ;;  %v22650_v51 = vld [vmem:[%s28649_s2 + $0x160] sm:$0xff]   ;;  %v22794_v36 = vld [vmem:[%s28649_s2 + $0x5c8] sm:$0xff]  }
 0x88a   :  { %18673 = vmatprep.subr.bf16.mxu0 %v28814_v1 }
 0x88c   :  { %18878 = vmatpush3.bf16.msra.mxu1 %v22647_v41  ;;  %v22914_v41 = vld [vmem:[#allocation2 + $0x3c] sm:$0xff] }
 0x88d   :  { %18674 = vmatpush3.bf16.msra.mxu0 %v22648_v21  ;;  %18879 = vmatprep.subr.bf16.mxu1 %v28814_v1 }
 0x88e   :  { %18624 = vmatmul.mubr.bf16.gmra.mrb[116].mxu0 %v25970_v56  ;;  %18675 = vmatprep.subr.bf16.mxu0 %v28814_v1  ;;  %v22651_v56 = vld [vmem:[%s28649_s2 + $0xa8] sm:$0xff]  }
 0x88f   :  { %18828 = vmatmul.mubr.bf16.gmra.mrb[40].mxu1 %v8031_v45  ;;  %18627 = vmatprep.mubr.msk.bf16.mxu0 %vm23296_vm3, %v28814_v1  ;;  %v22913_v45 = vld [vmem:[#allocation2 + $0x34] sm:$0xff] }
 0x890   :  { %18831 = vmatprep.mubr.msk.bf16.mxu1 %vm23296_vm3, %v28814_v1  ;;  %18880 = vmatpush3.bf16.msra.mxu1 %v22650_v51  ;;  %v8032_v21 = vpack.c.bf16 %v22914_v41, %v22913_v45  ;;  %v22656_v51 = vld [vmem:[%s28649_s2 + $0x178] sm:$0xff]  }
 0x891   :  { %18676 = vmatpush3.bf16.msra.mxu0 %v22649_v25  ;;  %18881 = vmatprep.subr.bf16.mxu1 %v28814_v1  ;;  %v22653_v25 = vld [vmem:[%s28649_s2 + $0xb0] sm:$0xff]  }
 0x892   :  { %18677 = vmatprep.subr.bf16.mxu0 %v28814_v1 }
 0x894   :  { %18882 = vmatpush3.bf16.msra.mxu1 %v22652_v58  ;;  %v22915_v58 = vld [vmem:[#allocation2 + $0x44] sm:$0xff] }
 0x895   :  { %18678 = vmatpush3.bf16.msra.mxu0 %v22651_v56  ;;  %18883 = vmatprep.subr.bf16.mxu1 %v28814_v1  ;;  %v22916_v56 = vld [vmem:[#allocation2 + $0x4c] sm:$0xff] }
 0x896   :  { %18628 = vmatmul.mubr.bf16.gmra.mrb[120].mxu0 %v25962_v48  ;;  %18679 = vmatprep.subr.bf16.mxu0 %v28814_v1  ;;  %v22655_v48 = vld [vmem:[%s28649_s2 + $0xb8] sm:$0xff]   ;;  %v8033_v45 = vpack.c.bf16 %v22916_v56, %v22915_v58  ;;  %v7477_v58 = vld [vmem:[#allocation2 + $0xa] sm:$0xff] }
 0x897   :  { %18832 = vmatmul.mubr.bf16.gmra.mrb[44].mxu1 %v8032_v21  ;;  %18631 = vmatprep.mubr.msk.bf16.mxu0 %vm23296_vm3, %v28814_v1  ;;  %v8268_v56 = vld [vmem:[#allocation2 + $0xb] sm:$0xff] }
 0x898   :  { %18835 = vmatprep.mubr.msk.bf16.mxu1 %vm23296_vm3, %v28814_v1  ;;  %18884 = vmatpush3.bf16.msra.mxu1 %v22654_v11  ;;  %v22917_v11 = vld [vmem:[#allocation2 + $0x54] sm:$0xff] }
 0x899   :  { %18680 = vmatpush3.bf16.msra.mxu0 %v22653_v25  ;;  %18885 = vmatprep.subr.bf16.mxu1 %v28814_v1  ;;  %v8034_v41 = vpack.c.bf16 %v26144_v18, %v22917_v11  ;;  %v8028_v25 = vld [vmem:[#allocation2 + $0xc4] sm:$0x3] }
 0x89a   :  { %18681 = vmatprep.subr.bf16.mxu0 %v28814_v1 }
 0x89c   :  { %18886 = vmatpush3.bf16.msra.mxu1 %v22656_v51 }
 0x89d   :  { %18682 = vmatpush3.bf16.msra.mxu0 %v22655_v48  ;;  %18939 = vmatprep.subr.bf16.mxu1 %v28814_v1  ;;  %v8041_v48 = vpack.c.bf16 %v8028_v25, %v8028_v25  ;;  %v22659_v25 = vld [vmem:[%s28649_s2 + $0x190] sm:$0xff]  }
 0x89e   :  { %18632 = vmatmul.mubr.bf16.gmra.mrb[124].mxu0 %v26002_v29  ;;  %v8035_v29 = vpack.c.bf16 %v26186_v46, %v26137_v63 }
 0x89f   :  { %18836 = vmatmul.mubr.bf16.gmra.mrb[48].mxu1 %v8033_v45  ;;  %18635 = vmatprep.mubr.msk.bf16.mxu0 %vm23296_vm3, %v28814_v1  ;;  %v8269_v45 = vld [vmem:[#allocation2 + $0x13] sm:$0xff] }
 0x8a0   :  { %18839 = vmatprep.mubr.msk.bf16.mxu1 %vm23296_vm3, %v28814_v1 }
 0x8a6   :  { %18636 = vmatmul.mubr.bf16.gmra.mrb[128].mxu0 %v26029_v52  ;;  %v8036_v52 = vpack.c.bf16 %v26240_v53, %v26193_v2 }
 0x8a7   :  { %18840 = vmatmul.mubr.bf16.gmra.mrb[52].mxu1 %v8034_v41  ;;  %18639 = vmatprep.mubr.msk.bf16.mxu0 %vm23296_vm3, %v28814_v1  ;;  %v22657_v41 = vld [vmem:[%s28649_s2 + $0x180] sm:$0xff]  }
 0x8a8   :  { %18843 = vmatprep.mubr.msk.bf16.mxu1 %vm23296_vm3, %v28814_v1 }
 0x8ae   :  { %18640 = vmatmul.mubr.bf16.gmra.mrb[132].mxu0 %v26072_v31  ;;  %v8037_v31 = vpack.c.bf16 %v26280_v33, %v26233_v16 }
 0x8af   :  { %18844 = vmatmul.mubr.bf16.gmra.mrb[56].mxu1 %v8035_v29  ;;  %18643 = vmatprep.mubr.msk.bf16.mxu0 %vm23296_vm3, %v28814_v1  ;;  %v8293_v29 = vpack.c.bf16 %v8269_v45, %v8268_v56  ;;  %v8272_v56 = vld [vmem:[#allocation2 + $0x2b] sm:$0xff]  ;;  %v8273_v45 = vld [vmem:[#allocation2 + $0x33] sm:$0xff] }
 0x8b0   :  { %18847 = vmatprep.mubr.msk.bf16.mxu1 %vm23296_vm3, %v28814_v1 }
 0x8b6   :  { %18644 = vmatmul.mubr.bf16.gmra.mrb[136].mxu0 %v26146_v15  ;;  %v8038_v15 = vpack.c.bf16 %v26345_v57, %v26286_v26 }
 0x8b7   :  { %18848 = vmatmul.mubr.bf16.gmra.mrb[60].mxu1 %v8036_v52  ;;  %18647 = vmatprep.mubr.msk.bf16.mxu0 %vm23296_vm3, %v28814_v1  ;;  %v22658_v52 = vld [vmem:[%s28649_s2 + $0x188] sm:$0xff]  }
 0x8b8   :  { %18851 = vmatprep.mubr.msk.bf16.mxu1 %vm23296_vm3, %v28814_v1 }
 0x8be   :  { %18648 = vmatmul.mubr.bf16.gmra.mrb[140].mxu0 %v26198_v10  ;;  %v8039_v10 = vpack.c.bf16 %v26382_v32, %v26340_v20 }
 0x8bf   :  { %18852 = vmatmul.mubr.bf16.gmra.mrb[64].mxu1 %v8037_v31  ;;  %18651 = vmatprep.mubr.msk.bf16.mxu0 %vm23296_vm3, %v28814_v1  ;;  %v7479_v31 = vld [vmem:[#allocation2 + $0x1a] sm:$0xff] }
 0x8c0   :  { %18855 = vmatprep.mubr.msk.bf16.mxu1 %vm23296_vm3, %v28814_v1 }
 0x8c6   :  { %18652 = vmatmul.mubr.bf16.gmra.mrb[144].mxu0 %v26242_v40  ;;  %v26803_v40 = vld [vmem:[#allocation2 + $0xbc] sm:$0xff] }
 0x8c7   :  { %18856 = vmatmul.mubr.bf16.gmra.mrb[68].mxu1 %v8038_v15  ;;  %18655 = vmatprep.mubr.msk.bf16.mxu0 %vm23296_vm3, %v28814_v1  ;;  %v8040_v21 = vpack.c.bf16 %v26803_v40, %v26390_v34  ;;  %v8271_v15 = vld [vmem:[#allocation2 + $0x23] sm:$0xff] }
 0x8c8   :  { %18859 = vmatprep.mubr.msk.bf16.mxu1 %vm23296_vm3, %v28814_v1 }
 0x8ce   :  { %18656 = vmatmul.mubr.bf16.gmra.mrb[148].mxu0 %v26291_v23  ;;  %v7023_v23 = vld [vmem:[#allocation2 + $0xc0] sm:$0x3] }
 0x8cf   :  { %18860 = vmatmul.mubr.bf16.gmra.mrb[72].mxu1 %v8039_v10  ;;  %18659 = vmatprep.mubr.msk.bf16.mxu0 %vm23296_vm3, %v28814_v1  ;;  %v7036_v51 = vpack.c.bf16 %v7023_v23, %v7023_v23  ;;  %v7478_v10 = vld [vmem:[#allocation2 + $0x12] sm:$0xff]  ;;  %v8270_v23 = vld [vmem:[#allocation2 + $0x1b] sm:$0xff] }
 0x8d0   :  { %18863 = vmatprep.mubr.msk.bf16.mxu1 %vm23296_vm3, %v28814_v1 }
 0x8d6   :  { %18660 = vmatmul.mubr.bf16.gmra.mrb[152].mxu0 %v26347_v59  ;;  %v7476_v59 = vld [vmem:[#allocation2 + $0x2] sm:$0xff] }
 0x8d7   :  { %18864 = vmatmul.mubr.bf16.gmra.mrb[76].mxu1 %v8040_v21  ;;  %18663 = vmatprep.mubr.msk.bf16.mxu0 %vm23296_vm3, %v28814_v1  ;;  %v7501_v11 = vpack.c.bf16 %v7477_v58, %v7476_v59  ;;  %v7502_v21 = vpack.c.bf16 %v7479_v31, %v7478_v10  ;;  %v7480_v59 = vld [vmem:[#allocation2 + $0x22] sm:$0xff]  ;;  %v7481_v58 = vld [vmem:[#allocation2 + $0x2a] sm:$0xff]  ;;  %v7483_v31 = vld [vmem:[#allocation2 + $0x3a] sm:$0xff] }
 0x8d8   :  { %18867 = vmatprep.mubr.msk.bf16.mxu1 %vm23296_vm3, %v28814_v1  ;;  %v7482_v10 = vld [vmem:[#allocation2 + $0x32] sm:$0xff] }
 0x8de   :  { %18664 = vmatmul.mubr.bf16.gmra.mrb[156].mxu0 %v7036_v51  ;;  %v8294_v51 = vpack.c.bf16 %v8271_v15, %v8270_v23  ;;  %v8275_v15 = vld [vmem:[#allocation2 + $0x43] sm:$0xff]  ;;  %v8274_v23 = vld [vmem:[#allocation2 + $0x3b] sm:$0xff] }
 0x8df   :  { %18868 = vmatmul.mubr.bf16.gmra.mrb[80].mxu1 %v8041_v48  ;;  %18683 = vmatprep.mubr.msk.bf16.mxu0 %vm23296_vm3, %v28814_v1  ;;  %v22660_v48 = vld [vmem:[%s28649_s2 + $0x198] sm:$0xff]  }
 0x8e0   :  { %18887 = vmatprep.mubr.msk.bf16.mxu1 %vm23296_vm3, %v28814_v1 }
 0x8e6   :  { %18684 = vmatmul.mubr.bf16.vlgmr.msra.gmra.mrb[108].mxu0 %v7501_v11  ;;  %v7503_v11 = vpack.c.bf16 %v7481_v58, %v7480_v59  ;;  %v7484_v59 = vld [vmem:[#allocation2 + $0x42] sm:$0xff]  ;;  %v7485_v58 = vld [vmem:[#allocation2 + $0x4a] sm:$0xff] }
 0x8e7   :  { %18888 = vmatmul.mubr.bf16.vlgmr.msra.gmra.mrb[32].mxu1 %v8293_v29  ;;  %18687 = vmatprep.mubr.msk.bf16.mxu0 %vm23296_vm3, %v28814_v1  ;;  %v8295_v29 = vpack.c.bf16 %v8273_v45, %v8272_v56  ;;  %v8276_v56 = vld [vmem:[#allocation2 + $0x4b] sm:$0xff]  ;;  %v8277_v45 = vld [vmem:[#allocation2 + $0x53] sm:$0xff] }
 0x8e8   :  { %18891 = vmatprep.mubr.msk.bf16.mxu1 %vm23296_vm3, %v28814_v1  ;;  %18940 = vmatpush3.bf16.msra.mxu1 %v22657_v41  ;;  %v22661_v41 = vld [vmem:[%s28649_s2 + $0x1a0] sm:$0xff]  }
 0x8e9   :  { %18941 = vmatprep.subr.bf16.mxu1 %v28814_v1 }
 0x8ec   :  { %18942 = vmatpush3.bf16.msra.mxu1 %v22658_v52  ;;  %v22662_v52 = vld [vmem:[%s28649_s2 + $0x1a8] sm:$0xff]  }
 0x8ed   :  { %18943 = vmatprep.subr.bf16.mxu1 %v28814_v1 }
 0x8ee   :  { %18688 = vmatmul.mubr.bf16.gmra.mrb[112].mxu0 %v7502_v21  ;;  %v7504_v21 = vpack.c.bf16 %v7483_v31, %v7482_v10 }
 0x8ef   :  { %18892 = vmatmul.mubr.bf16.gmra.mrb[36].mxu1 %v8294_v51  ;;  %18691 = vmatprep.mubr.msk.bf16.mxu0 %vm23296_vm3, %v28814_v1  ;;  %v8296_v51 = vpack.c.bf16 %v8275_v15, %v8274_v23  ;;  %v8278_v15 = vld [vmem:[#allocation2 + $0x5b] sm:$0xff]  ;;  %v7489_v23 = vld [vmem:[#allocation2 + $0x6a] sm:$0xff] }
 0x8f0   :  { %18895 = vmatprep.mubr.msk.bf16.mxu1 %vm23296_vm3, %v28814_v1  ;;  %18944 = vmatpush3.bf16.msra.mxu1 %v22659_v25  ;;  %v22663_v25 = vld [vmem:[%s28649_s2 + $0x1b0] sm:$0xff]   ;;  %v8298_v10 = vpack.c.bf16 %v26250_v8, %v8278_v15  ;;  %v7491_v8 = vld [vmem:[#allocation2 + $0x7a] sm:$0xff]  ;;  %v28915_v15 = vpack.c.bf16 %v26388_v35, %v26380_v54  ;;  %v7500_v54 = vld [vmem:[#allocation2 + $0xc2] sm:$0x3] }
 0x8f1   :  { %18945 = vmatprep.subr.bf16.mxu1 %v28814_v1  ;;  %v8292_v35 = vld [vmem:[#allocation2 + $0xcb] sm:$0x3] }
 0x8f4   :  { %18946 = vmatpush3.bf16.msra.mxu1 %v22660_v48  ;;  %v22664_v48 = vld [vmem:[%s28649_s2 + $0x1b8] sm:$0xff]  }
 0x8f5   :  { %18947 = vmatprep.subr.bf16.mxu1 %v28814_v1 }
 0x8f6   :  { %18692 = vmatmul.mubr.bf16.gmra.mrb[116].mxu0 %v7503_v11  ;;  %v7505_v11 = vpack.c.bf16 %v7485_v58, %v7484_v59  ;;  %v7490_v59 = vld [vmem:[#allocation2 + $0x72] sm:$0xff] }
 0x8f7   :  { %18896 = vmatmul.mubr.bf16.gmra.mrb[40].mxu1 %v8295_v29  ;;  %18695 = vmatprep.mubr.msk.bf16.mxu0 %vm23296_vm3, %v28814_v1  ;;  %v7487_v29 = vld [vmem:[#allocation2 + $0x5a] sm:$0xff]  ;;  %v7508_v58 = vpack.c.bf16 %v7491_v8, %v7490_v59  ;;  %v22666_v8 = vld [vmem:[%s28649_s2 + $0x1c8] sm:$0xff]   ;;  %v22667_v59 = vld [vmem:[%s28649_s2 + $0x1d0] sm:$0xff]  }
 0x8f8   :  { %18899 = vmatprep.mubr.msk.bf16.mxu1 %vm23296_vm3, %v28814_v1  ;;  %18948 = vmatpush3.bf16.msra.mxu1 %v22661_v41  ;;  %v8297_v41 = vpack.c.bf16 %v8277_v45, %v8276_v56  ;;  %v28912_v56 = vpack.c.bf16 %v26229_v37, %v26227_v13  ;;  %v7493_v45 = vld [vmem:[#allocation2 + $0x8a] sm:$0xff]  ;;  %v7495_v13 = vld [vmem:[#allocation2 + $0x9a] sm:$0xff]  ;;  %v7494_v37 = vld [vmem:[#allocation2 + $0x92] sm:$0xff] }
 0x8f9   :  { %18949 = vmatprep.subr.bf16.mxu1 %v28814_v1 }
 0x8fc   :  { %18950 = vmatpush3.bf16.msra.mxu1 %v22662_v52  ;;  %v7486_v52 = vld [vmem:[#allocation2 + $0x52] sm:$0xff] }
 0x8fd   :  { %18951 = vmatprep.subr.bf16.mxu1 %v28814_v1  ;;  %v7506_v31 = vpack.c.bf16 %v7487_v29, %v7486_v52  ;;  %v7510_v29 = vpack.c.bf16 %v7495_v13, %v7494_v37  ;;  %v28914_v52 = vpack.c.bf16 %v26338_v17, %v26336_v39  ;;  %v7499_v39 = vld [vmem:[#allocation2 + $0xba] sm:$0xff]  ;;  %v8291_v17 = vld [vmem:[#allocation2 + $0xc3] sm:$0xff]  ;;  %v28925_v37 = vpack.c.bf16 %v26137_v63, %v26144_v18 }
 0x8fe   :  { %18696 = vmatmul.mubr.bf16.gmra.mrb[120].mxu0 %v7504_v21  ;;  %v7488_v21 = vld [vmem:[#allocation2 + $0x62] sm:$0xff]  ;;  %v28928_v18 = vpack.c.bf16 %v26286_v26, %v26280_v33  ;;  %v28929_v63 = vpack.c.bf16 %v26340_v20, %v26345_v57  ;;  %v8797_v20 = vld [vmem:[#allocation2 + $0x15] sm:$0xff] }
 0x8ff   :  { %18900 = vmatmul.mubr.bf16.gmra.mrb[44].mxu1 %v8296_v51  ;;  %18699 = vmatprep.mubr.msk.bf16.mxu0 %vm23296_vm3, %v28814_v1  ;;  %v7507_v51 = vpack.c.bf16 %v7489_v23, %v7488_v21  ;;  %v8304_v23 = vpack.c.bf16 %v8291_v17, %v26457_v7  ;;  %v22665_v7 = vld [vmem:[%s28649_s2 + $0x1c0] sm:$0xff]   ;;  %v22675_v17 = vld [vmem:[%s28649_s2 + $0x210] sm:$0xff]  }
 0x900   :  { %18903 = vmatprep.mubr.msk.bf16.mxu1 %vm23296_vm3, %v28814_v1  ;;  %18952 = vmatpush3.bf16.msra.mxu1 %v22663_v25  ;;  %v8280_v25 = vld [vmem:[#allocation2 + $0x6b] sm:$0xff]  ;;  %v22673_v57 = vld [vmem:[%s28649_s2 + $0x200] sm:$0xff]  }
 0x901   :  { %18953 = vmatprep.subr.bf16.mxu1 %v28814_v1 }
 0x904   :  { %18954 = vmatpush3.bf16.msra.mxu1 %v22664_v48  ;;  %v8299_v48 = vpack.c.bf16 %v26303_v50, %v8280_v25  ;;  %v7492_v50 = vld [vmem:[#allocation2 + $0x82] sm:$0xff]  ;;  %v7513_v25 = vpack.c.bf16 %v7500_v54, %v7500_v54 }
 0x905   :  { %19007 = vmatprep.subr.bf16.mxu1 %v28814_v1 }
 0x906   :  { %18700 = vmatmul.mubr.bf16.gmra.mrb[124].mxu0 %v7505_v11  ;;  %v7509_v11 = vpack.c.bf16 %v7493_v45, %v7492_v50  ;;  %v28919_v50 = vld [vmem:[#allocation28_spill] sm:$0xff]  ;;  %v22672_v45 = vld [vmem:[%s28649_s2 + $0x1f8] sm:$0xff]  }
 0x907   :  { %18904 = vmatmul.mubr.bf16.gmra.mrb[48].mxu1 %v8297_v41  ;;  %18703 = vmatprep.mubr.msk.bf16.mxu0 %vm23296_vm3, %v28814_v1  ;;  %v28913_v41 = vpack.c.bf16 %v26284_v47, %v26272_v62  ;;  %v7496_v47 = vld [vmem:[#allocation2 + $0xa2] sm:$0xff]  ;;  %v7497_v62 = vld [vmem:[#allocation2 + $0xaa] sm:$0xff] }
 0x908   :  { %18907 = vmatprep.mubr.msk.bf16.mxu1 %vm23296_vm3, %v28814_v1 }
 0x90e   :  { %18704 = vmatmul.mubr.bf16.gmra.mrb[128].mxu0 %v7506_v31  ;;  %v7511_v31 = vpack.c.bf16 %v7497_v62, %v7496_v47  ;;  %v8799_v62 = vld [vmem:[#allocation2 + $0x25] sm:$0xff] }
 0x90f   :  { %18908 = vmatmul.mubr.bf16.gmra.mrb[52].mxu1 %v8298_v10  ;;  %18707 = vmatprep.mubr.msk.bf16.mxu0 %vm23296_vm3, %v28814_v1  ;;  %v7498_v10 = vld [vmem:[#allocation2 + $0xb2] sm:$0xff] }
 0x910   :  { %18911 = vmatprep.mubr.msk.bf16.mxu1 %vm23296_vm3, %v28814_v1  ;;  %v7512_v21 = vpack.c.bf16 %v7499_v39, %v7498_v10  ;;  %v8798_v39 = vld [vmem:[#allocation2 + $0x1d] sm:$0xff] }
 0x911   :  { %v8822_v10 = vpack.c.bf16 %v8799_v62, %v8798_v39 }
 0x916   :  { %18708 = vmatmul.mubr.bf16.gmra.mrb[132].mxu0 %v7507_v51  ;;  %v8305_v51 = vpack.c.bf16 %v8292_v35, %v8292_v35  ;;  %v8800_v35 = vld [vmem:[#allocation2 + $0x2d] sm:$0xff] }
 0x917   :  { %18912 = vmatmul.mubr.bf16.gmra.mrb[56].mxu1 %v8299_v48  ;;  %18711 = vmatprep.mubr.msk.bf16.mxu0 %vm23296_vm3, %v28814_v1  ;;  %v28916_v48 = vpack.c.bf16 %v25960_v44, %v25968_v55  ;;  %v28917_v44 = vpack.c.bf16 %v25996_v24, %v26011_v38  ;;  %v22668_v55 = vld [vmem:[%s28649_s2 + $0x1d8] sm:$0xff]   ;;  %v28918_v24 = vpack.c.bf16 %v26000_v28, %v25998_v27  ;;  %v22670_v38 = vld [vmem:[%s28649_s2 + $0x1e8] sm:$0xff]   ;;  %v28920_v27 = vld [vmem:[#allocation27_spill] sm:$0xff] }
 0x918   :  { %18915 = vmatprep.mubr.msk.bf16.mxu1 %vm23296_vm3, %v28814_v1  ;;  %v28921_v28 = vpack.c.bf16 %v28919_v50, %v28920_v27  ;;  %v22679_v50 = vld [vmem:[%s28649_s2 + $0x230] sm:$0xff]  }
 0x91e   :  { %18712 = vmatmul.mubr.bf16.gmra.mrb[136].mxu0 %v7508_v58  ;;  %v22669_v58 = vld [vmem:[%s28649_s2 + $0x1e0] sm:$0xff]  }
 0x91f   :  { %18916 = vmatmul.mubr.bf16.gmra.mrb[60].mxu1 %v28912_v56  ;;  %18715 = vmatprep.mubr.msk.bf16.mxu0 %vm23296_vm3, %v28814_v1  ;;  %v22671_v56 = vld [vmem:[%s28649_s2 + $0x1f0] sm:$0xff]  }
 0x920   :  { %18919 = vmatprep.mubr.msk.bf16.mxu1 %vm23296_vm3, %v28814_v1 }
 0x926   :  { %18716 = vmatmul.mubr.bf16.gmra.mrb[140].mxu0 %v7509_v11  ;;  %v28922_v11 = vld [vmem:[#allocation31_spill] sm:$0xff] }
 0x927   :  { %18920 = vmatmul.mubr.bf16.gmra.mrb[64].mxu1 %v28913_v41  ;;  %18719 = vmatprep.mubr.msk.bf16.mxu0 %vm23296_vm3, %v28814_v1  ;;  %v28923_v41 = vld [vmem:[#allocation29_spill] sm:$0xff] }
 0x928   :  { %18923 = vmatprep.mubr.msk.bf16.mxu1 %vm23296_vm3, %v28814_v1  ;;  %v28924_v13 = vpack.c.bf16 %v28922_v11, %v28923_v41  ;;  %v8804_v41 = vld [vmem:[#allocation2 + $0x4d] sm:$0xff] }
 0x92e   :  { %18720 = vmatmul.mubr.bf16.gmra.mrb[144].mxu0 %v7510_v29  ;;  %v28926_v29 = vpack.c.bf16 %v26193_v2, %v26186_v46  ;;  %v28930_v46 = vpack.c.bf16 %v26390_v34, %v26382_v32  ;;  %v8555_v2 = vld [vmem:[#allocation2 + $0xc4] sm:$0xff] }
 0x92f   :  { %18924 = vmatmul.mubr.bf16.gmra.mrb[68].mxu1 %v28914_v52  ;;  %18723 = vmatprep.mubr.msk.bf16.mxu0 %vm23296_vm3, %v28814_v1  ;;  %v28927_v52 = vpack.c.bf16 %v26233_v16, %v26240_v53  ;;  %v8568_v33 = vpack.c.bf16 %v8555_v2, %v26803_v40  ;;  %v8556_v16 = vld [vmem:[#allocation2 + $0xcc] sm:$0x3] }
 0x930   :  { %18927 = vmatprep.mubr.msk.bf16.mxu1 %vm23296_vm3, %v28814_v1  ;;  %v8569_v26 = vpack.c.bf16 %v8556_v16, %v8556_v16  ;;  %v8796_v53 = vld [vmem:[#allocation2 + $0xd] sm:$0xff]  ;;  %v8806_v16 = vld [vmem:[#allocation2 + $0x5d] sm:$0xff] }
 0x931   :  { %v8821_v34 = vpack.c.bf16 %v8797_v20, %v8796_v53  ;;  %v22674_v32 = vld [vmem:[%s28649_s2 + $0x208] sm:$0xff]  }
 0x936   :  { %18724 = vmatmul.mubr.bf16.gmra.mrb[148].mxu0 %v7511_v31 }
 0x937   :  { %18928 = vmatmul.mubr.bf16.gmra.mrb[72].mxu1 %v28915_v15  ;;  %18727 = vmatprep.mubr.msk.bf16.mxu0 %vm23296_vm3, %v28814_v1 }
 0x938   :  { %18931 = vmatprep.mubr.msk.bf16.mxu1 %vm23296_vm3, %v28814_v1 }
 0x93e   :  { %18728 = vmatmul.mubr.bf16.gmra.mrb[152].mxu0 %v7512_v21  ;;  %v22676_v21 = vld [vmem:[%s28649_s2 + $0x218] sm:$0xff]  }
 0x93f   :  { %18932 = vmatmul.mubr.bf16.gmra.mrb[76].mxu1 %v8304_v23  ;;  %18731 = vmatprep.mubr.msk.bf16.mxu0 %vm23296_vm3, %v28814_v1 }
 0x940   :  { %18935 = vmatprep.mubr.msk.bf16.mxu1 %vm23296_vm3, %v28814_v1 }
 0x946   :  { %18732 = vmatmul.mubr.bf16.gmra.mrb[156].mxu0 %v7513_v25  ;;  %v8801_v25 = vld [vmem:[#allocation2 + $0x35] sm:$0xff] }
 0x947   :  { %18936 = vmatmul.mubr.bf16.gmra.mrb[80].mxu1 %v8305_v51 }
 0x948   :  { %18955 = vmatprep.mubr.msk.bf16.mxu1 %vm23296_vm3, %v28814_v1 }
 0x94f   :  { %18956 = vmatmul.mubr.bf16.vlgmr.msra.gmra.mrb[32].mxu1 %v28916_v48  ;;  %v22677_v48 = vld [vmem:[%s28649_s2 + $0x220] sm:$0xff]  }
 0x950   :  { %18959 = vmatprep.mubr.msk.bf16.mxu1 %vm23296_vm3, %v28814_v1  ;;  %19008 = vmatpush3.bf16.msra.mxu1 %v22665_v7 }
 0x951   :  { %19009 = vmatprep.subr.bf16.mxu1 %v28814_v1 }
 0x954   :  { %19010 = vmatpush3.bf16.msra.mxu1 %v22666_v8  ;;  %v8823_v8 = vpack.c.bf16 %v8801_v25, %v8800_v35 }
 0x955   :  { %19011 = vmatprep.subr.bf16.mxu1 %v28814_v1 }
 0x957   :  { %18960 = vmatmul.mubr.bf16.gmra.mrb[36].mxu1 %v28917_v44 }
 0x958   :  { %18963 = vmatprep.mubr.msk.bf16.mxu1 %vm23296_vm3, %v28814_v1  ;;  %19012 = vmatpush3.bf16.msra.mxu1 %v22667_v59  ;;  %v22678_v59 = vld [vmem:[%s28649_s2 + $0x228] sm:$0xff]  }
 0x959   :  { %19013 = vmatprep.subr.bf16.mxu1 %v28814_v1 }
 0x95c   :  { %19014 = vmatpush3.bf16.msra.mxu1 %v22668_v55 }
 0x95d   :  { %19015 = vmatprep.subr.bf16.mxu1 %v28814_v1 }
 0x95f   :  { %18964 = vmatmul.mubr.bf16.gmra.mrb[40].mxu1 %v28918_v24 }
 0x960   :  { %18967 = vmatprep.mubr.msk.bf16.mxu1 %vm23296_vm3, %v28814_v1  ;;  %19016 = vmatpush3.bf16.msra.mxu1 %v22669_v58  ;;  %v8803_v58 = vld [vmem:[#allocation2 + $0x45] sm:$0xff] }
 0x961   :  { %19017 = vmatprep.subr.bf16.mxu1 %v28814_v1 }
 0x964   :  { %19018 = vmatpush3.bf16.msra.mxu1 %v22670_v38 }
 0x965   :  { %19019 = vmatprep.subr.bf16.mxu1 %v28814_v1 }
 0x967   :  { %18968 = vmatmul.mubr.bf16.gmra.mrb[44].mxu1 %v28921_v28  ;;  %v22680_v28 = vld [vmem:[%s28649_s2 + $0x238] sm:$0xff]  }
 0x968   :  { %18971 = vmatprep.mubr.msk.bf16.mxu1 %vm23296_vm3, %v28814_v1  ;;  %19020 = vmatpush3.bf16.msra.mxu1 %v22671_v56  ;;  %v8802_v56 = vld [vmem:[#allocation2 + $0x3d] sm:$0xff] }
 0x969   :  { %19021 = vmatprep.subr.bf16.mxu1 %v28814_v1  ;;  %v8824_v27 = vpack.c.bf16 %v8803_v58, %v8802_v56 }
 0x96c   :  { %19022 = vmatpush3.bf16.msra.mxu1 %v22672_v45 }
 0x96d   :  { %19075 = vmatprep.subr.bf16.mxu1 %v28814_v1 }
 0x96f   :  { %18972 = vmatmul.mubr.bf16.gmra.mrb[48].mxu1 %v28924_v13  ;;  %v8805_v13 = vld [vmem:[#allocation2 + $0x55] sm:$0xff] }
 0x970   :  { %18975 = vmatprep.mubr.msk.bf16.mxu1 %vm23296_vm3, %v28814_v1 }
 0x977   :  { %18976 = vmatmul.mubr.bf16.gmra.mrb[52].mxu1 %v28925_v37 }
 0x978   :  { %18979 = vmatprep.mubr.msk.bf16.mxu1 %vm23296_vm3, %v28814_v1 }
 0x97f   :  { %18980 = vmatmul.mubr.bf16.gmra.mrb[56].mxu1 %v28926_v29 }
 0x980   :  { %18983 = vmatprep.mubr.msk.bf16.mxu1 %vm23296_vm3, %v28814_v1 }
 0x987   :  { %18984 = vmatmul.mubr.bf16.gmra.mrb[60].mxu1 %v28927_v52  ;;  %v8825_v52 = vpack.c.bf16 %v8805_v13, %v8804_v41 }
 0x988   :  { %18987 = vmatprep.mubr.msk.bf16.mxu1 %vm23296_vm3, %v28814_v1 }
 0x98f   :  { %18988 = vmatmul.mubr.bf16.gmra.mrb[64].mxu1 %v28928_v18 }
 0x990   :  { %18991 = vmatprep.mubr.msk.bf16.mxu1 %vm23296_vm3, %v28814_v1 }
 0x997   :  { %18992 = vmatmul.mubr.bf16.gmra.mrb[68].mxu1 %v28929_v63 }
 0x998   :  { %18995 = vmatprep.mubr.msk.bf16.mxu1 %vm23296_vm3, %v28814_v1 }
 0x99f   :  { %18996 = vmatmul.mubr.bf16.gmra.mrb[72].mxu1 %v28930_v46  ;;  %v8807_v46 = vld [vmem:[#allocation2 + $0x65] sm:$0xff] }
 0x9a0   :  { %18999 = vmatprep.mubr.msk.bf16.mxu1 %vm23296_vm3, %v28814_v1 }
 0x9a7   :  { %19000 = vmatmul.mubr.bf16.gmra.mrb[76].mxu1 %v8568_v33 }
 0x9a8   :  { %19003 = vmatprep.mubr.msk.bf16.mxu1 %vm23296_vm3, %v28814_v1 }
 0x9af   :  { %19004 = vmatmul.mubr.bf16.gmra.mrb[80].mxu1 %v8569_v26  ;;  %v8826_v26 = vpack.c.bf16 %v8807_v46, %v8806_v16 }
 0x9b0   :  { %19023 = vmatprep.mubr.msk.bf16.mxu1 %vm23296_vm3, %v28814_v1 }
 0x9b7   :  { %19024 = vmatmul.mubr.bf16.vlgmr.msra.gmra.mrb[32].mxu1 %v8821_v34  ;;  %v8809_v34 = vld [vmem:[#allocation2 + $0x75] sm:$0xff] }
 0x9b8   :  { %19027 = vmatprep.mubr.msk.bf16.mxu1 %vm23296_vm3, %v28814_v1  ;;  %19076 = vmatpush3.bf16.msra.mxu1 %v22673_v57  ;;  %v8808_v57 = vld [vmem:[#allocation2 + $0x6d] sm:$0xff] }
 0x9b9   :  { %v27013_v40 = vpop.f32.mrb[108].mxu0  ;;  %19077 = vmatprep.subr.bf16.mxu1 %v28814_v1  ;;  %v8827_v62 = vpack.c.bf16 %v8809_v34, %v8808_v57  ;;  %v8819_v57 = vld [vmem:[#allocation2 + $0xc5] sm:$0xff] }
 0x9ba   :  { %v18685_v47 = vpop.f32.mrb[109].mxu0 }
 0x9bb   :  { %v27016_v31 = vpop.f32.mrb[110].mxu0 }
 0x9bc   :  { %v18686_v15 = vpop.f32.mrb[111].mxu0  ;;  %19078 = vmatpush3.bf16.msra.mxu1 %v22674_v32 }
 0x9bd   :  { %19079 = vmatprep.subr.bf16.mxu1 %v28814_v1 }
 0x9bf   :  { %19028 = vmatmul.mubr.bf16.gmra.mrb[36].mxu1 %v8822_v10 }
 0x9c0   :  { %19031 = vmatprep.mubr.msk.bf16.mxu1 %vm23296_vm3, %v28814_v1  ;;  %19080 = vmatpush3.bf16.msra.mxu1 %v22675_v17  ;;  %v8811_v17 = vld [vmem:[#allocation2 + $0x85] sm:$0xff] }
 0x9c1   :  { %v27027_v23 = vpop.f32.mrb[112].mxu0  ;;  %19081 = vmatprep.subr.bf16.mxu1 %v28814_v1 }
 0x9c2   :  { %v18689_v54 = vpop.f32.mrb[113].mxu0 }
 0x9c3   :  { %v27030_v51 = vpop.f32.mrb[114].mxu0  ;;  %v8810_v54 = vld [vmem:[#allocation2 + $0x7d] sm:$0xff] }
 0x9c4   :  { %v18690_v7 = vpop.f32.mrb[115].mxu0  ;;  %19082 = vmatpush3.bf16.msra.mxu1 %v22676_v21  ;;  %v8828_v35 = vpack.c.bf16 %v8811_v17, %v8810_v54  ;;  %v8820_v54 = vld [vmem:[#allocation2 + $0xcd] sm:$0x3] }
 0x9c5   :  { %19083 = vmatprep.subr.bf16.mxu1 %v28814_v1 }
 0x9c7   :  { %19032 = vmatmul.mubr.bf16.gmra.mrb[40].mxu1 %v8823_v8  ;;  %v8813_v8 = vld [vmem:[#allocation2 + $0x95] sm:$0xff] }
 0x9c8   :  { %19035 = vmatprep.mubr.msk.bf16.mxu1 %vm23296_vm3, %v28814_v1  ;;  %19084 = vmatpush3.bf16.msra.mxu1 %v22677_v48  ;;  %v8812_v48 = vld [vmem:[#allocation2 + $0x8d] sm:$0xff] }
 0x9c9   :  { %v27041_v44 = vpop.f32.mrb[116].mxu0  ;;  %19085 = vmatprep.subr.bf16.mxu1 %v28814_v1  ;;  %v8829_v58 = vpack.c.bf16 %v8813_v8, %v8812_v48  ;;  %v8833_v48 = vpack.c.bf16 %v8820_v54, %v8820_v54  ;;  %v22687_v54 = vld [vmem:[%s28649_s2 + $0x270] sm:$0xff]  }
 0x9ca   :  { %v18693_v55 = vpop.f32.mrb[117].mxu0 }
 0x9cb   :  { %v27044_v24 = vpop.f32.mrb[118].mxu0 }
 0x9cc   :  { %v18694_v38 = vpop.f32.mrb[119].mxu0  ;;  %19086 = vmatpush3.bf16.msra.mxu1 %v22678_v59 }
 0x9cd   :  { %19087 = vmatprep.subr.bf16.mxu1 %v28814_v1 }
 0x9cf   :  { %19036 = vmatmul.mubr.bf16.gmra.mrb[44].mxu1 %v8824_v27 }
 0x9d0   :  { %19039 = vmatprep.mubr.msk.bf16.mxu1 %vm23296_vm3, %v28814_v1  ;;  %19088 = vmatpush3.bf16.msra.mxu1 %v22679_v50  ;;  %v8815_v50 = vld [vmem:[#allocation2 + $0xa5] sm:$0xff] }
 0x9d1   :  { %v27055_v45 = vpop.f32.mrb[120].mxu0  ;;  %19089 = vmatprep.subr.bf16.mxu1 %v28814_v1 }
 0x9d2   :  { %v18697_v11 = vpop.f32.mrb[121].mxu0 }
 0x9d3   :  { %v27058_v37 = vpop.f32.mrb[122].mxu0  ;;  %v8814_v11 = vld [vmem:[#allocation2 + $0x9d] sm:$0xff] }
 0x9d4   :  { %v18698_v29 = vpop.f32.mrb[123].mxu0  ;;  %19090 = vmatpush3.bf16.msra.mxu1 %v22680_v28  ;;  %v8830_v41 = vpack.c.bf16 %v8815_v50, %v8814_v11  ;;  %v22918_v11 = vld [vmem:[#allocation2 + $0x16] sm:$0xff] }
 0x9d5   :  { %19143 = vmatprep.subr.bf16.mxu1 %v28814_v1 }
 0x9d7   :  { %19040 = vmatmul.mubr.bf16.gmra.mrb[48].mxu1 %v8825_v52  ;;  %v8816_v52 = vld [vmem:[#allocation2 + $0xad] sm:$0xff] }
 0x9d8   :  { %19043 = vmatprep.mubr.msk.bf16.mxu1 %vm23296_vm3, %v28814_v1 }
 0x9d9   :  { %v27063_v18 = vpop.f32.mrb[124].mxu0 }
 0x9da   :  { %v18701_v63 = vpop.f32.mrb[125].mxu0 }
 0x9db   :  { %v27065_v2 = vpop.f32.mrb[126].mxu0  ;;  %v8817_v63 = vld [vmem:[#allocation2 + $0xb5] sm:$0xff] }
 0x9dc   :  { %v18702_v33 = vpop.f32.mrb[127].mxu0  ;;  %v8831_v16 = vpack.c.bf16 %v8817_v63, %v8816_v52  ;;  %v22683_v52 = vld [vmem:[%s28649_s2 + $0x250] sm:$0xff]   ;;  %v22919_v63 = vld [vmem:[#allocation2 + $0x1e] sm:$0xff] }
 0x9df   :  { %19044 = vmatmul.mubr.bf16.gmra.mrb[52].mxu1 %v8826_v26 }
 0x9e0   :  { %19047 = vmatprep.mubr.msk.bf16.mxu1 %vm23296_vm3, %v28814_v1 }
 0x9e1   :  { %v27069_v53 = vpop.f32.mrb[128].mxu0 }
 0x9e2   :  { %v18705_v20 = vpop.f32.mrb[129].mxu0 }
 0x9e3   :  { %v27071_v32 = vpop.f32.mrb[130].mxu0 }
 0x9e4   :  { %v18706_v47 = vpop.f32.mrb[131].mxu0 }
 0x9e7   :  { %19048 = vmatmul.mubr.bf16.gmra.mrb[56].mxu1 %v8827_v62  ;;  %v8818_v62 = vld [vmem:[#allocation2 + $0xbd] sm:$0xff] }
 0x9e8   :  { %19051 = vmatprep.mubr.msk.bf16.mxu1 %vm23296_vm3, %v28814_v1 }
 0x9e9   :  { %v27075_v15 = vpop.f32.mrb[132].mxu0 }
 0x9ea   :  { %v18709_v39 = vpop.f32.mrb[133].mxu0 }
 0x9eb   :  { %v27077_v10 = vpop.f32.mrb[134].mxu0  ;;  %v8832_v39 = vpack.c.bf16 %v8819_v57, %v8818_v62  ;;  %v22685_v57 = vld [vmem:[%s28649_s2 + $0x260] sm:$0xff]   ;;  %v22922_v62 = vld [vmem:[#allocation2 + $0x36] sm:$0xff] }
 0x9ec   :  { %v18710_v21 = vpop.f32.mrb[135].mxu0 }
 0x9ef   :  { %19052 = vmatmul.mubr.bf16.gmra.mrb[60].mxu1 %v8828_v35 }
 0x9f0   :  { %19055 = vmatprep.mubr.msk.bf16.mxu1 %vm23296_vm3, %v28814_v1 }
 0x9f1   :  { %v27081_v25 = vpop.f32.mrb[136].mxu0 }
 0x9f2   :  { %v18713_v7 = vpop.f32.mrb[137].mxu0 }
 0x9f3   :  { %v27083_v59 = vpop.f32.mrb[138].mxu0 }
 0x9f4   :  { %v18714_v55 = vpop.f32.mrb[139].mxu0 }
 0x9f7   :  { %19056 = vmatmul.mubr.bf16.gmra.mrb[64].mxu1 %v8829_v58  ;;  %v9060_v58 = vld [vmem:[#allocation2 + $0xe] sm:$0xff] }
 0x9f8   :  { %19059 = vmatprep.mubr.msk.bf16.mxu1 %vm23296_vm3, %v28814_v1 }
 0x9f9   :  { %v27087_v38 = vpop.f32.mrb[140].mxu0 }
 0x9fa   :  { %v18717_v56 = vpop.f32.mrb[141].mxu0 }
 0x9fb   :  { %v27089_v27 = vpop.f32.mrb[142].mxu0 }
 0x9fc   :  { %v18718_v28 = vpop.f32.mrb[143].mxu0 }
 0x9fd   :  { %v22681_v28 = vld [vmem:[%s28649_s2 + $0x240] sm:$0xff]  }
 0x9ff   :  { %19060 = vmatmul.mubr.bf16.gmra.mrb[68].mxu1 %v8830_v41  ;;  %v9085_v41 = vpack.c.bf16 %v22918_v11, %v9060_v58  ;;  %v22688_v58 = vld [vmem:[%s28649_s2 + $0x278] sm:$0xff]  }
 0xa00   :  { %19063 = vmatprep.mubr.msk.bf16.mxu1 %vm23296_vm3, %v28814_v1  ;;  %v22927_v11 = vld [vmem:[#allocation2 + $0x5e] sm:$0xff] }
 0xa01   :  { %v27093_v13 = vpop.f32.mrb[144].mxu0 }
 0xa02   :  { %v18721_v29 = vpop.f32.mrb[145].mxu0 }
 0xa03   :  { %v27095_v46 = vpop.f32.mrb[146].mxu0  ;;  %v22682_v29 = vld [vmem:[%s28649_s2 + $0x248] sm:$0xff]  }
 0xa04   :  { %v18722_v33 = vpop.f32.mrb[147].mxu0 }
 0xa05   :  { %v22920_v33 = vld [vmem:[#allocation2 + $0x26] sm:$0xff] }
 0xa07   :  { %19064 = vmatmul.mubr.bf16.gmra.mrb[72].mxu1 %v8831_v16  ;;  %v9086_v16 = vpack.c.bf16 %v22920_v33, %v22919_v63  ;;  %v22930_v63 = vld [vmem:[#allocation2 + $0x76] sm:$0xff] }
 0xa08   :  { %19067 = vmatprep.mubr.msk.bf16.mxu1 %vm23296_vm3, %v28814_v1 }
 0xa09   :  { %v27099_v26 = vpop.f32.mrb[148].mxu0 }
 0xa0a   :  { %v18725_v20 = vpop.f32.mrb[149].mxu0 }
 0xa0b   :  { %v27101_v34 = vpop.f32.mrb[150].mxu0  ;;  %v22684_v20 = vld [vmem:[%s28649_s2 + $0x258] sm:$0xff]  }
 0xa0c   :  { %v18726_v47 = vpop.f32.mrb[151].mxu0 }
 0xa0d   :  { %v22921_v47 = vld [vmem:[#allocation2 + $0x2e] sm:$0xff] }
 0xa0f   :  { %19068 = vmatmul.mubr.bf16.gmra.mrb[76].mxu1 %v8832_v39  ;;  %v9087_v39 = vpack.c.bf16 %v22922_v62, %v22921_v47  ;;  %v22933_v47 = vld [vmem:[#allocation2 + $0x8e] sm:$0xff]  ;;  %v22934_v62 = vld [vmem:[#allocation2 + $0x96] sm:$0xff] }
 0xa10   :  { %19071 = vmatprep.mubr.msk.bf16.mxu1 %vm23296_vm3, %v28814_v1 }
 0xa11   :  { %v27105_v17 = vpop.f32.mrb[152].mxu0 }
 0xa12   :  { %v18729_v21 = vpop.f32.mrb[153].mxu0 }
 0xa13   :  { %v27107_v35 = vpop.f32.mrb[154].mxu0  ;;  %v22686_v21 = vld [vmem:[%s28649_s2 + $0x268] sm:$0xff]  }
 0xa14   :  { %v18730_v7 = vpop.f32.mrb[155].mxu0 }
 0xa15   :  { %v22923_v7 = vld [vmem:[#allocation2 + $0x3e] sm:$0xff] }
 0xa17   :  { %19072 = vmatmul.mubr.bf16.gmra.mrb[80].mxu1 %v8833_v48  ;;  %v22924_v48 = vld [vmem:[#allocation2 + $0x46] sm:$0xff] }
 0xa18   :  { %19091 = vmatprep.mubr.msk.bf16.mxu1 %vm23296_vm3, %v28814_v1 }
 0xa19   :  { %v27111_v8 = vpop.f32.mrb[156].mxu0 }
 0xa1a   :  { %v18733_v55 = vpop.f32.mrb[157].mxu0 }
 0xa1b   :  { %v7712_v56 = vpop.f32.mrb[158].mxu0  ;;  %v9088_v55 = vpack.c.bf16 %v22924_v48, %v22923_v7  ;;  %v22937_v48 = vld [vmem:[#allocation2 + $0xae] sm:$0xff] }
 0xa1c   :  { %v18734_v50 = vpop.f32.mrb[159].mxu0  ;;  %v22925_v56 = vld [vmem:[#allocation2 + $0x4e] sm:$0xff] }
 0xa1d   :  { %v22926_v50 = vld [vmem:[#allocation2 + $0x56] sm:$0xff] }
 0xa1f   :  { %19092 = vmatmul.mubr.bf16.vlgmr.msra.gmra.mrb[32].mxu1 %v9085_v41  ;;  %v22928_v41 = vld [vmem:[#allocation2 + $0x66] sm:$0xff] }
 0xa20   :  { %19095 = vmatprep.mubr.msk.bf16.mxu1 %vm23296_vm3, %v28814_v1  ;;  %19144 = vmatpush3.bf16.msra.mxu1 %v22681_v28  ;;  %v9089_v28 = vpack.c.bf16 %v22926_v50, %v22925_v56  ;;  %v27167_v56 = vld [vmem:[#allocation2 + $0xc6] sm:$0xff]  ;;  %v22939_v50 = vld [vmem:[#allocation2 + $0xbe] sm:$0xff] }
 0xa21   :  { %19145 = vmatprep.subr.bf16.mxu1 %v28814_v1 }
 0xa24   :  { %19146 = vmatpush3.bf16.msra.mxu1 %v22682_v29  ;;  %v9090_v29 = vpack.c.bf16 %v22928_v41, %v22927_v11  ;;  %v9084_v11 = vld [vmem:[#allocation2 + $0xce] sm:$0x3] }
 0xa25   :  { %19147 = vmatprep.subr.bf16.mxu1 %v28814_v1  ;;  %v9097_v41 = vpack.c.bf16 %v9084_v11, %v9084_v11 }
 0xa27   :  { %19096 = vmatmul.mubr.bf16.gmra.mrb[36].mxu1 %v9086_v16  ;;  %v22931_v16 = vld [vmem:[#allocation2 + $0x7e] sm:$0xff] }
 0xa28   :  { %19099 = vmatprep.mubr.msk.bf16.mxu1 %vm23296_vm3, %v28814_v1  ;;  %19148 = vmatpush3.bf16.msra.mxu1 %v22683_v52  ;;  %v22929_v52 = vld [vmem:[#allocation2 + $0x6e] sm:$0xff] }
 0xa29   :  { %19149 = vmatprep.subr.bf16.mxu1 %v28814_v1  ;;  %v9091_v33 = vpack.c.bf16 %v22930_v63, %v22929_v52  ;;  %v22689_v52 = vld [vmem:[%s28649_s2 + $0x280] sm:$0xff]   ;;  %v22940_v63 = vld [vmem:[#allocation2 + $0x17] sm:$0xff] }
 0xa2c   :  { %19150 = vmatpush3.bf16.msra.mxu1 %v22684_v20  ;;  %v22932_v20 = vld [vmem:[#allocation2 + $0x86] sm:$0xff] }
 0xa2d   :  { %19151 = vmatprep.subr.bf16.mxu1 %v28814_v1 }
 0xa2f   :  { %19100 = vmatmul.mubr.bf16.gmra.mrb[40].mxu1 %v9087_v39  ;;  %v9093_v39 = vpack.c.bf16 %v22934_v62, %v22933_v47  ;;  %v22942_v47 = vld [vmem:[#allocation2 + $0x27] sm:$0xff] }
 0xa30   :  { %19103 = vmatprep.mubr.msk.bf16.mxu1 %vm23296_vm3, %v28814_v1  ;;  %19152 = vmatpush3.bf16.msra.mxu1 %v22685_v57  ;;  %v9092_v57 = vpack.c.bf16 %v22932_v20, %v22931_v16  ;;  %v22690_v16 = vld [vmem:[%s28649_s2 + $0x288] sm:$0xff]   ;;  %v22691_v20 = vld [vmem:[%s28649_s2 + $0x290] sm:$0xff]  }
 0xa31   :  { %19153 = vmatprep.subr.bf16.mxu1 %v28814_v1 }
 0xa34   :  { %19154 = vmatpush3.bf16.msra.mxu1 %v22686_v21  ;;  %v22935_v21 = vld [vmem:[#allocation2 + $0x9e] sm:$0xff] }
 0xa35   :  { %19155 = vmatprep.subr.bf16.mxu1 %v28814_v1 }
 0xa37   :  { %19104 = vmatmul.mubr.bf16.gmra.mrb[44].mxu1 %v9088_v55  ;;  %v22938_v55 = vld [vmem:[#allocation2 + $0xb6] sm:$0xff] }
 0xa38   :  { %19107 = vmatprep.mubr.msk.bf16.mxu1 %vm23296_vm3, %v28814_v1  ;;  %19156 = vmatpush3.bf16.msra.mxu1 %v22687_v54  ;;  %v22936_v54 = vld [vmem:[#allocation2 + $0xa6] sm:$0xff] }
 0xa39   :  { %19157 = vmatprep.subr.bf16.mxu1 %v28814_v1  ;;  %v9094_v7 = vpack.c.bf16 %v22936_v54, %v22935_v21  ;;  %v22693_v21 = vld [vmem:[%s28649_s2 + $0x2a0] sm:$0xff]   ;;  %v22943_v54 = vld [vmem:[#allocation2 + $0x2f] sm:$0xff] }
 0xa3c   :  { %19158 = vmatpush3.bf16.msra.mxu1 %v22688_v58  ;;  %v9095_v58 = vpack.c.bf16 %v22938_v55, %v22937_v48  ;;  %v22694_v55 = vld [vmem:[%s28649_s2 + $0x2a8] sm:$0xff]  }
 0xa3d   :  { %19211 = vmatprep.subr.bf16.mxu1 %v28814_v1 }
 0xa3f   :  { %19108 = vmatmul.mubr.bf16.gmra.mrb[48].mxu1 %v9089_v28  ;;  %v9096_v28 = vpack.c.bf16 %v27167_v56, %v22939_v50  ;;  %v22945_v50 = vld [vmem:[#allocation2 + $0x3f] sm:$0xff] }
 0xa40   :  { %19111 = vmatprep.mubr.msk.bf16.mxu1 %vm23296_vm3, %v28814_v1 }
 0xa47   :  { %19112 = vmatmul.mubr.bf16.gmra.mrb[52].mxu1 %v9090_v29  ;;  %v9324_v29 = vld [vmem:[#allocation2 + $0xf] sm:$0xff] }
 0xa48   :  { %19115 = vmatprep.mubr.msk.bf16.mxu1 %vm23296_vm3, %v28814_v1 }
 0xa4f   :  { %19116 = vmatmul.mubr.bf16.gmra.mrb[56].mxu1 %v9091_v33  ;;  %v9349_v33 = vpack.c.bf16 %v22940_v63, %v9324_v29  ;;  %v22947_v29 = vld [vmem:[#allocation2 + $0x4f] sm:$0xff] }
 0xa50   :  { %19119 = vmatprep.mubr.msk.bf16.mxu1 %vm23296_vm3, %v28814_v1 }
 0xa57   :  { %19120 = vmatmul.mubr.bf16.gmra.mrb[60].mxu1 %v9092_v57  ;;  %v22941_v57 = vld [vmem:[#allocation2 + $0x1f] sm:$0xff] }
 0xa58   :  { %19123 = vmatprep.mubr.msk.bf16.mxu1 %vm23296_vm3, %v28814_v1  ;;  %v9350_v62 = vpack.c.bf16 %v22942_v47, %v22941_v57  ;;  %v22951_v57 = vld [vmem:[#allocation2 + $0x6f] sm:$0xff]  ;;  %v22952_v47 = vld [vmem:[#allocation2 + $0x77] sm:$0xff] }
 0xa5f   :  { %19124 = vmatmul.mubr.bf16.gmra.mrb[64].mxu1 %v9093_v39  ;;  %v22692_v39 = vld [vmem:[%s28649_s2 + $0x298] sm:$0xff]  }
 0xa60   :  { %19127 = vmatprep.mubr.msk.bf16.mxu1 %vm23296_vm3, %v28814_v1 }
 0xa67   :  { %19128 = vmatmul.mubr.bf16.gmra.mrb[68].mxu1 %v9094_v7  ;;  %v22944_v7 = vld [vmem:[#allocation2 + $0x37] sm:$0xff] }
 0xa68   :  { %19131 = vmatprep.mubr.msk.bf16.mxu1 %vm23296_vm3, %v28814_v1  ;;  %v9351_v48 = vpack.c.bf16 %v22944_v7, %v22943_v54  ;;  %v22955_v7 = vld [vmem:[#allocation2 + $0x8f] sm:$0xff] }
 0xa6f   :  { %19132 = vmatmul.mubr.bf16.gmra.mrb[72].mxu1 %v9095_v58  ;;  %v22695_v58 = vld [vmem:[%s28649_s2 + $0x2b0] sm:$0xff]  }
 0xa70   :  { %19135 = vmatprep.mubr.msk.bf16.mxu1 %vm23296_vm3, %v28814_v1 }
 0xa77   :  { %19136 = vmatmul.mubr.bf16.gmra.mrb[76].mxu1 %v9096_v28  ;;  %v22946_v28 = vld [vmem:[#allocation2 + $0x47] sm:$0xff] }
 0xa78   :  { %19139 = vmatprep.mubr.msk.bf16.mxu1 %vm23296_vm3, %v28814_v1  ;;  %v9352_v11 = vpack.c.bf16 %v22946_v28, %v22945_v50  ;;  %v22958_v50 = vld [vmem:[#allocation2 + $0xa7] sm:$0xff] }
 0xa7f   :  { %19140 = vmatmul.mubr.bf16.gmra.mrb[80].mxu1 %v9097_v41  ;;  %v22696_v41 = vld [vmem:[%s28649_s2 + $0x2b8] sm:$0xff]  }
 0xa80   :  { %19159 = vmatprep.mubr.msk.bf16.mxu1 %vm23296_vm3, %v28814_v1 }
 0xa87   :  { %19160 = vmatmul.mubr.bf16.vlgmr.msra.gmra.mrb[32].mxu1 %v9349_v33  ;;  %v22949_v33 = vld [vmem:[#allocation2 + $0x5f] sm:$0xff] }
 0xa88   :  { %19163 = vmatprep.mubr.msk.bf16.mxu1 %vm23296_vm3, %v28814_v1  ;;  %19212 = vmatpush3.bf16.msra.mxu1 %v22689_v52  ;;  %v22948_v52 = vld [vmem:[#allocation2 + $0x57] sm:$0xff] }
 0xa89   :  { %19213 = vmatprep.subr.bf16.mxu1 %v28814_v1  ;;  %v9353_v63 = vpack.c.bf16 %v22948_v52, %v22947_v29  ;;  %v27228_v52 = vld [vmem:[#allocation2 + $0xc7] sm:$0xff] }
 0xa8c   :  { %19214 = vmatpush3.bf16.msra.mxu1 %v22690_v16  ;;  %v22950_v16 = vld [vmem:[#allocation2 + $0x67] sm:$0xff] }
 0xa8d   :  { %19215 = vmatprep.subr.bf16.mxu1 %v28814_v1 }
 0xa8f   :  { %19164 = vmatmul.mubr.bf16.gmra.mrb[36].mxu1 %v9350_v62  ;;  %v9355_v62 = vpack.c.bf16 %v22952_v47, %v22951_v57  ;;  %v22697_v57 = vld [vmem:[%s28649_s2 + $0x2c0] sm:$0xff]   ;;  %v28931_v47 = vld [vmem:[#allocation30_spill] sm:$0xff] }
 0xa90   :  { %19167 = vmatprep.mubr.msk.bf16.mxu1 %vm23296_vm3, %v28814_v1  ;;  %19216 = vmatpush3.bf16.msra.mxu1 %v22691_v20  ;;  %v9354_v20 = vpack.c.bf16 %v22950_v16, %v22949_v33  ;;  %v9348_v16 = vld [vmem:[#allocation2 + $0xcf] sm:$0x3] }
 0xa91   :  { %19217 = vmatprep.subr.bf16.mxu1 %v28814_v1 }
 0xa94   :  { %19218 = vmatpush3.bf16.msra.mxu1 %v22692_v39  ;;  %v22953_v39 = vld [vmem:[#allocation2 + $0x7f] sm:$0xff] }
 0xa95   :  { %19219 = vmatprep.subr.bf16.mxu1 %v28814_v1 }
 0xa97   :  { %19168 = vmatmul.mubr.bf16.gmra.mrb[40].mxu1 %v9351_v48  ;;  %v22956_v48 = vld [vmem:[#allocation2 + $0x97] sm:$0xff] }
 0xa98   :  { %19171 = vmatprep.mubr.msk.bf16.mxu1 %vm23296_vm3, %v28814_v1  ;;  %19220 = vmatpush3.bf16.msra.mxu1 %v22693_v21  ;;  %v22954_v21 = vld [vmem:[#allocation2 + $0x87] sm:$0xff] }
 0xa99   :  { %19221 = vmatprep.subr.bf16.mxu1 %v28814_v1  ;;  %v9356_v54 = vpack.c.bf16 %v22954_v21, %v22953_v39  ;;  %v22698_v21 = vld [vmem:[%s28649_s2 + $0x2c8] sm:$0xff]  }
 0xa9c   :  { %19222 = vmatpush3.bf16.msra.mxu1 %v22694_v55  ;;  %v9357_v55 = vpack.c.bf16 %v22956_v48, %v22955_v7  ;;  %v28934_v7 = vld [vmem:[#allocation34_spill] sm:$0xff]  ;;  %v28935_v48 = vld [vmem:[#allocation33_spill] sm:$0xff] }
 0xa9d   :  { %19223 = vmatprep.subr.bf16.mxu1 %v28814_v1 }
 0xa9f   :  { %19172 = vmatmul.mubr.bf16.gmra.mrb[44].mxu1 %v9352_v11  ;;  %v22959_v11 = vld [vmem:[#allocation2 + $0xaf] sm:$0xff] }
 0xaa0   :  { %19175 = vmatprep.mubr.msk.bf16.mxu1 %vm23296_vm3, %v28814_v1  ;;  %19224 = vmatpush3.bf16.msra.mxu1 %v22695_v58  ;;  %v22957_v58 = vld [vmem:[#allocation2 + $0x9f] sm:$0xff] }
 0xaa1   :  { %19225 = vmatprep.subr.bf16.mxu1 %v28814_v1  ;;  %v9358_v28 = vpack.c.bf16 %v22958_v50, %v22957_v58  ;;  %v22700_v58 = vld [vmem:[%s28649_s2 + $0x2d8] sm:$0xff]   ;;  %v22701_v50 = vld [vmem:[%s28649_s2 + $0x2e0] sm:$0xff]  }
 0xaa4   :  { %19226 = vmatpush3.bf16.msra.mxu1 %v22696_v41  ;;  %v22960_v41 = vld [vmem:[#allocation2 + $0xb7] sm:$0xff] }
 0xaa5   :  { %19279 = vmatprep.subr.bf16.mxu1 %v28814_v1  ;;  %v9359_v29 = vpack.c.bf16 %v22960_v41, %v22959_v11  ;;  %v28938_v11 = vld [vmem:[#allocation35_spill] sm:$0xff] }
 0xaa7   :  { %19176 = vmatmul.mubr.bf16.gmra.mrb[48].mxu1 %v9353_v63  ;;  %v22961_v63 = vld [vmem:[#allocation2 + $0xbf] sm:$0xff] }
 0xaa8   :  { %19179 = vmatprep.mubr.msk.bf16.mxu1 %vm23296_vm3, %v28814_v1  ;;  %v9360_v33 = vpack.c.bf16 %v27228_v52, %v22961_v63  ;;  %v22703_v63 = vld [vmem:[%s28649_s2 + $0x2f0] sm:$0xff]  }
 0xaaf   :  { %19180 = vmatmul.mubr.bf16.gmra.mrb[52].mxu1 %v9354_v20  ;;  %v9361_v20 = vpack.c.bf16 %v9348_v16, %v9348_v16  ;;  %v28941_v16 = vld [vmem:[#allocation38_spill] sm:$0xff] }
 0xab0   :  { %19183 = vmatprep.mubr.msk.bf16.mxu1 %vm23296_vm3, %v28814_v1 }
 0xab7   :  { %19184 = vmatmul.mubr.bf16.gmra.mrb[56].mxu1 %v9355_v62  ;;  %v28932_v62 = vld [vmem:[#allocation32_spill] sm:$0xff] }
 0xab8   :  { %19187 = vmatprep.mubr.msk.bf16.mxu1 %vm23296_vm3, %v28814_v1  ;;  %v28933_v39 = vpack.c.bf16 %v28931_v47, %v28932_v62  ;;  %v28943_v47 = vld [vmem:[#allocation43_spill] sm:$0xff]  ;;  %v28944_v62 = vld [vmem:[#allocation45_spill] sm:$0xff] }
 0xabf   :  { %19188 = vmatmul.mubr.bf16.gmra.mrb[60].mxu1 %v9356_v54  ;;  %v22699_v54 = vld [vmem:[%s28649_s2 + $0x2d0] sm:$0xff]  }
 0xac0   :  { %19191 = vmatprep.mubr.msk.bf16.mxu1 %vm23296_vm3, %v28814_v1 }
 0xac7   :  { %19192 = vmatmul.mubr.bf16.gmra.mrb[64].mxu1 %v9357_v55  ;;  %v28936_v55 = vpack.c.bf16 %v28934_v7, %v28935_v48  ;;  %v28949_v48 = vld [vmem:[#allocation56_spill] sm:$0xff] }
 0xac8   :  { %19195 = vmatprep.mubr.msk.bf16.mxu1 %vm23296_vm3, %v28814_v1 }
 0xacf   :  { %19196 = vmatmul.mubr.bf16.gmra.mrb[68].mxu1 %v9358_v28  ;;  %v28937_v28 = vld [vmem:[#allocation36_spill] sm:$0xff] }
 0xad0   :  { %19199 = vmatprep.mubr.msk.bf16.mxu1 %vm23296_vm3, %v28814_v1  ;;  %v28939_v41 = vpack.c.bf16 %v28937_v28, %v28938_v11  ;;  %v28953_v28 = vld [vmem:[#allocation65_spill] sm:$0xff] }
 0xad7   :  { %19200 = vmatmul.mubr.bf16.gmra.mrb[72].mxu1 %v9359_v29  ;;  %v22702_v29 = vld [vmem:[%s28649_s2 + $0x2e8] sm:$0xff]  }
 0xad8   :  { %19203 = vmatprep.mubr.msk.bf16.mxu1 %vm23296_vm3, %v28814_v1 }
 0xadf   :  { %19204 = vmatmul.mubr.bf16.gmra.mrb[76].mxu1 %v9360_v33  ;;  %v28940_v33 = vld [vmem:[#allocation39_spill] sm:$0xff] }
 0xae0   :  { %19207 = vmatprep.mubr.msk.bf16.mxu1 %vm23296_vm3, %v28814_v1 }
 0xae7   :  { %19208 = vmatmul.mubr.bf16.gmra.mrb[80].mxu1 %v9361_v20  ;;  %v28942_v20 = vpack.c.bf16 %v28940_v33, %v28941_v16  ;;  %v28958_v33 = vld [vmem:[#allocation83_spill] sm:$0xff] }
 0xae8   :  { %19227 = vmatprep.mubr.msk.bf16.mxu1 %vm23296_vm3, %v28814_v1  ;;  %v28959_v16 = vpack.c.bf16 %v26401_v4, %v28958_v33  ;;  %v22710_v33 = vld [vmem:[%s28649_s2 + $0x328] sm:$0xff]  }
 0xaef   :  { %19228 = vmatmul.mubr.bf16.vlgmr.msra.gmra.mrb[32].mxu1 %v28933_v39  ;;  %v28945_v39 = vpack.c.bf16 %v28943_v47, %v28944_v62  ;;  %v9611_v47 = vld [vmem:[#allocation2 + $0xce] sm:$0xff] }
 0xaf0   :  { %19231 = vmatprep.mubr.msk.bf16.mxu1 %vm23296_vm3, %v28814_v1  ;;  %19280 = vmatpush3.bf16.msra.mxu1 %v22697_v57  ;;  %v22704_v57 = vld [vmem:[%s28649_s2 + $0x2f8] sm:$0xff]   ;;  %v9624_v62 = vpack.c.bf16 %v9611_v47, %v27167_v56  ;;  %v22706_v56 = vld [vmem:[%s28649_s2 + $0x308] sm:$0xff]  }
 0xaf1   :  { %19281 = vmatprep.subr.bf16.mxu1 %v28814_v1 }
 0xaf4   :  { %19282 = vmatpush3.bf16.msra.mxu1 %v22698_v21  ;;  %v28946_v21 = vld [vmem:[#allocation52_spill] sm:$0xff] }
 0xaf5   :  { %19283 = vmatprep.subr.bf16.mxu1 %v28814_v1 }
 0xaf7   :  { %19232 = vmatmul.mubr.bf16.gmra.mrb[36].mxu1 %v28936_v55  ;;  %v28950_v55 = vld [vmem:[#allocation55_spill] sm:$0xff] }
 0xaf8   :  { %19235 = vmatprep.mubr.msk.bf16.mxu1 %vm23296_vm3, %v28814_v1  ;;  %19284 = vmatpush3.bf16.msra.mxu1 %v22699_v54  ;;  %v28947_v54 = vld [vmem:[#allocation51_spill] sm:$0xff] }
 0xaf9   :  { %19285 = vmatprep.subr.bf16.mxu1 %v28814_v1  ;;  %v28948_v7 = vpack.c.bf16 %v28946_v21, %v28947_v54  ;;  %v28962_v21 = vld [vmem:[#allocation40_spill] sm:$0xff]  ;;  %v28963_v54 = vld [vmem:[#allocation37_spill] sm:$0xff] }
 0xafc   :  { %19286 = vmatpush3.bf16.msra.mxu1 %v22700_v58  ;;  %v28951_v58 = vpack.c.bf16 %v28949_v48, %v28950_v55  ;;  %v22707_v48 = vld [vmem:[%s28649_s2 + $0x310] sm:$0xff]   ;;  %v28965_v55 = vld [vmem:[#allocation42_spill] sm:$0xff] }
 0xafd   :  { %19287 = vmatprep.subr.bf16.mxu1 %v28814_v1 }
 0xaff   :  { %19236 = vmatmul.mubr.bf16.gmra.mrb[40].mxu1 %v28939_v41  ;;  %v28955_v41 = vld [vmem:[#allocation75_spill] sm:$0xff] }
 0xb00   :  { %19239 = vmatprep.mubr.msk.bf16.mxu1 %vm23296_vm3, %v28814_v1  ;;  %19288 = vmatpush3.bf16.msra.mxu1 %v22701_v50  ;;  %v28952_v50 = vld [vmem:[#allocation66_spill] sm:$0xff] }
 0xb01   :  { %19289 = vmatprep.subr.bf16.mxu1 %v28814_v1  ;;  %v28954_v11 = vpack.c.bf16 %v28952_v50, %v28953_v28  ;;  %v22708_v28 = vld [vmem:[%s28649_s2 + $0x318] sm:$0xff]  }
 0xb04   :  { %19290 = vmatpush3.bf16.msra.mxu1 %v22702_v29  ;;  %v28956_v29 = vld [vmem:[#allocation76_spill] sm:$0xff] }
 0xb05   :  { %19291 = vmatprep.subr.bf16.mxu1 %v28814_v1 }
 0xb07   :  { %19240 = vmatmul.mubr.bf16.gmra.mrb[44].mxu1 %v28942_v20  ;;  %v28960_v20 = vld [vmem:[#allocation88_spill] sm:$0xff] }
 0xb08   :  { %19243 = vmatprep.mubr.msk.bf16.mxu1 %vm23296_vm3, %v28814_v1  ;;  %19292 = vmatpush3.bf16.msra.mxu1 %v22703_v63  ;;  %v28957_v63 = vpack.c.bf16 %v28955_v41, %v28956_v29  ;;  %v28968_v41 = vld [vmem:[#allocation44_spill] sm:$0xff]  ;;  %v28969_v29 = vld [vmem:[#allocation46_spill] sm:$0xff] }
 0xb09   :  { %19293 = vmatprep.subr.bf16.mxu1 %v28814_v1 }
 0xb0c   :  { %19294 = vmatpush3.bf16.msra.mxu1 %v22704_v57  ;;  %v28961_v57 = vpack.c.bf16 %v26429_v60, %v28960_v20  ;;  %v22705_v60 = vld [vmem:[%s28649_s2 + $0x300] sm:$0xff]  }
 0xb0d   :  { %19347 = vmatprep.subr.bf16.mxu1 %v28814_v1  ;;  %v28971_v20 = vld [vmem:[#allocation47_spill] sm:$0xff] }
 0xb0f   :  { %19244 = vmatmul.mubr.bf16.gmra.mrb[48].mxu1 %v28945_v39  ;;  %v9612_v39 = vld [vmem:[#allocation2 + $0xd6] sm:$0x3] }
 0xb10   :  { %19247 = vmatprep.mubr.msk.bf16.mxu1 %vm23296_vm3, %v28814_v1  ;;  %v9625_v4 = vpack.c.bf16 %v9612_v39, %v9612_v39  ;;  %v28974_v39 = vld [vmem:[#allocation49_spill] sm:$0xff] }
 0xb17   :  { %19248 = vmatmul.mubr.bf16.gmra.mrb[52].mxu1 %v28948_v7  ;;  %v28964_v7 = vpack.c.bf16 %v28962_v21, %v28963_v54  ;;  %v28977_v21 = vld [vmem:[#allocation53_spill] sm:$0xff]  ;;  %v28978_v54 = vld [vmem:[#allocation54_spill] sm:$0xff] }
 0xb18   :  { %19251 = vmatprep.mubr.msk.bf16.mxu1 %vm23296_vm3, %v28814_v1 }
 0xb1f   :  { %19252 = vmatmul.mubr.bf16.gmra.mrb[56].mxu1 %v28951_v58  ;;  %v28966_v58 = vld [vmem:[#allocation41_spill] sm:$0xff] }
 0xb20   :  { %19255 = vmatprep.mubr.msk.bf16.mxu1 %vm23296_vm3, %v28814_v1  ;;  %v28967_v50 = vpack.c.bf16 %v28965_v55, %v28966_v58  ;;  %v28983_v58 = vld [vmem:[#allocation67_spill] sm:$0xff] }
 0xb27   :  { %19256 = vmatmul.mubr.bf16.gmra.mrb[60].mxu1 %v28954_v11  ;;  %v22709_v11 = vld [vmem:[%s28649_s2 + $0x320] sm:$0xff]  }
 0xb28   :  { %19259 = vmatprep.mubr.msk.bf16.mxu1 %vm23296_vm3, %v28814_v1 }
 0xb2f   :  { %19260 = vmatmul.mubr.bf16.gmra.mrb[64].mxu1 %v28957_v63  ;;  %v28970_v63 = vpack.c.bf16 %v28968_v41, %v28969_v29  ;;  %v28987_v41 = vld [vmem:[#allocation77_spill] sm:$0xff] }
 0xb30   :  { %19263 = vmatprep.mubr.msk.bf16.mxu1 %vm23296_vm3, %v28814_v1 }
 0xb37   :  { %19264 = vmatmul.mubr.bf16.gmra.mrb[68].mxu1 %v28959_v16  ;;  %v22711_v16 = vld [vmem:[%s28649_s2 + $0x330] sm:$0xff]  }
 0xb38   :  { %19267 = vmatprep.mubr.msk.bf16.mxu1 %vm23296_vm3, %v28814_v1 }
 0xb3f   :  { %19268 = vmatmul.mubr.bf16.gmra.mrb[72].mxu1 %v28961_v57  ;;  %v28972_v57 = vld [vmem:[#allocation48_spill] sm:$0xff] }
 0xb40   :  { %19271 = vmatprep.mubr.msk.bf16.mxu1 %vm23296_vm3, %v28814_v1  ;;  %v28973_v47 = vpack.c.bf16 %v28971_v20, %v28972_v57  ;;  %v28992_v20 = vld [vmem:[#allocation90_spill] sm:$0xff]  ;;  %v28993_v57 = vld [vmem:[#allocation89_spill] sm:$0xff] }
 0xb47   :  { %19272 = vmatmul.mubr.bf16.gmra.mrb[76].mxu1 %v9624_v62  ;;  %v22712_v62 = vld [vmem:[%s28649_s2 + $0x338] sm:$0xff]  }
 0xb48   :  { %19275 = vmatprep.mubr.msk.bf16.mxu1 %vm23296_vm3, %v28814_v1 }
 0xb4f   :  { %19276 = vmatmul.mubr.bf16.gmra.mrb[80].mxu1 %v9625_v4  ;;  %v28975_v4 = vld [vmem:[#allocation50_spill] sm:$0xff] }
 0xb50   :  { %19295 = vmatprep.mubr.msk.bf16.mxu1 %vm23296_vm3, %v28814_v1 }
 0xb57   :  { %19296 = vmatmul.mubr.bf16.vlgmr.msra.gmra.mrb[32].mxu1 %v28964_v7  ;;  %v28979_v7 = vpack.c.bf16 %v28977_v21, %v28978_v54  ;;  %v10117_v21 = vld [vmem:[#allocation2 + $0x20] sm:$0xff]  ;;  %v10116_v54 = vld [vmem:[#allocation2 + $0x18] sm:$0xff] }
 0xb58   :  { %19299 = vmatprep.mubr.msk.bf16.mxu1 %vm23296_vm3, %v28814_v1  ;;  %19348 = vmatpush3.bf16.msra.mxu1 %v22705_v60  ;;  %v28976_v60 = vpack.c.bf16 %v28974_v39, %v28975_v4  ;;  %v9876_v4 = vld [vmem:[#allocation2 + $0xd7] sm:$0x3] }
 0xb59   :  { %19349 = vmatprep.subr.bf16.mxu1 %v28814_v1 }
 0xb5c   :  { %19350 = vmatpush3.bf16.msra.mxu1 %v22706_v56  ;;  %v28980_v56 = vld [vmem:[#allocation57_spill] sm:$0xff] }
 0xb5d   :  { %19351 = vmatprep.subr.bf16.mxu1 %v28814_v1 }
 0xb5f   :  { %19300 = vmatmul.mubr.bf16.gmra.mrb[36].mxu1 %v28967_v50  ;;  %v28984_v50 = vld [vmem:[#allocation68_spill] sm:$0xff] }
 0xb60   :  { %19303 = vmatprep.mubr.msk.bf16.mxu1 %vm23296_vm3, %v28814_v1  ;;  %19352 = vmatpush3.bf16.msra.mxu1 %v22707_v48  ;;  %v28981_v48 = vld [vmem:[#allocation58_spill] sm:$0xff] }
 0xb61   :  { %19353 = vmatprep.subr.bf16.mxu1 %v28814_v1  ;;  %v28982_v55 = vpack.c.bf16 %v28980_v56, %v28981_v48  ;;  %v10141_v56 = vpack.c.bf16 %v10117_v21, %v10116_v54  ;;  %v10118_v48 = vld [vmem:[#allocation2 + $0x28] sm:$0xff]  ;;  %v10127_v54 = vld [vmem:[#allocation2 + $0x70] sm:$0xff] }
 0xb62   :  { %v10126_v21 = vld [vmem:[#allocation2 + $0x68] sm:$0xff] }
 0xb64   :  { %19354 = vmatpush3.bf16.msra.mxu1 %v22708_v28  ;;  %v28985_v28 = vpack.c.bf16 %v28983_v58, %v28984_v50  ;;  %v22715_v58 = vld [vmem:[%s28649_s2 + $0x350] sm:$0xff]  }
 0xb65   :  { %19355 = vmatprep.subr.bf16.mxu1 %v28814_v1 }
 0xb67   :  { %19304 = vmatmul.mubr.bf16.gmra.mrb[40].mxu1 %v28970_v63  ;;  %v28989_v63 = vld [vmem:[#allocation85_spill] sm:$0xff] }
 0xb68   :  { %19307 = vmatprep.mubr.msk.bf16.mxu1 %vm23296_vm3, %v28814_v1  ;;  %19356 = vmatpush3.bf16.msra.mxu1 %v22709_v11  ;;  %v28986_v11 = vld [vmem:[#allocation78_spill] sm:$0xff] }
 0xb69   :  { %19357 = vmatprep.subr.bf16.mxu1 %v28814_v1  ;;  %v28988_v29 = vpack.c.bf16 %v28986_v11, %v28987_v41  ;;  %v10121_v11 = vld [vmem:[#allocation2 + $0x40] sm:$0xff]  ;;  %v10120_v41 = vld [vmem:[#allocation2 + $0x38] sm:$0xff] }
 0xb6c   :  { %19358 = vmatpush3.bf16.msra.mxu1 %v22710_v33  ;;  %v28990_v33 = vld [vmem:[#allocation84_spill] sm:$0xff] }
 0xb6d   :  { %19359 = vmatprep.subr.bf16.mxu1 %v28814_v1 }
 0xb6f   :  { %19308 = vmatmul.mubr.bf16.gmra.mrb[44].mxu1 %v28973_v47  ;;  %v28994_v47 = vpack.c.bf16 %v28992_v20, %v28993_v57  ;;  %v10123_v20 = vld [vmem:[#allocation2 + $0x50] sm:$0xff] }
 0xb70   :  { %19311 = vmatprep.mubr.msk.bf16.mxu1 %vm23296_vm3, %v28814_v1  ;;  %19360 = vmatpush3.bf16.msra.mxu1 %v22711_v16  ;;  %v28991_v16 = vpack.c.bf16 %v28989_v63, %v28990_v33  ;;  %v10143_v63 = vpack.c.bf16 %v10121_v11, %v10120_v41  ;;  %v22718_v33 = vld [vmem:[%s28649_s2 + $0x368] sm:$0xff]   ;;  %v22719_v57 = vld [vmem:[%s28649_s2 + $0x370] sm:$0xff]   ;;  %v10132_v11 = vld [vmem:[#allocation2 + $0x98] sm:$0xff] }
 0xb71   :  { %19361 = vmatprep.subr.bf16.mxu1 %v28814_v1 }
 0xb74   :  { %19362 = vmatpush3.bf16.msra.mxu1 %v22712_v62  ;;  %v9875_v62 = vld [vmem:[#allocation2 + $0xcf] sm:$0xff] }
 0xb75   :  { %19415 = vmatprep.subr.bf16.mxu1 %v28814_v1  ;;  %v9888_v39 = vpack.c.bf16 %v9875_v62, %v27228_v52  ;;  %v22714_v52 = vld [vmem:[%s28649_s2 + $0x348] sm:$0xff]   ;;  %v22720_v62 = vld [vmem:[%s28649_s2 + $0x378] sm:$0xff]  }
 0xb77   :  { %19312 = vmatmul.mubr.bf16.gmra.mrb[48].mxu1 %v28976_v60  ;;  %v9889_v60 = vpack.c.bf16 %v9876_v4, %v9876_v4  ;;  %v10124_v4 = vld [vmem:[#allocation2 + $0x58] sm:$0xff] }
 0xb78   :  { %19315 = vmatprep.mubr.msk.bf16.mxu1 %vm23296_vm3, %v28814_v1 }
 0xb7f   :  { %19316 = vmatmul.mubr.bf16.gmra.mrb[52].mxu1 %v28979_v7  ;;  %v22713_v7 = vld [vmem:[%s28649_s2 + $0x340] sm:$0xff]  }
 0xb80   :  { %19319 = vmatprep.mubr.msk.bf16.mxu1 %vm23296_vm3, %v28814_v1 }
 0xb87   :  { %19320 = vmatmul.mubr.bf16.gmra.mrb[56].mxu1 %v28982_v55  ;;  %v10119_v55 = vld [vmem:[#allocation2 + $0x30] sm:$0xff] }
 0xb88   :  { %19323 = vmatprep.mubr.msk.bf16.mxu1 %vm23296_vm3, %v28814_v1  ;;  %v10142_v50 = vpack.c.bf16 %v10119_v55, %v10118_v48  ;;  %v10130_v55 = vld [vmem:[#allocation2 + $0x88] sm:$0xff] }
 0xb8f   :  { %19324 = vmatmul.mubr.bf16.gmra.mrb[60].mxu1 %v28985_v28  ;;  %v22716_v28 = vld [vmem:[%s28649_s2 + $0x358] sm:$0xff]  }
 0xb90   :  { %19327 = vmatprep.mubr.msk.bf16.mxu1 %vm23296_vm3, %v28814_v1 }
 0xb97   :  { %19328 = vmatmul.mubr.bf16.gmra.mrb[64].mxu1 %v28988_v29  ;;  %v22717_v29 = vld [vmem:[%s28649_s2 + $0x360] sm:$0xff]  }
 0xb98   :  { %19331 = vmatprep.mubr.msk.bf16.mxu1 %vm23296_vm3, %v28814_v1 }
 0xb9f   :  { %19332 = vmatmul.mubr.bf16.gmra.mrb[68].mxu1 %v28991_v16  ;;  %v10122_v16 = vld [vmem:[#allocation2 + $0x48] sm:$0xff] }
 0xba0   :  { %19335 = vmatprep.mubr.msk.bf16.mxu1 %vm23296_vm3, %v28814_v1 }
 0xba7   :  { %19336 = vmatmul.mubr.bf16.gmra.mrb[72].mxu1 %v28994_v47  ;;  %v10144_v47 = vpack.c.bf16 %v10123_v20, %v10122_v16  ;;  %v10137_v16 = vld [vmem:[#allocation2 + $0xc0] sm:$0xff]  ;;  %v10136_v20 = vld [vmem:[#allocation2 + $0xb8] sm:$0xff] }
 0xba8   :  { %19339 = vmatprep.mubr.msk.bf16.mxu1 %vm23296_vm3, %v28814_v1 }
 0xbaf   :  { %19340 = vmatmul.mubr.bf16.gmra.mrb[76].mxu1 %v9888_v39  ;;  %v10125_v39 = vld [vmem:[#allocation2 + $0x60] sm:$0xff] }
 0xbb0   :  { %19343 = vmatprep.mubr.msk.bf16.mxu1 %vm23296_vm3, %v28814_v1 }
 0xbb7   :  { %19344 = vmatmul.mubr.bf16.gmra.mrb[80].mxu1 %v9889_v60  ;;  %v10145_v60 = vpack.c.bf16 %v10125_v39, %v10124_v4  ;;  %v10140_v4 = vld [vmem:[#allocation2 + $0xd8] sm:$0x3] }
 0xbb8   :  { %19363 = vmatprep.mubr.msk.bf16.mxu1 %vm23296_vm3, %v28814_v1 }
 0xbbf   :  { %19364 = vmatmul.mubr.bf16.vlgmr.msra.gmra.mrb[32].mxu1 %v10141_v56  ;;  %v10129_v56 = vld [vmem:[#allocation2 + $0x80] sm:$0xff] }
 0xbc0   :  { %19367 = vmatprep.mubr.msk.bf16.mxu1 %vm23296_vm3, %v28814_v1  ;;  %19416 = vmatpush3.bf16.msra.mxu1 %v22713_v7  ;;  %v10146_v7 = vpack.c.bf16 %v10127_v54, %v10126_v21  ;;  %v10380_v21 = vld [vmem:[#allocation2 + $0x19] sm:$0xff] }
 0xbc1   :  { %19417 = vmatprep.subr.bf16.mxu1 %v28814_v1  ;;  %v22721_v54 = vld [vmem:[%s28649_s2 + $0x380] sm:$0xff]  }
 0xbc4   :  { %19418 = vmatpush3.bf16.msra.mxu1 %v22714_v52  ;;  %v10128_v52 = vld [vmem:[#allocation2 + $0x78] sm:$0xff] }
 0xbc5   :  { %19419 = vmatprep.subr.bf16.mxu1 %v28814_v1  ;;  %v10147_v48 = vpack.c.bf16 %v10129_v56, %v10128_v52  ;;  %v22722_v52 = vld [vmem:[%s28649_s2 + $0x388] sm:$0xff]  }
 0xbc7   :  { %19368 = vmatmul.mubr.bf16.gmra.mrb[36].mxu1 %v10142_v50 }
 0xbc8   :  { %19371 = vmatprep.mubr.msk.bf16.mxu1 %vm23296_vm3, %v28814_v1  ;;  %19420 = vmatpush3.bf16.msra.mxu1 %v22715_v58  ;;  %v10131_v58 = vld [vmem:[#allocation2 + $0x90] sm:$0xff] }
 0xbc9   :  { %19421 = vmatprep.subr.bf16.mxu1 %v28814_v1  ;;  %v10148_v50 = vpack.c.bf16 %v10131_v58, %v10130_v55  ;;  %v22963_v55 = vld [vmem:[#allocation2 + $0x29] sm:$0xff]  ;;  %v22964_v58 = vld [vmem:[#allocation2 + $0x31] sm:$0xff] }
 0xbcc   :  { %19422 = vmatpush3.bf16.msra.mxu1 %v22716_v28  ;;  %v10133_v28 = vld [vmem:[#allocation2 + $0xa0] sm:$0xff] }
 0xbcd   :  { %19423 = vmatprep.subr.bf16.mxu1 %v28814_v1  ;;  %v10149_v41 = vpack.c.bf16 %v10133_v28, %v10132_v11  ;;  %v22724_v28 = vld [vmem:[%s28649_s2 + $0x398] sm:$0xff]   ;;  %v22725_v11 = vld [vmem:[%s28649_s2 + $0x3a0] sm:$0xff]  }
 0xbcf   :  { %19372 = vmatmul.mubr.bf16.gmra.mrb[40].mxu1 %v10143_v63  ;;  %v10135_v63 = vld [vmem:[#allocation2 + $0xb0] sm:$0xff] }
 0xbd0   :  { %19375 = vmatprep.mubr.msk.bf16.mxu1 %vm23296_vm3, %v28814_v1  ;;  %19424 = vmatpush3.bf16.msra.mxu1 %v22717_v29  ;;  %v10134_v29 = vld [vmem:[#allocation2 + $0xa8] sm:$0xff] }
 0xbd1   :  { %19425 = vmatprep.subr.bf16.mxu1 %v28814_v1 }
 0xbd4   :  { %19426 = vmatpush3.bf16.msra.mxu1 %v22718_v33  ;;  %v10150_v33 = vpack.c.bf16 %v10135_v63, %v10134_v29  ;;  %v22966_v29 = vld [vmem:[#allocation2 + $0x41] sm:$0xff] }
 0xbd5   :  { %19427 = vmatprep.subr.bf16.mxu1 %v28814_v1 }
 0xbd7   :  { %19376 = vmatmul.mubr.bf16.gmra.mrb[44].mxu1 %v10144_v47  ;;  %v10138_v47 = vld [vmem:[#allocation2 + $0xc8] sm:$0xff] }
 0xbd8   :  { %19379 = vmatprep.mubr.msk.bf16.mxu1 %vm23296_vm3, %v28814_v1  ;;  %19428 = vmatpush3.bf16.msra.mxu1 %v22719_v57  ;;  %v10151_v57 = vpack.c.bf16 %v10137_v16, %v10136_v20  ;;  %v22727_v16 = vld [vmem:[%s28649_s2 + $0x3b0] sm:$0xff]  }
 0xbd9   :  { %19429 = vmatprep.subr.bf16.mxu1 %v28814_v1  ;;  %v22967_v20 = vld [vmem:[#allocation2 + $0x49] sm:$0xff] }
 0xbdc   :  { %19430 = vmatpush3.bf16.msra.mxu1 %v22720_v62  ;;  %v10139_v62 = vld [vmem:[#allocation2 + $0xd0] sm:$0xff] }
 0xbdd   :  { %19483 = vmatprep.subr.bf16.mxu1 %v28814_v1  ;;  %v10152_v39 = vpack.c.bf16 %v10139_v62, %v10138_v47  ;;  %v22728_v62 = vld [vmem:[%s28649_s2 + $0x3b8] sm:$0xff]  }
 0xbdf   :  { %19380 = vmatmul.mubr.bf16.gmra.mrb[48].mxu1 %v10145_v60  ;;  %v10153_v60 = vpack.c.bf16 %v10140_v4, %v10140_v4  ;;  %v22970_v4 = vld [vmem:[#allocation2 + $0x61] sm:$0xff] }
 0xbe0   :  { %19383 = vmatprep.mubr.msk.bf16.mxu1 %vm23296_vm3, %v28814_v1 }
 0xbe7   :  { %19384 = vmatmul.mubr.bf16.gmra.mrb[52].mxu1 %v10146_v7  ;;  %v22962_v7 = vld [vmem:[#allocation2 + $0x21] sm:$0xff] }
 0xbe8   :  { %19387 = vmatprep.mubr.msk.bf16.mxu1 %vm23296_vm3, %v28814_v1  ;;  %v10405_v56 = vpack.c.bf16 %v22962_v7, %v10380_v21  ;;  %v22971_v21 = vld [vmem:[#allocation2 + $0x69] sm:$0xff] }
 0xbef   :  { %19388 = vmatmul.mubr.bf16.gmra.mrb[56].mxu1 %v10147_v48  ;;  %v22723_v48 = vld [vmem:[%s28649_s2 + $0x390] sm:$0xff]  }
 0xbf0   :  { %19391 = vmatprep.mubr.msk.bf16.mxu1 %vm23296_vm3, %v28814_v1 }
 0xbf7   :  { %19392 = vmatmul.mubr.bf16.gmra.mrb[60].mxu1 %v10148_v50  ;;  %v10406_v50 = vpack.c.bf16 %v22964_v58, %v22963_v55  ;;  %v22975_v55 = vld [vmem:[#allocation2 + $0x89] sm:$0xff]  ;;  %v22976_v58 = vld [vmem:[#allocation2 + $0x91] sm:$0xff] }
 0xbf8   :  { %19395 = vmatprep.mubr.msk.bf16.mxu1 %vm23296_vm3, %v28814_v1 }
 0xbff   :  { %19396 = vmatmul.mubr.bf16.gmra.mrb[64].mxu1 %v10149_v41  ;;  %v22965_v41 = vld [vmem:[#allocation2 + $0x39] sm:$0xff] }
 0xc00   :  { %19399 = vmatprep.mubr.msk.bf16.mxu1 %vm23296_vm3, %v28814_v1  ;;  %v10407_v63 = vpack.c.bf16 %v22966_v29, %v22965_v41  ;;  %v22979_v29 = vld [vmem:[#allocation2 + $0xa9] sm:$0xff] }
 0xc07   :  { %19400 = vmatmul.mubr.bf16.gmra.mrb[68].mxu1 %v10150_v33  ;;  %v22726_v33 = vld [vmem:[%s28649_s2 + $0x3a8] sm:$0xff]  }
 0xc08   :  { %19403 = vmatprep.mubr.msk.bf16.mxu1 %vm23296_vm3, %v28814_v1 }
 0xc0f   :  { %19404 = vmatmul.mubr.bf16.gmra.mrb[72].mxu1 %v10151_v57  ;;  %v22968_v57 = vld [vmem:[#allocation2 + $0x51] sm:$0xff] }
 0xc10   :  { %19407 = vmatprep.mubr.msk.bf16.mxu1 %vm23296_vm3, %v28814_v1  ;;  %v10408_v47 = vpack.c.bf16 %v22968_v57, %v22967_v20  ;;  %v22982_v20 = vld [vmem:[#allocation2 + $0xc1] sm:$0xff] }
 0xc17   :  { %19408 = vmatmul.mubr.bf16.gmra.mrb[76].mxu1 %v10152_v39  ;;  %v22969_v39 = vld [vmem:[#allocation2 + $0x59] sm:$0xff] }
 0xc18   :  { %19411 = vmatprep.mubr.msk.bf16.mxu1 %vm23296_vm3, %v28814_v1 }
 0xc1f   :  { %19412 = vmatmul.mubr.bf16.gmra.mrb[80].mxu1 %v10153_v60  ;;  %v10409_v60 = vpack.c.bf16 %v22970_v4, %v22969_v39  ;;  %v10404_v4 = vld [vmem:[#allocation2 + $0xd9] sm:$0x3] }
 0xc20   :  { %19431 = vmatprep.mubr.msk.bf16.mxu1 %vm23296_vm3, %v28814_v1 }
 0xc27   :  { %19432 = vmatmul.mubr.bf16.vlgmr.msra.gmra.mrb[32].mxu1 %v10405_v56  ;;  %v22973_v56 = vld [vmem:[#allocation2 + $0x79] sm:$0xff] }
 0xc28   :  { %19435 = vmatprep.mubr.msk.bf16.mxu1 %vm23296_vm3, %v28814_v1  ;;  %19484 = vmatpush3.bf16.msra.mxu1 %v22721_v54  ;;  %v22972_v54 = vld [vmem:[#allocation2 + $0x71] sm:$0xff] }
 0xc29   :  { %19485 = vmatprep.subr.bf16.mxu1 %v28814_v1  ;;  %v10410_v7 = vpack.c.bf16 %v22972_v54, %v22971_v21  ;;  %v10644_v21 = vld [vmem:[#allocation2 + $0x1a] sm:$0xff] }
 0xc2a   :  { %v22729_v54 = vld [vmem:[%s28649_s2 + $0x3c0] sm:$0xff]  }
 0xc2c   :  { %19486 = vmatpush3.bf16.msra.mxu1 %v22722_v52  ;;  %v22974_v52 = vld [vmem:[#allocation2 + $0x81] sm:$0xff] }
 0xc2d   :  { %19487 = vmatprep.subr.bf16.mxu1 %v28814_v1 }
 0xc2f   :  { %19436 = vmatmul.mubr.bf16.gmra.mrb[36].mxu1 %v10406_v50  ;;  %v10412_v50 = vpack.c.bf16 %v22976_v58, %v22975_v55  ;;  %v22985_v55 = vld [vmem:[#allocation2 + $0x2a] sm:$0xff]  ;;  %v22986_v58 = vld [vmem:[#allocation2 + $0x32] sm:$0xff] }
 0xc30   :  { %19439 = vmatprep.mubr.msk.bf16.mxu1 %vm23296_vm3, %v28814_v1  ;;  %19488 = vmatpush3.bf16.msra.mxu1 %v22723_v48  ;;  %v10411_v48 = vpack.c.bf16 %v22974_v52, %v22973_v56  ;;  %v22730_v52 = vld [vmem:[%s28649_s2 + $0x3c8] sm:$0xff]  }
 0xc31   :  { %19489 = vmatprep.subr.bf16.mxu1 %v28814_v1 }
 0xc34   :  { %19490 = vmatpush3.bf16.msra.mxu1 %v22724_v28  ;;  %v22977_v28 = vld [vmem:[#allocation2 + $0x99] sm:$0xff] }
 0xc35   :  { %19491 = vmatprep.subr.bf16.mxu1 %v28814_v1 }
 0xc37   :  { %19440 = vmatmul.mubr.bf16.gmra.mrb[40].mxu1 %v10407_v63  ;;  %v22980_v63 = vld [vmem:[#allocation2 + $0xb1] sm:$0xff] }
 0xc38   :  { %19443 = vmatprep.mubr.msk.bf16.mxu1 %vm23296_vm3, %v28814_v1  ;;  %19492 = vmatpush3.bf16.msra.mxu1 %v22725_v11  ;;  %v22978_v11 = vld [vmem:[#allocation2 + $0xa1] sm:$0xff] }
 0xc39   :  { %19493 = vmatprep.subr.bf16.mxu1 %v28814_v1  ;;  %v10413_v41 = vpack.c.bf16 %v22978_v11, %v22977_v28  ;;  %v22732_v28 = vld [vmem:[%s28649_s2 + $0x3d8] sm:$0xff]   ;;  %v22733_v11 = vld [vmem:[%s28649_s2 + $0x3e0] sm:$0xff]  }
 0xc3c   :  { %19494 = vmatpush3.bf16.msra.mxu1 %v22726_v33  ;;  %v10414_v33 = vpack.c.bf16 %v22980_v63, %v22979_v29  ;;  %v22988_v29 = vld [vmem:[#allocation2 + $0x42] sm:$0xff] }
 0xc3d   :  { %19495 = vmatprep.subr.bf16.mxu1 %v28814_v1 }
 0xc3f   :  { %19444 = vmatmul.mubr.bf16.gmra.mrb[44].mxu1 %v10408_v47  ;;  %v27531_v47 = vld [vmem:[#allocation2 + $0xd1] sm:$0xff] }
 0xc40   :  { %19447 = vmatprep.mubr.msk.bf16.mxu1 %vm23296_vm3, %v28814_v1  ;;  %19496 = vmatpush3.bf16.msra.mxu1 %v22727_v16  ;;  %v22981_v16 = vld [vmem:[#allocation2 + $0xb9] sm:$0xff] }
 0xc41   :  { %19497 = vmatprep.subr.bf16.mxu1 %v28814_v1  ;;  %v10415_v57 = vpack.c.bf16 %v22982_v20, %v22981_v16  ;;  %v22735_v16 = vld [vmem:[%s28649_s2 + $0x3f0] sm:$0xff]  }
 0xc42   :  { %v22989_v20 = vld [vmem:[#allocation2 + $0x4a] sm:$0xff] }
 0xc44   :  { %19498 = vmatpush3.bf16.msra.mxu1 %v22728_v62  ;;  %v22983_v62 = vld [vmem:[#allocation2 + $0xc9] sm:$0xff] }
 0xc45   :  { %19551 = vmatprep.subr.bf16.mxu1 %v28814_v1  ;;  %v10416_v39 = vpack.c.bf16 %v27531_v47, %v22983_v62 }
 0xc47   :  { %19448 = vmatmul.mubr.bf16.gmra.mrb[48].mxu1 %v10409_v60  ;;  %v10417_v60 = vpack.c.bf16 %v10404_v4, %v10404_v4  ;;  %v22991_v4 = vld [vmem:[#allocation2 + $0x5a] sm:$0xff] }
 0xc48   :  { %19451 = vmatprep.mubr.msk.bf16.mxu1 %vm23296_vm3, %v28814_v1 }
 0xc4f   :  { %19452 = vmatmul.mubr.bf16.gmra.mrb[52].mxu1 %v10410_v7  ;;  %v22984_v7 = vld [vmem:[#allocation2 + $0x22] sm:$0xff] }
 0xc50   :  { %19455 = vmatprep.mubr.msk.bf16.mxu1 %vm23296_vm3, %v28814_v1  ;;  %v10669_v56 = vpack.c.bf16 %v22984_v7, %v10644_v21  ;;  %v22994_v7 = vld [vmem:[#allocation2 + $0x72] sm:$0xff] }
 0xc57   :  { %19456 = vmatmul.mubr.bf16.gmra.mrb[56].mxu1 %v10411_v48  ;;  %v22731_v48 = vld [vmem:[%s28649_s2 + $0x3d0] sm:$0xff]  }
 0xc58   :  { %19459 = vmatprep.mubr.msk.bf16.mxu1 %vm23296_vm3, %v28814_v1 }
 0xc5f   :  { %19460 = vmatmul.mubr.bf16.gmra.mrb[60].mxu1 %v10412_v50  ;;  %v10670_v50 = vpack.c.bf16 %v22986_v58, %v22985_v55  ;;  %v22997_v58 = vld [vmem:[#allocation2 + $0x8a] sm:$0xff] }
 0xc60   :  { %19463 = vmatprep.mubr.msk.bf16.mxu1 %vm23296_vm3, %v28814_v1 }
 0xc67   :  { %19464 = vmatmul.mubr.bf16.gmra.mrb[64].mxu1 %v10413_v41  ;;  %v22987_v41 = vld [vmem:[#allocation2 + $0x3a] sm:$0xff] }
 0xc68   :  { %19467 = vmatprep.mubr.msk.bf16.mxu1 %vm23296_vm3, %v28814_v1  ;;  %v10671_v63 = vpack.c.bf16 %v22988_v29, %v22987_v41  ;;  %v23000_v41 = vld [vmem:[#allocation2 + $0xa2] sm:$0xff] }
 0xc6f   :  { %19468 = vmatmul.mubr.bf16.gmra.mrb[68].mxu1 %v10414_v33  ;;  %v22734_v33 = vld [vmem:[%s28649_s2 + $0x3e8] sm:$0xff]  }
 0xc70   :  { %19471 = vmatprep.mubr.msk.bf16.mxu1 %vm23296_vm3, %v28814_v1 }
 0xc77   :  { %19472 = vmatmul.mubr.bf16.gmra.mrb[72].mxu1 %v10415_v57  ;;  %v22990_v57 = vld [vmem:[#allocation2 + $0x52] sm:$0xff] }
 0xc78   :  { %19475 = vmatprep.mubr.msk.bf16.mxu1 %vm23296_vm3, %v28814_v1  ;;  %v10672_v62 = vpack.c.bf16 %v22990_v57, %v22989_v20  ;;  %v23003_v20 = vld [vmem:[#allocation2 + $0xba] sm:$0xff]  ;;  %v23004_v57 = vld [vmem:[#allocation2 + $0xc2] sm:$0xff] }
 0xc7f   :  { %19476 = vmatmul.mubr.bf16.gmra.mrb[76].mxu1 %v10416_v39  ;;  %v22736_v39 = vld [vmem:[%s28649_s2 + $0x3f8] sm:$0xff]  }
 0xc80   :  { %19479 = vmatprep.mubr.msk.bf16.mxu1 %vm23296_vm3, %v28814_v1 }
 0xc87   :  { %19480 = vmatmul.mubr.bf16.gmra.mrb[80].mxu1 %v10417_v60  ;;  %v22992_v60 = vld [vmem:[#allocation2 + $0x62] sm:$0xff] }
 0xc88   :  { %19499 = vmatprep.mubr.msk.bf16.mxu1 %vm23296_vm3, %v28814_v1  ;;  %v10673_v21 = vpack.c.bf16 %v22992_v60, %v22991_v4  ;;  %v23005_v4 = vld [vmem:[#allocation2 + $0xca] sm:$0xff] }
 0xc8f   :  { %19500 = vmatmul.mubr.bf16.vlgmr.msra.gmra.mrb[32].mxu1 %v10669_v56 }
 0xc90   :  { %19503 = vmatprep.mubr.msk.bf16.mxu1 %vm23296_vm3, %v28814_v1  ;;  %19552 = vmatpush3.bf16.msra.mxu1 %v22729_v54  ;;  %v22993_v54 = vld [vmem:[#allocation2 + $0x6a] sm:$0xff] }
 0xc91   :  { %19553 = vmatprep.subr.bf16.mxu1 %v28814_v1  ;;  %v10674_v56 = vpack.c.bf16 %v22994_v7, %v22993_v54  ;;  %v22737_v7 = vld [vmem:[%s28649_s2 + $0x400] sm:$0xff]  }
 0xc94   :  { %19554 = vmatpush3.bf16.msra.mxu1 %v22730_v52  ;;  %v22995_v52 = vld [vmem:[#allocation2 + $0x7a] sm:$0xff] }
 0xc95   :  { %19555 = vmatprep.subr.bf16.mxu1 %v28814_v1 }
 0xc97   :  { %19504 = vmatmul.mubr.bf16.gmra.mrb[36].mxu1 %v10670_v50  ;;  %v22998_v50 = vld [vmem:[#allocation2 + $0x92] sm:$0xff] }
 0xc98   :  { %19507 = vmatprep.mubr.msk.bf16.mxu1 %vm23296_vm3, %v28814_v1  ;;  %19556 = vmatpush3.bf16.msra.mxu1 %v22731_v48  ;;  %v22996_v48 = vld [vmem:[#allocation2 + $0x82] sm:$0xff] }
 0xc99   :  { %19557 = vmatprep.subr.bf16.mxu1 %v28814_v1  ;;  %v10675_v55 = vpack.c.bf16 %v22996_v48, %v22995_v52  ;;  %v28996_v52 = vld [vmem:[#allocation59_spill] sm:$0xff] }
 0xc9c   :  { %19558 = vmatpush3.bf16.msra.mxu1 %v22732_v28  ;;  %v10676_v28 = vpack.c.bf16 %v22998_v50, %v22997_v58  ;;  %v22739_v58 = vld [vmem:[%s28649_s2 + $0x410] sm:$0xff]   ;;  %v28998_v50 = vld [vmem:[#allocation62_spill] sm:$0xff] }
 0xc9d   :  { %19559 = vmatprep.subr.bf16.mxu1 %v28814_v1 }
 0xc9f   :  { %19508 = vmatmul.mubr.bf16.gmra.mrb[40].mxu1 %v10671_v63  ;;  %v23001_v63 = vld [vmem:[#allocation2 + $0xaa] sm:$0xff] }
 0xca0   :  { %19511 = vmatprep.mubr.msk.bf16.mxu1 %vm23296_vm3, %v28814_v1  ;;  %19560 = vmatpush3.bf16.msra.mxu1 %v22733_v11  ;;  %v22999_v11 = vld [vmem:[#allocation2 + $0x9a] sm:$0xff] }
 0xca1   :  { %19561 = vmatprep.subr.bf16.mxu1 %v28814_v1  ;;  %v10677_v29 = vpack.c.bf16 %v23000_v41, %v22999_v11  ;;  %v22740_v41 = vld [vmem:[%s28649_s2 + $0x418] sm:$0xff]  }
 0xca4   :  { %19562 = vmatpush3.bf16.msra.mxu1 %v22734_v33  ;;  %v23002_v33 = vld [vmem:[#allocation2 + $0xb2] sm:$0xff] }
 0xca5   :  { %19563 = vmatprep.subr.bf16.mxu1 %v28814_v1 }
 0xca7   :  { %19512 = vmatmul.mubr.bf16.gmra.mrb[44].mxu1 %v10672_v62  ;;  %v10679_v62 = vpack.c.bf16 %v23004_v57, %v23003_v20  ;;  %v22742_v20 = vld [vmem:[%s28649_s2 + $0x428] sm:$0xff]   ;;  %v22743_v57 = vld [vmem:[%s28649_s2 + $0x430] sm:$0xff]  }
 0xca8   :  { %19515 = vmatprep.mubr.msk.bf16.mxu1 %vm23296_vm3, %v28814_v1  ;;  %19564 = vmatpush3.bf16.msra.mxu1 %v22735_v16  ;;  %v10678_v16 = vpack.c.bf16 %v23002_v33, %v23001_v63  ;;  %v29001_v63 = vld [vmem:[#allocation64_spill] sm:$0xff]  ;;  %v29002_v33 = vld [vmem:[#allocation63_spill] sm:$0xff] }
 0xca9   :  { %19565 = vmatprep.subr.bf16.mxu1 %v28814_v1 }
 0xcac   :  { %19566 = vmatpush3.bf16.msra.mxu1 %v22736_v39  ;;  %v27592_v39 = vld [vmem:[#allocation2 + $0xd2] sm:$0xff] }
 0xcad   :  { %19619 = vmatprep.subr.bf16.mxu1 %v28814_v1  ;;  %v10680_v60 = vpack.c.bf16 %v27592_v39, %v23005_v4  ;;  %v29005_v4 = vld [vmem:[#allocation69_spill] sm:$0xff] }
 0xcaf   :  { %19516 = vmatmul.mubr.bf16.gmra.mrb[48].mxu1 %v10673_v21  ;;  %v10668_v21 = vld [vmem:[#allocation2 + $0xda] sm:$0x3] }
 0xcb0   :  { %19519 = vmatprep.mubr.msk.bf16.mxu1 %vm23296_vm3, %v28814_v1  ;;  %v10681_v54 = vpack.c.bf16 %v10668_v21, %v10668_v21  ;;  %v22744_v21 = vld [vmem:[%s28649_s2 + $0x438] sm:$0xff]  }
 0xcb7   :  { %19520 = vmatmul.mubr.bf16.gmra.mrb[52].mxu1 %v10674_v56  ;;  %v28995_v56 = vld [vmem:[#allocation60_spill] sm:$0xff] }
 0xcb8   :  { %19523 = vmatprep.mubr.msk.bf16.mxu1 %vm23296_vm3, %v28814_v1  ;;  %v28997_v48 = vpack.c.bf16 %v28995_v56, %v28996_v52  ;;  %v29010_v52 = vld [vmem:[#allocation74_spill] sm:$0xff] }
 0xcbf   :  { %19524 = vmatmul.mubr.bf16.gmra.mrb[56].mxu1 %v10675_v55  ;;  %v22738_v55 = vld [vmem:[%s28649_s2 + $0x408] sm:$0xff]  }
 0xcc0   :  { %19527 = vmatprep.mubr.msk.bf16.mxu1 %vm23296_vm3, %v28814_v1 }
 0xcc7   :  { %19528 = vmatmul.mubr.bf16.gmra.mrb[60].mxu1 %v10676_v28  ;;  %v28999_v28 = vld [vmem:[#allocation61_spill] sm:$0xff] }
 0xcc8   :  { %19531 = vmatprep.mubr.msk.bf16.mxu1 %vm23296_vm3, %v28814_v1  ;;  %v29000_v11 = vpack.c.bf16 %v28998_v50, %v28999_v28  ;;  %v29014_v50 = vld [vmem:[#allocation79_spill] sm:$0xff] }
 0xccf   :  { %19532 = vmatmul.mubr.bf16.gmra.mrb[64].mxu1 %v10677_v29  ;;  %v22741_v29 = vld [vmem:[%s28649_s2 + $0x420] sm:$0xff]  }
 0xcd0   :  { %19535 = vmatprep.mubr.msk.bf16.mxu1 %vm23296_vm3, %v28814_v1 }
 0xcd7   :  { %19536 = vmatmul.mubr.bf16.gmra.mrb[68].mxu1 %v10678_v16  ;;  %v29003_v16 = vpack.c.bf16 %v29001_v63, %v29002_v33  ;;  %v29019_v63 = vld [vmem:[#allocation87_spill] sm:$0xff]  ;;  %v29020_v33 = vld [vmem:[#allocation86_spill] sm:$0xff] }
 0xcd8   :  { %19539 = vmatprep.mubr.msk.bf16.mxu1 %vm23296_vm3, %v28814_v1 }
 0xcdf   :  { %19540 = vmatmul.mubr.bf16.gmra.mrb[72].mxu1 %v10679_v62  ;;  %v29004_v62 = vld [vmem:[#allocation70_spill] sm:$0xff] }
 0xce0   :  { %19543 = vmatprep.mubr.msk.bf16.mxu1 %vm23296_vm3, %v28814_v1 }
 0xce7   :  { %19544 = vmatmul.mubr.bf16.gmra.mrb[76].mxu1 %v10680_v60  ;;  %v29006_v60 = vpack.c.bf16 %v29004_v62, %v29005_v4  ;;  %v29025_v4 = vld [vmem:[#allocation95_spill] sm:$0xff] }
 0xce8   :  { %19547 = vmatprep.mubr.msk.bf16.mxu1 %vm23296_vm3, %v28814_v1 }
 0xcef   :  { %19548 = vmatmul.mubr.bf16.gmra.mrb[80].mxu1 %v10681_v54  ;;  %v29007_v54 = vld [vmem:[#allocation72_spill] sm:$0xff] }
 0xcf0   :  { %19567 = vmatprep.mubr.msk.bf16.mxu1 %vm23296_vm3, %v28814_v1 }
 0xcf7   :  { %19568 = vmatmul.mubr.bf16.vlgmr.msra.gmra.mrb[32].mxu1 %v28997_v48  ;;  %v29011_v48 = vld [vmem:[#allocation73_spill] sm:$0xff] }
 0xcf8   :  { %19571 = vmatprep.mubr.msk.bf16.mxu1 %vm23296_vm3, %v28814_v1  ;;  %19620 = vmatpush3.bf16.msra.mxu1 %v22737_v7  ;;  %v29008_v7 = vld [vmem:[#allocation71_spill] sm:$0xff] }
 0xcf9   :  { %19621 = vmatprep.subr.bf16.mxu1 %v28814_v1  ;;  %v29009_v56 = vpack.c.bf16 %v29007_v54, %v29008_v7  ;;  %v10931_v54 = vld [vmem:[#allocation2 + $0xd9] sm:$0xff] }
 0xcfa   :  { %v10944_v7 = vpack.c.bf16 %v10931_v54, %v27531_v47  ;;  %v22746_v47 = vld [vmem:[%s28649_s2 + $0x448] sm:$0xff]  }
 0xcfc   :  { %19622 = vmatpush3.bf16.msra.mxu1 %v22738_v55  ;;  %v29012_v55 = vpack.c.bf16 %v29010_v52, %v29011_v48  ;;  %v22745_v48 = vld [vmem:[%s28649_s2 + $0x440] sm:$0xff]  }
 0xcfd   :  { %19623 = vmatprep.subr.bf16.mxu1 %v28814_v1 }
 0xcff   :  { %19572 = vmatmul.mubr.bf16.gmra.mrb[36].mxu1 %v29000_v11  ;;  %v29016_v11 = vld [vmem:[#allocation82_spill] sm:$0xff] }
 0xd00   :  { %19575 = vmatprep.mubr.msk.bf16.mxu1 %vm23296_vm3, %v28814_v1  ;;  %19624 = vmatpush3.bf16.msra.mxu1 %v22739_v58  ;;  %v29013_v58 = vld [vmem:[#allocation80_spill] sm:$0xff] }
 0xd01   :  { %19625 = vmatprep.subr.bf16.mxu1 %v28814_v1  ;;  %v29015_v28 = vpack.c.bf16 %v29013_v58, %v29014_v50  ;;  %v22747_v50 = vld [vmem:[%s28649_s2 + $0x450] sm:$0xff]  }
 0xd04   :  { %19626 = vmatpush3.bf16.msra.mxu1 %v22740_v41  ;;  %v29017_v41 = vld [vmem:[#allocation81_spill] sm:$0xff] }
 0xd05   :  { %19627 = vmatprep.subr.bf16.mxu1 %v28814_v1 }
 0xd07   :  { %19576 = vmatmul.mubr.bf16.gmra.mrb[40].mxu1 %v29003_v16  ;;  %v29021_v16 = vpack.c.bf16 %v29019_v63, %v29020_v33  ;;  %v22750_v33 = vld [vmem:[%s28649_s2 + $0x468] sm:$0xff]  }
 0xd08   :  { %19579 = vmatprep.mubr.msk.bf16.mxu1 %vm23296_vm3, %v28814_v1  ;;  %19628 = vmatpush3.bf16.msra.mxu1 %v22741_v29  ;;  %v29018_v29 = vpack.c.bf16 %v29016_v11, %v29017_v41  ;;  %v22748_v11 = vld [vmem:[%s28649_s2 + $0x458] sm:$0xff]   ;;  %v22749_v41 = vld [vmem:[%s28649_s2 + $0x460] sm:$0xff]  }
 0xd09   :  { %19629 = vmatprep.subr.bf16.mxu1 %v28814_v1 }
 0xd0c   :  { %19630 = vmatpush3.bf16.msra.mxu1 %v22742_v20  ;;  %v29022_v20 = vld [vmem:[#allocation92_spill] sm:$0xff] }
 0xd0d   :  { %19631 = vmatprep.subr.bf16.mxu1 %v28814_v1 }
 0xd0f   :  { %19580 = vmatmul.mubr.bf16.gmra.mrb[44].mxu1 %v29006_v60  ;;  %v29026_v60 = vld [vmem:[#allocation94_spill] sm:$0xff] }
 0xd10   :  { %19583 = vmatprep.mubr.msk.bf16.mxu1 %vm23296_vm3, %v28814_v1  ;;  %19632 = vmatpush3.bf16.msra.mxu1 %v22743_v57  ;;  %v29023_v57 = vld [vmem:[#allocation91_spill] sm:$0xff] }
 0xd11   :  { %19633 = vmatprep.subr.bf16.mxu1 %v28814_v1  ;;  %v29024_v62 = vpack.c.bf16 %v29022_v20, %v29023_v57  ;;  %v29035_v20 = vld [vmem:[#allocation100_spill] sm:$0xff]  ;;  %v29036_v57 = vld [vmem:[#allocation99_spill] sm:$0xff] }
 0xd14   :  { %19634 = vmatpush3.bf16.msra.mxu1 %v22744_v21  ;;  %v29027_v21 = vpack.c.bf16 %v29025_v4, %v29026_v60  ;;  %v22752_v4 = vld [vmem:[%s28649_s2 + $0x478] sm:$0xff]  }
 0xd15   :  { %19687 = vmatprep.subr.bf16.mxu1 %v28814_v1  ;;  %v29038_v60 = vld [vmem:[#allocation102_spill] sm:$0xff] }
 0xd17   :  { %19584 = vmatmul.mubr.bf16.gmra.mrb[48].mxu1 %v29009_v56  ;;  %v10932_v56 = vld [vmem:[#allocation2 + $0xe1] sm:$0x3] }
 0xd18   :  { %19587 = vmatprep.mubr.msk.bf16.mxu1 %vm23296_vm3, %v28814_v1  ;;  %v10945_v52 = vpack.c.bf16 %v10932_v56, %v10932_v56  ;;  %v29042_v56 = vld [vmem:[#allocation103_spill] sm:$0xff] }
 0xd1f   :  { %19588 = vmatmul.mubr.bf16.gmra.mrb[52].mxu1 %v29012_v55  ;;  %v29028_v55 = vld [vmem:[#allocation93_spill] sm:$0xff] }
 0xd20   :  { %19591 = vmatprep.mubr.msk.bf16.mxu1 %vm23296_vm3, %v28814_v1  ;;  %v29029_v58 = vpack.c.bf16 %v26466_v22, %v29028_v55  ;;  %v29030_v22 = vld [vmem:[#allocation96_spill] sm:$0xff]  ;;  %v29045_v55 = vld [vmem:[#allocation105_spill] sm:$0xff] }
 0xd27   :  { %19592 = vmatmul.mubr.bf16.gmra.mrb[56].mxu1 %v29015_v28  ;;  %v29031_v28 = vpack.c.bf16 %v26470_v12, %v29030_v22  ;;  %v29033_v12 = vld [vmem:[#allocation97_spill] sm:$0xff] }
 0xd28   :  { %19595 = vmatprep.mubr.msk.bf16.mxu1 %vm23296_vm3, %v28814_v1 }
 0xd2f   :  { %19596 = vmatmul.mubr.bf16.gmra.mrb[60].mxu1 %v29018_v29  ;;  %v29032_v29 = vld [vmem:[#allocation98_spill] sm:$0xff] }
 0xd30   :  { %19599 = vmatprep.mubr.msk.bf16.mxu1 %vm23296_vm3, %v28814_v1  ;;  %v29034_v63 = vpack.c.bf16 %v29032_v29, %v29033_v12  ;;  %v29053_v29 = vld [vmem:[#allocation112_spill] sm:$0xff]  ;;  %v29054_v12 = vld [vmem:[#allocation111_spill] sm:$0xff] }
 0xd37   :  { %19600 = vmatmul.mubr.bf16.gmra.mrb[64].mxu1 %v29021_v16  ;;  %v22751_v16 = vld [vmem:[%s28649_s2 + $0x470] sm:$0xff]  }
 0xd38   :  { %19603 = vmatprep.mubr.msk.bf16.mxu1 %vm23296_vm3, %v28814_v1 }
 0xd3f   :  { %19604 = vmatmul.mubr.bf16.gmra.mrb[68].mxu1 %v29024_v62  ;;  %v29037_v62 = vpack.c.bf16 %v29035_v20, %v29036_v57  ;;  %v11195_v57 = vld [vmem:[#allocation2 + $0xda] sm:$0xff] }
 0xd40   :  { %19607 = vmatprep.mubr.msk.bf16.mxu1 %vm23296_vm3, %v28814_v1 }
 0xd47   :  { %19608 = vmatmul.mubr.bf16.gmra.mrb[72].mxu1 %v29027_v21  ;;  %v29039_v21 = vld [vmem:[#allocation101_spill] sm:$0xff] }
 0xd48   :  { %19611 = vmatprep.mubr.msk.bf16.mxu1 %vm23296_vm3, %v28814_v1  ;;  %v29040_v54 = vpack.c.bf16 %v29038_v60, %v29039_v21  ;;  %v11436_v21 = vld [vmem:[#allocation2 + $0x23] sm:$0xff] }
 0xd4f   :  { %19612 = vmatmul.mubr.bf16.gmra.mrb[76].mxu1 %v10944_v7  ;;  %v29041_v7 = vld [vmem:[#allocation104_spill] sm:$0xff] }
 0xd50   :  { %19615 = vmatprep.mubr.msk.bf16.mxu1 %vm23296_vm3, %v28814_v1 }
 0xd57   :  { %19616 = vmatmul.mubr.bf16.gmra.mrb[80].mxu1 %v10945_v52  ;;  %v29043_v52 = vpack.c.bf16 %v29041_v7, %v29042_v56  ;;  %v22753_v7 = vld [vmem:[%s28649_s2 + $0x480] sm:$0xff]  }
 0xd58   :  { %19635 = vmatprep.mubr.msk.bf16.mxu1 %vm23296_vm3, %v28814_v1 }
 0xd5f   :  { %19636 = vmatmul.mubr.bf16.vlgmr.msra.gmra.mrb[32].mxu1 %v29029_v58 }
 0xd60   :  { %19639 = vmatprep.mubr.msk.bf16.mxu1 %vm23296_vm3, %v28814_v1  ;;  %19688 = vmatpush3.bf16.msra.mxu1 %v22745_v48  ;;  %v29044_v48 = vld [vmem:[#allocation106_spill] sm:$0xff] }
 0xd61   :  { %19689 = vmatprep.subr.bf16.mxu1 %v28814_v1  ;;  %v29046_v58 = vpack.c.bf16 %v29044_v48, %v29045_v55  ;;  %v11438_v48 = vld [vmem:[#allocation2 + $0x33] sm:$0xff] }
 0xd62   :  { %v22755_v55 = vld [vmem:[%s28649_s2 + $0x490] sm:$0xff]  }
 0xd64   :  { %19690 = vmatpush3.bf16.msra.mxu1 %v22746_v47  ;;  %v29047_v47 = vld [vmem:[#allocation108_spill] sm:$0xff] }
 0xd65   :  { %19691 = vmatprep.subr.bf16.mxu1 %v28814_v1 }
 0xd67   :  { %19640 = vmatmul.mubr.bf16.gmra.mrb[36].mxu1 %v29031_v28  ;;  %v29050_v28 = vld [vmem:[#allocation110_spill] sm:$0xff] }
 0xd68   :  { %19643 = vmatprep.mubr.msk.bf16.mxu1 %vm23296_vm3, %v28814_v1  ;;  %19692 = vmatpush3.bf16.msra.mxu1 %v22747_v50  ;;  %v29048_v50 = vld [vmem:[#allocation107_spill] sm:$0xff] }
 0xd69   :  { %19693 = vmatprep.subr.bf16.mxu1 %v28814_v1  ;;  %v29049_v22 = vpack.c.bf16 %v29047_v47, %v29048_v50  ;;  %v22756_v47 = vld [vmem:[%s28649_s2 + $0x498] sm:$0xff]   ;;  %v11440_v50 = vld [vmem:[#allocation2 + $0x43] sm:$0xff] }
 0xd6c   :  { %19694 = vmatpush3.bf16.msra.mxu1 %v22748_v11  ;;  %v29051_v11 = vld [vmem:[#allocation109_spill] sm:$0xff] }
 0xd6d   :  { %19695 = vmatprep.subr.bf16.mxu1 %v28814_v1 }
 0xd6f   :  { %19644 = vmatmul.mubr.bf16.gmra.mrb[40].mxu1 %v29034_v63  ;;  %v29055_v63 = vpack.c.bf16 %v29053_v29, %v29054_v12  ;;  %v11443_v29 = vld [vmem:[#allocation2 + $0x5b] sm:$0xff]  ;;  %v11442_v12 = vld [vmem:[#allocation2 + $0x53] sm:$0xff] }
 0xd70   :  { %19647 = vmatprep.mubr.msk.bf16.mxu1 %vm23296_vm3, %v28814_v1  ;;  %19696 = vmatpush3.bf16.msra.mxu1 %v22749_v41  ;;  %v29052_v41 = vpack.c.bf16 %v29050_v28, %v29051_v11  ;;  %v22757_v28 = vld [vmem:[%s28649_s2 + $0x4a0] sm:$0xff]  }
 0xd71   :  { %19697 = vmatprep.subr.bf16.mxu1 %v28814_v1 }
 0xd74   :  { %19698 = vmatpush3.bf16.msra.mxu1 %v22750_v33  ;;  %v29056_v33 = vld [vmem:[#allocation114_spill] sm:$0xff] }
 0xd75   :  { %19699 = vmatprep.subr.bf16.mxu1 %v28814_v1 }
 0xd77   :  { %19648 = vmatmul.mubr.bf16.gmra.mrb[44].mxu1 %v29037_v62  ;;  %v11208_v62 = vpack.c.bf16 %v11195_v57, %v27592_v39  ;;  %v22754_v39 = vld [vmem:[%s28649_s2 + $0x488] sm:$0xff]  }
 0xd78   :  { %19651 = vmatprep.mubr.msk.bf16.mxu1 %vm23296_vm3, %v28814_v1  ;;  %19700 = vmatpush3.bf16.msra.mxu1 %v22751_v16  ;;  %v29057_v16 = vld [vmem:[#allocation113_spill] sm:$0xff] }
 0xd79   :  { %19701 = vmatprep.subr.bf16.mxu1 %v28814_v1  ;;  %v29058_v20 = vpack.c.bf16 %v29056_v33, %v29057_v16  ;;  %v11464_v33 = vpack.c.bf16 %v11443_v29, %v11442_v12  ;;  %v22760_v16 = vld [vmem:[%s28649_s2 + $0x4b8] sm:$0xff]   ;;  %v11445_v57 = vld [vmem:[#allocation2 + $0x6b] sm:$0xff] }
 0xd7a   :  { %v11459_v12 = vld [vmem:[#allocation2 + $0xdb] sm:$0xff] }
 0xd7c   :  { %19702 = vmatpush3.bf16.msra.mxu1 %v22752_v4  ;;  %v11196_v4 = vld [vmem:[#allocation2 + $0xe2] sm:$0x3] }
 0xd7d   :  { %19755 = vmatprep.subr.bf16.mxu1 %v28814_v1  ;;  %v11209_v60 = vpack.c.bf16 %v11196_v4, %v11196_v4  ;;  %v11447_v4 = vld [vmem:[#allocation2 + $0x7b] sm:$0xff] }
 0xd7f   :  { %19652 = vmatmul.mubr.bf16.gmra.mrb[48].mxu1 %v29040_v54  ;;  %v11437_v54 = vld [vmem:[#allocation2 + $0x2b] sm:$0xff] }
 0xd80   :  { %19655 = vmatprep.mubr.msk.bf16.mxu1 %vm23296_vm3, %v28814_v1  ;;  %v11461_v56 = vpack.c.bf16 %v11437_v54, %v11436_v21  ;;  %v11448_v54 = vld [vmem:[#allocation2 + $0x83] sm:$0xff] }
 0xd87   :  { %19656 = vmatmul.mubr.bf16.gmra.mrb[52].mxu1 %v29043_v52  ;;  %v11439_v52 = vld [vmem:[#allocation2 + $0x3b] sm:$0xff] }
 0xd88   :  { %19659 = vmatprep.mubr.msk.bf16.mxu1 %vm23296_vm3, %v28814_v1 }
 0xd8f   :  { %19660 = vmatmul.mubr.bf16.gmra.mrb[56].mxu1 %v29046_v58  ;;  %v11462_v58 = vpack.c.bf16 %v11439_v52, %v11438_v48  ;;  %v11450_v52 = vld [vmem:[#allocation2 + $0x93] sm:$0xff] }
 0xd90   :  { %19663 = vmatprep.mubr.msk.bf16.mxu1 %vm23296_vm3, %v28814_v1 }
 0xd97   :  { %19664 = vmatmul.mubr.bf16.gmra.mrb[60].mxu1 %v29049_v22  ;;  %v11441_v22 = vld [vmem:[#allocation2 + $0x4b] sm:$0xff] }
 0xd98   :  { %19667 = vmatprep.mubr.msk.bf16.mxu1 %vm23296_vm3, %v28814_v1  ;;  %v11463_v11 = vpack.c.bf16 %v11441_v22, %v11440_v50  ;;  %v11455_v50 = vld [vmem:[#allocation2 + $0xbb] sm:$0xff]  ;;  %v11454_v22 = vld [vmem:[#allocation2 + $0xb3] sm:$0xff] }
 0xd9f   :  { %19668 = vmatmul.mubr.bf16.gmra.mrb[64].mxu1 %v29052_v41  ;;  %v22758_v41 = vld [vmem:[%s28649_s2 + $0x4a8] sm:$0xff]  }
 0xda0   :  { %19671 = vmatprep.mubr.msk.bf16.mxu1 %vm23296_vm3, %v28814_v1 }
 0xda7   :  { %19672 = vmatmul.mubr.bf16.gmra.mrb[68].mxu1 %v29055_v63  ;;  %v22759_v63 = vld [vmem:[%s28649_s2 + $0x4b0] sm:$0xff]  }
 0xda8   :  { %19675 = vmatprep.mubr.msk.bf16.mxu1 %vm23296_vm3, %v28814_v1 }
 0xdaf   :  { %19676 = vmatmul.mubr.bf16.gmra.mrb[72].mxu1 %v29058_v20  ;;  %v11444_v20 = vld [vmem:[#allocation2 + $0x63] sm:$0xff] }
 0xdb0   :  { %19679 = vmatprep.mubr.msk.bf16.mxu1 %vm23296_vm3, %v28814_v1 }
 0xdb7   :  { %19680 = vmatmul.mubr.bf16.gmra.mrb[76].mxu1 %v11208_v62  ;;  %v11465_v62 = vpack.c.bf16 %v11445_v57, %v11444_v20  ;;  %v11700_v57 = vld [vmem:[#allocation2 + $0x24] sm:$0xff] }
 0xdb8   :  { %19683 = vmatprep.mubr.msk.bf16.mxu1 %vm23296_vm3, %v28814_v1 }
 0xdbf   :  { %19684 = vmatmul.mubr.bf16.gmra.mrb[80].mxu1 %v11209_v60  ;;  %v11446_v60 = vld [vmem:[#allocation2 + $0x73] sm:$0xff] }
 0xdc0   :  { %19703 = vmatprep.mubr.msk.bf16.mxu1 %vm23296_vm3, %v28814_v1  ;;  %v11466_v21 = vpack.c.bf16 %v11447_v4, %v11446_v60  ;;  %v23006_v4 = vld [vmem:[#allocation2 + $0x2c] sm:$0xff] }
 0xdc1   :  { %v11725_v60 = vpack.c.bf16 %v23006_v4, %v11700_v57  ;;  %v23018_v4 = vld [vmem:[#allocation2 + $0x8c] sm:$0xff] }
 0xdc7   :  { %19704 = vmatmul.mubr.bf16.vlgmr.msra.gmra.mrb[32].mxu1 %v11461_v56 }
 0xdc8   :  { %19707 = vmatprep.mubr.msk.bf16.mxu1 %vm23296_vm3, %v28814_v1  ;;  %19756 = vmatpush3.bf16.msra.mxu1 %v22753_v7  ;;  %v11449_v7 = vld [vmem:[#allocation2 + $0x8b] sm:$0xff] }
 0xdc9   :  { %19757 = vmatprep.subr.bf16.mxu1 %v28814_v1  ;;  %v11467_v56 = vpack.c.bf16 %v11449_v7, %v11448_v54  ;;  %v22763_v54 = vld [vmem:[%s28649_s2 + $0x4d0] sm:$0xff]  }
 0xdca   :  { %v23007_v7 = vld [vmem:[#allocation2 + $0x34] sm:$0xff] }
 0xdcc   :  { %19758 = vmatpush3.bf16.msra.mxu1 %v22754_v39  ;;  %v11451_v39 = vld [vmem:[#allocation2 + $0x9b] sm:$0xff] }
 0xdcd   :  { %19759 = vmatprep.subr.bf16.mxu1 %v28814_v1  ;;  %v11468_v48 = vpack.c.bf16 %v11451_v39, %v11450_v52  ;;  %v22764_v52 = vld [vmem:[%s28649_s2 + $0x4d8] sm:$0xff]  }
 0xdcf   :  { %19708 = vmatmul.mubr.bf16.gmra.mrb[36].mxu1 %v11462_v58  ;;  %v11453_v58 = vld [vmem:[#allocation2 + $0xab] sm:$0xff] }
 0xdd0   :  { %19711 = vmatprep.mubr.msk.bf16.mxu1 %vm23296_vm3, %v28814_v1  ;;  %19760 = vmatpush3.bf16.msra.mxu1 %v22755_v55  ;;  %v11452_v55 = vld [vmem:[#allocation2 + $0xa3] sm:$0xff] }
 0xdd1   :  { %19761 = vmatprep.subr.bf16.mxu1 %v28814_v1 }
 0xdd4   :  { %19762 = vmatpush3.bf16.msra.mxu1 %v22756_v47  ;;  %v11469_v47 = vpack.c.bf16 %v11453_v58, %v11452_v55  ;;  %v23009_v55 = vld [vmem:[#allocation2 + $0x44] sm:$0xff]  ;;  %v23010_v58 = vld [vmem:[#allocation2 + $0x4c] sm:$0xff] }
 0xdd5   :  { %19763 = vmatprep.subr.bf16.mxu1 %v28814_v1 }
 0xdd7   :  { %19712 = vmatmul.mubr.bf16.gmra.mrb[40].mxu1 %v11463_v11  ;;  %v11456_v11 = vld [vmem:[#allocation2 + $0xc3] sm:$0xff] }
 0xdd8   :  { %19715 = vmatprep.mubr.msk.bf16.mxu1 %vm23296_vm3, %v28814_v1  ;;  %19764 = vmatpush3.bf16.msra.mxu1 %v22757_v28  ;;  %v11470_v28 = vpack.c.bf16 %v11455_v50, %v11454_v22  ;;  %v22766_v50 = vld [vmem:[%s28649_s2 + $0x4e8] sm:$0xff]   ;;  %v22767_v22 = vld [vmem:[%s28649_s2 + $0x4f0] sm:$0xff]  }
 0xdd9   :  { %19765 = vmatprep.subr.bf16.mxu1 %v28814_v1 }
 0xddc   :  { %19766 = vmatpush3.bf16.msra.mxu1 %v22758_v41  ;;  %v11457_v41 = vld [vmem:[#allocation2 + $0xcb] sm:$0xff] }
 0xddd   :  { %19767 = vmatprep.subr.bf16.mxu1 %v28814_v1  ;;  %v11471_v29 = vpack.c.bf16 %v11457_v41, %v11456_v11  ;;  %v23012_v11 = vld [vmem:[#allocation2 + $0x5c] sm:$0xff] }
 0xddf   :  { %19716 = vmatmul.mubr.bf16.gmra.mrb[44].mxu1 %v11464_v33 }
 0xde0   :  { %19719 = vmatprep.mubr.msk.bf16.mxu1 %vm23296_vm3, %v28814_v1  ;;  %19768 = vmatpush3.bf16.msra.mxu1 %v22759_v63  ;;  %v11458_v63 = vld [vmem:[#allocation2 + $0xd3] sm:$0xff] }
 0xde1   :  { %19769 = vmatprep.subr.bf16.mxu1 %v28814_v1  ;;  %v11472_v33 = vpack.c.bf16 %v11459_v12, %v11458_v63  ;;  %v23013_v12 = vld [vmem:[#allocation2 + $0x64] sm:$0xff]  ;;  %v23014_v63 = vld [vmem:[#allocation2 + $0x6c] sm:$0xff] }
 0xde4   :  { %19770 = vmatpush3.bf16.msra.mxu1 %v22760_v16  ;;  %v11460_v16 = vld [vmem:[#allocation2 + $0xe3] sm:$0x3] }
 0xde5   :  { %19823 = vmatprep.subr.bf16.mxu1 %v28814_v1  ;;  %v11473_v20 = vpack.c.bf16 %v11460_v16, %v11460_v16  ;;  %v23015_v16 = vld [vmem:[#allocation2 + $0x74] sm:$0xff] }
 0xde7   :  { %19720 = vmatmul.mubr.bf16.gmra.mrb[48].mxu1 %v11465_v62  ;;  %v22761_v62 = vld [vmem:[%s28649_s2 + $0x4c0] sm:$0xff]  }
 0xde8   :  { %19723 = vmatprep.mubr.msk.bf16.mxu1 %vm23296_vm3, %v28814_v1 }
 0xdef   :  { %19724 = vmatmul.mubr.bf16.gmra.mrb[52].mxu1 %v11466_v21  ;;  %v22762_v21 = vld [vmem:[%s28649_s2 + $0x4c8] sm:$0xff]  }
 0xdf0   :  { %19727 = vmatprep.mubr.msk.bf16.mxu1 %vm23296_vm3, %v28814_v1 }
 0xdf7   :  { %19728 = vmatmul.mubr.bf16.gmra.mrb[56].mxu1 %v11467_v56  ;;  %v23008_v56 = vld [vmem:[#allocation2 + $0x3c] sm:$0xff] }
 0xdf8   :  { %19731 = vmatprep.mubr.msk.bf16.mxu1 %vm23296_vm3, %v28814_v1  ;;  %v11726_v39 = vpack.c.bf16 %v23008_v56, %v23007_v7  ;;  %v23021_v56 = vld [vmem:[#allocation2 + $0xa4] sm:$0xff] }
 0xdff   :  { %19732 = vmatmul.mubr.bf16.gmra.mrb[60].mxu1 %v11468_v48  ;;  %v22765_v48 = vld [vmem:[%s28649_s2 + $0x4e0] sm:$0xff]  }
 0xe00   :  { %19735 = vmatprep.mubr.msk.bf16.mxu1 %vm23296_vm3, %v28814_v1 }
 0xe07   :  { %19736 = vmatmul.mubr.bf16.gmra.mrb[64].mxu1 %v11469_v47  ;;  %v11727_v47 = vpack.c.bf16 %v23010_v58, %v23009_v55  ;;  %v23024_v55 = vld [vmem:[#allocation2 + $0xbc] sm:$0xff] }
 0xe08   :  { %19739 = vmatprep.mubr.msk.bf16.mxu1 %vm23296_vm3, %v28814_v1 }
 0xe0f   :  { %19740 = vmatmul.mubr.bf16.gmra.mrb[68].mxu1 %v11470_v28  ;;  %v23011_v28 = vld [vmem:[#allocation2 + $0x54] sm:$0xff] }
 0xe10   :  { %19743 = vmatprep.mubr.msk.bf16.mxu1 %vm23296_vm3, %v28814_v1  ;;  %v11728_v41 = vpack.c.bf16 %v23012_v11, %v23011_v28  ;;  %v27895_v28 = vld [vmem:[#allocation2 + $0xdc] sm:$0xff]  ;;  %v23027_v11 = vld [vmem:[#allocation2 + $0xd4] sm:$0xff] }
 0xe17   :  { %19744 = vmatmul.mubr.bf16.gmra.mrb[72].mxu1 %v11471_v29  ;;  %v22768_v29 = vld [vmem:[%s28649_s2 + $0x4f8] sm:$0xff]  }
 0xe18   :  { %19747 = vmatprep.mubr.msk.bf16.mxu1 %vm23296_vm3, %v28814_v1 }
 0xe1f   :  { %19748 = vmatmul.mubr.bf16.gmra.mrb[76].mxu1 %v11472_v33  ;;  %v11729_v33 = vpack.c.bf16 %v23014_v63, %v23013_v12  ;;  %v11964_v63 = vld [vmem:[#allocation2 + $0x25] sm:$0xff] }
 0xe20   :  { %19751 = vmatprep.mubr.msk.bf16.mxu1 %vm23296_vm3, %v28814_v1 }
 0xe27   :  { %19752 = vmatmul.mubr.bf16.gmra.mrb[80].mxu1 %v11473_v20  ;;  %v23016_v20 = vld [vmem:[#allocation2 + $0x7c] sm:$0xff] }
 0xe28   :  { %19771 = vmatprep.mubr.msk.bf16.mxu1 %vm23296_vm3, %v28814_v1  ;;  %v11730_v57 = vpack.c.bf16 %v23016_v20, %v23015_v16  ;;  %v23028_v16 = vld [vmem:[#allocation2 + $0x2d] sm:$0xff] }
 0xe29   :  { %v11989_v20 = vpack.c.bf16 %v23028_v16, %v11964_v63  ;;  %v23038_v63 = vld [vmem:[#allocation2 + $0x7d] sm:$0xff]  ;;  %v23039_v16 = vld [vmem:[#allocation2 + $0x85] sm:$0xff] }
 0xe2f   :  { %19772 = vmatmul.mubr.bf16.vlgmr.msra.gmra.mrb[32].mxu1 %v11725_v60 }
 0xe30   :  { %19775 = vmatprep.mubr.msk.bf16.mxu1 %vm23296_vm3, %v28814_v1  ;;  %19824 = vmatpush3.bf16.msra.mxu1 %v22761_v62  ;;  %v23017_v62 = vld [vmem:[#allocation2 + $0x84] sm:$0xff] }
 0xe31   :  { %19825 = vmatprep.subr.bf16.mxu1 %v28814_v1  ;;  %v11731_v60 = vpack.c.bf16 %v23018_v4, %v23017_v62  ;;  %v22771_v62 = vld [vmem:[%s28649_s2 + $0x510] sm:$0xff]  }
 0xe32   :  { %v23029_v4 = vld [vmem:[#allocation2 + $0x35] sm:$0xff] }
 0xe34   :  { %19826 = vmatpush3.bf16.msra.mxu1 %v22762_v21  ;;  %v23019_v21 = vld [vmem:[#allocation2 + $0x94] sm:$0xff] }
 0xe35   :  { %19827 = vmatprep.subr.bf16.mxu1 %v28814_v1 }
 0xe37   :  { %19776 = vmatmul.mubr.bf16.gmra.mrb[36].mxu1 %v11726_v39  ;;  %v23022_v39 = vld [vmem:[#allocation2 + $0xac] sm:$0xff] }
 0xe38   :  { %19779 = vmatprep.mubr.msk.bf16.mxu1 %vm23296_vm3, %v28814_v1  ;;  %19828 = vmatpush3.bf16.msra.mxu1 %v22763_v54  ;;  %v23020_v54 = vld [vmem:[#allocation2 + $0x9c] sm:$0xff] }
 0xe39   :  { %19829 = vmatprep.subr.bf16.mxu1 %v28814_v1  ;;  %v11732_v7 = vpack.c.bf16 %v23020_v54, %v23019_v21  ;;  %v22772_v54 = vld [vmem:[%s28649_s2 + $0x518] sm:$0xff]  }
 0xe3c   :  { %19830 = vmatpush3.bf16.msra.mxu1 %v22764_v52  ;;  %v11733_v52 = vpack.c.bf16 %v23022_v39, %v23021_v56  ;;  %v23031_v56 = vld [vmem:[#allocation2 + $0x45] sm:$0xff]  ;;  %v23032_v39 = vld [vmem:[#allocation2 + $0x4d] sm:$0xff] }
 0xe3d   :  { %19831 = vmatprep.subr.bf16.mxu1 %v28814_v1 }
 0xe3f   :  { %19780 = vmatmul.mubr.bf16.gmra.mrb[40].mxu1 %v11727_v47  ;;  %v23025_v47 = vld [vmem:[#allocation2 + $0xc4] sm:$0xff] }
 0xe40   :  { %19783 = vmatprep.mubr.msk.bf16.mxu1 %vm23296_vm3, %v28814_v1  ;;  %19832 = vmatpush3.bf16.msra.mxu1 %v22765_v48  ;;  %v23023_v48 = vld [vmem:[#allocation2 + $0xb4] sm:$0xff] }
 0xe41   :  { %19833 = vmatprep.subr.bf16.mxu1 %v28814_v1  ;;  %v11734_v58 = vpack.c.bf16 %v23024_v55, %v23023_v48  ;;  %v22774_v48 = vld [vmem:[%s28649_s2 + $0x528] sm:$0xff]   ;;  %v22775_v55 = vld [vmem:[%s28649_s2 + $0x530] sm:$0xff]  }
 0xe44   :  { %19834 = vmatpush3.bf16.msra.mxu1 %v22766_v50  ;;  %v23026_v50 = vld [vmem:[#allocation2 + $0xcc] sm:$0xff] }
 0xe45   :  { %19835 = vmatprep.subr.bf16.mxu1 %v28814_v1 }
 0xe47   :  { %19784 = vmatmul.mubr.bf16.gmra.mrb[44].mxu1 %v11728_v41  ;;  %v11736_v41 = vpack.c.bf16 %v27895_v28, %v23027_v11  ;;  %v23035_v11 = vld [vmem:[#allocation2 + $0x65] sm:$0xff] }
 0xe48   :  { %19787 = vmatprep.mubr.msk.bf16.mxu1 %vm23296_vm3, %v28814_v1  ;;  %19836 = vmatpush3.bf16.msra.mxu1 %v22767_v22  ;;  %v11735_v22 = vpack.c.bf16 %v23026_v50, %v23025_v47  ;;  %v23034_v47 = vld [vmem:[#allocation2 + $0x5d] sm:$0xff] }
 0xe49   :  { %19837 = vmatprep.subr.bf16.mxu1 %v28814_v1 }
 0xe4c   :  { %19838 = vmatpush3.bf16.msra.mxu1 %v22768_v29  ;;  %v11724_v29 = vld [vmem:[#allocation2 + $0xe4] sm:$0x3] }
 0xe4d   :  { %19891 = vmatprep.subr.bf16.mxu1 %v28814_v1  ;;  %v11737_v12 = vpack.c.bf16 %v11724_v29, %v11724_v29 }
 0xe4f   :  { %19788 = vmatmul.mubr.bf16.gmra.mrb[48].mxu1 %v11729_v33  ;;  %v22769_v33 = vld [vmem:[%s28649_s2 + $0x500] sm:$0xff]  }
 0xe50   :  { %19791 = vmatprep.mubr.msk.bf16.mxu1 %vm23296_vm3, %v28814_v1 }
 0xe57   :  { %19792 = vmatmul.mubr.bf16.gmra.mrb[52].mxu1 %v11730_v57  ;;  %v22770_v57 = vld [vmem:[%s28649_s2 + $0x508] sm:$0xff]  }
 0xe58   :  { %19795 = vmatprep.mubr.msk.bf16.mxu1 %vm23296_vm3, %v28814_v1 }
 0xe5f   :  { %19796 = vmatmul.mubr.bf16.gmra.mrb[56].mxu1 %v11731_v60  ;;  %v23030_v60 = vld [vmem:[#allocation2 + $0x3d] sm:$0xff] }
 0xe60   :  { %19799 = vmatprep.mubr.msk.bf16.mxu1 %vm23296_vm3, %v28814_v1  ;;  %v11990_v21 = vpack.c.bf16 %v23030_v60, %v23029_v4  ;;  %v23042_v4 = vld [vmem:[#allocation2 + $0x9d] sm:$0xff] }
 0xe67   :  { %19800 = vmatmul.mubr.bf16.gmra.mrb[60].mxu1 %v11732_v7  ;;  %v22773_v7 = vld [vmem:[%s28649_s2 + $0x520] sm:$0xff]  }
 0xe68   :  { %19803 = vmatprep.mubr.msk.bf16.mxu1 %vm23296_vm3, %v28814_v1 }
 0xe6f   :  { %19804 = vmatmul.mubr.bf16.gmra.mrb[64].mxu1 %v11733_v52  ;;  %v11991_v52 = vpack.c.bf16 %v23032_v39, %v23031_v56  ;;  %v23045_v56 = vld [vmem:[#allocation2 + $0xb5] sm:$0xff]  ;;  %v23046_v39 = vld [vmem:[#allocation2 + $0xbd] sm:$0xff] }
 0xe70   :  { %19807 = vmatprep.mubr.msk.bf16.mxu1 %vm23296_vm3, %v28814_v1 }
 0xe77   :  { %19808 = vmatmul.mubr.bf16.gmra.mrb[68].mxu1 %v11734_v58  ;;  %v23033_v58 = vld [vmem:[#allocation2 + $0x55] sm:$0xff] }
 0xe78   :  { %19811 = vmatprep.mubr.msk.bf16.mxu1 %vm23296_vm3, %v28814_v1  ;;  %v11992_v50 = vpack.c.bf16 %v23034_v47, %v23033_v58  ;;  %v27956_v47 = vld [vmem:[#allocation2 + $0xdd] sm:$0xff] }
 0xe7f   :  { %19812 = vmatmul.mubr.bf16.gmra.mrb[72].mxu1 %v11735_v22  ;;  %v22776_v22 = vld [vmem:[%s28649_s2 + $0x538] sm:$0xff]  }
 0xe80   :  { %19815 = vmatprep.mubr.msk.bf16.mxu1 %vm23296_vm3, %v28814_v1 }
 0xe87   :  { %19816 = vmatmul.mubr.bf16.gmra.mrb[76].mxu1 %v11736_v41  ;;  %v23036_v41 = vld [vmem:[#allocation2 + $0x6d] sm:$0xff] }
 0xe88   :  { %19819 = vmatprep.mubr.msk.bf16.mxu1 %vm23296_vm3, %v28814_v1  ;;  %v11993_v29 = vpack.c.bf16 %v23036_v41, %v23035_v11  ;;  %v11988_v11 = vld [vmem:[#allocation2 + $0xe5] sm:$0x3] }
 0xe89   :  { %v12001_v41 = vpack.c.bf16 %v11988_v11, %v11988_v11  ;;  %v29072_v11 = vld [vmem:[#allocation123_spill] sm:$0xff] }
 0xe8f   :  { %19820 = vmatmul.mubr.bf16.gmra.mrb[80].mxu1 %v11737_v12  ;;  %v23037_v12 = vld [vmem:[#allocation2 + $0x75] sm:$0xff] }
 0xe90   :  { %19839 = vmatprep.mubr.msk.bf16.mxu1 %vm23296_vm3, %v28814_v1 }
 0xe97   :  { %19840 = vmatmul.mubr.bf16.vlgmr.msra.gmra.mrb[32].mxu1 %v11989_v20  ;;  %v23040_v20 = vld [vmem:[#allocation2 + $0x8d] sm:$0xff] }
 0xe98   :  { %19843 = vmatprep.mubr.msk.bf16.mxu1 %vm23296_vm3, %v28814_v1  ;;  %19892 = vmatpush3.bf16.msra.mxu1 %v22769_v33  ;;  %v11994_v33 = vpack.c.bf16 %v23038_v63, %v23037_v12  ;;  %v29059_v12 = vld [vmem:[#allocation116_spill] sm:$0xff]  ;;  %v29060_v63 = vld [vmem:[#allocation115_spill] sm:$0xff] }
 0xe99   :  { %19893 = vmatprep.subr.bf16.mxu1 %v28814_v1 }
 0xe9c   :  { %19894 = vmatpush3.bf16.msra.mxu1 %v22770_v57  ;;  %v11995_v57 = vpack.c.bf16 %v23040_v20, %v23039_v16  ;;  %v22778_v16 = vld [vmem:[%s28649_s2 + $0x548] sm:$0xff]   ;;  %v22779_v20 = vld [vmem:[%s28649_s2 + $0x550] sm:$0xff]  }
 0xe9d   :  { %19895 = vmatprep.subr.bf16.mxu1 %v28814_v1 }
 0xe9f   :  { %19844 = vmatmul.mubr.bf16.gmra.mrb[36].mxu1 %v11990_v21  ;;  %v23043_v21 = vld [vmem:[#allocation2 + $0xa5] sm:$0xff] }
 0xea0   :  { %19847 = vmatprep.mubr.msk.bf16.mxu1 %vm23296_vm3, %v28814_v1  ;;  %19896 = vmatpush3.bf16.msra.mxu1 %v22771_v62  ;;  %v23041_v62 = vld [vmem:[#allocation2 + $0x95] sm:$0xff] }
 0xea1   :  { %19897 = vmatprep.subr.bf16.mxu1 %v28814_v1  ;;  %v11996_v60 = vpack.c.bf16 %v23042_v4, %v23041_v62  ;;  %v29063_v62 = vld [vmem:[#allocation117_spill] sm:$0xff] }
 0xea4   :  { %19898 = vmatpush3.bf16.msra.mxu1 %v22772_v54  ;;  %v23044_v54 = vld [vmem:[#allocation2 + $0xad] sm:$0xff] }
 0xea5   :  { %19899 = vmatprep.subr.bf16.mxu1 %v28814_v1 }
 0xea7   :  { %19848 = vmatmul.mubr.bf16.gmra.mrb[40].mxu1 %v11991_v52  ;;  %v11998_v52 = vpack.c.bf16 %v23046_v39, %v23045_v56  ;;  %v22782_v39 = vld [vmem:[%s28649_s2 + $0x568] sm:$0xff]  }
 0xea8   :  { %19851 = vmatprep.mubr.msk.bf16.mxu1 %vm23296_vm3, %v28814_v1  ;;  %19900 = vmatpush3.bf16.msra.mxu1 %v22773_v7  ;;  %v11997_v7 = vpack.c.bf16 %v23044_v54, %v23043_v21  ;;  %v22781_v21 = vld [vmem:[%s28649_s2 + $0x560] sm:$0xff]   ;;  %v29065_v54 = vld [vmem:[#allocation120_spill] sm:$0xff] }
 0xea9   :  { %19901 = vmatprep.subr.bf16.mxu1 %v28814_v1 }
 0xeac   :  { %19902 = vmatpush3.bf16.msra.mxu1 %v22774_v48  ;;  %v23047_v48 = vld [vmem:[#allocation2 + $0xc5] sm:$0xff] }
 0xead   :  { %19903 = vmatprep.subr.bf16.mxu1 %v28814_v1 }
 0xeaf   :  { %19852 = vmatmul.mubr.bf16.gmra.mrb[44].mxu1 %v11992_v50  ;;  %v23049_v50 = vld [vmem:[#allocation2 + $0xd5] sm:$0xff] }
 0xeb0   :  { %19855 = vmatprep.mubr.msk.bf16.mxu1 %vm23296_vm3, %v28814_v1  ;;  %19904 = vmatpush3.bf16.msra.mxu1 %v22775_v55  ;;  %v23048_v55 = vld [vmem:[#allocation2 + $0xcd] sm:$0xff] }
 0xeb1   :  { %19905 = vmatprep.subr.bf16.mxu1 %v28814_v1  ;;  %v11999_v58 = vpack.c.bf16 %v23048_v55, %v23047_v48  ;;  %v29068_v48 = vld [vmem:[#allocation122_spill] sm:$0xff]  ;;  %v29069_v55 = vld [vmem:[#allocation121_spill] sm:$0xff] }
 0xeb4   :  { %19906 = vmatpush3.bf16.msra.mxu1 %v22776_v22  ;;  %v12000_v22 = vpack.c.bf16 %v27956_v47, %v23049_v50  ;;  %v22784_v50 = vld [vmem:[%s28649_s2 + $0x578] sm:$0xff]  }
 0xeb5   :  { %19959 = vmatprep.subr.bf16.mxu1 %v28814_v1 }
 0xeb7   :  { %19856 = vmatmul.mubr.bf16.gmra.mrb[48].mxu1 %v11993_v29  ;;  %v22777_v29 = vld [vmem:[%s28649_s2 + $0x540] sm:$0xff]  }
 0xeb8   :  { %19859 = vmatprep.mubr.msk.bf16.mxu1 %vm23296_vm3, %v28814_v1 }
 0xebf   :  { %19860 = vmatmul.mubr.bf16.gmra.mrb[52].mxu1 %v11994_v33  ;;  %v29061_v33 = vpack.c.bf16 %v29059_v12, %v29060_v63  ;;  %v29075_v12 = vld [vmem:[#allocation125_spill] sm:$0xff] }
 0xec0   :  { %19863 = vmatprep.mubr.msk.bf16.mxu1 %vm23296_vm3, %v28814_v1 }
 0xec7   :  { %19864 = vmatmul.mubr.bf16.gmra.mrb[56].mxu1 %v11995_v57  ;;  %v29062_v57 = vld [vmem:[#allocation118_spill] sm:$0xff] }
 0xec8   :  { %19867 = vmatprep.mubr.msk.bf16.mxu1 %vm23296_vm3, %v28814_v1  ;;  %v29064_v4 = vpack.c.bf16 %v29062_v57, %v29063_v62  ;;  %v29080_v57 = vld [vmem:[#allocation130_spill] sm:$0xff]  ;;  %v29081_v62 = vld [vmem:[#allocation129_spill] sm:$0xff] }
 0xecf   :  { %19868 = vmatmul.mubr.bf16.gmra.mrb[60].mxu1 %v11996_v60  ;;  %v22780_v60 = vld [vmem:[%s28649_s2 + $0x558] sm:$0xff]  }
 0xed0   :  { %19871 = vmatprep.mubr.msk.bf16.mxu1 %vm23296_vm3, %v28814_v1 }
 0xed7   :  { %19872 = vmatmul.mubr.bf16.gmra.mrb[64].mxu1 %v11997_v7  ;;  %v29066_v7 = vld [vmem:[#allocation119_spill] sm:$0xff] }
 0xed8   :  { %19875 = vmatprep.mubr.msk.bf16.mxu1 %vm23296_vm3, %v28814_v1  ;;  %v29067_v56 = vpack.c.bf16 %v29065_v54, %v29066_v7  ;;  %v29086_v7 = vld [vmem:[#allocation134_spill] sm:$0xff] }
 0xedf   :  { %19876 = vmatmul.mubr.bf16.gmra.mrb[68].mxu1 %v11998_v52  ;;  %v22783_v52 = vld [vmem:[%s28649_s2 + $0x570] sm:$0xff]  }
 0xee0   :  { %19879 = vmatprep.mubr.msk.bf16.mxu1 %vm23296_vm3, %v28814_v1 }
 0xee7   :  { %19880 = vmatmul.mubr.bf16.gmra.mrb[72].mxu1 %v11999_v58  ;;  %v29070_v58 = vpack.c.bf16 %v29068_v48, %v29069_v55  ;;  %v29090_v48 = vld [vmem:[#allocation135_spill] sm:$0xff] }
 0xee8   :  { %19883 = vmatprep.mubr.msk.bf16.mxu1 %vm23296_vm3, %v28814_v1 }
 0xeef   :  { %19884 = vmatmul.mubr.bf16.gmra.mrb[76].mxu1 %v12000_v22  ;;  %v29071_v22 = vld [vmem:[#allocation124_spill] sm:$0xff] }
 0xef0   :  { %19887 = vmatprep.mubr.msk.bf16.mxu1 %vm23296_vm3, %v28814_v1 }
 0xef7   :  { %19888 = vmatmul.mubr.bf16.gmra.mrb[80].mxu1 %v12001_v41  ;;  %v29073_v41 = vpack.c.bf16 %v29071_v22, %v29072_v11  ;;  %v12252_v22 = vld [vmem:[#allocation2 + $0xec] sm:$0x3] }
 0xef8   :  { %19907 = vmatprep.mubr.msk.bf16.mxu1 %vm23296_vm3, %v28814_v1  ;;  %v12265_v11 = vpack.c.bf16 %v12252_v22, %v12252_v22 }
 0xeff   :  { %19908 = vmatmul.mubr.bf16.vlgmr.msra.gmra.mrb[32].mxu1 %v29061_v33  ;;  %v29077_v33 = vld [vmem:[#allocation128_spill] sm:$0xff] }
 0xf00   :  { %19911 = vmatprep.mubr.msk.bf16.mxu1 %vm23296_vm3, %v28814_v1  ;;  %19960 = vmatpush3.bf16.msra.mxu1 %v22777_v29  ;;  %v29074_v29 = vld [vmem:[#allocation126_spill] sm:$0xff] }
 0xf01   :  { %19961 = vmatprep.subr.bf16.mxu1 %v28814_v1  ;;  %v29076_v63 = vpack.c.bf16 %v29074_v29, %v29075_v12  ;;  %v29092_v29 = vpack.c.bf16 %v26635_v3, %v26626_v61  ;;  %v22787_v12 = vld [vmem:[%s28649_s2 + $0x590] sm:$0xff]  }
 0xf02   :  { %v29093_v61 = vld [vmem:[#allocation137_spill] sm:$0xff] }
 0xf03   :  { %v29094_v3 = vpack.c.bf16 %v26639_v49, %v29093_v61  ;;  %v29096_v49 = vld [vmem:[#allocation138_spill] sm:$0xff]  ;;  %v12760_v61 = vld [vmem:[#allocation2 + $0x4e] sm:$0xff] }
 0xf04   :  { %19962 = vmatpush3.bf16.msra.mxu1 %v22778_v16  ;;  %v29078_v16 = vld [vmem:[#allocation127_spill] sm:$0xff] }
 0xf05   :  { %19963 = vmatprep.subr.bf16.mxu1 %v28814_v1 }
 0xf07   :  { %19912 = vmatmul.mubr.bf16.gmra.mrb[36].mxu1 %v29064_v4  ;;  %v29082_v4 = vpack.c.bf16 %v29080_v57, %v29081_v62  ;;  %v22790_v57 = vld [vmem:[%s28649_s2 + $0x5a8] sm:$0xff]   ;;  %v22791_v62 = vld [vmem:[%s28649_s2 + $0x5b0] sm:$0xff]  }
 0xf08   :  { %19915 = vmatprep.mubr.msk.bf16.mxu1 %vm23296_vm3, %v28814_v1  ;;  %19964 = vmatpush3.bf16.msra.mxu1 %v22779_v20  ;;  %v29079_v20 = vpack.c.bf16 %v29077_v33, %v29078_v16  ;;  %v22789_v33 = vld [vmem:[%s28649_s2 + $0x5a0] sm:$0xff]  }
 0xf09   :  { %19965 = vmatprep.subr.bf16.mxu1 %v28814_v1  ;;  %v29095_v16 = vld [vmem:[#allocation139_spill] sm:$0xff] }
 0xf0c   :  { %19966 = vmatpush3.bf16.msra.mxu1 %v22780_v60  ;;  %v29083_v60 = vld [vmem:[#allocation132_spill] sm:$0xff] }
 0xf0d   :  { %19967 = vmatprep.subr.bf16.mxu1 %v28814_v1 }
 0xf0f   :  { %19916 = vmatmul.mubr.bf16.gmra.mrb[40].mxu1 %v29067_v56  ;;  %v29087_v56 = vld [vmem:[#allocation133_spill] sm:$0xff] }
 0xf10   :  { %19919 = vmatprep.mubr.msk.bf16.mxu1 %vm23296_vm3, %v28814_v1  ;;  %19968 = vmatpush3.bf16.msra.mxu1 %v22781_v21  ;;  %v29084_v21 = vld [vmem:[#allocation131_spill] sm:$0xff] }
 0xf11   :  { %19969 = vmatprep.subr.bf16.mxu1 %v28814_v1  ;;  %v29085_v54 = vpack.c.bf16 %v29083_v60, %v29084_v21  ;;  %v22792_v21 = vld [vmem:[%s28649_s2 + $0x5b8] sm:$0xff]  }
 0xf14   :  { %19970 = vmatpush3.bf16.msra.mxu1 %v22782_v39  ;;  %v29088_v39 = vpack.c.bf16 %v29086_v7, %v29087_v56  ;;  %v29101_v7 = vld [vmem:[#allocation141_spill] sm:$0xff] }
 0xf15   :  { %19971 = vmatprep.subr.bf16.mxu1 %v28814_v1 }
 0xf17   :  { %19920 = vmatmul.mubr.bf16.gmra.mrb[44].mxu1 %v29070_v58  ;;  %v12251_v58 = vld [vmem:[#allocation2 + $0xe4] sm:$0xff] }
 0xf18   :  { %19923 = vmatprep.mubr.msk.bf16.mxu1 %vm23296_vm3, %v28814_v1  ;;  %19972 = vmatpush3.bf16.msra.mxu1 %v22783_v52  ;;  %v29089_v52 = vld [vmem:[#allocation136_spill] sm:$0xff] }
 0xf19   :  { %19973 = vmatprep.subr.bf16.mxu1 %v28814_v1  ;;  %v29091_v55 = vpack.c.bf16 %v29089_v52, %v29090_v48  ;;  %v29106_v48 = vld [vmem:[#allocation145_spill] sm:$0xff] }
 0xf1c   :  { %19974 = vmatpush3.bf16.msra.mxu1 %v22784_v50  ;;  %v12264_v50 = vpack.c.bf16 %v12251_v58, %v27895_v28  ;;  %v22786_v28 = vld [vmem:[%s28649_s2 + $0x588] sm:$0xff]   ;;  %v29108_v58 = vld [vmem:[#allocation147_spill] sm:$0xff] }
 0xf1d   :  { %20027 = vmatprep.subr.bf16.mxu1 %v28814_v1 }
 0xf1f   :  { %19924 = vmatmul.mubr.bf16.gmra.mrb[48].mxu1 %v29073_v41  ;;  %v22785_v41 = vld [vmem:[%s28649_s2 + $0x580] sm:$0xff]  }
 0xf20   :  { %19927 = vmatprep.mubr.msk.bf16.mxu1 %vm23296_vm3, %v28814_v1 }
 0xf27   :  { %19928 = vmatmul.mubr.bf16.gmra.mrb[52].mxu1 %v29076_v63  ;;  %v22788_v63 = vld [vmem:[%s28649_s2 + $0x598] sm:$0xff]  }
 0xf28   :  { %19931 = vmatprep.mubr.msk.bf16.mxu1 %vm23296_vm3, %v28814_v1 }
 0xf2f   :  { %19932 = vmatmul.mubr.bf16.gmra.mrb[56].mxu1 %v29079_v20  ;;  %v29097_v20 = vpack.c.bf16 %v29095_v16, %v29096_v49  ;;  %v22798_v16 = vld [vmem:[%s28649_s2 + $0x5e8] sm:$0xff]  }
 0xf30   :  { %19935 = vmatprep.mubr.msk.bf16.mxu1 %vm23296_vm3, %v28814_v1  ;;  %v12763_v49 = vld [vmem:[#allocation2 + $0x66] sm:$0xff] }
 0xf37   :  { %19936 = vmatmul.mubr.bf16.gmra.mrb[60].mxu1 %v29082_v4  ;;  %v29098_v4 = vld [vmem:[#allocation140_spill] sm:$0xff] }
 0xf38   :  { %19939 = vmatprep.mubr.msk.bf16.mxu1 %vm23296_vm3, %v28814_v1  ;;  %v29099_v60 = vpack.c.bf16 %v26652_v0, %v29098_v4  ;;  %v29103_v0 = vld [vmem:[#allocation144_spill] sm:$0xff]  ;;  %v22800_v4 = vld [vmem:[%s28649_s2 + $0x5f8] sm:$0xff]  }
 0xf3f   :  { %19940 = vmatmul.mubr.bf16.gmra.mrb[64].mxu1 %v29085_v54  ;;  %v29100_v54 = vld [vmem:[#allocation142_spill] sm:$0xff] }
 0xf40   :  { %19943 = vmatprep.mubr.msk.bf16.mxu1 %vm23296_vm3, %v28814_v1  ;;  %v29102_v56 = vpack.c.bf16 %v29100_v54, %v29101_v7  ;;  %v12767_v7 = vld [vmem:[#allocation2 + $0x86] sm:$0xff] }
 0xf47   :  { %19944 = vmatmul.mubr.bf16.gmra.mrb[68].mxu1 %v29088_v39  ;;  %v29104_v39 = vld [vmem:[#allocation143_spill] sm:$0xff] }
 0xf48   :  { %19947 = vmatprep.mubr.msk.bf16.mxu1 %vm23296_vm3, %v28814_v1  ;;  %v29105_v52 = vpack.c.bf16 %v29103_v0, %v29104_v39  ;;  %v12768_v39 = vld [vmem:[#allocation2 + $0x8e] sm:$0xff] }
 0xf4f   :  { %19948 = vmatmul.mubr.bf16.gmra.mrb[72].mxu1 %v29091_v55  ;;  %v29107_v55 = vpack.c.bf16 %v26680_v5, %v29106_v48  ;;  %v12515_v5 = vld [vmem:[#allocation2 + $0xe5] sm:$0xff] }
 0xf50   :  { %19951 = vmatprep.mubr.msk.bf16.mxu1 %vm23296_vm3, %v28814_v1 }
 0xf57   :  { %19952 = vmatmul.mubr.bf16.gmra.mrb[76].mxu1 %v12264_v50  ;;  %v29109_v50 = vld [vmem:[#allocation146_spill] sm:$0xff] }
 0xf58   :  { %19955 = vmatprep.mubr.msk.bf16.mxu1 %vm23296_vm3, %v28814_v1  ;;  %v29110_v22 = vpack.c.bf16 %v29108_v58, %v29109_v50  ;;  %v12770_v58 = vld [vmem:[#allocation2 + $0x9e] sm:$0xff] }
 0xf5f   :  { %19956 = vmatmul.mubr.bf16.gmra.mrb[80].mxu1 %v12265_v11  ;;  %v29111_v11 = vpack.c.bf16 %v26692_v14, %v26690_v19  ;;  %v12528_v14 = vpack.c.bf16 %v12515_v5, %v27956_v47  ;;  %v12516_v19 = vld [vmem:[#allocation2 + $0xed] sm:$0x3] }
 0xf60   :  { %19975 = vmatprep.mubr.msk.bf16.mxu1 %vm23296_vm3, %v28814_v1  ;;  %v12529_v43 = vpack.c.bf16 %v12516_v19, %v12516_v19  ;;  %v12759_v47 = vld [vmem:[#allocation2 + $0x46] sm:$0xff]  ;;  %v12774_v19 = vld [vmem:[#allocation2 + $0xbe] sm:$0xff] }
 0xf67   :  { %19976 = vmatmul.mubr.bf16.vlgmr.msra.gmra.mrb[32].mxu1 %v29092_v29  ;;  %v22795_v29 = vld [vmem:[%s28649_s2 + $0x5d0] sm:$0xff]  }
 0xf68   :  { %19979 = vmatprep.mubr.msk.bf16.mxu1 %vm23296_vm3, %v28814_v1  ;;  %20028 = vmatpush3.bf16.msra.mxu1 %v22785_v41  ;;  %v12758_v41 = vld [vmem:[#allocation2 + $0x3e] sm:$0xff] }
 0xf69   :  { %20029 = vmatprep.subr.bf16.mxu1 %v28814_v1 }
 0xf6c   :  { %20030 = vmatpush3.bf16.msra.mxu1 %v22786_v28  ;;  %v12782_v28 = vpack.c.bf16 %v12759_v47, %v12758_v41  ;;  %v12780_v41 = vld [vmem:[#allocation2 + $0xee] sm:$0x3] }
 0xf6d   :  { %20031 = vmatprep.subr.bf16.mxu1 %v28814_v1 }
 0xf6f   :  { %19980 = vmatmul.mubr.bf16.gmra.mrb[36].mxu1 %v29094_v3  ;;  %v12761_v3 = vld [vmem:[#allocation2 + $0x56] sm:$0xff] }
 0xf70   :  { %19983 = vmatprep.mubr.msk.bf16.mxu1 %vm23296_vm3, %v28814_v1  ;;  %20032 = vmatpush3.bf16.msra.mxu1 %v22787_v12  ;;  %v22796_v12 = vld [vmem:[%s28649_s2 + $0x5d8] sm:$0xff]  }
 0xf71   :  { %20033 = vmatprep.subr.bf16.mxu1 %v28814_v1 }
 0xf74   :  { %20034 = vmatpush3.bf16.msra.mxu1 %v22788_v63  ;;  %v22797_v63 = vld [vmem:[%s28649_s2 + $0x5e0] sm:$0xff]  }
 0xf75   :  { %20035 = vmatprep.subr.bf16.mxu1 %v28814_v1 }
 0xf77   :  { %19984 = vmatmul.mubr.bf16.gmra.mrb[40].mxu1 %v29097_v20  ;;  %v12762_v20 = vld [vmem:[#allocation2 + $0x5e] sm:$0xff] }
 0xf78   :  { %19987 = vmatprep.mubr.msk.bf16.mxu1 %vm23296_vm3, %v28814_v1  ;;  %20036 = vmatpush3.bf16.msra.mxu1 %v22789_v33  ;;  %v12783_v33 = vpack.c.bf16 %v12761_v3, %v12760_v61  ;;  %v22801_v61 = vld [vmem:[%s28649_s2 + $0x600] sm:$0xff]  }
 0xf79   :  { %20037 = vmatprep.subr.bf16.mxu1 %v28814_v1 }
 0xf7c   :  { %20038 = vmatpush3.bf16.msra.mxu1 %v22790_v57  ;;  %v22799_v57 = vld [vmem:[%s28649_s2 + $0x5f0] sm:$0xff]  }
 0xf7d   :  { %20039 = vmatprep.subr.bf16.mxu1 %v28814_v1 }
 0xf7f   :  { %19988 = vmatmul.mubr.bf16.gmra.mrb[44].mxu1 %v29099_v60  ;;  %v12764_v60 = vld [vmem:[#allocation2 + $0x6e] sm:$0xff] }
 0xf80   :  { %19991 = vmatprep.mubr.msk.bf16.mxu1 %vm23296_vm3, %v28814_v1  ;;  %20040 = vmatpush3.bf16.msra.mxu1 %v22791_v62  ;;  %v12784_v62 = vpack.c.bf16 %v12763_v49, %v12762_v20  ;;  %v22803_v49 = vld [vmem:[%s28649_s2 + $0x610] sm:$0xff]  }
 0xf81   :  { %20041 = vmatprep.subr.bf16.mxu1 %v28814_v1 }
 0xf84   :  { %20042 = vmatpush3.bf16.msra.mxu1 %v22792_v21  ;;  %v12765_v21 = vld [vmem:[#allocation2 + $0x76] sm:$0xff] }
 0xf85   :  { %20095 = vmatprep.subr.bf16.mxu1 %v28814_v1  ;;  %v12785_v54 = vpack.c.bf16 %v12765_v21, %v12764_v60  ;;  %v22805_v60 = vld [vmem:[%s28649_s2 + $0x620] sm:$0xff]  }
 0xf87   :  { %19992 = vmatmul.mubr.bf16.gmra.mrb[48].mxu1 %v29102_v56  ;;  %v12766_v56 = vld [vmem:[#allocation2 + $0x7e] sm:$0xff] }
 0xf88   :  { %19995 = vmatprep.mubr.msk.bf16.mxu1 %vm23296_vm3, %v28814_v1  ;;  %v12786_v0 = vpack.c.bf16 %v12767_v7, %v12766_v56  ;;  %v13027_v7 = vld [vmem:[#allocation2 + $0x67] sm:$0xff]  ;;  %v13026_v56 = vld [vmem:[#allocation2 + $0x5f] sm:$0xff] }
 0xf8f   :  { %19996 = vmatmul.mubr.bf16.gmra.mrb[52].mxu1 %v29105_v52  ;;  %v12769_v52 = vld [vmem:[#allocation2 + $0x96] sm:$0xff] }
 0xf90   :  { %19999 = vmatprep.mubr.msk.bf16.mxu1 %vm23296_vm3, %v28814_v1  ;;  %v12787_v48 = vpack.c.bf16 %v12769_v52, %v12768_v39  ;;  %v13048_v39 = vpack.c.bf16 %v13027_v7, %v13026_v56  ;;  %v22808_v52 = vld [vmem:[%s28649_s2 + $0x638] sm:$0xff]  }
 0xf91   :  { %v13289_v7 = vld [vmem:[#allocation2 + $0x58] sm:$0xff] }
 0xf97   :  { %20000 = vmatmul.mubr.bf16.gmra.mrb[56].mxu1 %v29107_v55  ;;  %v12771_v55 = vld [vmem:[#allocation2 + $0xa6] sm:$0xff] }
 0xf98   :  { %20003 = vmatprep.mubr.msk.bf16.mxu1 %vm23296_vm3, %v28814_v1  ;;  %v12788_v50 = vpack.c.bf16 %v12771_v55, %v12770_v58  ;;  %v13029_v55 = vld [vmem:[#allocation2 + $0x77] sm:$0xff] }
 0xf9f   :  { %20004 = vmatmul.mubr.bf16.gmra.mrb[60].mxu1 %v29110_v22  ;;  %v12772_v22 = vld [vmem:[#allocation2 + $0xae] sm:$0xff] }
 0xfa0   :  { %20007 = vmatprep.mubr.msk.bf16.mxu1 %vm23296_vm3, %v28814_v1 }
 0xfa7   :  { %20008 = vmatmul.mubr.bf16.gmra.mrb[64].mxu1 %v29111_v11  ;;  %v12773_v11 = vld [vmem:[#allocation2 + $0xb6] sm:$0xff] }
 0xfa8   :  { %20011 = vmatprep.mubr.msk.bf16.mxu1 %vm23296_vm3, %v28814_v1  ;;  %v12789_v5 = vpack.c.bf16 %v12773_v11, %v12772_v22  ;;  %v13030_v22 = vld [vmem:[#allocation2 + $0x7f] sm:$0xff] }
 0xfaf   :  { %20012 = vmatmul.mubr.bf16.gmra.mrb[68].mxu1 %v12526_v6  ;;  %v12756_v6 = vld [vmem:[#allocation2 + $0x2e] sm:$0xff] }
 0xfb0   :  { %20015 = vmatprep.mubr.msk.bf16.mxu1 %vm23296_vm3, %v28814_v1  ;;  %v12781_v30 = vpack.c.bf16 %v12757_v42, %v12756_v6  ;;  %v12776_v6 = vld [vmem:[#allocation2 + $0xce] sm:$0xff]  ;;  %v12777_v42 = vld [vmem:[#allocation2 + $0xd6] sm:$0xff] }
 0xfb7   :  { %20016 = vmatmul.mubr.bf16.gmra.mrb[72].mxu1 %v12527_v9  ;;  %v22793_v9 = vld [vmem:[%s28649_s2 + $0x5c0] sm:$0xff]  }
 0xfb8   :  { %20019 = vmatprep.mubr.msk.bf16.mxu1 %vm23296_vm3, %v28814_v1 }
 0xfbf   :  { %20020 = vmatmul.mubr.bf16.gmra.mrb[76].mxu1 %v12528_v14  ;;  %v12775_v14 = vld [vmem:[#allocation2 + $0xc6] sm:$0xff] }
 0xfc0   :  { %20023 = vmatprep.mubr.msk.bf16.mxu1 %vm23296_vm3, %v28814_v1 }
 0xfc7   :  { %20024 = vmatmul.mubr.bf16.gmra.mrb[80].mxu1 %v12529_v43  ;;  %v12790_v43 = vpack.c.bf16 %v12775_v14, %v12774_v19  ;;  %v13033_v14 = vld [vmem:[#allocation2 + $0x97] sm:$0xff] }
 0xfc8   :  { %20043 = vmatprep.mubr.msk.bf16.mxu1 %vm23296_vm3, %v28814_v1 }
 0xfcf   :  { %20044 = vmatmul.mubr.bf16.vlgmr.msra.gmra.mrb[32].mxu1 %v12781_v30  ;;  %v12779_v30 = vld [vmem:[#allocation2 + $0xe6] sm:$0xff] }
 0xfd0   :  { %20047 = vmatprep.mubr.msk.bf16.mxu1 %vm23296_vm3, %v28814_v1  ;;  %20096 = vmatpush3.bf16.msra.mxu1 %v22793_v9  ;;  %v12791_v9 = vpack.c.bf16 %v12777_v42, %v12776_v6  ;;  %v13034_v6 = vld [vmem:[#allocation2 + $0x9f] sm:$0xff] }
 0xfd1   :  { %20097 = vmatprep.subr.bf16.mxu1 %v28814_v1 }
 0xfd4   :  { %20098 = vmatpush3.bf16.msra.mxu1 %v22794_v36  ;;  %v12778_v36 = vld [vmem:[#allocation2 + $0xde] sm:$0xff] }
 0xfd5   :  { %20099 = vmatprep.subr.bf16.mxu1 %v28814_v1  ;;  %v12792_v47 = vpack.c.bf16 %v12779_v30, %v12778_v36  ;;  %v13037_v30 = vld [vmem:[#allocation2 + $0xb7] sm:$0xff] }
 0xfd7   :  { %20048 = vmatmul.mubr.bf16.gmra.mrb[36].mxu1 %v12782_v28  ;;  %v13020_v28 = vld [vmem:[#allocation2 + $0x2f] sm:$0xff] }
 0xfd8   :  { %20051 = vmatprep.mubr.msk.bf16.mxu1 %vm23296_vm3, %v28814_v1  ;;  %20100 = vmatpush3.bf16.msra.mxu1 %v22795_v29  ;;  %v12793_v29 = vpack.c.bf16 %v12780_v41, %v12780_v41  ;;  %v13038_v41 = vld [vmem:[#allocation2 + $0xbf] sm:$0xff] }
 0xfd9   :  { %20101 = vmatprep.subr.bf16.mxu1 %v28814_v1 }
 0xfdc   :  { %20102 = vmatpush3.bf16.msra.mxu1 %v22796_v12  ;;  %v13021_v12 = vld [vmem:[#allocation2 + $0x37] sm:$0xff] }
 0xfdd   :  { %20103 = vmatprep.subr.bf16.mxu1 %v28814_v1  ;;  %v13045_v3 = vpack.c.bf16 %v13021_v12, %v13020_v28  ;;  %v13040_v28 = vld [vmem:[#allocation2 + $0xcf] sm:$0xff]  ;;  %v13041_v12 = vld [vmem:[#allocation2 + $0xd7] sm:$0xff] }
 0xfdf   :  { %20052 = vmatmul.mubr.bf16.gmra.mrb[40].mxu1 %v12783_v33  ;;  %v13023_v33 = vld [vmem:[#allocation2 + $0x47] sm:$0xff] }
 0xfe0   :  { %20055 = vmatprep.mubr.msk.bf16.mxu1 %vm23296_vm3, %v28814_v1  ;;  %20104 = vmatpush3.bf16.msra.mxu1 %v22797_v63  ;;  %v22802_v63 = vld [vmem:[%s28649_s2 + $0x608] sm:$0xff]  }
 0xfe1   :  { %20105 = vmatprep.subr.bf16.mxu1 %v28814_v1 }
 0xfe4   :  { %20106 = vmatpush3.bf16.msra.mxu1 %v22798_v16  ;;  %v13022_v16 = vld [vmem:[#allocation2 + $0x3f] sm:$0xff] }
 0xfe5   :  { %20107 = vmatprep.subr.bf16.mxu1 %v28814_v1  ;;  %v13046_v20 = vpack.c.bf16 %v13023_v33, %v13022_v16  ;;  %v13044_v16 = vld [vmem:[#allocation2 + $0xef] sm:$0x3] }
 0xfe7   :  { %20056 = vmatmul.mubr.bf16.gmra.mrb[44].mxu1 %v12784_v62  ;;  %v13024_v62 = vld [vmem:[#allocation2 + $0x4f] sm:$0xff] }
 0xfe8   :  { %20059 = vmatprep.mubr.msk.bf16.mxu1 %vm23296_vm3, %v28814_v1  ;;  %20108 = vmatpush3.bf16.msra.mxu1 %v22799_v57  ;;  %v22804_v57 = vld [vmem:[%s28649_s2 + $0x618] sm:$0xff]  }
 0xfe9   :  { %20109 = vmatprep.subr.bf16.mxu1 %v28814_v1 }
 0xfec   :  { %20110 = vmatpush3.bf16.msra.mxu1 %v22800_v4  ;;  %v13025_v4 = vld [vmem:[#allocation2 + $0x57] sm:$0xff] }
 0xfed   :  { %20163 = vmatprep.subr.bf16.mxu1 %v28814_v1  ;;  %v13047_v21 = vpack.c.bf16 %v13025_v4, %v13024_v62  ;;  %v13286_v4 = vld [vmem:[#allocation2 + $0x40] sm:$0xff] }
 0xfef   :  { %20060 = vmatmul.mubr.bf16.gmra.mrb[48].mxu1 %v12785_v54  ;;  %v22806_v54 = vld [vmem:[%s28649_s2 + $0x628] sm:$0xff]  }
 0xff0   :  { %20063 = vmatprep.mubr.msk.bf16.mxu1 %vm23296_vm3, %v28814_v1 }
 0xff7   :  { %20064 = vmatmul.mubr.bf16.gmra.mrb[52].mxu1 %v12786_v0  ;;  %v22807_v0 = vld [vmem:[%s28649_s2 + $0x630] sm:$0xff]  }
 0xff8   :  { %20067 = vmatprep.mubr.msk.bf16.mxu1 %vm23296_vm3, %v28814_v1 }
 0xfff   :  { %20068 = vmatmul.mubr.bf16.gmra.mrb[56].mxu1 %v12787_v48  ;;  %v13028_v48 = vld [vmem:[#allocation2 + $0x6f] sm:$0xff] }
0x1000   :  { %20071 = vmatprep.mubr.msk.bf16.mxu1 %vm23296_vm3, %v28814_v1  ;;  %v13049_v58 = vpack.c.bf16 %v13029_v55, %v13028_v48  ;;  %v13292_v48 = vld [vmem:[#allocation2 + $0x70] sm:$0xff]  ;;  %v13293_v55 = vld [vmem:[#allocation2 + $0x78] sm:$0xff] }
0x1007   :  { %20072 = vmatmul.mubr.bf16.gmra.mrb[60].mxu1 %v12788_v50  ;;  %v13031_v50 = vld [vmem:[#allocation2 + $0x87] sm:$0xff] }
0x1008   :  { %20075 = vmatprep.mubr.msk.bf16.mxu1 %vm23296_vm3, %v28814_v1  ;;  %v13050_v11 = vpack.c.bf16 %v13031_v50, %v13030_v22  ;;  %v13294_v50 = vld [vmem:[#allocation2 + $0x80] sm:$0xff]  ;;  %v13295_v22 = vld [vmem:[#allocation2 + $0x88] sm:$0xff] }
0x100f   :  { %20076 = vmatmul.mubr.bf16.gmra.mrb[64].mxu1 %v12789_v5  ;;  %v13032_v5 = vld [vmem:[#allocation2 + $0x8f] sm:$0xff] }
0x1010   :  { %20079 = vmatprep.mubr.msk.bf16.mxu1 %vm23296_vm3, %v28814_v1  ;;  %v13051_v19 = vpack.c.bf16 %v13033_v14, %v13032_v5  ;;  %v13296_v5 = vld [vmem:[#allocation2 + $0x90] sm:$0xff]  ;;  %v13297_v14 = vld [vmem:[#allocation2 + $0x98] sm:$0xff] }
0x1017   :  { %20080 = vmatmul.mubr.bf16.gmra.mrb[68].mxu1 %v12790_v43  ;;  %v13035_v43 = vld [vmem:[#allocation2 + $0xa7] sm:$0xff] }
0x1018   :  { %20083 = vmatprep.mubr.msk.bf16.mxu1 %vm23296_vm3, %v28814_v1  ;;  %v13052_v42 = vpack.c.bf16 %v13035_v43, %v13034_v6  ;;  %v13298_v43 = vld [vmem:[#allocation2 + $0xa0] sm:$0xff]  ;;  %v13299_v6 = vld [vmem:[#allocation2 + $0xa8] sm:$0xff] }
0x101f   :  { %20084 = vmatmul.mubr.bf16.gmra.mrb[72].mxu1 %v12791_v9  ;;  %v13036_v9 = vld [vmem:[#allocation2 + $0xaf] sm:$0xff] }
0x1020   :  { %20087 = vmatprep.mubr.msk.bf16.mxu1 %vm23296_vm3, %v28814_v1  ;;  %v13053_v36 = vpack.c.bf16 %v13037_v30, %v13036_v9  ;;  %v13300_v9 = vld [vmem:[#allocation2 + $0xb0] sm:$0xff]  ;;  %v13301_v30 = vld [vmem:[#allocation2 + $0xb8] sm:$0xff] }
0x1027   :  { %20088 = vmatmul.mubr.bf16.gmra.mrb[76].mxu1 %v12792_v47  ;;  %v13039_v47 = vld [vmem:[#allocation2 + $0xc7] sm:$0xff] }
0x1028   :  { %20091 = vmatprep.mubr.msk.bf16.mxu1 %vm23296_vm3, %v28814_v1 }
0x102f   :  { %20092 = vmatmul.mubr.bf16.gmra.mrb[80].mxu1 %v12793_v29  ;;  %v13054_v29 = vpack.c.bf16 %v13039_v47, %v13038_v41  ;;  %v13302_v47 = vld [vmem:[#allocation2 + $0xc0] sm:$0xff]  ;;  %v13303_v41 = vld [vmem:[#allocation2 + $0xc8] sm:$0xff] }
0x1030   :  { %20111 = vmatprep.mubr.msk.bf16.mxu1 %vm23296_vm3, %v28814_v1 }
0x1037   :  { %20112 = vmatmul.mubr.bf16.vlgmr.msra.gmra.mrb[32].mxu1 %v13045_v3  ;;  %v13043_v3 = vld [vmem:[#allocation2 + $0xe7] sm:$0xff] }
0x1038   :  { %20115 = vmatprep.mubr.msk.bf16.mxu1 %vm23296_vm3, %v28814_v1  ;;  %20164 = vmatpush3.bf16.msra.mxu1 %v22801_v61  ;;  %v13055_v61 = vpack.c.bf16 %v13041_v12, %v13040_v28  ;;  %v13304_v28 = vld [vmem:[#allocation2 + $0xd0] sm:$0xff]  ;;  %v13305_v12 = vld [vmem:[#allocation2 + $0xd8] sm:$0xff] }
0x1039   :  { %20165 = vmatprep.subr.bf16.mxu1 %v28814_v1 }
0x103c   :  { %20166 = vmatpush3.bf16.msra.mxu1 %v22802_v63  ;;  %v13042_v63 = vld [vmem:[#allocation2 + $0xdf] sm:$0xff] }
0x103d   :  { %20167 = vmatprep.subr.bf16.mxu1 %v28814_v1  ;;  %v13056_v33 = vpack.c.bf16 %v13043_v3, %v13042_v63  ;;  %v13306_v3 = vld [vmem:[#allocation2 + $0xe0] sm:$0xff]  ;;  %v13307_v63 = vld [vmem:[#allocation2 + $0xe8] sm:$0xff] }
0x103f   :  { %20116 = vmatmul.mubr.bf16.gmra.mrb[36].mxu1 %v13046_v20  ;;  %v13284_v20 = vld [vmem:[#allocation2 + $0x30] sm:$0xff] }
0x1040   :  { %20119 = vmatprep.mubr.msk.bf16.mxu1 %vm23296_vm3, %v28814_v1  ;;  %20168 = vmatpush3.bf16.msra.mxu1 %v22803_v49  ;;  %v13057_v49 = vpack.c.bf16 %v13044_v16, %v13044_v16  ;;  %v23297_v16 = vmov 0  }
0x1041   :  { %20169 = vmatprep.subr.bf16.mxu1 %v28814_v1  ;;  %13667 = vmatprep.subr.bf16.mxu0 %v23297_v16 }
0x1044   :  { %20170 = vmatpush3.bf16.msra.mxu1 %v22804_v57  ;;  %v13285_v57 = vld [vmem:[#allocation2 + $0x38] sm:$0xff] }
0x1045   :  { %20171 = vmatprep.subr.bf16.mxu1 %v28814_v1  ;;  %v13309_v62 = vpack.c.bf16 %v13285_v57, %v13284_v20  ;;  %v22811_v57 = vld [vmem:[%s28659_s12 + $0x4] ss:$8 sps:$4 sm:$0xff]  }
0x1046   :  { %16119 = vmatprep.mubr.msk.bf16.mxu0 %vm13641_vm4, %v22811_v57 }
0x1047   :  { %20120 = vmatmul.mubr.bf16.gmra.mrb[40].mxu1 %v13047_v21 }
0x1048   :  { %20123 = vmatprep.mubr.msk.bf16.mxu1 %vm23296_vm3, %v28814_v1  ;;  %20172 = vmatpush3.bf16.msra.mxu1 %v22805_v60  ;;  %v13287_v60 = vld [vmem:[#allocation2 + $0x48] sm:$0xff] }
0x1049   :  { %20173 = vmatprep.subr.bf16.mxu1 %v28814_v1  ;;  %v13310_v21 = vpack.c.bf16 %v13287_v60, %v13286_v4 }
0x104c   :  { %20174 = vmatpush3.bf16.msra.mxu1 %v22806_v54  ;;  %v13288_v54 = vld [vmem:[#allocation2 + $0x50] sm:$0xff] }
0x104d   :  { %20175 = vmatprep.subr.bf16.mxu1 %v28814_v1  ;;  %v13311_v56 = vpack.c.bf16 %v13289_v7, %v13288_v54 }
0x104f   :  { %20124 = vmatmul.mubr.bf16.gmra.mrb[44].mxu1 %v13048_v39  ;;  %v13291_v39 = vld [vmem:[#allocation2 + $0x68] sm:$0xff] }
0x1050   :  { %20127 = vmatprep.mubr.msk.bf16.mxu1 %vm23296_vm3, %v28814_v1  ;;  %20176 = vmatpush3.bf16.msra.mxu1 %v22807_v0  ;;  %v13290_v0 = vld [vmem:[#allocation2 + $0x60] sm:$0xff] }
0x1051   :  { %20177 = vmatprep.subr.bf16.mxu1 %v28814_v1 }
0x1054   :  { %20178 = vmatpush3.bf16.msra.mxu1 %v22808_v52  ;;  %v13312_v52 = vpack.c.bf16 %v13291_v39, %v13290_v0 }
0x1057   :  { %20128 = vmatmul.mubr.bf16.gmra.mrb[48].mxu1 %v13049_v58  ;;  %v13313_v58 = vpack.c.bf16 %v13293_v55, %v13292_v48 }
0x1058   :  { %20131 = vmatprep.mubr.msk.bf16.mxu1 %vm23296_vm3, %v28814_v1 }
0x105f   :  { %20132 = vmatmul.mubr.bf16.gmra.mrb[52].mxu1 %v13050_v11  ;;  %v13314_v11 = vpack.c.bf16 %v13295_v22, %v13294_v50 }
0x1060   :  { %20135 = vmatprep.mubr.msk.bf16.mxu1 %vm23296_vm3, %v28814_v1 }
0x1067   :  { %20136 = vmatmul.mubr.bf16.gmra.mrb[56].mxu1 %v13051_v19  ;;  %v13315_v19 = vpack.c.bf16 %v13297_v14, %v13296_v5 }
0x1068   :  { %20139 = vmatprep.mubr.msk.bf16.mxu1 %vm23296_vm3, %v28814_v1 }
0x106f   :  { %20140 = vmatmul.mubr.bf16.gmra.mrb[60].mxu1 %v13052_v42  ;;  %v13316_v42 = vpack.c.bf16 %v13299_v6, %v13298_v43 }
0x1070   :  { %20143 = vmatprep.mubr.msk.bf16.mxu1 %vm23296_vm3, %v28814_v1 }
0x1077   :  { %20144 = vmatmul.mubr.bf16.gmra.mrb[64].mxu1 %v13053_v36  ;;  %v13317_v36 = vpack.c.bf16 %v13301_v30, %v13300_v9 }
0x1078   :  { %20147 = vmatprep.mubr.msk.bf16.mxu1 %vm23296_vm3, %v28814_v1 }
0x107f   :  { %20148 = vmatmul.mubr.bf16.gmra.mrb[68].mxu1 %v13054_v29  ;;  %v13318_v29 = vpack.c.bf16 %v13303_v41, %v13302_v47 }
0x1080   :  { %20151 = vmatprep.mubr.msk.bf16.mxu1 %vm23296_vm3, %v28814_v1 }
0x1087   :  { %20152 = vmatmul.mubr.bf16.gmra.mrb[72].mxu1 %v13055_v61  ;;  %v13319_v61 = vpack.c.bf16 %v13305_v12, %v13304_v28 }
0x1088   :  { %20155 = vmatprep.mubr.msk.bf16.mxu1 %vm23296_vm3, %v28814_v1 }
0x108f   :  { %20156 = vmatmul.mubr.bf16.gmra.mrb[76].mxu1 %v13056_v33  ;;  %v13320_v33 = vpack.c.bf16 %v13307_v63, %v13306_v3 }
0x1090   :  { %20159 = vmatprep.mubr.msk.bf16.mxu1 %vm23296_vm3, %v28814_v1 }
0x1097   :  { %20160 = vmatmul.mubr.bf16.gmra.mrb[80].mxu1 %v13057_v49  ;;  %v13308_v49 = vld [vmem:[#allocation2 + $0xf0] sm:$0x3] }
0x1098   :  { %20179 = vmatprep.mubr.msk.bf16.mxu1 %vm23296_vm3, %v28814_v1  ;;  %v13321_v20 = vpack.c.bf16 %v13308_v49, %v13308_v49 }
0x109f   :  { %20180 = vmatmul.mubr.bf16.vlgmr.msra.gmra.mrb[32].mxu1 %v13309_v62 }
0x10a0   :  { %20183 = vmatprep.mubr.msk.bf16.mxu1 %vm23296_vm3, %v28814_v1 }
0x10a7   :  { %20184 = vmatmul.mubr.bf16.gmra.mrb[36].mxu1 %v13310_v21 }
0x10a8   :  { %20187 = vmatprep.mubr.msk.bf16.mxu1 %vm23296_vm3, %v28814_v1 }
0x10af   :  { %20188 = vmatmul.mubr.bf16.gmra.mrb[40].mxu1 %v13311_v56 }
0x10b0   :  { %20191 = vmatprep.mubr.msk.bf16.mxu1 %vm23296_vm3, %v28814_v1 }
0x10b7   :  { %20192 = vmatmul.mubr.bf16.gmra.mrb[44].mxu1 %v13312_v52 }
0x10b8   :  { %20195 = vmatprep.mubr.msk.bf16.mxu1 %vm23296_vm3, %v28814_v1 }
0x10bf   :  { %20196 = vmatmul.mubr.bf16.gmra.mrb[48].mxu1 %v13313_v58 }
0x10c0   :  { %20199 = vmatprep.mubr.msk.bf16.mxu1 %vm23296_vm3, %v28814_v1 }
0x10c7   :  { %20200 = vmatmul.mubr.bf16.gmra.mrb[52].mxu1 %v13314_v11 }
0x10c8   :  { %20203 = vmatprep.mubr.msk.bf16.mxu1 %vm23296_vm3, %v28814_v1 }
0x10cf   :  { %20204 = vmatmul.mubr.bf16.gmra.mrb[56].mxu1 %v13315_v19 }
0x10d0   :  { %20207 = vmatprep.mubr.msk.bf16.mxu1 %vm23296_vm3, %v28814_v1 }
0x10d7   :  { %20208 = vmatmul.mubr.bf16.gmra.mrb[60].mxu1 %v13316_v42 }
0x10d8   :  { %20211 = vmatprep.mubr.msk.bf16.mxu1 %vm23296_vm3, %v28814_v1 }
0x10df   :  { %20212 = vmatmul.mubr.bf16.gmra.mrb[64].mxu1 %v13317_v36 }
0x10e0   :  { %20215 = vmatprep.mubr.msk.bf16.mxu1 %vm23296_vm3, %v28814_v1 }
0x10e7   :  { %20216 = vmatmul.mubr.bf16.gmra.mrb[68].mxu1 %v13318_v29 }
0x10e8   :  { %20219 = vmatprep.mubr.msk.bf16.mxu1 %vm23296_vm3, %v28814_v1 }
0x10ef   :  { %20220 = vmatmul.mubr.bf16.gmra.mrb[72].mxu1 %v13319_v61 }
0x10f0   :  { %20223 = vmatprep.mubr.msk.bf16.mxu1 %vm23296_vm3, %v28814_v1 }
0x10f7   :  { %20224 = vmatmul.mubr.bf16.gmra.mrb[76].mxu1 %v13320_v33 }
0x10f8   :  { %20227 = vmatprep.mubr.msk.bf16.mxu1 %vm23296_vm3, %v28814_v1 }
0x10ff   :  { %20228 = vmatmul.mubr.bf16.gmra.mrb[80].mxu1 %v13321_v20 }
0x1172   :  { %v13421_v62 = vpop.f32.mrb[32].mxu1 }
0x1173   :  { %v20505_v4 = vadd.f32 %v13421_v62, %v27013_v40  ;;  %v20181_v60 = vpop.f32.mrb[33].mxu1 }
0x1174   :  { %v13424_v21 = vpop.f32.mrb[34].mxu1 }
0x1175   :  { %v20506_v54 = vadd.f32 %v13424_v21, %v27016_v31  ;;  %v20182_v7 = vpop.f32.mrb[35].mxu1 }
0x1177   :  { %v13561_v56 = vpack.c.bf16 %v20506_v54, %v20505_v4 }
0x1179   :  { %13668 = vmatpush1.bf16.msra.mxu0 %v13561_v56 }
0x117a   :  { %v13429_v0 = vpop.f32.mrb[36].mxu1  ;;  %13669 = vmatprep.subr.bf16.mxu0 %v23297_v16 }
0x117b   :  { %v20507_v39 = vadd.f32 %v13429_v0, %v27027_v23  ;;  %v20185_v52 = vpop.f32.mrb[37].mxu1 }
0x117c   :  { %v13432_v48 = vpop.f32.mrb[38].mxu1 }
0x117d   :  { %v20508_v55 = vadd.f32 %v13432_v48, %v27030_v51  ;;  %v20186_v58 = vpop.f32.mrb[39].mxu1 }
0x117f   :  { %v13562_v50 = vpack.c.bf16 %v20508_v55, %v20507_v39 }
0x1181   :  { %13670 = vmatpush1.bf16.msra.mxu0 %v13562_v50 }
0x1182   :  { %v13437_v40 = vpop.f32.mrb[40].mxu1  ;;  %13671 = vmatprep.subr.bf16.mxu0 %v23297_v16 }
0x1183   :  { %v20509_v31 = vadd.f32 %v13437_v40, %v27041_v44  ;;  %v20189_v22 = vpop.f32.mrb[41].mxu1 }
0x1184   :  { %v13440_v11 = vpop.f32.mrb[42].mxu1 }
0x1185   :  { %v20510_v5 = vadd.f32 %v13440_v11, %v27044_v24  ;;  %v20190_v14 = vpop.f32.mrb[43].mxu1 }
0x1187   :  { %v13563_v19 = vpack.c.bf16 %v20510_v5, %v20509_v31 }
0x1189   :  { %13672 = vmatpush1.bf16.msra.mxu0 %v13563_v19 }
0x118a   :  { %v13445_v23 = vpop.f32.mrb[44].mxu1  ;;  %13673 = vmatprep.subr.bf16.mxu0 %v23297_v16 }
0x118b   :  { %v20511_v51 = vadd.f32 %v13445_v23, %v27055_v45  ;;  %v20193_v43 = vpop.f32.mrb[45].mxu1 }
0x118c   :  { %v13448_v6 = vpop.f32.mrb[46].mxu1 }
0x118d   :  { %v20512_v42 = vadd.f32 %v13448_v6, %v27058_v37  ;;  %v20194_v9 = vpop.f32.mrb[47].mxu1 }
0x118f   :  { %v13564_v30 = vpack.c.bf16 %v20512_v42, %v20511_v51 }
0x1191   :  { %13674 = vmatpush1.bf16.msra.mxu0 %v13564_v30 }
0x1192   :  { %v13453_v44 = vpop.f32.mrb[48].mxu1  ;;  %13675 = vmatprep.subr.bf16.mxu0 %v23297_v16 }
0x1193   :  { %v20513_v24 = vadd.f32 %v13453_v44, %v27063_v18  ;;  %v20197_v36 = vpop.f32.mrb[49].mxu1 }
0x1194   :  { %v13456_v47 = vpop.f32.mrb[50].mxu1 }
0x1195   :  { %v20514_v41 = vadd.f32 %v13456_v47, %v27065_v2  ;;  %v20198_v29 = vpop.f32.mrb[51].mxu1 }
0x1196   :  { %v22818_v29 = vld [vmem:[%s28659_s12 + $0x34] ss:$8 sps:$4 sm:$0xff]  }
0x1197   :  { %v13565_v28 = vpack.c.bf16 %v20514_v41, %v20513_v24  ;;  %v22817_v41 = vld [vmem:[%s28659_s12 + $0x20] ss:$8 sps:$4 sm:$0xff]  }
0x1199   :  { %13676 = vmatpush1.bf16.msra.mxu0 %v13565_v28  ;;  %v22820_v28 = vld [vmem:[%s28659_s12 + $0x30] ss:$8 sps:$4 sm:$0xff]  }
0x119a   :  { %v13461_v45 = vpop.f32.mrb[52].mxu1  ;;  %13677 = vmatprep.subr.bf16.mxu0 %v23297_v16 }
0x119b   :  { %v20515_v37 = vadd.f32 %v13461_v45, %v27069_v53  ;;  %v20201_v12 = vpop.f32.mrb[53].mxu1  ;;  %v22821_v45 = vld [vmem:[%s28659_s12 + $0x44] ss:$8 sps:$4 sm:$0xff]  }
0x119c   :  { %v13464_v61 = vpop.f32.mrb[54].mxu1  ;;  %v22824_v12 = vld [vmem:[%s28659_s12 + $0x54] ss:$8 sps:$4 sm:$0xff]  }
0x119d   :  { %v20516_v3 = vadd.f32 %v13464_v61, %v27071_v32  ;;  %v20202_v63 = vpop.f32.mrb[55].mxu1  ;;  %v22826_v61 = vld [vmem:[%s28659_s12 + $0x50] ss:$8 sps:$4 sm:$0xff]  }
0x119f   :  { %v13566_v33 = vpack.c.bf16 %v20516_v3, %v20515_v37  ;;  %v22823_v37 = vld [vmem:[%s28659_s12 + $0x40] ss:$8 sps:$4 sm:$0xff]  }
0x11a0   :  { %v13560_v3 = vld [vmem:[%s28659_s12 + $0x60] sm:$0xff] }
0x11a1   :  { %13678 = vmatpush1.bf16.msra.mxu0 %v13566_v33  ;;  %v16118_v63 = vcombine.high %v13560_v3, %v13560_v3  ;;  %v16117_v33 = vcombine.low %v13560_v3, %v13560_v3 }
0x11a2   :  { %v13469_v18 = vpop.f32.mrb[56].mxu1  ;;  %13679 = vmatprep.subr.bf16.mxu0 %v23297_v16 }
0x11a3   :  { %v20517_v2 = vadd.f32 %v13469_v18, %v27075_v15  ;;  %v20205_v49 = vpop.f32.mrb[57].mxu1  ;;  %v28371_v18 = vld [vmem:[#allocation16] sm:$0xff]  }
0x11a4   :  { %v13472_v20 = vpop.f32.mrb[58].mxu1 }
0x11a5   :  { %v20518_v57 = vadd.f32 %v13472_v20, %v27077_v10  ;;  %v20206_v62 = vpop.f32.mrb[59].mxu1 }
0x11a7   :  { %v13567_v4 = vpack.c.bf16 %v20518_v57, %v20517_v2  ;;  %v28375_v2 = vld [vmem:[#allocation10] ss:$0 sm:$0xff] }
0x11a9   :  { %13680 = vmatpush1.bf16.msra.mxu0 %v13567_v4 }
0x11aa   :  { %v13477_v53 = vpop.f32.mrb[60].mxu1  ;;  %13681 = vmatprep.subr.bf16.mxu0 %v23297_v16 }
0x11ab   :  { %v20519_v32 = vadd.f32 %v13477_v53, %v27081_v25  ;;  %v20209_v60 = vpop.f32.mrb[61].mxu1 }
0x11ac   :  { %v13480_v21 = vpop.f32.mrb[62].mxu1 }
0x11ad   :  { %v20520_v54 = vadd.f32 %v13480_v21, %v27083_v59  ;;  %v20210_v7 = vpop.f32.mrb[63].mxu1 }
0x11af   :  { %v13568_v56 = vpack.c.bf16 %v20520_v54, %v20519_v32 }
0x11b1   :  { %13682 = vmatpush1.bf16.msra.mxu0 %v13568_v56 }
0x11b2   :  { %v13485_v15 = vpop.f32.mrb[64].mxu1  ;;  %13683 = vmatprep.subr.bf16.mxu0 %v23297_v16 }
0x11b3   :  { %v20521_v10 = vadd.f32 %v13485_v15, %v27087_v38  ;;  %v20213_v0 = vpop.f32.mrb[65].mxu1 }
0x11b4   :  { %v13488_v39 = vpop.f32.mrb[66].mxu1 }
0x11b5   :  { %v20522_v52 = vadd.f32 %v13488_v39, %v27089_v27  ;;  %v20214_v48 = vpop.f32.mrb[67].mxu1 }
0x11b7   :  { %v13569_v55 = vpack.c.bf16 %v20522_v52, %v20521_v10 }
0x11b9   :  { %13684 = vmatpush1.bf16.msra.mxu0 %v13569_v55 }
0x11ba   :  { %v13493_v25 = vpop.f32.mrb[68].mxu1  ;;  %13685 = vmatprep.subr.bf16.mxu0 %v23297_v16 }
0x11bb   :  { %v20523_v59 = vadd.f32 %v13493_v25, %v27093_v13  ;;  %v20217_v58 = vpop.f32.mrb[69].mxu1 }
0x11bc   :  { %v13496_v50 = vpop.f32.mrb[70].mxu1 }
0x11bd   :  { %v20524_v40 = vadd.f32 %v13496_v50, %v27095_v46  ;;  %v20218_v31 = vpop.f32.mrb[71].mxu1 }
0x11bf   :  { %v13570_v22 = vpack.c.bf16 %v20524_v40, %v20523_v59 }
0x11c1   :  { %13686 = vmatpush1.bf16.msra.mxu0 %v13570_v22 }
0x11c2   :  { %v13501_v38 = vpop.f32.mrb[72].mxu1  ;;  %13687 = vmatprep.subr.bf16.mxu0 %v23297_v16 }
0x11c3   :  { %v20525_v27 = vadd.f32 %v13501_v38, %v27099_v26  ;;  %v20221_v11 = vpop.f32.mrb[73].mxu1 }
0x11c4   :  { %v13504_v5 = vpop.f32.mrb[74].mxu1 }
0x11c5   :  { %v20526_v14 = vadd.f32 %v13504_v5, %v27101_v34  ;;  %v20222_v19 = vpop.f32.mrb[75].mxu1 }
0x11c7   :  { %v13571_v23 = vpack.c.bf16 %v20526_v14, %v20525_v27 }
0x11c9   :  { %13688 = vmatpush1.bf16.msra.mxu0 %v13571_v23 }
0x11ca   :  { %v13509_v13 = vpop.f32.mrb[76].mxu1  ;;  %13689 = vmatprep.subr.bf16.mxu0 %v23297_v16 }
0x11cb   :  { %v20527_v46 = vadd.f32 %v13509_v13, %v27105_v17  ;;  %v20225_v51 = vpop.f32.mrb[77].mxu1  ;;  %v22809_v17 = vld [vmem:[%s28659_s12] ss:$8 sps:$4 sm:$0xff]  }
0x11cc   :  { %v13512_v43 = vpop.f32.mrb[78].mxu1 }
0x11cd   :  { %v20528_v6 = vadd.f32 %v13512_v43, %v27107_v35  ;;  %v20226_v42 = vpop.f32.mrb[79].mxu1  ;;  %v22812_v35 = vld [vmem:[%s28659_s12 + $0x14] ss:$8 sps:$4 sm:$0xff]  }
0x11cf   :  { %v13572_v9 = vpack.c.bf16 %v20528_v6, %v20527_v46 }
0x11d1   :  { %13690 = vmatpush1.bf16.msra.mxu0 %v13572_v9 }
0x11d2   :  { %v13517_v26 = vpop.f32.mrb[80].mxu1  ;;  %13691 = vmatprep.subr.bf16.mxu0 %v23297_v16  ;;  %v22815_v16 = vld [vmem:[%s28659_s12 + $0x24] ss:$8 sps:$4 sm:$0xff]  }
0x11d3   :  { %v20529_v34 = vadd.f32 %v13517_v26, %v27111_v8  ;;  %v20229_v30 = vpop.f32.mrb[81].mxu1  ;;  %v22814_v8 = vld [vmem:[%s28659_s12 + $0x10] ss:$8 sps:$4 sm:$0xff]  }
0x11d4   :  { %v13520_v44 = vpop.f32.mrb[82].mxu1 }
0x11d5   :  { %v13573_v24 = vpack.c.bf16 %v20529_v34, %v20529_v34  ;;  %v20230_v36 = vpop.f32.mrb[83].mxu1 }
0x11d7   :  { %v13665_v47 = vsel %vm13663_vm5, %v13573_v24, 0 }
0x11d8   :  { %13692 = vmatpush1.bf16.msra.mxu0 %v13665_v47 }
0x11db   :  { %13700 = vmatmul.mubr.bf16.vlgmr.msra.gmra.mrb[160].mxu0 %v22809_v17 }
0x11dc   :  { %16120 = vmatprep.mubr.msk.bf16.mxu0 %vm13641_vm4, %v22812_v35 }
0x11e3   :  { %13708 = vmatmul.mubr.bf16.gmra.mrb[164].mxu0 %v22814_v8 }
0x11e4   :  { %16121 = vmatprep.mubr.msk.bf16.mxu0 %vm13641_vm4, %v22815_v16 }
0x11eb   :  { %13716 = vmatmul.mubr.bf16.gmra.mrb[168].mxu0 %v22817_v41 }
0x11ec   :  { %16122 = vmatprep.mubr.msk.bf16.mxu0 %vm13641_vm4, %v22818_v29 }
0x11f3   :  { %13724 = vmatmul.mubr.bf16.gmra.mrb[172].mxu0 %v22820_v28 }
0x11f4   :  { %16123 = vmatprep.mubr.msk.bf16.mxu0 %vm13641_vm4, %v22821_v45 }
0x11fb   :  { %13732 = vmatmul.mubr.bf16.gmra.mrb[176].mxu0 %v22823_v37 }
0x11fc   :  { %16124 = vmatprep.mubr.msk.bf16.mxu0 %vm13641_vm4, %v22824_v12 }
0x1203   :  { %13740 = vmatmul.mubr.bf16.gmra.mrb[180].mxu0 %v22826_v61 }
0x1204   :  { %16125 = vmatprep.mubr.msk.bf16.mxu0 %vm13641_vm4, %v16118_v63 }
0x120b   :  { %13748 = vmatmul.mubr.bf16.gmra.mrb[184].mxu0 %v16117_v33 }
0x120c   :  { %20243 = vmatprep.mubr.msk.bf16.mxu0 %vm13809_vm6, %v28371_v18 }
0x12ae   :  { %v13701_v49 = vpop.f32.mrb[160].mxu0 }
0x12af   :  { %v13702_v20 = vadd.f32 %v28375_v2, %v13701_v49  ;;  %v13703_v57 = vpop.f32.mrb[161].mxu0 }
0x12b0   :  { %v13704_v62 = vpop.f32.mrb[162].mxu0 }
0x12b1   :  { %v13755_v4 = vmax.f32 %v13702_v20, 0.0  ;;  %v13705_v53 = vadd.f32 %v28375_v2, %v13704_v62  ;;  %v13706_v32 = vpop.f32.mrb[163].mxu0  ;;  %v28401_v62 = vld [vmem:[#allocation16 + $0x8] ss:$0 sps:$4 sm:$0xff]  }
0x12b3   :  { %13768 = vst [vmem:[#allocation3] sm:$0xff] %v13755_v4  ;;  %v13756_v60 = vmax.f32 %v13705_v53, 0.0 }
0x12b5   :  { %13769 = vst [vmem:[#allocation3 + $0x8] sm:$0xff] %v13756_v60  ;;  %v13792_v21 = vpack.c.bf16 %v13756_v60, %v13755_v4 }
0x12b6   :  { %v13709_v54 = vpop.f32.mrb[164].mxu0 }
0x12b7   :  { %v13710_v7 = vadd.f32 %v28375_v2, %v13709_v54  ;;  %v13711_v56 = vpop.f32.mrb[165].mxu0  ;;  %20231 = vmatprep.subr.bf16.mxu0 %v13792_v21 }
0x12b8   :  { %v13712_v15 = vpop.f32.mrb[166].mxu0  ;;  %20232 = vmatpush3.bf16.msra.mxu0 %v13792_v21 }
0x12b9   :  { %v13757_v10 = vmax.f32 %v13710_v7, 0.0  ;;  %v13713_v0 = vadd.f32 %v28375_v2, %v13712_v15  ;;  %v13714_v39 = vpop.f32.mrb[167].mxu0 }
0x12bb   :  { %13770 = vst [vmem:[#allocation3 + $0x10] sm:$0xff] %v13757_v10  ;;  %v13758_v52 = vmax.f32 %v13713_v0, 0.0  ;;  %v28381_v48 = vpack.c.bf16 %v13757_v10, %v13756_v60 }
0x12bc   :  { %v13867_v49 = vld [vmem:[#allocation3 + $0x1] sm:$0xff] }
0x12bd   :  { %13771 = vst [vmem:[#allocation3 + $0x18] sm:$0xff] %v13758_v52  ;;  %v13793_v55 = vpack.c.bf16 %v13758_v52, %v13757_v10 }
0x12be   :  { %v13717_v25 = vpop.f32.mrb[168].mxu0 }
0x12bf   :  { %v13718_v59 = vadd.f32 %v28375_v2, %v13717_v25  ;;  %v13719_v58 = vpop.f32.mrb[169].mxu0  ;;  %20233 = vmatprep.subr.bf16.mxu0 %v13793_v55  ;;  %v13938_v25 = vld [vmem:[#allocation3 + $0x7] sm:$0xff] }
0x12c0   :  { %v13720_v50 = vpop.f32.mrb[170].mxu0  ;;  %20234 = vmatpush3.bf16.msra.mxu0 %v13793_v55 }
0x12c1   :  { %v13759_v40 = vmax.f32 %v13718_v59, 0.0  ;;  %v13721_v31 = vadd.f32 %v28375_v2, %v13720_v50  ;;  %v13722_v22 = vpop.f32.mrb[171].mxu0 }
0x12c2   :  { %v13868_v63 = vld [vmem:[#allocation3 + $0x9] sm:$0xff] }
0x12c3   :  { %13772 = vst [vmem:[#allocation3 + $0x20] sm:$0xff] %v13759_v40  ;;  %v13760_v38 = vmax.f32 %v13721_v31, 0.0  ;;  %v28385_v27 = vpack.c.bf16 %v13759_v40, %v13758_v52  ;;  %v13878_v57 = vpack.c.bf16 %v13868_v63, %v13867_v49  ;;  %v13939_v55 = vld [vmem:[#allocation3 + $0xf] sm:$0xff] }
0x12c4   :  { %v13949_v58 = vpack.c.bf16 %v13939_v55, %v13938_v25  ;;  %v22840_v55 = vld [vmem:[%s28650_s3 + $0x8] sm:$0xff]   ;;  %v22841_v25 = vld [vmem:[%s28650_s3 + $0x10] sm:$0xff]  }
0x12c5   :  { %13773 = vst [vmem:[#allocation3 + $0x28] sm:$0xff] %v13760_v38  ;;  %v13794_v11 = vpack.c.bf16 %v13760_v38, %v13759_v40  ;;  %v13940_v40 = vld [vmem:[#allocation3 + $0x17] sm:$0xff] }
0x12c6   :  { %v13725_v5 = vpop.f32.mrb[172].mxu0 }
0x12c7   :  { %v13726_v14 = vadd.f32 %v28375_v2, %v13725_v5  ;;  %v13727_v19 = vpop.f32.mrb[173].mxu0  ;;  %20235 = vmatprep.subr.bf16.mxu0 %v13794_v11 }
0x12c8   :  { %v13728_v23 = vpop.f32.mrb[174].mxu0  ;;  %20236 = vmatpush3.bf16.msra.mxu0 %v13794_v11 }
0x12c9   :  { %v13761_v13 = vmax.f32 %v13726_v14, 0.0  ;;  %v13729_v46 = vadd.f32 %v28375_v2, %v13728_v23  ;;  %v13730_v51 = vpop.f32.mrb[175].mxu0 }
0x12ca   :  { %v13870_v4 = vld [vmem:[#allocation3 + $0x19] sm:$0xff] }
0x12cb   :  { %13774 = vst [vmem:[#allocation3 + $0x30] sm:$0xff] %v13761_v13  ;;  %v13762_v43 = vmax.f32 %v13729_v46, 0.0  ;;  %v28389_v6 = vpack.c.bf16 %v13761_v13, %v13760_v38  ;;  %v13941_v50 = vld [vmem:[#allocation3 + $0x1f] sm:$0xff] }
0x12cc   :  { %v13871_v60 = vld [vmem:[#allocation3 + $0x21] sm:$0xff]  ;;  %v13950_v31 = vpack.c.bf16 %v13941_v50, %v13940_v40  ;;  %v22844_v50 = vld [vmem:[%s28650_s3 + $0x28] sm:$0xff]   ;;  %v22845_v40 = vld [vmem:[%s28650_s3 + $0x30] sm:$0xff]  }
0x12cd   :  { %13775 = vst [vmem:[#allocation3 + $0x38] sm:$0xff] %v13762_v43  ;;  %v13795_v42 = vpack.c.bf16 %v13762_v43, %v13761_v13  ;;  %v13942_v38 = vld [vmem:[#allocation3 + $0x27] sm:$0xff] }
0x12ce   :  { %v13733_v9 = vpop.f32.mrb[176].mxu0 }
0x12cf   :  { %v13734_v26 = vadd.f32 %v28375_v2, %v13733_v9  ;;  %v13735_v34 = vpop.f32.mrb[177].mxu0  ;;  %20237 = vmatprep.subr.bf16.mxu0 %v13795_v42 }
0x12d0   :  { %v13736_v30 = vpop.f32.mrb[178].mxu0  ;;  %20238 = vmatpush3.bf16.msra.mxu0 %v13795_v42 }
0x12d1   :  { %v13763_v44 = vmax.f32 %v13734_v26, 0.0  ;;  %v13737_v24 = vadd.f32 %v28375_v2, %v13736_v30  ;;  %v13738_v36 = vpop.f32.mrb[179].mxu0  ;;  %v22831_v30 = vld [vmem:[%s28650_s3 + $0x40] sm:$0xff]  }
0x12d2   :  { %v13872_v32 = vld [vmem:[#allocation3 + $0x29] sm:$0xff]  ;;  %v22834_v36 = vld [vmem:[%s28650_s3 + $0x58] sm:$0xff]  }
0x12d3   :  { %13776 = vst [vmem:[#allocation3 + $0x40] sm:$0xff] %v13763_v44  ;;  %v13764_v47 = vmax.f32 %v13737_v24, 0.0  ;;  %v28393_v17 = vpack.c.bf16 %v13763_v44, %v13762_v43  ;;  %v13880_v21 = vpack.c.bf16 %v13872_v32, %v13871_v60  ;;  %v13943_v22 = vld [vmem:[#allocation3 + $0x2f] sm:$0xff]  ;;  %v22833_v24 = vld [vmem:[%s28650_s3 + $0x50] sm:$0xff]  }
0x12d4   :  { %v13873_v7 = vld [vmem:[#allocation3 + $0x31] sm:$0xff]  ;;  %v13951_v11 = vpack.c.bf16 %v13943_v22, %v13942_v38  ;;  %v22847_v38 = vld [vmem:[%s28650_s3 + $0x80] sm:$0xff]  }
0x12d5   :  { %13777 = vst [vmem:[#allocation3 + $0x48] sm:$0xff] %v13764_v47  ;;  %v13796_v35 = vpack.c.bf16 %v13764_v47, %v13763_v44  ;;  %v13944_v14 = vld [vmem:[#allocation3 + $0x37] sm:$0xff] }
0x12d6   :  { %v13741_v8 = vpop.f32.mrb[180].mxu0  ;;  %v22832_v44 = vld [vmem:[%s28650_s3 + $0x48] sm:$0xff]  }
0x12d7   :  { %v13742_v16 = vadd.f32 %v28375_v2, %v13741_v8  ;;  %20239 = vmatprep.subr.bf16.mxu0 %v13796_v35  ;;  %v13743_v41 = vpop.f32.mrb[181].mxu0  ;;  %v22838_v8 = vld [vmem:[%s28650_s3 + $0x78] sm:$0xff]  }
0x12d8   :  { %20240 = vmatpush3.bf16.msra.mxu0 %v13796_v35  ;;  %v13744_v29 = vpop.f32.mrb[182].mxu0  ;;  %v22837_v35 = vld [vmem:[%s28650_s3 + $0x70] sm:$0xff]  }
0x12d9   :  { %v13765_v28 = vmax.f32 %v13742_v16, 0.0  ;;  %v13745_v45 = vadd.f32 %v28375_v2, %v13744_v29  ;;  %v13746_v37 = vpop.f32.mrb[183].mxu0  ;;  %v13869_v2 = vld [vmem:[#allocation3 + $0x11] sm:$0xff] }
0x12da   :  { %v13879_v53 = vpack.c.bf16 %v13870_v4, %v13869_v2  ;;  %v13874_v54 = vld [vmem:[#allocation3 + $0x39] sm:$0xff] }
0x12db   :  { %13778 = vst [vmem:[#allocation3 + $0x50] sm:$0xff] %v13765_v28  ;;  %v13766_v12 = vmax.f32 %v13745_v45, 0.0  ;;  %v28397_v61 = vpack.c.bf16 %v13765_v28, %v13764_v47  ;;  %v13881_v56 = vpack.c.bf16 %v13874_v54, %v13873_v7  ;;  %v13945_v5 = vld [vmem:[#allocation3 + $0x3f] sm:$0xff]  ;;  %v22835_v47 = vld [vmem:[%s28650_s3 + $0x60] sm:$0xff]  }
0x12dc   :  { %v13875_v10 = vld [vmem:[#allocation3 + $0x41] sm:$0xff]  ;;  %v13952_v19 = vpack.c.bf16 %v13945_v5, %v13944_v14  ;;  %v22848_v5 = vld [vmem:[%s28650_s3 + $0x88] sm:$0xff]   ;;  %v22849_v14 = vld [vmem:[%s28650_s3 + $0x90] sm:$0xff]  }
0x12dd   :  { %13779 = vst [vmem:[#allocation3 + $0x58] sm:$0xff] %v13766_v12  ;;  %v13946_v13 = vld [vmem:[#allocation3 + $0x47] sm:$0xff] }
0x12e2   :  { %v13791_v3 = vld [vmem:[#allocation3 + $0x50] sm:$0x3] }
0x12e3   :  { %v13797_v33 = vpack.c.bf16 %v13791_v3, %v13791_v3  ;;  %v13876_v15 = vld [vmem:[#allocation3 + $0x49] sm:$0xff]  ;;  %v13877_v39 = vld [vmem:[#allocation3 + $0x51] sm:$0x3] }
0x12e4   :  { %v13882_v0 = vpack.c.bf16 %v13876_v15, %v13875_v10  ;;  %v13883_v52 = vpack.c.bf16 %v13877_v39, %v13877_v39  ;;  %v13947_v23 = vld [vmem:[#allocation3 + $0x4f] sm:$0xff]  ;;  %v13948_v51 = vld [vmem:[#allocation3 + $0x57] sm:$0x3] }
0x12e5   :  { %22398 = vmatprep.subr.msk.bf16.mxu0 %vm13663_vm5, %v13797_v33  ;;  %v13817_v20 = vsel %vm13663_vm5, %v13797_v33, 0  ;;  %v13953_v46 = vpack.c.bf16 %v13947_v23, %v13946_v13  ;;  %v13954_v43 = vpack.c.bf16 %v13948_v51, %v13948_v51  ;;  %v14019_v9 = vld [vmem:[#allocation3 + $0x58] sm:$0x3]  ;;  %v22839_v39 = vld [vmem:[%s28650_s3] sm:$0xff]   ;;  %v22852_v13 = vld [vmem:[%s28650_s3 + $0xa8] sm:$0xff]  }
0x12e6   :  { %20242 = vmatpush3.bf16.msra.mxu0 %v13817_v20  ;;  %v13885_v59 = vsel %vm13663_vm5, %v13883_v52, 0  ;;  %v14025_v26 = vpack.c.bf16 %v14019_v9, %v14019_v9  ;;  %v22851_v23 = vld [vmem:[%s28650_s3 + $0xa0] sm:$0xff]   ;;  %v22854_v51 = vld [vmem:[%s28650_s3 + $0xb8] sm:$0xff]  }
0x12e7   :  { %20247 = vmatprep.subr.bf16.mxu0 %v13878_v57  ;;  %v13956_v42 = vsel %vm13663_vm5, %v13954_v43, 0  ;;  %v22855_v9 = vld [vmem:[%s28650_s3 + $0xc0] sm:$0xff]  }
0x12e9   :  { %20244 = vmatmul.mubr.msk.bf16.vlgmr.msra.gmra.mrb[188].mxu0 %vm13809_vm6, %v28401_v62 }
0x12ea   :  { %20248 = vmatpush3.bf16.msra.mxu0 %v13878_v57  ;;  %20259 = vmatprep.mubr.msk.bf16.mxu0 %vm13809_vm6, %v28371_v18 }
0x12eb   :  { %20249 = vmatprep.subr.bf16.mxu0 %v13879_v53 }
0x12ee   :  { %20250 = vmatpush3.bf16.msra.mxu0 %v13879_v53 }
0x12ef   :  { %20251 = vmatprep.subr.bf16.mxu0 %v13880_v21 }
0x12f2   :  { %20252 = vmatpush3.bf16.msra.mxu0 %v13880_v21 }
0x12f3   :  { %20253 = vmatprep.subr.bf16.mxu0 %v13881_v56 }
0x12f6   :  { %20254 = vmatpush3.bf16.msra.mxu0 %v13881_v56 }
0x12f7   :  { %20255 = vmatprep.subr.bf16.mxu0 %v13882_v0 }
0x12fa   :  { %20256 = vmatpush3.bf16.msra.mxu0 %v13882_v0 }
0x12fb   :  { %22399 = vmatprep.subr.msk.bf16.mxu0 %vm13663_vm5, %v13883_v52 }
0x12fe   :  { %20258 = vmatpush3.bf16.msra.mxu0 %v13885_v59  ;;  %v22842_v59 = vld [vmem:[%s28650_s3 + $0x18] sm:$0xff]  }
0x12ff   :  { %20263 = vmatprep.subr.bf16.mxu0 %v13949_v58 }
0x1301   :  { %20260 = vmatmul.mubr.msk.bf16.vlgmr.msra.gmra.mrb[192].mxu0 %vm13809_vm6, %v28401_v62 }
0x1302   :  { %20264 = vmatpush3.bf16.msra.mxu0 %v13949_v58  ;;  %20275 = vmatprep.mubr.msk.bf16.mxu0 %vm13809_vm6, %v28371_v18  ;;  %v22843_v58 = vld [vmem:[%s28650_s3 + $0x20] sm:$0xff]  }
0x1303   :  { %20265 = vmatprep.subr.bf16.mxu0 %v13950_v31 }
0x1306   :  { %20266 = vmatpush3.bf16.msra.mxu0 %v13950_v31  ;;  %v22846_v31 = vld [vmem:[%s28650_s3 + $0x38] sm:$0xff]  }
0x1307   :  { %20267 = vmatprep.subr.bf16.mxu0 %v13951_v11 }
0x130a   :  { %20268 = vmatpush3.bf16.msra.mxu0 %v13951_v11 }
0x130b   :  { %20269 = vmatprep.subr.bf16.mxu0 %v13952_v19 }
0x130e   :  { %20270 = vmatpush3.bf16.msra.mxu0 %v13952_v19  ;;  %v22850_v19 = vld [vmem:[%s28650_s3 + $0x98] sm:$0xff]  }
0x130f   :  { %20271 = vmatprep.subr.bf16.mxu0 %v13953_v46 }
0x1312   :  { %20272 = vmatpush3.bf16.msra.mxu0 %v13953_v46  ;;  %v22853_v46 = vld [vmem:[%s28650_s3 + $0xb0] sm:$0xff]  }
0x1313   :  { %22400 = vmatprep.subr.msk.bf16.mxu0 %vm13663_vm5, %v13954_v43 }
0x1316   :  { %20274 = vmatpush3.bf16.msra.mxu0 %v13956_v42 }
0x1317   :  { %20279 = vmatprep.subr.bf16.mxu0 %v28381_v48 }
0x1319   :  { %20276 = vmatmul.mubr.msk.bf16.vlgmr.msra.gmra.mrb[196].mxu0 %vm13809_vm6, %v28401_v62 }
0x131a   :  { %20280 = vmatpush3.bf16.msra.mxu0 %v28381_v48  ;;  %20291 = vmatprep.mubr.msk.bf16.mxu0 %vm13809_vm6, %v28371_v18  ;;  %v14027_v18 = vsel %vm13663_vm5, %v14025_v26, 0  ;;  %v13749_v48 = vpop.f32.mrb[184].mxu0 }
0x131b   :  { %20281 = vmatprep.subr.bf16.mxu0 %v28385_v27  ;;  %v22857_v48 = vld [vmem:[%s28650_s3 + $0xd0] sm:$0xff]  }
0x131e   :  { %20282 = vmatpush3.bf16.msra.mxu0 %v28385_v27  ;;  %v13751_v27 = vpop.f32.mrb[185].mxu0 }
0x131f   :  { %20283 = vmatprep.subr.bf16.mxu0 %v28389_v6  ;;  %v22858_v27 = vld [vmem:[%s28650_s3 + $0xd8] sm:$0xff]  }
0x1322   :  { %20284 = vmatpush3.bf16.msra.mxu0 %v28389_v6  ;;  %v13752_v6 = vpop.f32.mrb[186].mxu0 }
0x1323   :  { %20285 = vmatprep.subr.bf16.mxu0 %v28393_v17  ;;  %v13753_v34 = vpop.f32.mrb[187].mxu0  ;;  %v22859_v6 = vld [vmem:[%s28650_s3 + $0xe0] sm:$0xff]  }
0x1324   :  { %v22860_v34 = vld [vmem:[%s28650_s3 + $0xe8] sm:$0xff]  }
0x1326   :  { %20286 = vmatpush3.bf16.msra.mxu0 %v28393_v17  ;;  %v22836_v17 = vld [vmem:[%s28650_s3 + $0x68] sm:$0xff]  }
0x1327   :  { %20287 = vmatprep.subr.bf16.mxu0 %v28397_v61 }
0x132a   :  { %20288 = vmatpush3.bf16.msra.mxu0 %v28397_v61 }
0x132b   :  { %22401 = vmatprep.subr.msk.bf16.mxu0 %vm13663_vm5, %v14025_v26 }
0x132e   :  { %20290 = vmatpush3.bf16.msra.mxu0 %v14027_v18  ;;  %v22856_v18 = vld [vmem:[%s28650_s3 + $0xc8] sm:$0xff]  }
0x132f   :  { %20295 = vmatprep.subr.bf16.mxu0 %v28814_v1 }
0x1331   :  { %20292 = vmatmul.mubr.msk.bf16.vlgmr.msra.gmra.mrb[200].mxu0 %vm13809_vm6, %v28401_v62 }
0x1332   :  { %20311 = vmatprep.mubr.msk.bf16.mxu0 %vm23296_vm3, %v28814_v1  ;;  %20296 = vmatpush3.bf16.msra.mxu0 %v22831_v30  ;;  %v22861_v30 = vld [vmem:[%s28650_s3 + $0xf0] sm:$0xff]  }
0x1333   :  { %20297 = vmatprep.subr.bf16.mxu0 %v28814_v1 }
0x1336   :  { %20298 = vmatpush3.bf16.msra.mxu0 %v22832_v44  ;;  %v22862_v44 = vld [vmem:[%s28650_s3 + $0xf8] sm:$0xff]  }
0x1337   :  { %20299 = vmatprep.subr.bf16.mxu0 %v28814_v1 }
0x133a   :  { %20300 = vmatpush3.bf16.msra.mxu0 %v22833_v24 }
0x133b   :  { %20301 = vmatprep.subr.bf16.mxu0 %v28814_v1 }
0x133e   :  { %20302 = vmatpush3.bf16.msra.mxu0 %v22834_v36 }
0x133f   :  { %20303 = vmatprep.subr.bf16.mxu0 %v28814_v1 }
0x1342   :  { %20304 = vmatpush3.bf16.msra.mxu0 %v22835_v47 }
0x1343   :  { %20305 = vmatprep.subr.bf16.mxu0 %v28814_v1 }
0x1346   :  { %20306 = vmatpush3.bf16.msra.mxu0 %v22836_v17 }
0x1347   :  { %20307 = vmatprep.subr.bf16.mxu0 %v28814_v1 }
0x134a   :  { %20308 = vmatpush3.bf16.msra.mxu0 %v22837_v35 }
0x134b   :  { %20309 = vmatprep.subr.bf16.mxu0 %v28814_v1 }
0x134e   :  { %20310 = vmatpush3.bf16.msra.mxu0 %v22838_v8 }
0x134f   :  { %20315 = vmatprep.subr.bf16.mxu0 %v28814_v1 }
0x13bc   :  { %v20245_v16 = vpop.f32.mrb[188].mxu0 }
0x13bd   :  { %v13853_v41 = vpop.f32.mrb[189].mxu0 }
0x13be   :  { %v20246_v29 = vpop.f32.mrb[190].mxu0 }
0x13bf   :  { %v13856_v28 = vpop.f32.mrb[191].mxu0 }
0x13d4   :  { %v20261_v45 = vpop.f32.mrb[192].mxu0 }
0x13d5   :  { %v13937_v37 = vmax.f32 %v20245_v16, %v20261_v45  ;;  %v13921_v12 = vpop.f32.mrb[193].mxu0  ;;  %v16216_v45 = vld [vmem:[#allocation12] ss:$0 sm:$0xff] }
0x13d6   :  { %v13935_v61 = vmax.f32 %v13853_v41, %v13921_v12  ;;  %v20262_v3 = vpop.f32.mrb[194].mxu0 }
0x13d7   :  { %v13924_v63 = vpop.f32.mrb[195].mxu0 }
0x13d8   :  { %v13936_v33 = vmax.f32 %v13856_v28, %v13924_v63  ;;  %v14522_v28 = vld [vmem:[#allocation18] sm:$0xf] }
0x13ec   :  { %v20277_v49 = vpop.f32.mrb[196].mxu0 }
0x13ed   :  { %v14008_v20 = vmax.f32 %v13937_v37, %v20277_v49  ;;  %v13992_v57 = vpop.f32.mrb[197].mxu0 }
0x13ee   :  { %v14006_v62 = vmax.f32 %v13935_v61, %v13992_v57  ;;  %v20278_v4 = vpop.f32.mrb[198].mxu0  ;;  %v14581_v57 = vld [vmem:[#allocation19] sm:$0xf] }
0x13ef   :  { %v13995_v2 = vpop.f32.mrb[199].mxu0  ;;  %v22863_v4 = vld [vmem:[#allocation7 + $0x40] sm:$0xff]  }
0x13f0   :  { %v14007_v53 = vmax.f32 %v13936_v33, %v13995_v2  ;;  %v22864_v2 = vld [vmem:[#allocation7 + $0x48] sm:$0xff]  }
0x1404   :  { %v20293_v32 = vpop.f32.mrb[200].mxu0 }
0x1405   :  { %v14079_v60 = vmax.f32 %v14008_v20, %v20293_v32  ;;  %v14063_v21 = vpop.f32.mrb[201].mxu0  ;;  %v22866_v32 = vld [vmem:[#allocation7 + $0x58] sm:$0xff]  }
0x1406   :  { %v14077_v54 = vmax.f32 %v14006_v62, %v14063_v21  ;;  %v20294_v7 = vpop.f32.mrb[202].mxu0  ;;  %v14648_v62 = vld [vmem:[#allocation19 + $0x4] sm:$0xf]  ;;  %v22868_v21 = vld [vmem:[#allocation7 + $0x68] sm:$0xff]  }
0x1407   :  { %14082 = vst [vmem:[#allocation4 + $0x10] sm:$0xff] %v14079_v60  ;;  %v14066_v56 = vpop.f32.mrb[203].mxu0  ;;  %v22867_v60 = vld [vmem:[#allocation7 + $0x60] sm:$0xff]   ;;  %v22870_v7 = vld [vmem:[#allocation7 + $0x78] sm:$0xff]  }
0x1408   :  { %14080 = vst [vmem:[#allocation4] sm:$0xff] %v14077_v54  ;;  %v14078_v15 = vmax.f32 %v14007_v53, %v14066_v56  ;;  %v22865_v53 = vld [vmem:[#allocation7 + $0x50] sm:$0xff]  }
0x140a   :  { %14081 = vst [vmem:[#allocation4 + $0x8] sm:$0xff] %v14078_v15 }
0x1411   :  { %v14102_v10 = vld [vmem:[#allocation4 + $0x1] sm:$0xff]  ;;  %v14103_v0 = vld [vmem:[#allocation4 + $0x9] sm:$0x3f] }
0x1412   :  { %v14104_v52 = vpack.c.bf16 %v14103_v0, %v14102_v10  ;;  %v14084_v22 = vld [vmem:[#allocation4 + $0x8] sm:$0x3f] }
0x1413   :  { %v14085_v11 = vpack.c.bf16 %v14084_v22, %v14077_v54  ;;  %v14300_v43 = vld [vmem:[#allocation4 + $0x3] sm:$0xff]  ;;  %v14301_v42 = vld [vmem:[#allocation4 + $0xb] sm:$0x3f]  ;;  %v22875_v22 = vld [vmem:[#allocation7 + $0x20] sm:$0xff]  }
0x1414   :  { %20312 = vmatmul.mubr.bf16.vlgmr.msra.gmra.mrb[204].mxu0 %v14104_v52  ;;  %v14302_v26 = vpack.c.bf16 %v14301_v42, %v14300_v43  ;;  %v14411_v24 = vld [vmem:[#allocation4 + $0x4] sm:$0xff]  ;;  %v14412_v36 = vld [vmem:[#allocation4 + $0xc] sm:$0x3f]  ;;  %v22871_v52 = vld [vmem:[#allocation7] sm:$0xff]  }
0x1415   :  { %20316 = vmatpush3.bf16.msra.mxu0 %v22839_v39  ;;  %20331 = vmatprep.mubr.msk.bf16.mxu0 %vm23296_vm3, %v28814_v1  ;;  %v14413_v47 = vpack.c.bf16 %v14412_v36, %v14411_v24  ;;  %v22869_v54 = vld [vmem:[#allocation7 + $0x70] sm:$0xff]   ;;  %v22883_v43 = vld [vmem:[#allocation7 + $0xa0] sm:$0xff]   ;;  %v22884_v42 = vld [vmem:[#allocation7 + $0xa8] sm:$0xff]  }
0x1416   :  { %20317 = vmatprep.subr.bf16.mxu0 %v28814_v1 }
0x1419   :  { %20318 = vmatpush3.bf16.msra.mxu0 %v22840_v55 }
0x141a   :  { %20319 = vmatprep.subr.bf16.mxu0 %v28814_v1 }
0x141d   :  { %20320 = vmatpush3.bf16.msra.mxu0 %v22841_v25 }
0x141e   :  { %20321 = vmatprep.subr.bf16.mxu0 %v28814_v1 }
0x1421   :  { %20322 = vmatpush3.bf16.msra.mxu0 %v22842_v59 }
0x1422   :  { %20323 = vmatprep.subr.bf16.mxu0 %v28814_v1 }
0x1425   :  { %20324 = vmatpush3.bf16.msra.mxu0 %v22843_v58 }
0x1426   :  { %20325 = vmatprep.subr.bf16.mxu0 %v28814_v1 }
0x1429   :  { %20326 = vmatpush3.bf16.msra.mxu0 %v22844_v50  ;;  %v22872_v50 = vld [vmem:[#allocation7 + $0x8] sm:$0xff]  }
0x142a   :  { %20327 = vmatprep.subr.bf16.mxu0 %v28814_v1 }
0x142d   :  { %20328 = vmatpush3.bf16.msra.mxu0 %v22845_v40  ;;  %v22873_v40 = vld [vmem:[#allocation7 + $0x10] sm:$0xff]  }
0x142e   :  { %20329 = vmatprep.subr.bf16.mxu0 %v28814_v1 }
0x1431   :  { %20330 = vmatpush3.bf16.msra.mxu0 %v22846_v31  ;;  %v22874_v31 = vld [vmem:[#allocation7 + $0x18] sm:$0xff]  }
0x1432   :  { %20335 = vmatprep.subr.bf16.mxu0 %v28814_v1 }
0x1434   :  { %20332 = vmatmul.mubr.bf16.vlgmr.msra.gmra.mrb[204].mxu0 %v14085_v11  ;;  %v22877_v11 = vld [vmem:[#allocation7 + $0x30] sm:$0xff]  }
0x1435   :  { %20336 = vmatpush3.bf16.msra.mxu0 %v22847_v38  ;;  %20351 = vmatprep.mubr.msk.bf16.mxu0 %vm23296_vm3, %v28814_v1  ;;  %v22876_v38 = vld [vmem:[#allocation7 + $0x28] sm:$0xff]  }
0x1436   :  { %20337 = vmatprep.subr.bf16.mxu0 %v28814_v1 }
0x1439   :  { %20338 = vmatpush3.bf16.msra.mxu0 %v22848_v5  ;;  %v22878_v5 = vld [vmem:[#allocation7 + $0x38] sm:$0xff]  }
0x143a   :  { %20339 = vmatprep.subr.bf16.mxu0 %v28814_v1 }
0x143d   :  { %20340 = vmatpush3.bf16.msra.mxu0 %v22849_v14 }
0x143e   :  { %20341 = vmatprep.subr.bf16.mxu0 %v28814_v1 }
0x1441   :  { %20342 = vmatpush3.bf16.msra.mxu0 %v22850_v19  ;;  %v14887_v19 = vld [vmem:[#allocation19 + $0x8] sm:$0xf] }
0x1442   :  { %20343 = vmatprep.subr.bf16.mxu0 %v28814_v1 }
0x1445   :  { %20344 = vmatpush3.bf16.msra.mxu0 %v22851_v23  ;;  %v22879_v23 = vld [vmem:[#allocation7 + $0x80] sm:$0xff]  }
0x1446   :  { %20345 = vmatprep.subr.bf16.mxu0 %v28814_v1 }
0x1449   :  { %20346 = vmatpush3.bf16.msra.mxu0 %v22852_v13  ;;  %v22880_v13 = vld [vmem:[#allocation7 + $0x88] sm:$0xff]  }
0x144a   :  { %20347 = vmatprep.subr.bf16.mxu0 %v28814_v1 }
0x144d   :  { %20348 = vmatpush3.bf16.msra.mxu0 %v22853_v46  ;;  %v22881_v46 = vld [vmem:[#allocation7 + $0x90] sm:$0xff]  }
0x144e   :  { %20349 = vmatprep.subr.bf16.mxu0 %v28814_v1 }
0x1451   :  { %20350 = vmatpush3.bf16.msra.mxu0 %v22854_v51  ;;  %v22882_v51 = vld [vmem:[#allocation7 + $0x98] sm:$0xff]  }
0x1452   :  { %20355 = vmatprep.subr.bf16.mxu0 %v28814_v1 }
0x1454   :  { %20352 = vmatmul.mubr.bf16.vlgmr.msra.gmra.mrb[204].mxu0 %v14302_v26  ;;  %v22886_v26 = vld [vmem:[#allocation7 + $0xb8] sm:$0xff]  }
0x1455   :  { %20356 = vmatpush3.bf16.msra.mxu0 %v22855_v9  ;;  %20371 = vmatprep.mubr.msk.bf16.mxu0 %vm23296_vm3, %v28814_v1  ;;  %v22885_v9 = vld [vmem:[#allocation7 + $0xb0] sm:$0xff]  }
0x1456   :  { %20357 = vmatprep.subr.bf16.mxu0 %v28814_v1 }
0x1459   :  { %20358 = vmatpush3.bf16.msra.mxu0 %v22856_v18 }
0x145a   :  { %20359 = vmatprep.subr.bf16.mxu0 %v28814_v1 }
0x145d   :  { %20360 = vmatpush3.bf16.msra.mxu0 %v22857_v48 }
0x145e   :  { %20361 = vmatprep.subr.bf16.mxu0 %v28814_v1 }
0x1461   :  { %20362 = vmatpush3.bf16.msra.mxu0 %v22858_v27 }
0x1462   :  { %20363 = vmatprep.subr.bf16.mxu0 %v28814_v1 }
0x1465   :  { %20364 = vmatpush3.bf16.msra.mxu0 %v22859_v6 }
0x1466   :  { %20365 = vmatprep.subr.bf16.mxu0 %v28814_v1 }
0x1469   :  { %20366 = vmatpush3.bf16.msra.mxu0 %v22860_v34 }
0x146a   :  { %20367 = vmatprep.subr.bf16.mxu0 %v28814_v1 }
0x146d   :  { %20368 = vmatpush3.bf16.msra.mxu0 %v22861_v30 }
0x146e   :  { %20369 = vmatprep.subr.bf16.mxu0 %v28814_v1 }
0x1471   :  { %20370 = vmatpush3.bf16.msra.mxu0 %v22862_v44 }
0x1472   :  { %20375 = vmatprep.subr.bf16.mxu0 %v28814_v1 }
0x1474   :  { %20372 = vmatmul.mubr.bf16.vlgmr.msra.gmra.mrb[204].mxu0 %v14413_v47 }
0x1475   :  { %20377 = vmatprep.mubr.msk.bf16.mxu0 %vm23296_vm3, %v28814_v1 }
0x1547   :  { %v14513_v17 = vpop.f32.mrb[204].mxu0 }
0x1548   :  { %v20373_v35 = vpop.f32.mrb[205].mxu0 }
0x1549   :  { %v14516_v8 = vpop.f32.mrb[206].mxu0 }
0x154a   :  { %v14523_v16 = vpack.c.bf16 %v14516_v8, %v14513_v17  ;;  %v20374_v41 = vpop.f32.mrb[207].mxu0 }
0x154b   :  { %v15039_v41 = vld [vmem:[#allocation19 + $0xc] sm:$0xf] }
0x154c   :  { %v14537_v29 = vsel %vm14535_vm7, %v14523_v16, 0 }
0x154d   :  { %20376 = vmatpush3.bf16.msra.mxu0 %v14537_v29  ;;  %v22887_v29 = vld [vmem:[#allocation7 + $0xc0] sm:$0xff]  }
0x154e   :  { %20381 = vmatprep.subr.bf16.mxu0 %v28814_v1 }
0x1550   :  { %20378 = vmatmul.mubr.msk.bf16.vlgmr.msra.gmra.mrb[208].mxu0 %vm14531_vm8, %v14522_v28  ;;  %v22888_v28 = vld [vmem:[#allocation7 + $0xc8] sm:$0xff]  }
0x1551   :  { %20383 = vmatprep.mubr.msk.bf16.mxu0 %vm23296_vm3, %v28814_v1 }
0x1623   :  { %v14573_v37 = vpop.f32.mrb[208].mxu0 }
0x1624   :  { %v14574_v12 = vadd.f32 %v16216_v45, %v14573_v37  ;;  %v20379_v61 = vpop.f32.mrb[209].mxu0  ;;  %v22889_v45 = vld [vmem:[#allocation7 + $0xd0] sm:$0xff]   ;;  %v22890_v37 = vld [vmem:[#allocation7 + $0xd8] sm:$0xff]  }
0x1625   :  { %v14576_v3 = vpop.f32.mrb[210].mxu0  ;;  %v22892_v61 = vld [vmem:[#allocation7 + $0xe8] sm:$0xff]  }
0x1626   :  { %v14579_v63 = vmax.f32 %v14574_v12, 0.0  ;;  %v20380_v33 = vpop.f32.mrb[211].mxu0  ;;  %v22891_v12 = vld [vmem:[#allocation7 + $0xe0] sm:$0xff]   ;;  %v22893_v3 = vld [vmem:[#allocation7 + $0xf0] sm:$0xff]  }
0x1628   :  { %v14580_v49 = vpack.c.bf16 %v14579_v63, %v14579_v63  ;;  %v22894_v63 = vld [vmem:[#allocation7 + $0xf8] sm:$0xff]  }
0x162a   :  { %v28575_v20 = vsel %vm14586_vm9, %v14580_v49, 0 }
0x162b   :  { %20382 = vmatpush3.bf16.msra.mxu0 %v28575_v20 }
0x162c   :  { %20387 = vmatprep.subr.bf16.mxu0 %v28814_v1 }
0x162e   :  { %20384 = vmatmul.mubr.msk.bf16.vlgmr.msra.gmra.mrb[212].mxu0 %vm14582_vm10, %v14581_v57 }
0x162f   :  { %20388 = vmatpush3.bf16.msra.mxu0 %v28575_v20  ;;  %20389 = vmatprep.mubr.msk.bf16.mxu0 %vm23296_vm3, %v28814_v1 }
0x1630   :  { %20393 = vmatprep.subr.bf16.mxu0 %v28814_v1 }
0x1636   :  { %20390 = vmatmul.mubr.msk.bf16.vlgmr.msra.gmra.mrb[216].mxu0 %vm14582_vm10, %v14648_v62 }
0x1637   :  { %20394 = vmatpush3.bf16.msra.mxu0 %v22863_v4  ;;  %20409 = vmatprep.mubr.msk.bf16.mxu0 %vm23296_vm3, %v28814_v1 }
0x1638   :  { %20395 = vmatprep.subr.bf16.mxu0 %v28814_v1 }
0x163b   :  { %20396 = vmatpush3.bf16.msra.mxu0 %v22864_v2 }
0x163c   :  { %20397 = vmatprep.subr.bf16.mxu0 %v28814_v1 }
0x163f   :  { %20398 = vmatpush3.bf16.msra.mxu0 %v22865_v53 }
0x1640   :  { %20399 = vmatprep.subr.bf16.mxu0 %v28814_v1 }
0x1643   :  { %20400 = vmatpush3.bf16.msra.mxu0 %v22866_v32 }
0x1644   :  { %20401 = vmatprep.subr.bf16.mxu0 %v28814_v1 }
0x1647   :  { %20402 = vmatpush3.bf16.msra.mxu0 %v22867_v60 }
0x1648   :  { %20403 = vmatprep.subr.bf16.mxu0 %v28814_v1 }
0x164b   :  { %20404 = vmatpush3.bf16.msra.mxu0 %v22868_v21  ;;  %v22895_v21 = vld [vmem:[#allocation9] sm:$0xff]  }
0x164c   :  { %20405 = vmatprep.subr.bf16.mxu0 %v28814_v1 }
0x164f   :  { %20406 = vmatpush3.bf16.msra.mxu0 %v22869_v54  ;;  %v22896_v54 = vld [vmem:[#allocation9 + $0x8] sm:$0xff]  }
0x1650   :  { %20407 = vmatprep.subr.bf16.mxu0 %v28814_v1 }
0x1653   :  { %20408 = vmatpush3.bf16.msra.mxu0 %v22870_v7  ;;  %v22897_v7 = vld [vmem:[#allocation9 + $0x10] sm:$0xff]  }
0x1654   :  { %20413 = vmatprep.subr.bf16.mxu0 %v28814_v1 }
0x1701   :  { %v14624_v56 = vpop.f32.mrb[212].mxu0 }
0x1702   :  { %v20385_v15 = vpop.f32.mrb[213].mxu0  ;;  %v14630_v14 = vpack.c.bf16 %v14624_v56, %v14624_v56  ;;  %v22898_v56 = vld [vmem:[#allocation9 + $0x18] sm:$0xff]  }
0x1703   :  { %v14627_v10 = vpop.f32.mrb[214].mxu0  ;;  %v22899_v15 = vld [vmem:[#allocation9 + $0x20] sm:$0xff]  }
0x1704   :  { %v20386_v0 = vpop.f32.mrb[215].mxu0  ;;  %v22900_v10 = vld [vmem:[#allocation9 + $0x28] sm:$0xff]  }
0x1705   :  { %v22901_v0 = vld [vmem:[#allocation9 + $0x30] sm:$0xff]  }
0x1709   :  { %v14686_v39 = vpop.f32.mrb[216].mxu0 }
0x170a   :  { %v14692_v55 = vpack.c.bf16 %v14686_v39, %v14686_v39  ;;  %v20391_v25 = vpop.f32.mrb[217].mxu0  ;;  %v22902_v39 = vld [vmem:[#allocation9 + $0x38] sm:$0xff]  }
0x170b   :  { %v14689_v59 = vpop.f32.mrb[218].mxu0 }
0x170c   :  { %20410 = vmatmul.mubr.bf16.vlgmr.msra.gmra.mrb[220].mxu0 %v14692_v55  ;;  %v20392_v58 = vpop.f32.mrb[219].mxu0  ;;  %v16254_v55 = vld [vmem:[#allocation13] ss:$0 sm:$0xff] }
0x170d   :  { %20414 = vmatpush3.bf16.msra.mxu0 %v22871_v52  ;;  %20429 = vmatprep.mubr.msk.bf16.mxu0 %vm23296_vm3, %v28814_v1 }
0x170e   :  { %20415 = vmatprep.subr.bf16.mxu0 %v28814_v1 }
0x1711   :  { %20416 = vmatpush3.bf16.msra.mxu0 %v22872_v50 }
0x1712   :  { %20417 = vmatprep.subr.bf16.mxu0 %v28814_v1 }
0x1715   :  { %20418 = vmatpush3.bf16.msra.mxu0 %v22873_v40 }
0x1716   :  { %20419 = vmatprep.subr.bf16.mxu0 %v28814_v1 }
0x1719   :  { %20420 = vmatpush3.bf16.msra.mxu0 %v22874_v31 }
0x171a   :  { %20421 = vmatprep.subr.bf16.mxu0 %v28814_v1 }
0x171d   :  { %20422 = vmatpush3.bf16.msra.mxu0 %v22875_v22 }
0x171e   :  { %20423 = vmatprep.subr.bf16.mxu0 %v28814_v1 }
0x1721   :  { %20424 = vmatpush3.bf16.msra.mxu0 %v22876_v38 }
0x1722   :  { %20425 = vmatprep.subr.bf16.mxu0 %v28814_v1 }
0x1725   :  { %20426 = vmatpush3.bf16.msra.mxu0 %v22877_v11 }
0x1726   :  { %20427 = vmatprep.subr.bf16.mxu0 %v28814_v1 }
0x1729   :  { %20428 = vmatpush3.bf16.msra.mxu0 %v22878_v5 }
0x172a   :  { %20433 = vmatprep.subr.bf16.mxu0 %v28814_v1 }
0x172c   :  { %20430 = vmatmul.mubr.bf16.vlgmr.msra.gmra.mrb[224].mxu0 %v14630_v14  ;;  %v16256_v14 = vld [vmem:[#allocation15] ss:$0 sm:$0xff] }
0x172d   :  { %20434 = vmatpush3.bf16.msra.mxu0 %v28575_v20  ;;  %20435 = vmatprep.mubr.msk.bf16.mxu0 %vm23296_vm3, %v28814_v1 }
0x172e   :  { %20439 = vmatprep.subr.bf16.mxu0 %v28814_v1 }
0x1734   :  { %20436 = vmatmul.mubr.msk.bf16.vlgmr.msra.gmra.mrb[228].mxu0 %vm14582_vm10, %v14887_v19 }
0x1735   :  { %20440 = vmatpush3.bf16.msra.mxu0 %v22879_v23  ;;  %20455 = vmatprep.mubr.msk.bf16.mxu0 %vm23296_vm3, %v28814_v1 }
0x1736   :  { %20441 = vmatprep.subr.bf16.mxu0 %v28814_v1 }
0x1739   :  { %20442 = vmatpush3.bf16.msra.mxu0 %v22880_v13 }
0x173a   :  { %20443 = vmatprep.subr.bf16.mxu0 %v28814_v1 }
0x173d   :  { %20444 = vmatpush3.bf16.msra.mxu0 %v22881_v46 }
0x173e   :  { %20445 = vmatprep.subr.bf16.mxu0 %v28814_v1 }
0x1741   :  { %20446 = vmatpush3.bf16.msra.mxu0 %v22882_v51 }
0x1742   :  { %20447 = vmatprep.subr.bf16.mxu0 %v28814_v1 }
0x1745   :  { %20448 = vmatpush3.bf16.msra.mxu0 %v22883_v43 }
0x1746   :  { %20449 = vmatprep.subr.bf16.mxu0 %v28814_v1 }
0x1749   :  { %20450 = vmatpush3.bf16.msra.mxu0 %v22884_v42 }
0x174a   :  { %20451 = vmatprep.subr.bf16.mxu0 %v28814_v1 }
0x174d   :  { %20452 = vmatpush3.bf16.msra.mxu0 %v22885_v9 }
0x174e   :  { %20453 = vmatprep.subr.bf16.mxu0 %v28814_v1 }
0x1751   :  { %20454 = vmatpush3.bf16.msra.mxu0 %v22886_v26 }
0x1752   :  { %20459 = vmatprep.subr.bf16.mxu0 %v28814_v1 }
0x17df   :  { %v14792_v18 = vpop.f32.mrb[220].mxu0 }
0x17e0   :  { %v20411_v48 = vpop.f32.mrb[221].mxu0 }
0x17e1   :  { %v14795_v27 = vpop.f32.mrb[222].mxu0 }
0x17e2   :  { %v20412_v6 = vpop.f32.mrb[223].mxu0 }
0x17ff   :  { %v14880_v34 = vpop.f32.mrb[224].mxu0 }
0x1800   :  { %v14881_v30 = vadd.f32 %v14880_v34, %v14792_v18  ;;  %v20431_v44 = vpop.f32.mrb[225].mxu0 }
0x1801   :  { %v14883_v24 = vpop.f32.mrb[226].mxu0 }
0x1802   :  { %v20432_v36 = vpop.f32.mrb[227].mxu0 }
0x1807   :  { %v14925_v47 = vpop.f32.mrb[228].mxu0 }
0x1808   :  { %v14931_v17 = vpack.c.bf16 %v14925_v47, %v14925_v47  ;;  %v20437_v35 = vpop.f32.mrb[229].mxu0 }
0x1809   :  { %v14928_v8 = vpop.f32.mrb[230].mxu0 }
0x180a   :  { %20456 = vmatmul.mubr.bf16.vlgmr.msra.gmra.mrb[232].mxu0 %v14931_v17  ;;  %v20438_v16 = vpop.f32.mrb[231].mxu0 }
0x180b   :  { %20460 = vmatpush3.bf16.msra.mxu0 %v28575_v20  ;;  %20461 = vmatprep.mubr.msk.bf16.mxu0 %vm23296_vm3, %v28814_v1 }
0x180c   :  { %20465 = vmatprep.subr.bf16.mxu0 %v28814_v1 }
0x1812   :  { %20462 = vmatmul.mubr.msk.bf16.vlgmr.msra.gmra.mrb[236].mxu0 %vm14582_vm10, %v15039_v41 }
0x1813   :  { %20466 = vmatpush3.bf16.msra.mxu0 %v22887_v29  ;;  %20481 = vmatprep.mubr.msk.bf16.mxu0 %vm23296_vm3, %v28814_v1 }
0x1814   :  { %20467 = vmatprep.subr.bf16.mxu0 %v28814_v1 }
0x1817   :  { %20468 = vmatpush3.bf16.msra.mxu0 %v22888_v28 }
0x1818   :  { %20469 = vmatprep.subr.bf16.mxu0 %v28814_v1 }
0x181b   :  { %20470 = vmatpush3.bf16.msra.mxu0 %v22889_v45 }
0x181c   :  { %20471 = vmatprep.subr.bf16.mxu0 %v28814_v1 }
0x181f   :  { %20472 = vmatpush3.bf16.msra.mxu0 %v22890_v37 }
0x1820   :  { %20473 = vmatprep.subr.bf16.mxu0 %v28814_v1 }
0x1823   :  { %20474 = vmatpush3.bf16.msra.mxu0 %v22891_v12 }
0x1824   :  { %20475 = vmatprep.subr.bf16.mxu0 %v28814_v1 }
0x1827   :  { %20476 = vmatpush3.bf16.msra.mxu0 %v22892_v61 }
0x1828   :  { %20477 = vmatprep.subr.bf16.mxu0 %v28814_v1 }
0x182b   :  { %20478 = vmatpush3.bf16.msra.mxu0 %v22893_v3 }
0x182c   :  { %20479 = vmatprep.subr.bf16.mxu0 %v28814_v1 }
0x182f   :  { %20480 = vmatpush3.bf16.msra.mxu0 %v22894_v63 }
0x1830   :  { %20485 = vmatprep.subr.bf16.mxu0 %v28814_v1 }
0x18dd   :  { %v15031_v33 = vpop.f32.mrb[232].mxu0 }
0x18de   :  { %v15037_v49 = vadd.f32 %v15031_v33, %v14881_v30  ;;  %v20457_v20 = vpop.f32.mrb[233].mxu0 }
0x18df   :  { %v15034_v57 = vpop.f32.mrb[234].mxu0 }
0x18e0   :  { %v20458_v62 = vpop.f32.mrb[235].mxu0 }
0x18e5   :  { %v15077_v4 = vpop.f32.mrb[236].mxu0 }
0x18e6   :  { %v15083_v2 = vpack.c.bf16 %v15077_v4, %v15077_v4  ;;  %v20463_v53 = vpop.f32.mrb[237].mxu0 }
0x18e7   :  { %v15080_v32 = vpop.f32.mrb[238].mxu0 }
0x18e8   :  { %20482 = vmatmul.mubr.bf16.vlgmr.msra.gmra.mrb[240].mxu0 %v15083_v2  ;;  %v20464_v60 = vpop.f32.mrb[239].mxu0 }
0x18e9   :  { %20501 = vmatprep.mubr.msk.bf16.mxu0 %vm23296_vm3, %v28814_v1  ;;  %20486 = vmatpush3.bf16.msra.mxu0 %v22895_v21 }
0x18ea   :  { %20487 = vmatprep.subr.bf16.mxu0 %v28814_v1 }
0x18ed   :  { %20488 = vmatpush3.bf16.msra.mxu0 %v22896_v54 }
0x18ee   :  { %20489 = vmatprep.subr.bf16.mxu0 %v28814_v1 }
0x18f1   :  { %20490 = vmatpush3.bf16.msra.mxu0 %v22897_v7 }
0x18f2   :  { %20491 = vmatprep.subr.bf16.mxu0 %v28814_v1 }
0x18f5   :  { %20492 = vmatpush3.bf16.msra.mxu0 %v22898_v56 }
0x18f6   :  { %20493 = vmatprep.subr.bf16.mxu0 %v28814_v1 }
0x18f9   :  { %20494 = vmatpush3.bf16.msra.mxu0 %v22899_v15 }
0x18fa   :  { %20495 = vmatprep.subr.bf16.mxu0 %v28814_v1 }
0x18fd   :  { %20496 = vmatpush3.bf16.msra.mxu0 %v22900_v10 }
0x18fe   :  { %20497 = vmatprep.subr.bf16.mxu0 %v28814_v1 }
0x1901   :  { %20498 = vmatpush3.bf16.msra.mxu0 %v22901_v0 }
0x1902   :  { %20499 = vmatprep.subr.bf16.mxu0 %v28814_v1 }
0x1905   :  { %20500 = vmatpush3.bf16.msra.mxu0 %v22902_v39 }
0x19bb   :  { %v15183_v52 = vpop.f32.mrb[240].mxu0 }
0x19bc   :  { %v15189_v25 = vadd.f32 %v15183_v52, %v15037_v49  ;;  %v20483_v59 = vpop.f32.mrb[241].mxu0 }
0x19bd   :  { %v15186_v58 = vpop.f32.mrb[242].mxu0 }
0x19be   :  { %v15197_v50 = vadd.f32 %v16254_v55, %v15189_v25  ;;  %v20484_v40 = vpop.f32.mrb[243].mxu0 }
0x19c0   :  { %v16255_v31 = vmul.f32 -1.442695, %v15197_v50 }
0x19c2   :  { %22903 = vpow2.f32 %v16255_v31 }
0x19cc   :  { %v22904_v22 = vpop.eup %22903 }
0x19cd   :  { %v15201_v38 = vadd.f32 1.0, %v22904_v22 }
0x19cf   :  { %22905 = vrcp.f32 %v15201_v38 }
0x19d9   :  { %v22906_v11 = vpop.eup %22905 }
0x19da   :  { %v15204_v5 = vpack.c.bf16 %v22906_v11, %v22906_v11 }
0x19dc   :  { %20502 = vmatmul.mubr.bf16.vlgmr.msra.gmra.mrb[244].mxu0 %v15204_v5 }
0x1aaf   :  { %v15310_v19 = vpop.f32.mrb[244].mxu0 }
0x1ab0   :  { %v15311_v23 = vadd.f32 %v16256_v14, %v15310_v19  ;;  %v20503_v1 = vpop.f32.mrb[245].mxu0 }
0x1ab1   :  { %v15313_v13 = vpop.f32.mrb[246].mxu0 }
0x1ab2   :  { %15316 = vst [vmem:[%s28663_s16] sm:$0xff] %v15311_v23  ;;  %v20504_v46 = vpop.f32.mrb[247].mxu0 }
0x1ab3   :  { %15321 = vsyncpa [#allocation6], 1 }
0x1ab4   :  { %15322 = vsyncpa [#allocation8], 1 }
0x1ab5   :  { %15323 = vsyncpa [#allocation11], 1 }
0x1ab6   :  { %15324 = vsyncpa [#allocation14], 1 }
0x1ab7   :  { %15325 = vsyncpa [#allocation17], 1 }
0x1ab8   :  { %15326 = vsyncpa [#allocation20], 1 }

</bundles_post_ra>
